<compile_context>
chip_gen: v6e
topology: v6e:2x2x1
jax: 0.10.0
libtpu: 0.0.40
codegen_flags: <defaults>
</compile_context>

<pallas_src>
import jax
import jax.numpy as jnp
from jax.experimental import pallas as pl
from jax.experimental.pallas import tpu as pltpu


def _round_up(x, m):
    return ((x + m - 1) // m) * m


def _pick_tile(dim, preferred, multiple):
    """Largest tile <= preferred that divides `dim` and is a multiple of
    `multiple`.  `dim` is assumed already padded to a multiple of `multiple`,
    so this never falls back to a full oversized dimension."""
    if dim <= preferred:
        return dim
    best = multiple
    t = multiple
    while t <= preferred:
        if dim % t == 0:
            best = t
        t += multiple
    return best


# ---------------------------------------------------------------------------
# Tiled GEMM + bias (hoisted input projection and vocab projection).
# ---------------------------------------------------------------------------
def _matmul_bias_acc_kernel(x_ref, w_ref, b_ref, o_ref, acc_ref):
    """K is grid-tiled: accumulate in f32 VMEM scratch, epilogue adds bias."""
    @pl.when(pl.program_id(2) == 0)
    def _():
        acc_ref[...] = jnp.zeros_like(acc_ref)

    acc_ref[...] += jnp.dot(x_ref[...], w_ref[...],
                            preferred_element_type=jnp.float32)

    @pl.when(pl.program_id(2) == pl.num_programs(2) - 1)
    def _():
        o_ref[...] = (acc_ref[...] + b_ref[...]).astype(o_ref.dtype)


def _matmul_bias_single_k_kernel(x_ref, w_ref, b_ref, o_ref):
    """K fits in one tile: bypass the accumulator (no extra VMEM round trip)."""
    o_ref[...] = (jnp.dot(x_ref[...], w_ref[...],
                          preferred_element_type=jnp.float32)
                  + b_ref[...]).astype(o_ref.dtype)


def matmul_bias(x, w, b, *, out_dtype=jnp.float32, tm=256, tn=1024, tk=512):
    """(M, K) @ (K, N) + (1, N) -> (M, N), tiled + parallel over M/N.

    Pads M/K/N up to (8, 128, 128) multiples (zero padding is exact for K;
    padded M/N rows/cols are sliced off), so output tiles are always
    lane-dense multiples of 128 and tile sizes never exceed the requested
    budget.
    """
    M, K = x.shape
    Kw, N = w.shape
    assert K == Kw and b.shape == (1, N)

    Mp, Kp, Np = _round_up(M, 8), _round_up(K, 128), _round_up(N, 128)
    if Mp != M or Kp != K:
        x = jnp.pad(x, ((0, Mp - M), (0, Kp - K)))
    if Kp != K or Np != N:
        w = jnp.pad(w, ((0, Kp - K), (0, Np - N)))
    if Np != N:
        b = jnp.pad(b, ((0, 0), (0, Np - N)))

    tm = _pick_tile(Mp, tm, 8)
    tn = _pick_tile(Np, tn, 128)
    tk = _pick_tile(Kp, tk, 128)
    k_grid = Kp // tk

    # Explicit VMEM budget: double-buffered tiles + accumulator + headroom.
    # Capped under v7x's 64 MiB physical VMEM, floored at v5e's 16 MiB scope.
    buf = (tm * tk * x.dtype.itemsize + tk * tn * w.dtype.itemsize
           + 8 * tn * b.dtype.itemsize
           + tm * tn * jnp.dtype(out_dtype).itemsize)
    acc_bytes = tm * tn * 4 if k_grid > 1 else 0
    vmem_limit = int(min(max(2 * buf + acc_bytes + (2 << 20), 16 << 20),
                         60 << 20))

    if k_grid == 1:
        out = pl.pallas_call(
            _matmul_bias_single_k_kernel,
            out_shape=jax.ShapeDtypeStruct((Mp, Np), out_dtype),
            grid_spec=pltpu.PrefetchScalarGridSpec(
                num_scalar_prefetch=0,
                grid=(Mp // tm, Np // tn),
                in_specs=[
                    pl.BlockSpec((tm, tk), lambda i, j: (i, 0)),
                    pl.BlockSpec((tk, tn), lambda i, j: (0, j)),
                    pl.BlockSpec((1, tn), lambda i, j: (0, j)),
                ],
                out_specs=pl.BlockSpec((tm, tn), lambda i, j: (i, j)),
            ),
            compiler_params=pltpu.CompilerParams(
                dimension_semantics=("parallel", "parallel"),
                vmem_limit_bytes=vmem_limit),
        )(x, w, b)
    else:
        out = pl.pallas_call(
            _matmul_bias_acc_kernel,
            out_shape=jax.ShapeDtypeStruct((Mp, Np), out_dtype),
            grid_spec=pltpu.PrefetchScalarGridSpec(
                num_scalar_prefetch=0,
                grid=(Mp // tm, Np // tn, k_grid),
                in_specs=[
                    pl.BlockSpec((tm, tk), lambda i, j, k: (i, k)),
                    pl.BlockSpec((tk, tn), lambda i, j, k: (k, j)),
                    pl.BlockSpec((1, tn), lambda i, j, k: (0, j)),
                ],
                out_specs=pl.BlockSpec((tm, tn), lambda i, j, k: (i, j)),
                scratch_shapes=[pltpu.VMEM((tm, tn), jnp.float32)],
            ),
            compiler_params=pltpu.CompilerParams(
                dimension_semantics=("parallel", "parallel", "arbitrary"),
                vmem_limit_bytes=vmem_limit),
        )(x, w, b)

    if Mp != M or Np != N:
        out = out[:M, :N]
    return out


# ---------------------------------------------------------------------------
# Sequential LSTM recurrence (only h @ W_hh + elementwise cell update here).
# ---------------------------------------------------------------------------
def _lstm_scan_kernel(gx_ref, whh_ref, hseq_ref, h_ref, c_ref):
    """Runs t_chunk sequential LSTM steps for one (batch block, time chunk).

    gx_ref:   (b_block, t_chunk, 4H) f32  precomputed x @ W_ih + (b_ih + b_hh)
    whh_ref:  (H, 4H) bf16               recurrent weights (pre-transposed)
    hseq_ref: (b_block, t_chunk, H) bf16 hidden states for this chunk (output)
    h_ref, c_ref: (b_block, H) f32       VMEM scratch carrying state over time
    """
    @pl.when(pl.program_id(1) == 0)
    def _():
        h_ref[...] = jnp.zeros_like(h_ref)
        c_ref[...] = jnp.zeros_like(c_ref)

    t_chunk = gx_ref.shape[1]
    H = h_ref.shape[-1]

    h = h_ref[...]
    c = c_ref[...]
    w_hh = whh_ref[...]            # bf16, hoisted load; reused every step
    for t in range(t_chunk):       # small static unroll (t_chunk <= 16)
        gates = gx_ref[:, t, :] + jnp.dot(
            h.astype(w_hh.dtype), w_hh, preferred_element_type=jnp.float32)
        # Gate math stays f32 (v5e has no bf16 VPU/EUP); order i, f, g, o.
        i = jax.nn.sigmoid(gates[:, 0 * H:1 * H])
        f = jax.nn.sigmoid(gates[:, 1 * H:2 * H])
        g = jnp.tanh(gates[:, 2 * H:3 * H])
        o = jax.nn.sigmoid(gates[:, 3 * H:4 * H])
        c = f * c + i * g
        h = o * jnp.tanh(c)
        hseq_ref[:, t, :] = h.astype(hseq_ref.dtype)
    h_ref[...] = h
    c_ref[...] = c


def _pick_t_chunk(T):
    # Chunk must be a multiple of 8 (sublane constraint on the time axis of
    # the (b, t, 4H) block) or the full sequence; capped at 16 to bound vreg
    # live ranges of the statically unrolled inner loop.
    for c in (8, 16):
        if T % c == 0:
            return c
    return T


def _pick_b_block(B):
    # B is a multiple of 8.  Split into two batch blocks (one per v7x
    # TensorCore) whenever each block stays a multiple of 8 sublanes.
    if B >= 16 and (B // 2) % 8 == 0:
        return B // 2
    return B


def lstm_scan(gates_x, w_hh, *, out_dtype=jnp.bfloat16):
    """gates_x: (B, T, 4H) f32, w_hh: (H, 4H) bf16 -> hidden states (B, T, H)."""
    B, T, G = gates_x.shape
    H = w_hh.shape[0]
    assert G == 4 * H and B % 8 == 0
    t_chunk = _pick_t_chunk(T)
    b_block = _pick_b_block(B)

    buf = (b_block * t_chunk * G * gates_x.dtype.itemsize
           + H * G * w_hh.dtype.itemsize
           + b_block * t_chunk * H * jnp.dtype(out_dtype).itemsize)
    vmem_limit = int(min(max(2 * buf + 2 * b_block * H * 4 + (2 << 20),
                             16 << 20), 60 << 20))

    return pl.pallas_call(
        _lstm_scan_kernel,
        out_shape=jax.ShapeDtypeStruct((B, T, H), out_dtype),
        grid_spec=pltpu.PrefetchScalarGridSpec(
            num_scalar_prefetch=0,
            grid=(B // b_block, T // t_chunk),
            in_specs=[
                pl.BlockSpec((b_block, t_chunk, G), lambda b, s: (b, s, 0)),
                pl.BlockSpec((H, G), lambda b, s: (0, 0)),
            ],
            out_specs=pl.BlockSpec((b_block, t_chunk, H),
                                   lambda b, s: (b, s, 0)),
            scratch_shapes=[
                pltpu.VMEM((b_block, H), jnp.float32),   # h carry
                pltpu.VMEM((b_block, H), jnp.float32),   # c carry
            ],
        ),
        # Batch blocks are independent (parallel, can be split across v7x's
        # two TensorCores); the time axis carries h/c and must stay arbitrary.
        compiler_params=pltpu.CompilerParams(
            dimension_semantics=("parallel", "arbitrary"),
            vmem_limit_bytes=vmem_limit),
    )(gates_x, w_hh)


# ---------------------------------------------------------------------------
# Full forward pass.
# ---------------------------------------------------------------------------
@jax.jit
def base_language_model_forward(tokens, params):
    """tokens: (B, T) int32 -> logits (B, T, vocab) float32.

    Expects `params` with bf16 matmul weights (see prepare_kernel_params).
    """
    emb_table = params["embedding"]          # (vocab, E) f32
    w_ih = params["w_ih"]                    # (E, 4H)  bf16
    w_hh = params["w_hh"]                    # (H, 4H)  bf16
    b = params["b"]                          # (1, 4H)  f32 combined bias
    w_fc = params["w_fc"]                    # (H, V)   bf16
    b_fc = params["b_fc"]                    # (1, V)   f32

    B, T = tokens.shape
    E = emb_table.shape[1]
    H = w_hh.shape[0]
    V = w_fc.shape[1]

    # Pad batch to a sublane multiple so the recurrence fills whole vregs.
    B_pad = _round_up(B, 8)
    if B_pad != B:
        tokens = jnp.pad(tokens, ((0, B_pad - B), (0, 0)))

    # Embedding gather: plain-JAX glue, identical to nn.Embedding (batch-major).
    emb = jnp.take(emb_table, tokens, axis=0)                      # (B_pad,T,E)

    # (1) Hoisted input projection: one MXU GEMM with M = B_pad*T, bf16 ops.
    gates_x = matmul_bias(emb.reshape(B_pad * T, E).astype(jnp.bfloat16),
                          w_ih, b)                                 # (B_pad*T,4H) f32

    # (2) Sequential recurrence only (h @ W_hh + gate math), chunked over T.
    h_seq = lstm_scan(gates_x.reshape(B_pad, T, 4 * H), w_hh)      # (B_pad,T,H) bf16

    # (3) Hoisted vocab projection: parallel tiled GEMM, V padded to 128-lane
    #     multiples inside matmul_bias and sliced back.
    logits = matmul_bias(h_seq.reshape(B_pad * T, H), w_fc, b_fc)  # (B_pad*T,V) f32
    return logits.reshape(B_pad, T, V)[:B]                         # no transposes


def prepare_kernel_params(params):
    """One-time cast of the MXU operands to bf16 (f32 accumulation is kept)."""
    p = dict(params)
    for k in ("w_ih", "w_hh", "w_fc"):
        p[k] = params[k].astype(jnp.bfloat16)
    return p


# ---------------------------------------------------------------------------
# Pure-JAX f32 reference (matches PyTorch LSTM semantics, gate order i,f,g,o).
# ---------------------------------------------------------------------------
def reference_forward(tokens, params):
    emb = jnp.take(params["embedding"], tokens, axis=0)            # (B, T, E)
    B = tokens.shape[0]
    H = params["w_hh"].shape[0]

    def step(carry, x_t):
        h, c = carry
        gates = x_t @ params["w_ih"] + h @ params["w_hh"] + params["b"]
        i = jax.nn.sigmoid(gates[:, 0 * H:1 * H])
        f = jax.nn.sigmoid(gates[:, 1 * H:2 * H])
        g = jnp.tanh(gates[:, 2 * H:3 * H])
        o = jax.nn.sigmoid(gates[:, 3 * H:4 * H])
        c = f * c + i * g
        h = o * jnp.tanh(c)
        return (h, c), h

    h0 = jnp.zeros((B, H), jnp.float32)
    c0 = jnp.zeros((B, H), jnp.float32)
    (_, _), hs = jax.lax.scan(step, (h0, c0), jnp.transpose(emb, (1, 0, 2)))
    logits = hs @ params["w_fc"] + params["b_fc"]                  # (T, B, V)
    return jnp.transpose(logits, (1, 0, 2))


def init_params(key, vocab_size, embedding_dim, hidden_dim):
    """Deterministic synthetic f32 parameters mirroring the PyTorch module."""
    ks = jax.random.split(key, 7)
    scale = 0.1
    embedding = scale * jax.random.normal(
        ks[0], (vocab_size, embedding_dim), jnp.float32)
    # PyTorch: weight_ih_l0 (4H, E), weight_hh_l0 (4H, H), two biases (4H,)
    weight_ih = scale * jax.random.normal(
        ks[1], (4 * hidden_dim, embedding_dim), jnp.float32)
    weight_hh = scale * jax.random.normal(
        ks[2], (4 * hidden_dim, hidden_dim), jnp.float32)
    bias_ih = scale * jax.random.normal(ks[3], (4 * hidden_dim,), jnp.float32)
    bias_hh = scale * jax.random.normal(ks[4], (4 * hidden_dim,), jnp.float32)
    # PyTorch: fc.weight (V, H), fc.bias (V,)
    fc_w = scale * jax.random.normal(
        ks[5], (vocab_size, hidden_dim), jnp.float32)
    fc_b = scale * jax.random.normal(ks[6], (vocab_size,), jnp.float32)
    return {
        "embedding": embedding,
        "w_ih": weight_ih.T,                       # (E, 4H)
        "w_hh": weight_hh.T,                       # (H, 4H)
        "b": (bias_ih + bias_hh)[None, :],         # (1, 4H)
        "w_fc": fc_w.T,                            # (H, V)
        "b_fc": fc_b[None, :],                     # (1, V)
    }


if __name__ == "__main__":
    # Module defaults (vocab=1000, E=128, H=256) with a small batch/sequence.
    VOCAB, EMB, HID = 1000, 128, 256
    B, T = 2, 8

    key = jax.random.PRNGKey(0)
    pkey, tkey = jax.random.split(key)
    params = init_params(pkey, VOCAB, EMB, HID)            # f32 (reference)
    kparams = prepare_kernel_params(params)                # bf16 MXU weights
    tokens = jax.random.randint(tkey, (B, T), 0, VOCAB, dtype=jnp.int32)

    out = base_language_model_forward(tokens, kparams)
    out = jax.block_until_ready(out)
    assert out.shape == (B, T, VOCAB) and out.dtype == jnp.float32

    ref = jax.block_until_ready(reference_forward(tokens, params))
    # bf16 MXU operands vs f32 reference -> looser tolerance than pure f32.
    assert jnp.allclose(out, ref, atol=5e-2, rtol=5e-2), (
        f"max err {jnp.max(jnp.abs(out - ref))}")

    print("KERNEL_OK")
</pallas_src>

<mosaic_0001>
module attributes {stable_mosaic.version = 11 : i64} {
  func.func @_matmul_bias_single_k_kernel(%arg0: i32, %arg1: i32, %arg2: memref<64x128xbf16, #tpu.memory_space<vmem>>, %arg3: memref<128x1024xbf16, #tpu.memory_space<vmem>>, %arg4: memref<1x1024xf32, #tpu.memory_space<vmem>>, %arg5: memref<64x1024xf32, #tpu.memory_space<vmem>>) attributes {dimension_semantics = [#tpu.dimension_semantics<parallel>, #tpu.dimension_semantics<parallel>], iteration_bounds = array<i64: 1, 1>, scalar_prefetch = 0 : i64, scratch_operands = 0 : i64, tpu.core_type = #tpu.core_type<tc>, window_params = [{transform_indices = @transform_0, window_bounds = array<i64: 64, 128>}, {transform_indices = @transform_1, window_bounds = array<i64: 128, 1024>}, {transform_indices = @transform_2, window_bounds = array<i64: 1, 1024>}, {transform_indices = @transform_3, window_bounds = array<i64: 64, 1024>}]} {
    %c0 = arith.constant 0 : index
    %c0_0 = arith.constant 0 : index
    %0 = vector.load %arg2[%c0, %c0_0] : memref<64x128xbf16, #tpu.memory_space<vmem>>, vector<64x128xbf16>
    %c0_1 = arith.constant 0 : index
    %c0_2 = arith.constant 0 : index
    %1 = vector.load %arg3[%c0_1, %c0_2] : memref<128x1024xbf16, #tpu.memory_space<vmem>>, vector<128x1024xbf16>
    %cst = arith.constant dense<0.000000e+00> : vector<64x1024xf32>
    %2 = tpu.matmul %0, %1, %cst {dimension_numbers = #tpu.dot_dimension_numbers<[1], [0], [0], [1], [0, 0, 1, 1], [], []>} : vector<64x128xbf16>, vector<128x1024xbf16>, vector<64x1024xf32> -> vector<64x1024xf32>
    %c0_3 = arith.constant 0 : index
    %c0_4 = arith.constant 0 : index
    %3 = vector.load %arg4[%c0_3, %c0_4] : memref<1x1024xf32, #tpu.memory_space<vmem>>, vector<1x1024xf32>
    %4 = vector.broadcast %3 : vector<1x1024xf32> to vector<64x1024xf32>
    %5 = arith.addf %2, %4 : vector<64x1024xf32>
    %c0_5 = arith.constant 0 : index
    %c0_6 = arith.constant 0 : index
    %6 = vector.load %arg5[%c0_5, %c0_6] : memref<64x1024xf32, #tpu.memory_space<vmem>>, vector<64x1024xf32>
    tpu.vector_store %arg5[%c0_5, %c0_6], %5 {strides = array<i32>} : memref<64x1024xf32, #tpu.memory_space<vmem>>, vector<64x1024xf32>,
    return
  }
  func.func @transform_0(%arg0: i32, %arg1: i32) -> (i32, i32) {
    %c0_i32 = arith.constant 0 : i32
    %c0_i32_0 = arith.constant 0 : i32
    return %arg0, %c0_i32 : i32, i32
  }
  func.func @transform_1(%arg0: i32, %arg1: i32) -> (i32, i32) {
    %c0_i32 = arith.constant 0 : i32
    %c0_i32_0 = arith.constant 0 : i32
    return %c0_i32, %arg1 : i32, i32
  }
  func.func @transform_2(%arg0: i32, %arg1: i32) -> (i32, i32) {
    %c0_i32 = arith.constant 0 : i32
    %c0_i32_0 = arith.constant 0 : i32
    return %c0_i32, %arg1 : i32, i32
  }
  func.func @transform_3(%arg0: i32, %arg1: i32) -> (i32, i32) {
    %c0_i32 = arith.constant 0 : i32
    return %arg0, %arg1 : i32, i32
  }
}

module attributes {stable_mosaic.version = 11 : i64} {
  func.func @_lstm_scan_kernel(%arg0: i32, %arg1: i32, %arg2: memref<8x8x1024xf32, #tpu.memory_space<vmem>>, %arg3: memref<256x1024xbf16, #tpu.memory_space<vmem>>, %arg4: memref<8x8x256xbf16, #tpu.memory_space<vmem>>, %arg5: memref<8x256xf32, #tpu.memory_space<vmem>>, %arg6: memref<8x256xf32, #tpu.memory_space<vmem>>) attributes {dimension_semantics = [#tpu.dimension_semantics<parallel>, #tpu.dimension_semantics<arbitrary>], iteration_bounds = array<i64: 1, 1>, scalar_prefetch = 0 : i64, scratch_operands = 2 : i64, tpu.core_type = #tpu.core_type<tc>, window_params = [{transform_indices = @transform_0, window_bounds = array<i64: 8, 8, 1024>}, {pipeline_mode = #tpu.pipeline_mode<synchronous>, transform_indices = @transform_1, window_bounds = array<i64: 256, 1024>}, {transform_indices = @transform_2, window_bounds = array<i64: 8, 8, 256>}]} {
    %c0_i32 = arith.constant 0 : i32
    %0 = arith.cmpi eq, %arg1, %c0_i32 : i32
    %1 = arith.extui %0 : i1 to i32
    %c0_i32_0 = arith.constant 0 : i32
    %2 = arith.cmpi ne, %1, %c0_i32_0 : i32
    scf.if %2 {
      %cst_82 = arith.constant 0.000000e+00 : f32
      %280 = vector.broadcast %cst_82 : f32 to vector<8x256xf32>
      %c0_83 = arith.constant 0 : index
      %c0_84 = arith.constant 0 : index
      %281 = vector.load %arg5[%c0_83, %c0_84] : memref<8x256xf32, #tpu.memory_space<vmem>>, vector<8x256xf32>
      tpu.vector_store %arg5[%c0_83, %c0_84], %280 {strides = array<i32>} : memref<8x256xf32, #tpu.memory_space<vmem>>, vector<8x256xf32>,
      %cst_85 = arith.constant 0.000000e+00 : f32
      %282 = vector.broadcast %cst_85 : f32 to vector<8x256xf32>
      %c0_86 = arith.constant 0 : index
      %c0_87 = arith.constant 0 : index
      %283 = vector.load %arg6[%c0_86, %c0_87] : memref<8x256xf32, #tpu.memory_space<vmem>>, vector<8x256xf32>
      tpu.vector_store %arg6[%c0_86, %c0_87], %282 {strides = array<i32>} : memref<8x256xf32, #tpu.memory_space<vmem>>, vector<8x256xf32>,
    } else {
    }
    %c0 = arith.constant 0 : index
    %c0_1 = arith.constant 0 : index
    %3 = vector.load %arg5[%c0, %c0_1] : memref<8x256xf32, #tpu.memory_space<vmem>>, vector<8x256xf32>
    %c0_2 = arith.constant 0 : index
    %c0_3 = arith.constant 0 : index
    %4 = vector.load %arg6[%c0_2, %c0_3] : memref<8x256xf32, #tpu.memory_space<vmem>>, vector<8x256xf32>
    %c0_4 = arith.constant 0 : index
    %c0_5 = arith.constant 0 : index
    %5 = vector.load %arg3[%c0_4, %c0_5] : memref<256x1024xbf16, #tpu.memory_space<vmem>>, vector<256x1024xbf16>
    %c0_6 = arith.constant 0 : index
    %c0_7 = arith.constant 0 : index
    %c0_8 = arith.constant 0 : index
    %6 = vector.load %arg2[%c0_6, %c0_7, %c0_8] : memref<8x8x1024xf32, #tpu.memory_space<vmem>>, vector<8x1x1024xf32>
    %7 = vector.shape_cast %6 : vector<8x1x1024xf32> to vector<8x1024xf32>
    %8 = arith.truncf %3 : vector<8x256xf32> to vector<8x256xbf16>
    %cst = arith.constant dense<0.000000e+00> : vector<8x1024xf32>
    %9 = tpu.matmul %8, %5, %cst {dimension_numbers = #tpu.dot_dimension_numbers<[1], [0], [0], [1], [0, 0, 1, 1], [], []>} : vector<8x256xbf16>, vector<256x1024xbf16>, vector<8x1024xf32> -> vector<8x1024xf32>
    %10 = arith.addf %7, %9 : vector<8x1024xf32>
    %11 = vector.extract_strided_slice %10 {offsets = [0, 0], sizes = [8, 256], strides = [1, 1]} : vector<8x1024xf32> to vector<8x256xf32>
    %12 = arith.negf %11 : vector<8x256xf32>
    %13 = math.exp %12 : vector<8x256xf32>
    %cst_9 = arith.constant 1.000000e+00 : f32
    %14 = vector.broadcast %cst_9 : f32 to vector<8x256xf32>
    %15 = arith.addf %14, %13 : vector<8x256xf32>
    %16 = arith.divf %14, %15 : vector<8x256xf32>
    %17 = vector.extract_strided_slice %10 {offsets = [0, 256], sizes = [8, 256], strides = [1, 1]} : vector<8x1024xf32> to vector<8x256xf32>
    %18 = arith.negf %17 : vector<8x256xf32>
    %19 = math.exp %18 : vector<8x256xf32>
    %cst_10 = arith.constant 1.000000e+00 : f32
    %20 = vector.broadcast %cst_10 : f32 to vector<8x256xf32>
    %21 = arith.addf %20, %19 : vector<8x256xf32>
    %22 = arith.divf %20, %21 : vector<8x256xf32>
    %23 = vector.extract_strided_slice %10 {offsets = [0, 512], sizes = [8, 256], strides = [1, 1]} : vector<8x1024xf32> to vector<8x256xf32>
    %24 = math.tanh %23 : vector<8x256xf32>
    %25 = vector.extract_strided_slice %10 {offsets = [0, 768], sizes = [8, 256], strides = [1, 1]} : vector<8x1024xf32> to vector<8x256xf32>
    %26 = arith.negf %25 : vector<8x256xf32>
    %27 = math.exp %26 : vector<8x256xf32>
    %cst_11 = arith.constant 1.000000e+00 : f32
    %28 = vector.broadcast %cst_11 : f32 to vector<8x256xf32>
    %29 = arith.addf %28, %27 : vector<8x256xf32>
    %30 = arith.divf %28, %29 : vector<8x256xf32>
    %31 = arith.mulf %22, %4 : vector<8x256xf32>
    %32 = arith.mulf %16, %24 : vector<8x256xf32>
    %33 = arith.addf %31, %32 : vector<8x256xf32>
    %34 = math.tanh %33 : vector<8x256xf32>
    %35 = arith.mulf %30, %34 : vector<8x256xf32>
    %36 = arith.truncf %35 : vector<8x256xf32> to vector<8x256xbf16>
    %c0_12 = arith.constant 0 : index
    %c0_13 = arith.constant 0 : index
    %c0_14 = arith.constant 0 : index
    %37 = vector.load %arg4[%c0_12, %c0_13, %c0_14] : memref<8x8x256xbf16, #tpu.memory_space<vmem>>, vector<8x1x256xbf16>
    %38 = vector.shape_cast %37 : vector<8x1x256xbf16> to vector<8x256xbf16>
    %39 = vector.shape_cast %36 : vector<8x256xbf16> to vector<8x1x256xbf16>
    tpu.vector_store %arg4[%c0_12, %c0_13, %c0_14], %39 {strides = array<i32>} : memref<8x8x256xbf16, #tpu.memory_space<vmem>>, vector<8x1x256xbf16>,
    %c0_15 = arith.constant 0 : index
    %c1 = arith.constant 1 : index
    %c0_16 = arith.constant 0 : index
    %40 = vector.load %arg2[%c0_15, %c1, %c0_16] : memref<8x8x1024xf32, #tpu.memory_space<vmem>>, vector<8x1x1024xf32>
    %41 = vector.shape_cast %40 : vector<8x1x1024xf32> to vector<8x1024xf32>
    %42 = arith.truncf %35 : vector<8x256xf32> to vector<8x256xbf16>
    %cst_17 = arith.constant dense<0.000000e+00> : vector<8x1024xf32>
    %43 = tpu.matmul %42, %5, %cst_17 {dimension_numbers = #tpu.dot_dimension_numbers<[1], [0], [0], [1], [0, 0, 1, 1], [], []>} : vector<8x256xbf16>, vector<256x1024xbf16>, vector<8x1024xf32> -> vector<8x1024xf32>
    %44 = arith.addf %41, %43 : vector<8x1024xf32>
    %45 = vector.extract_strided_slice %44 {offsets = [0, 0], sizes = [8, 256], strides = [1, 1]} : vector<8x1024xf32> to vector<8x256xf32>
    %46 = arith.negf %45 : vector<8x256xf32>
    %47 = math.exp %46 : vector<8x256xf32>
    %cst_18 = arith.constant 1.000000e+00 : f32
    %48 = vector.broadcast %cst_18 : f32 to vector<8x256xf32>
    %49 = arith.addf %48, %47 : vector<8x256xf32>
    %50 = arith.divf %48, %49 : vector<8x256xf32>
    %51 = vector.extract_strided_slice %44 {offsets = [0, 256], sizes = [8, 256], strides = [1, 1]} : vector<8x1024xf32> to vector<8x256xf32>
    %52 = arith.negf %51 : vector<8x256xf32>
    %53 = math.exp %52 : vector<8x256xf32>
    %cst_19 = arith.constant 1.000000e+00 : f32
    %54 = vector.broadcast %cst_19 : f32 to vector<8x256xf32>
    %55 = arith.addf %54, %53 : vector<8x256xf32>
    %56 = arith.divf %54, %55 : vector<8x256xf32>
    %57 = vector.extract_strided_slice %44 {offsets = [0, 512], sizes = [8, 256], strides = [1, 1]} : vector<8x1024xf32> to vector<8x256xf32>
    %58 = math.tanh %57 : vector<8x256xf32>
    %59 = vector.extract_strided_slice %44 {offsets = [0, 768], sizes = [8, 256], strides = [1, 1]} : vector<8x1024xf32> to vector<8x256xf32>
    %60 = arith.negf %59 : vector<8x256xf32>
    %61 = math.exp %60 : vector<8x256xf32>
    %cst_20 = arith.constant 1.000000e+00 : f32
    %62 = vector.broadcast %cst_20 : f32 to vector<8x256xf32>
    %63 = arith.addf %62, %61 : vector<8x256xf32>
    %64 = arith.divf %62, %63 : vector<8x256xf32>
    %65 = arith.mulf %56, %33 : vector<8x256xf32>
    %66 = arith.mulf %50, %58 : vector<8x256xf32>
    %67 = arith.addf %65, %66 : vector<8x256xf32>
    %68 = math.tanh %67 : vector<8x256xf32>
    %69 = arith.mulf %64, %68 : vector<8x256xf32>
    %70 = arith.truncf %69 : vector<8x256xf32> to vector<8x256xbf16>
    %c0_21 = arith.constant 0 : index
    %c1_22 = arith.constant 1 : index
    %c0_23 = arith.constant 0 : index
    %71 = vector.load %arg4[%c0_21, %c1_22, %c0_23] : memref<8x8x256xbf16, #tpu.memory_space<vmem>>, vector<8x1x256xbf16>
    %72 = vector.shape_cast %71 : vector<8x1x256xbf16> to vector<8x256xbf16>
    %73 = vector.shape_cast %70 : vector<8x256xbf16> to vector<8x1x256xbf16>
    tpu.vector_store %arg4[%c0_21, %c1_22, %c0_23], %73 {strides = array<i32>} : memref<8x8x256xbf16, #tpu.memory_space<vmem>>, vector<8x1x256xbf16>,
    %c0_24 = arith.constant 0 : index
    %c2 = arith.constant 2 : index
    %c0_25 = arith.constant 0 : index
    %74 = vector.load %arg2[%c0_24, %c2, %c0_25] : memref<8x8x1024xf32, #tpu.memory_space<vmem>>, vector<8x1x1024xf32>
    %75 = vector.shape_cast %74 : vector<8x1x1024xf32> to vector<8x1024xf32>
    %76 = arith.truncf %69 : vector<8x256xf32> to vector<8x256xbf16>
    %cst_26 = arith.constant dense<0.000000e+00> : vector<8x1024xf32>
    %77 = tpu.matmul %76, %5, %cst_26 {dimension_numbers = #tpu.dot_dimension_numbers<[1], [0], [0], [1], [0, 0, 1, 1], [], []>} : vector<8x256xbf16>, vector<256x1024xbf16>, vector<8x1024xf32> -> vector<8x1024xf32>
    %78 = arith.addf %75, %77 : vector<8x1024xf32>
    %79 = vector.extract_strided_slice %78 {offsets = [0, 0], sizes = [8, 256], strides = [1, 1]} : vector<8x1024xf32> to vector<8x256xf32>
    %80 = arith.negf %79 : vector<8x256xf32>
    %81 = math.exp %80 : vector<8x256xf32>
    %cst_27 = arith.constant 1.000000e+00 : f32
    %82 = vector.broadcast %cst_27 : f32 to vector<8x256xf32>
    %83 = arith.addf %82, %81 : vector<8x256xf32>
    %84 = arith.divf %82, %83 : vector<8x256xf32>
    %85 = vector.extract_strided_slice %78 {offsets = [0, 256], sizes = [8, 256], strides = [1, 1]} : vector<8x1024xf32> to vector<8x256xf32>
    %86 = arith.negf %85 : vector<8x256xf32>
    %87 = math.exp %86 : vector<8x256xf32>
    %cst_28 = arith.constant 1.000000e+00 : f32
    %88 = vector.broadcast %cst_28 : f32 to vector<8x256xf32>
    %89 = arith.addf %88, %87 : vector<8x256xf32>
    %90 = arith.divf %88, %89 : vector<8x256xf32>
    %91 = vector.extract_strided_slice %78 {offsets = [0, 512], sizes = [8, 256], strides = [1, 1]} : vector<8x1024xf32> to vector<8x256xf32>
    %92 = math.tanh %91 : vector<8x256xf32>
    %93 = vector.extract_strided_slice %78 {offsets = [0, 768], sizes = [8, 256], strides = [1, 1]} : vector<8x1024xf32> to vector<8x256xf32>
    %94 = arith.negf %93 : vector<8x256xf32>
    %95 = math.exp %94 : vector<8x256xf32>
    %cst_29 = arith.constant 1.000000e+00 : f32
    %96 = vector.broadcast %cst_29 : f32 to vector<8x256xf32>
    %97 = arith.addf %96, %95 : vector<8x256xf32>
    %98 = arith.divf %96, %97 : vector<8x256xf32>
    %99 = arith.mulf %90, %67 : vector<8x256xf32>
    %100 = arith.mulf %84, %92 : vector<8x256xf32>
    %101 = arith.addf %99, %100 : vector<8x256xf32>
    %102 = math.tanh %101 : vector<8x256xf32>
    %103 = arith.mulf %98, %102 : vector<8x256xf32>
    %104 = arith.truncf %103 : vector<8x256xf32> to vector<8x256xbf16>
    %c0_30 = arith.constant 0 : index
    %c2_31 = arith.constant 2 : index
    %c0_32 = arith.constant 0 : index
    %105 = vector.load %arg4[%c0_30, %c2_31, %c0_32] : memref<8x8x256xbf16, #tpu.memory_space<vmem>>, vector<8x1x256xbf16>
    %106 = vector.shape_cast %105 : vector<8x1x256xbf16> to vector<8x256xbf16>
    %107 = vector.shape_cast %104 : vector<8x256xbf16> to vector<8x1x256xbf16>
    tpu.vector_store %arg4[%c0_30, %c2_31, %c0_32], %107 {strides = array<i32>} : memref<8x8x256xbf16, #tpu.memory_space<vmem>>, vector<8x1x256xbf16>,
    %c0_33 = arith.constant 0 : index
    %c3 = arith.constant 3 : index
    %c0_34 = arith.constant 0 : index
    %108 = vector.load %arg2[%c0_33, %c3, %c0_34] : memref<8x8x1024xf32, #tpu.memory_space<vmem>>, vector<8x1x1024xf32>
    %109 = vector.shape_cast %108 : vector<8x1x1024xf32> to vector<8x1024xf32>
    %110 = arith.truncf %103 : vector<8x256xf32> to vector<8x256xbf16>
    %cst_35 = arith.constant dense<0.000000e+00> : vector<8x1024xf32>
    %111 = tpu.matmul %110, %5, %cst_35 {dimension_numbers = #tpu.dot_dimension_numbers<[1], [0], [0], [1], [0, 0, 1, 1], [], []>} : vector<8x256xbf16>, vector<256x1024xbf16>, vector<8x1024xf32> -> vector<8x1024xf32>
    %112 = arith.addf %109, %111 : vector<8x1024xf32>
    %113 = vector.extract_strided_slice %112 {offsets = [0, 0], sizes = [8, 256], strides = [1, 1]} : vector<8x1024xf32> to vector<8x256xf32>
    %114 = arith.negf %113 : vector<8x256xf32>
    %115 = math.exp %114 : vector<8x256xf32>
    %cst_36 = arith.constant 1.000000e+00 : f32
    %116 = vector.broadcast %cst_36 : f32 to vector<8x256xf32>
    %117 = arith.addf %116, %115 : vector<8x256xf32>
    %118 = arith.divf %116, %117 : vector<8x256xf32>
    %119 = vector.extract_strided_slice %112 {offsets = [0, 256], sizes = [8, 256], strides = [1, 1]} : vector<8x1024xf32> to vector<8x256xf32>
    %120 = arith.negf %119 : vector<8x256xf32>
    %121 = math.exp %120 : vector<8x256xf32>
    %cst_37 = arith.constant 1.000000e+00 : f32
    %122 = vector.broadcast %cst_37 : f32 to vector<8x256xf32>
    %123 = arith.addf %122, %121 : vector<8x256xf32>
    %124 = arith.divf %122, %123 : vector<8x256xf32>
    %125 = vector.extract_strided_slice %112 {offsets = [0, 512], sizes = [8, 256], strides = [1, 1]} : vector<8x1024xf32> to vector<8x256xf32>
    %126 = math.tanh %125 : vector<8x256xf32>
    %127 = vector.extract_strided_slice %112 {offsets = [0, 768], sizes = [8, 256], strides = [1, 1]} : vector<8x1024xf32> to vector<8x256xf32>
    %128 = arith.negf %127 : vector<8x256xf32>
    %129 = math.exp %128 : vector<8x256xf32>
    %cst_38 = arith.constant 1.000000e+00 : f32
    %130 = vector.broadcast %cst_38 : f32 to vector<8x256xf32>
    %131 = arith.addf %130, %129 : vector<8x256xf32>
    %132 = arith.divf %130, %131 : vector<8x256xf32>
    %133 = arith.mulf %124, %101 : vector<8x256xf32>
    %134 = arith.mulf %118, %126 : vector<8x256xf32>
    %135 = arith.addf %133, %134 : vector<8x256xf32>
    %136 = math.tanh %135 : vector<8x256xf32>
    %137 = arith.mulf %132, %136 : vector<8x256xf32>
    %138 = arith.truncf %137 : vector<8x256xf32> to vector<8x256xbf16>
    %c0_39 = arith.constant 0 : index
    %c3_40 = arith.constant 3 : index
    %c0_41 = arith.constant 0 : index
    %139 = vector.load %arg4[%c0_39, %c3_40, %c0_41] : memref<8x8x256xbf16, #tpu.memory_space<vmem>>, vector<8x1x256xbf16>
    %140 = vector.shape_cast %139 : vector<8x1x256xbf16> to vector<8x256xbf16>
    %141 = vector.shape_cast %138 : vector<8x256xbf16> to vector<8x1x256xbf16>
    tpu.vector_store %arg4[%c0_39, %c3_40, %c0_41], %141 {strides = array<i32>} : memref<8x8x256xbf16, #tpu.memory_space<vmem>>, vector<8x1x256xbf16>,
    %c0_42 = arith.constant 0 : index
    %c4 = arith.constant 4 : index
    %c0_43 = arith.constant 0 : index
    %142 = vector.load %arg2[%c0_42, %c4, %c0_43] : memref<8x8x1024xf32, #tpu.memory_space<vmem>>, vector<8x1x1024xf32>
    %143 = vector.shape_cast %142 : vector<8x1x1024xf32> to vector<8x1024xf32>
    %144 = arith.truncf %137 : vector<8x256xf32> to vector<8x256xbf16>
    %cst_44 = arith.constant dense<0.000000e+00> : vector<8x1024xf32>
    %145 = tpu.matmul %144, %5, %cst_44 {dimension_numbers = #tpu.dot_dimension_numbers<[1], [0], [0], [1], [0, 0, 1, 1], [], []>} : vector<8x256xbf16>, vector<256x1024xbf16>, vector<8x1024xf32> -> vector<8x1024xf32>
    %146 = arith.addf %143, %145 : vector<8x1024xf32>
    %147 = vector.extract_strided_slice %146 {offsets = [0, 0], sizes = [8, 256], strides = [1, 1]} : vector<8x1024xf32> to vector<8x256xf32>
    %148 = arith.negf %147 : vector<8x256xf32>
    %149 = math.exp %148 : vector<8x256xf32>
    %cst_45 = arith.constant 1.000000e+00 : f32
    %150 = vector.broadcast %cst_45 : f32 to vector<8x256xf32>
    %151 = arith.addf %150, %149 : vector<8x256xf32>
    %152 = arith.divf %150, %151 : vector<8x256xf32>
    %153 = vector.extract_strided_slice %146 {offsets = [0, 256], sizes = [8, 256], strides = [1, 1]} : vector<8x1024xf32> to vector<8x256xf32>
    %154 = arith.negf %153 : vector<8x256xf32>
    %155 = math.exp %154 : vector<8x256xf32>
    %cst_46 = arith.constant 1.000000e+00 : f32
    %156 = vector.broadcast %cst_46 : f32 to vector<8x256xf32>
    %157 = arith.addf %156, %155 : vector<8x256xf32>
    %158 = arith.divf %156, %157 : vector<8x256xf32>
    %159 = vector.extract_strided_slice %146 {offsets = [0, 512], sizes = [8, 256], strides = [1, 1]} : vector<8x1024xf32> to vector<8x256xf32>
    %160 = math.tanh %159 : vector<8x256xf32>
    %161 = vector.extract_strided_slice %146 {offsets = [0, 768], sizes = [8, 256], strides = [1, 1]} : vector<8x1024xf32> to vector<8x256xf32>
    %162 = arith.negf %161 : vector<8x256xf32>
    %163 = math.exp %162 : vector<8x256xf32>
    %cst_47 = arith.constant 1.000000e+00 : f32
    %164 = vector.broadcast %cst_47 : f32 to vector<8x256xf32>
    %165 = arith.addf %164, %163 : vector<8x256xf32>
    %166 = arith.divf %164, %165 : vector<8x256xf32>
    %167 = arith.mulf %158, %135 : vector<8x256xf32>
    %168 = arith.mulf %152, %160 : vector<8x256xf32>
    %169 = arith.addf %167, %168 : vector<8x256xf32>
    %170 = math.tanh %169 : vector<8x256xf32>
    %171 = arith.mulf %166, %170 : vector<8x256xf32>
    %172 = arith.truncf %171 : vector<8x256xf32> to vector<8x256xbf16>
    %c0_48 = arith.constant 0 : index
    %c4_49 = arith.constant 4 : index
    %c0_50 = arith.constant 0 : index
    %173 = vector.load %arg4[%c0_48, %c4_49, %c0_50] : memref<8x8x256xbf16, #tpu.memory_space<vmem>>, vector<8x1x256xbf16>
    %174 = vector.shape_cast %173 : vector<8x1x256xbf16> to vector<8x256xbf16>
    %175 = vector.shape_cast %172 : vector<8x256xbf16> to vector<8x1x256xbf16>
    tpu.vector_store %arg4[%c0_48, %c4_49, %c0_50], %175 {strides = array<i32>} : memref<8x8x256xbf16, #tpu.memory_space<vmem>>, vector<8x1x256xbf16>,
    %c0_51 = arith.constant 0 : index
    %c5 = arith.constant 5 : index
    %c0_52 = arith.constant 0 : index
    %176 = vector.load %arg2[%c0_51, %c5, %c0_52] : memref<8x8x1024xf32, #tpu.memory_space<vmem>>, vector<8x1x1024xf32>
    %177 = vector.shape_cast %176 : vector<8x1x1024xf32> to vector<8x1024xf32>
    %178 = arith.truncf %171 : vector<8x256xf32> to vector<8x256xbf16>
    %cst_53 = arith.constant dense<0.000000e+00> : vector<8x1024xf32>
    %179 = tpu.matmul %178, %5, %cst_53 {dimension_numbers = #tpu.dot_dimension_numbers<[1], [0], [0], [1], [0, 0, 1, 1], [], []>} : vector<8x256xbf16>, vector<256x1024xbf16>, vector<8x1024xf32> -> vector<8x1024xf32>
    %180 = arith.addf %177, %179 : vector<8x1024xf32>
    %181 = vector.extract_strided_slice %180 {offsets = [0, 0], sizes = [8, 256], strides = [1, 1]} : vector<8x1024xf32> to vector<8x256xf32>
    %182 = arith.negf %181 : vector<8x256xf32>
    %183 = math.exp %182 : vector<8x256xf32>
    %cst_54 = arith.constant 1.000000e+00 : f32
    %184 = vector.broadcast %cst_54 : f32 to vector<8x256xf32>
    %185 = arith.addf %184, %183 : vector<8x256xf32>
    %186 = arith.divf %184, %185 : vector<8x256xf32>
    %187 = vector.extract_strided_slice %180 {offsets = [0, 256], sizes = [8, 256], strides = [1, 1]} : vector<8x1024xf32> to vector<8x256xf32>
    %188 = arith.negf %187 : vector<8x256xf32>
    %189 = math.exp %188 : vector<8x256xf32>
    %cst_55 = arith.constant 1.000000e+00 : f32
    %190 = vector.broadcast %cst_55 : f32 to vector<8x256xf32>
    %191 = arith.addf %190, %189 : vector<8x256xf32>
    %192 = arith.divf %190, %191 : vector<8x256xf32>
    %193 = vector.extract_strided_slice %180 {offsets = [0, 512], sizes = [8, 256], strides = [1, 1]} : vector<8x1024xf32> to vector<8x256xf32>
    %194 = math.tanh %193 : vector<8x256xf32>
    %195 = vector.extract_strided_slice %180 {offsets = [0, 768], sizes = [8, 256], strides = [1, 1]} : vector<8x1024xf32> to vector<8x256xf32>
    %196 = arith.negf %195 : vector<8x256xf32>
    %197 = math.exp %196 : vector<8x256xf32>
    %cst_56 = arith.constant 1.000000e+00 : f32
    %198 = vector.broadcast %cst_56 : f32 to vector<8x256xf32>
    %199 = arith.addf %198, %197 : vector<8x256xf32>
    %200 = arith.divf %198, %199 : vector<8x256xf32>
    %201 = arith.mulf %192, %169 : vector<8x256xf32>
    %202 = arith.mulf %186, %194 : vector<8x256xf32>
    %203 = arith.addf %201, %202 : vector<8x256xf32>
    %204 = math.tanh %203 : vector<8x256xf32>
    %205 = arith.mulf %200, %204 : vector<8x256xf32>
    %206 = arith.truncf %205 : vector<8x256xf32> to vector<8x256xbf16>
    %c0_57 = arith.constant 0 : index
    %c5_58 = arith.constant 5 : index
    %c0_59 = arith.constant 0 : index
    %207 = vector.load %arg4[%c0_57, %c5_58, %c0_59] : memref<8x8x256xbf16, #tpu.memory_space<vmem>>, vector<8x1x256xbf16>
    %208 = vector.shape_cast %207 : vector<8x1x256xbf16> to vector<8x256xbf16>
    %209 = vector.shape_cast %206 : vector<8x256xbf16> to vector<8x1x256xbf16>
    tpu.vector_store %arg4[%c0_57, %c5_58, %c0_59], %209 {strides = array<i32>} : memref<8x8x256xbf16, #tpu.memory_space<vmem>>, vector<8x1x256xbf16>,
    %c0_60 = arith.constant 0 : index
    %c6 = arith.constant 6 : index
    %c0_61 = arith.constant 0 : index
    %210 = vector.load %arg2[%c0_60, %c6, %c0_61] : memref<8x8x1024xf32, #tpu.memory_space<vmem>>, vector<8x1x1024xf32>
    %211 = vector.shape_cast %210 : vector<8x1x1024xf32> to vector<8x1024xf32>
    %212 = arith.truncf %205 : vector<8x256xf32> to vector<8x256xbf16>
    %cst_62 = arith.constant dense<0.000000e+00> : vector<8x1024xf32>
    %213 = tpu.matmul %212, %5, %cst_62 {dimension_numbers = #tpu.dot_dimension_numbers<[1], [0], [0], [1], [0, 0, 1, 1], [], []>} : vector<8x256xbf16>, vector<256x1024xbf16>, vector<8x1024xf32> -> vector<8x1024xf32>
    %214 = arith.addf %211, %213 : vector<8x1024xf32>
    %215 = vector.extract_strided_slice %214 {offsets = [0, 0], sizes = [8, 256], strides = [1, 1]} : vector<8x1024xf32> to vector<8x256xf32>
    %216 = arith.negf %215 : vector<8x256xf32>
    %217 = math.exp %216 : vector<8x256xf32>
    %cst_63 = arith.constant 1.000000e+00 : f32
    %218 = vector.broadcast %cst_63 : f32 to vector<8x256xf32>
    %219 = arith.addf %218, %217 : vector<8x256xf32>
    %220 = arith.divf %218, %219 : vector<8x256xf32>
    %221 = vector.extract_strided_slice %214 {offsets = [0, 256], sizes = [8, 256], strides = [1, 1]} : vector<8x1024xf32> to vector<8x256xf32>
    %222 = arith.negf %221 : vector<8x256xf32>
    %223 = math.exp %222 : vector<8x256xf32>
    %cst_64 = arith.constant 1.000000e+00 : f32
    %224 = vector.broadcast %cst_64 : f32 to vector<8x256xf32>
    %225 = arith.addf %224, %223 : vector<8x256xf32>
    %226 = arith.divf %224, %225 : vector<8x256xf32>
    %227 = vector.extract_strided_slice %214 {offsets = [0, 512], sizes = [8, 256], strides = [1, 1]} : vector<8x1024xf32> to vector<8x256xf32>
    %228 = math.tanh %227 : vector<8x256xf32>
    %229 = vector.extract_strided_slice %214 {offsets = [0, 768], sizes = [8, 256], strides = [1, 1]} : vector<8x1024xf32> to vector<8x256xf32>
    %230 = arith.negf %229 : vector<8x256xf32>
    %231 = math.exp %230 : vector<8x256xf32>
    %cst_65 = arith.constant 1.000000e+00 : f32
    %232 = vector.broadcast %cst_65 : f32 to vector<8x256xf32>
    %233 = arith.addf %232, %231 : vector<8x256xf32>
    %234 = arith.divf %232, %233 : vector<8x256xf32>
    %235 = arith.mulf %226, %203 : vector<8x256xf32>
    %236 = arith.mulf %220, %228 : vector<8x256xf32>
    %237 = arith.addf %235, %236 : vector<8x256xf32>
    %238 = math.tanh %237 : vector<8x256xf32>
    %239 = arith.mulf %234, %238 : vector<8x256xf32>
    %240 = arith.truncf %239 : vector<8x256xf32> to vector<8x256xbf16>
    %c0_66 = arith.constant 0 : index
    %c6_67 = arith.constant 6 : index
    %c0_68 = arith.constant 0 : index
    %241 = vector.load %arg4[%c0_66, %c6_67, %c0_68] : memref<8x8x256xbf16, #tpu.memory_space<vmem>>, vector<8x1x256xbf16>
    %242 = vector.shape_cast %241 : vector<8x1x256xbf16> to vector<8x256xbf16>
    %243 = vector.shape_cast %240 : vector<8x256xbf16> to vector<8x1x256xbf16>
    tpu.vector_store %arg4[%c0_66, %c6_67, %c0_68], %243 {strides = array<i32>} : memref<8x8x256xbf16, #tpu.memory_space<vmem>>, vector<8x1x256xbf16>,
    %c0_69 = arith.constant 0 : index
    %c7 = arith.constant 7 : index
    %c0_70 = arith.constant 0 : index
    %244 = vector.load %arg2[%c0_69, %c7, %c0_70] : memref<8x8x1024xf32, #tpu.memory_space<vmem>>, vector<8x1x1024xf32>
    %245 = vector.shape_cast %244 : vector<8x1x1024xf32> to vector<8x1024xf32>
    %246 = arith.truncf %239 : vector<8x256xf32> to vector<8x256xbf16>
    %cst_71 = arith.constant dense<0.000000e+00> : vector<8x1024xf32>
    %247 = tpu.matmul %246, %5, %cst_71 {dimension_numbers = #tpu.dot_dimension_numbers<[1], [0], [0], [1], [0, 0, 1, 1], [], []>} : vector<8x256xbf16>, vector<256x1024xbf16>, vector<8x1024xf32> -> vector<8x1024xf32>
    %248 = arith.addf %245, %247 : vector<8x1024xf32>
    %249 = vector.extract_strided_slice %248 {offsets = [0, 0], sizes = [8, 256], strides = [1, 1]} : vector<8x1024xf32> to vector<8x256xf32>
    %250 = arith.negf %249 : vector<8x256xf32>
    %251 = math.exp %250 : vector<8x256xf32>
    %cst_72 = arith.constant 1.000000e+00 : f32
    %252 = vector.broadcast %cst_72 : f32 to vector<8x256xf32>
    %253 = arith.addf %252, %251 : vector<8x256xf32>
    %254 = arith.divf %252, %253 : vector<8x256xf32>
    %255 = vector.extract_strided_slice %248 {offsets = [0, 256], sizes = [8, 256], strides = [1, 1]} : vector<8x1024xf32> to vector<8x256xf32>
    %256 = arith.negf %255 : vector<8x256xf32>
    %257 = math.exp %256 : vector<8x256xf32>
    %cst_73 = arith.constant 1.000000e+00 : f32
    %258 = vector.broadcast %cst_73 : f32 to vector<8x256xf32>
    %259 = arith.addf %258, %257 : vector<8x256xf32>
    %260 = arith.divf %258, %259 : vector<8x256xf32>
    %261 = vector.extract_strided_slice %248 {offsets = [0, 512], sizes = [8, 256], strides = [1, 1]} : vector<8x1024xf32> to vector<8x256xf32>
    %262 = math.tanh %261 : vector<8x256xf32>
    %263 = vector.extract_strided_slice %248 {offsets = [0, 768], sizes = [8, 256], strides = [1, 1]} : vector<8x1024xf32> to vector<8x256xf32>
    %264 = arith.negf %263 : vector<8x256xf32>
    %265 = math.exp %264 : vector<8x256xf32>
    %cst_74 = arith.constant 1.000000e+00 : f32
    %266 = vector.broadcast %cst_74 : f32 to vector<8x256xf32>
    %267 = arith.addf %266, %265 : vector<8x256xf32>
    %268 = arith.divf %266, %267 : vector<8x256xf32>
    %269 = arith.mulf %260, %237 : vector<8x256xf32>
    %270 = arith.mulf %254, %262 : vector<8x256xf32>
    %271 = arith.addf %269, %270 : vector<8x256xf32>
    %272 = math.tanh %271 : vector<8x256xf32>
    %273 = arith.mulf %268, %272 : vector<8x256xf32>
    %274 = arith.truncf %273 : vector<8x256xf32> to vector<8x256xbf16>
    %c0_75 = arith.constant 0 : index
    %c7_76 = arith.constant 7 : index
    %c0_77 = arith.constant 0 : index
    %275 = vector.load %arg4[%c0_75, %c7_76, %c0_77] : memref<8x8x256xbf16, #tpu.memory_space<vmem>>, vector<8x1x256xbf16>
    %276 = vector.shape_cast %275 : vector<8x1x256xbf16> to vector<8x256xbf16>
    %277 = vector.shape_cast %274 : vector<8x256xbf16> to vector<8x1x256xbf16>
    tpu.vector_store %arg4[%c0_75, %c7_76, %c0_77], %277 {strides = array<i32>} : memref<8x8x256xbf16, #tpu.memory_space<vmem>>, vector<8x1x256xbf16>,
    %c0_78 = arith.constant 0 : index
    %c0_79 = arith.constant 0 : index
    %278 = vector.load %arg5[%c0_78, %c0_79] : memref<8x256xf32, #tpu.memory_space<vmem>>, vector<8x256xf32>
    tpu.vector_store %arg5[%c0_78, %c0_79], %273 {strides = array<i32>} : memref<8x256xf32, #tpu.memory_space<vmem>>, vector<8x256xf32>,
    %c0_80 = arith.constant 0 : index
    %c0_81 = arith.constant 0 : index
    %279 = vector.load %arg6[%c0_80, %c0_81] : memref<8x256xf32, #tpu.memory_space<vmem>>, vector<8x256xf32>
    tpu.vector_store %arg6[%c0_80, %c0_81], %271 {strides = array<i32>} : memref<8x256xf32, #tpu.memory_space<vmem>>, vector<8x256xf32>,
    return
  }
  func.func @transform_0(%arg0: i32, %arg1: i32) -> (i32, i32, i32) {
    %c0_i32 = arith.constant 0 : i32
    %c0_i32_0 = arith.constant 0 : i32
    return %arg0, %arg1, %c0_i32 : i32, i32, i32
  }
  func.func @transform_1(%arg0: i32, %arg1: i32) -> (i32, i32) {
    %c0_i32 = arith.constant 0 : i32
    %c0_i32_0 = arith.constant 0 : i32
    %c0_i32_1 = arith.constant 0 : i32
    return %c0_i32, %c0_i32_0 : i32, i32
  }
  func.func @transform_2(%arg0: i32, %arg1: i32) -> (i32, i32, i32) {
    %c0_i32 = arith.constant 0 : i32
    %c0_i32_0 = arith.constant 0 : i32
    return %arg0, %arg1, %c0_i32 : i32, i32, i32
  }
}

module attributes {stable_mosaic.version = 11 : i64} {
  func.func @_matmul_bias_single_k_kernel(%arg0: i32, %arg1: i32, %arg2: memref<64x256xbf16, #tpu.memory_space<vmem>>, %arg3: memref<256x1024xbf16, #tpu.memory_space<vmem>>, %arg4: memref<1x1024xf32, #tpu.memory_space<vmem>>, %arg5: memref<64x1024xf32, #tpu.memory_space<vmem>>) attributes {dimension_semantics = [#tpu.dimension_semantics<parallel>, #tpu.dimension_semantics<parallel>], iteration_bounds = array<i64: 1, 1>, scalar_prefetch = 0 : i64, scratch_operands = 0 : i64, tpu.core_type = #tpu.core_type<tc>, window_params = [{transform_indices = @transform_0, window_bounds = array<i64: 64, 256>}, {transform_indices = @transform_1, window_bounds = array<i64: 256, 1024>}, {transform_indices = @transform_2, window_bounds = array<i64: 1, 1024>}, {transform_indices = @transform_3, window_bounds = array<i64: 64, 1024>}]} {
    %c0 = arith.constant 0 : index
    %c0_0 = arith.constant 0 : index
    %0 = vector.load %arg2[%c0, %c0_0] : memref<64x256xbf16, #tpu.memory_space<vmem>>, vector<64x256xbf16>
    %c0_1 = arith.constant 0 : index
    %c0_2 = arith.constant 0 : index
    %1 = vector.load %arg3[%c0_1, %c0_2] : memref<256x1024xbf16, #tpu.memory_space<vmem>>, vector<256x1024xbf16>
    %cst = arith.constant dense<0.000000e+00> : vector<64x1024xf32>
    %2 = tpu.matmul %0, %1, %cst {dimension_numbers = #tpu.dot_dimension_numbers<[1], [0], [0], [1], [0, 0, 1, 1], [], []>} : vector<64x256xbf16>, vector<256x1024xbf16>, vector<64x1024xf32> -> vector<64x1024xf32>
    %c0_3 = arith.constant 0 : index
    %c0_4 = arith.constant 0 : index
    %3 = vector.load %arg4[%c0_3, %c0_4] : memref<1x1024xf32, #tpu.memory_space<vmem>>, vector<1x1024xf32>
    %4 = vector.broadcast %3 : vector<1x1024xf32> to vector<64x1024xf32>
    %5 = arith.addf %2, %4 : vector<64x1024xf32>
    %c0_5 = arith.constant 0 : index
    %c0_6 = arith.constant 0 : index
    %6 = vector.load %arg5[%c0_5, %c0_6] : memref<64x1024xf32, #tpu.memory_space<vmem>>, vector<64x1024xf32>
    tpu.vector_store %arg5[%c0_5, %c0_6], %5 {strides = array<i32>} : memref<64x1024xf32, #tpu.memory_space<vmem>>, vector<64x1024xf32>,
    return
  }
  func.func @transform_0(%arg0: i32, %arg1: i32) -> (i32, i32) {
    %c0_i32 = arith.constant 0 : i32
    %c0_i32_0 = arith.constant 0 : i32
    return %arg0, %c0_i32 : i32, i32
  }
  func.func @transform_1(%arg0: i32, %arg1: i32) -> (i32, i32) {
    %c0_i32 = arith.constant 0 : i32
    %c0_i32_0 = arith.constant 0 : i32
    return %c0_i32, %arg1 : i32, i32
  }
  func.func @transform_2(%arg0: i32, %arg1: i32) -> (i32, i32) {
    %c0_i32 = arith.constant 0 : i32
    %c0_i32_0 = arith.constant 0 : i32
    return %c0_i32, %arg1 : i32, i32
  }
  func.func @transform_3(%arg0: i32, %arg1: i32) -> (i32, i32) {
    %c0_i32 = arith.constant 0 : i32
    return %arg0, %arg1 : i32, i32
  }
}

</mosaic_0001>

<bundles_post_ra>
// kernel: base_language_model_forward.3
= control target key start
LH: loop header
LB: loop body
LE: loop exit
PB: predicated region body
PF: predicated region fallthrough
CT: control target
= control target key end

     0   :  { %v906_v3 = vmov 0   ;;  %s1454_s1 = inlined_call_operand.vmem [shape: bf16[128,1024], index: 1, kind: input, shape index: {}]   ;;  %s1455_s0 = inlined_call_operand.vmem [shape: bf16[64,128], index: 0, kind: input, shape index: {}]   ;;  %s1456_s2 = inlined_call_operand.vmem [shape: f32[1,1024], index: 2, kind: input, shape index: {}]   ;;  %s1457_s3 = inlined_call_operand.vmem [shape: f32[64,1024], index: 3, kind: output, shape index: {}]  }
   0x1   :  { %v79_v0 = vld [vmem:[%s1454_s1 + $0x1c0] sm:$0xff]  ;;  %v80_v2 = vld [vmem:[%s1454_s1 + $0x1c8] sm:$0xff]  ;;  %505 = vmatprep.mubr.bf16.mxu0 %v906_v3  ;;  %578 = vmatprep.mubr.bf16.mxu1 %v906_v3  ;;  %v81_v63 = vld [vmem:[%s1454_s1 + $0x1d0] sm:$0xff] }
   0x2   :  { %v83_v1 = vld [vmem:[%s1454_s1 + $0x1e0] sm:$0xff]  ;;  %v84_v5 = vld [vmem:[%s1454_s1 + $0x1e8] sm:$0xff] }
   0x3   :  { %v894_v4 = vcombine.high %v79_v0, %v83_v1  ;;  %v893_v6 = vcombine.low %v79_v0, %v83_v1  ;;  %v71_v7 = vld [vmem:[%s1454_s1 + $0x180] sm:$0xff]  ;;  %v896_v9 = vcombine.high %v80_v2, %v84_v5  ;;  %v895_v10 = vcombine.low %v80_v2, %v84_v5  ;;  %v72_v12 = vld [vmem:[%s1454_s1 + $0x188] sm:$0xff]  ;;  %v85_v0 = vld [vmem:[%s1454_s1 + $0x1f0] sm:$0xff] }
   0x4   :  { %v75_v8 = vld [vmem:[%s1454_s1 + $0x1a0] sm:$0xff]  ;;  %v76_v13 = vld [vmem:[%s1454_s1 + $0x1a8] sm:$0xff]  ;;  %v82_v1 = vld [vmem:[%s1454_s1 + $0x1d8] sm:$0xff] }
   0x5   :  { %v886_v11 = vcombine.high %v71_v7, %v75_v8  ;;  %v63_v14 = vld [vmem:[%s1454_s1 + $0x140] sm:$0xff]  ;;  %473 = vmatprep.subr.bf16.mxu0 %v894_v4  ;;  %v888_v15 = vcombine.high %v72_v12, %v76_v13  ;;  %v64_v17 = vld [vmem:[%s1454_s1 + $0x148] sm:$0xff]  ;;  %546 = vmatprep.subr.bf16.mxu1 %v896_v9  ;;  %v885_v19 = vcombine.low %v71_v7, %v75_v8  ;;  %v86_v2 = vld [vmem:[%s1454_s1 + $0x1f8] sm:$0xff] }
   0x6   :  { %v67_v16 = vld [vmem:[%s1454_s1 + $0x160] sm:$0xff]  ;;  %v68_v18 = vld [vmem:[%s1454_s1 + $0x168] sm:$0xff]  ;;  %474 = vmatpush1.bf16.msra.mxu0 %v893_v6  ;;  %547 = vmatpush1.bf16.msra.mxu1 %v895_v10  ;;  %v887_v20 = vcombine.low %v72_v12, %v76_v13  ;;  %v898_v6 = vcombine.high %v81_v63, %v85_v0  ;;  %v900_v7 = vcombine.high %v82_v1, %v86_v2  ;;  %v73_v8 = vld [vmem:[%s1454_s1 + $0x190] sm:$0xff] }
   0x7   :  { %475 = vmatprep.subr.bf16.mxu0 %v886_v11  ;;  %v878_v21 = vcombine.high %v63_v14, %v67_v16  ;;  %548 = vmatprep.subr.bf16.mxu1 %v888_v15  ;;  %v880_v22 = vcombine.high %v64_v17, %v68_v18  ;;  %v55_v23 = vld [vmem:[%s1454_s1 + $0x100] sm:$0xff]  ;;  %v56_v25 = vld [vmem:[%s1454_s1 + $0x108] sm:$0xff]  ;;  %v877_v27 = vcombine.low %v63_v14, %v67_v16  ;;  %v77_v9 = vld [vmem:[%s1454_s1 + $0x1b0] sm:$0xff] }
   0x8   :  { %v59_v24 = vld [vmem:[%s1454_s1 + $0x120] sm:$0xff]  ;;  %v60_v26 = vld [vmem:[%s1454_s1 + $0x128] sm:$0xff]  ;;  %v879_v28 = vcombine.low %v64_v17, %v68_v18  ;;  %v74_v11 = vld [vmem:[%s1454_s1 + $0x198] sm:$0xff]  ;;  %v897_v13 = vcombine.low %v81_v63, %v85_v0  ;;  %v899_v14 = vcombine.low %v82_v1, %v86_v2  ;;  %v890_v15 = vcombine.high %v73_v8, %v77_v9 }
   0x9   :  { %v870_v29 = vcombine.high %v55_v23, %v59_v24  ;;  %v872_v30 = vcombine.high %v56_v25, %v60_v26  ;;  %v47_v31 = vld [vmem:[%s1454_s1 + $0xc0] sm:$0xff]  ;;  %v48_v33 = vld [vmem:[%s1454_s1 + $0xc8] sm:$0xff]  ;;  %v869_v35 = vcombine.low %v55_v23, %v59_v24  ;;  %v871_v36 = vcombine.low %v56_v25, %v60_v26  ;;  %v78_v12 = vld [vmem:[%s1454_s1 + $0x1b8] sm:$0xff] }
   0xa   :  { %476 = vmatpush1.bf16.msra.mxu0 %v885_v19  ;;  %549 = vmatpush1.bf16.msra.mxu1 %v887_v20  ;;  %v51_v32 = vld [vmem:[%s1454_s1 + $0xe0] sm:$0xff]  ;;  %v52_v34 = vld [vmem:[%s1454_s1 + $0xe8] sm:$0xff]  ;;  %v892_v16 = vcombine.high %v74_v11, %v78_v12  ;;  %v65_v17 = vld [vmem:[%s1454_s1 + $0x150] sm:$0xff] }
   0xb   :  { %477 = vmatprep.subr.bf16.mxu0 %v878_v21  ;;  %550 = vmatprep.subr.bf16.mxu1 %v880_v22  ;;  %v862_v37 = vcombine.high %v47_v31, %v51_v32  ;;  %v39_v38 = vld [vmem:[%s1454_s1 + $0x80] sm:$0xff]  ;;  %v864_v39 = vcombine.high %v48_v33, %v52_v34  ;;  %v40_v41 = vld [vmem:[%s1454_s1 + $0x88] sm:$0xff]  ;;  %v861_v43 = vcombine.low %v47_v31, %v51_v32  ;;  %v69_v18 = vld [vmem:[%s1454_s1 + $0x170] sm:$0xff] }
   0xc   :  { %v43_v40 = vld [vmem:[%s1454_s1 + $0xa0] sm:$0xff]  ;;  %v44_v42 = vld [vmem:[%s1454_s1 + $0xa8] sm:$0xff]  ;;  %v863_v44 = vcombine.low %v48_v33, %v52_v34  ;;  %v66_v19 = vld [vmem:[%s1454_s1 + $0x158] sm:$0xff]  ;;  %v889_v21 = vcombine.low %v73_v8, %v77_v9  ;;  %v891_v22 = vcombine.low %v74_v11, %v78_v12  ;;  %v882_v23 = vcombine.high %v65_v17, %v69_v18 }
   0xd   :  { %v854_v45 = vcombine.high %v39_v38, %v43_v40  ;;  %v31_v46 = vld [vmem:[%s1454_s1 + $0x40] sm:$0xff]  ;;  %v856_v47 = vcombine.high %v40_v41, %v44_v42  ;;  %v32_v49 = vld [vmem:[%s1454_s1 + $0x48] sm:$0xff]  ;;  %v853_v51 = vcombine.low %v39_v38, %v43_v40  ;;  %v855_v52 = vcombine.low %v40_v41, %v44_v42  ;;  %v70_v20 = vld [vmem:[%s1454_s1 + $0x178] sm:$0xff] }
   0xe   :  { %478 = vmatpush1.bf16.msra.mxu0 %v877_v27  ;;  %551 = vmatpush1.bf16.msra.mxu1 %v879_v28  ;;  %v35_v48 = vld [vmem:[%s1454_s1 + $0x60] sm:$0xff]  ;;  %v36_v50 = vld [vmem:[%s1454_s1 + $0x68] sm:$0xff]  ;;  %v884_v24 = vcombine.high %v66_v19, %v70_v20  ;;  %v57_v25 = vld [vmem:[%s1454_s1 + $0x110] sm:$0xff]  ;;  %v883_v31 = vcombine.low %v66_v19, %v70_v20 }
   0xf   :  { %479 = vmatprep.subr.bf16.mxu0 %v870_v29  ;;  %552 = vmatprep.subr.bf16.mxu1 %v872_v30  ;;  %v846_v53 = vcombine.high %v31_v46, %v35_v48  ;;  %v848_v54 = vcombine.high %v32_v49, %v36_v50  ;;  %v23_v55 = vld [vmem:[%s1454_s1] sm:$0xff]  ;;  %v24_v57 = vld [vmem:[%s1454_s1 + $0x8] sm:$0xff]  ;;  %v845_v59 = vcombine.low %v31_v46, %v35_v48  ;;  %v61_v26 = vld [vmem:[%s1454_s1 + $0x130] sm:$0xff] }
  0x10   :  { %v27_v56 = vld [vmem:[%s1454_s1 + $0x20] sm:$0xff]  ;;  %v28_v58 = vld [vmem:[%s1454_s1 + $0x28] sm:$0xff]  ;;  %v847_v60 = vcombine.low %v32_v49, %v36_v50  ;;  %v58_v28 = vld [vmem:[%s1454_s1 + $0x118] sm:$0xff]  ;;  %v881_v30 = vcombine.low %v65_v17, %v69_v18  ;;  %v874_v32 = vcombine.high %v57_v25, %v61_v26  ;;  %v873_v38 = vcombine.low %v57_v25, %v61_v26 }
  0x11   :  { %v838_v61 = vcombine.high %v23_v55, %v27_v56  ;;  %v840_v62 = vcombine.high %v24_v57, %v28_v58  ;;  %v837_v4 = vcombine.low %v23_v55, %v27_v56  ;;  %v839_v5 = vcombine.low %v24_v57, %v28_v58  ;;  %v1046_v10 = vld [vmem:[%s1455_s0] sm:$0xff]   ;;  %v1079_v27 = vld [vmem:[%s1455_s0 + $0x8] sm:$0xff]   ;;  %v62_v29 = vld [vmem:[%s1454_s1 + $0x138] sm:$0xff] }
  0x12   :  { %480 = vmatpush1.bf16.msra.mxu0 %v869_v35  ;;  %553 = vmatpush1.bf16.msra.mxu1 %v871_v36  ;;  %v876_v33 = vcombine.high %v58_v28, %v62_v29  ;;  %v49_v34 = vld [vmem:[%s1454_s1 + $0xd0] sm:$0xff]  ;;  %v50_v36 = vld [vmem:[%s1454_s1 + $0xd8] sm:$0xff] }
  0x13   :  { %481 = vmatprep.subr.bf16.mxu0 %v862_v37  ;;  %554 = vmatprep.subr.bf16.mxu1 %v864_v39  ;;  %v53_v35 = vld [vmem:[%s1454_s1 + $0xf0] sm:$0xff]  ;;  %v54_v37 = vld [vmem:[%s1454_s1 + $0xf8] sm:$0xff]  ;;  %v875_v39 = vcombine.low %v58_v28, %v62_v29 }
  0x14   :  { %v866_v40 = vcombine.high %v49_v34, %v53_v35  ;;  %v868_v41 = vcombine.high %v50_v36, %v54_v37  ;;  %v41_v42 = vld [vmem:[%s1454_s1 + $0x90] sm:$0xff]  ;;  %v46_v46 = vld [vmem:[%s1454_s1 + $0xb8] sm:$0xff]  ;;  %v867_v48 = vcombine.low %v50_v36, %v54_v37 }
  0x15   :  { %v30_v63 = vld [vmem:[%s1454_s1 + $0x38] sm:$0xff] }
  0x16   :  { %482 = vmatpush1.bf16.msra.mxu0 %v861_v43  ;;  %555 = vmatpush1.bf16.msra.mxu1 %v863_v44  ;;  %v45_v43 = vld [vmem:[%s1454_s1 + $0xb0] sm:$0xff] }
  0x17   :  { %483 = vmatprep.subr.bf16.mxu0 %v854_v45  ;;  %556 = vmatprep.subr.bf16.mxu1 %v856_v47  ;;  %v904_v44 = vld [vmem:[%s1455_s0 + $0x10] sm:$0xff]   ;;  %v42_v45 = vld [vmem:[%s1454_s1 + $0x98] sm:$0xff]  ;;  %v865_v47 = vcombine.low %v49_v34, %v53_v35  ;;  %v858_v49 = vcombine.high %v41_v42, %v45_v43  ;;  %v857_v55 = vcombine.low %v41_v42, %v45_v43 }
  0x18   :  { %v860_v50 = vcombine.high %v42_v45, %v46_v46  ;;  %v859_v56 = vcombine.low %v42_v45, %v46_v46 }
  0x1a   :  { %484 = vmatpush1.bf16.msra.mxu0 %v853_v51  ;;  %557 = vmatpush1.bf16.msra.mxu1 %v855_v52  ;;  %v33_v51 = vld [vmem:[%s1454_s1 + $0x50] sm:$0xff] }
  0x1b   :  { %485 = vmatprep.subr.bf16.mxu0 %v846_v53  ;;  %558 = vmatprep.subr.bf16.mxu1 %v848_v54  ;;  %v37_v52 = vld [vmem:[%s1454_s1 + $0x70] sm:$0xff]  ;;  %v34_v53 = vld [vmem:[%s1454_s1 + $0x58] sm:$0xff] }
  0x1c   :  { %v38_v54 = vld [vmem:[%s1454_s1 + $0x78] sm:$0xff]  ;;  %v850_v57 = vcombine.high %v33_v51, %v37_v52  ;;  %v849_v0 = vcombine.low %v33_v51, %v37_v52 }
  0x1d   :  { %v852_v58 = vcombine.high %v34_v53, %v38_v54  ;;  %v851_v1 = vcombine.low %v34_v53, %v38_v54 }
  0x1e   :  { %486 = vmatpush1.bf16.msra.mxu0 %v845_v59  ;;  %559 = vmatpush1.bf16.msra.mxu1 %v847_v60  ;;  %v25_v59 = vld [vmem:[%s1454_s1 + $0x10] sm:$0xff] }
  0x1f   :  { %487 = vmatprep.subr.bf16.mxu0 %v838_v61  ;;  %560 = vmatprep.subr.bf16.mxu1 %v840_v62  ;;  %v29_v60 = vld [vmem:[%s1454_s1 + $0x30] sm:$0xff]  ;;  %v905_v61 = vld [vmem:[%s1455_s0 + $0x18] sm:$0xff]  }
  0x20   :  { %v26_v62 = vld [vmem:[%s1454_s1 + $0x18] sm:$0xff]  ;;  %v842_v2 = vcombine.high %v25_v59, %v29_v60 }
  0x22   :  { %488 = vmatpush1.bf16.msra.mxu0 %v837_v4  ;;  %561 = vmatpush1.bf16.msra.mxu1 %v839_v5  ;;  %v844_v4 = vcombine.high %v26_v62, %v30_v63  ;;  %v841_v5 = vcombine.low %v25_v59, %v29_v60 }
  0x23   :  { %619 = vmatprep.subr.bf16.mxu0 %v898_v6  ;;  %692 = vmatprep.subr.bf16.mxu1 %v900_v7  ;;  %v843_v6 = vcombine.low %v26_v62, %v30_v63  ;;  %v89_v7 = vlaneseq }
  0x25   :  { %506 = vmatmul.mubr.bf16.vlgmr.msra.gmra.mxu0 %v1046_v10  ;;  %579 = vmatmul.mubr.bf16.vlgmr.msra.gmra.mxu1 %v1046_v10  ;;  %v1159_v8 = vshrl.u32 %v89_v7, 7 }
  0x26   :  { %620 = vmatpush1.bf16.msra.mxu0 %v897_v13  ;;  %693 = vmatpush1.bf16.msra.mxu1 %v899_v14 }
  0x27   :  { %621 = vmatprep.subr.bf16.mxu0 %v890_v15  ;;  %694 = vmatprep.subr.bf16.mxu1 %v892_v16  ;;  %v91_v9 = vsub.s32 0, %v1159_v8  ;;  %v99_v11 = vsub.s32 2, %v1159_v8  ;;  %v95_v12 = vsub.s32 1, %v1159_v8  ;;  %v103_v13 = vsub.s32 3, %v1159_v8 }
  0x28   :  { %515 = vmatprep.mubr.bf16.mxu0 %v906_v3  ;;  %588 = vmatprep.mubr.bf16.mxu1 %v906_v3 }
  0x2a   :  { %622 = vmatpush1.bf16.msra.mxu0 %v889_v21  ;;  %695 = vmatpush1.bf16.msra.mxu1 %v891_v22 }
  0x2b   :  { %623 = vmatprep.subr.bf16.mxu0 %v882_v23  ;;  %696 = vmatprep.subr.bf16.mxu1 %v884_v24 }
  0x2d   :  { %516 = vmatmul.mubr.bf16.gmra.mxu0 %v1079_v27  ;;  %589 = vmatmul.mubr.bf16.gmra.mxu1 %v1079_v27 }
  0x2e   :  { %624 = vmatpush1.bf16.msra.mxu0 %v881_v30  ;;  %697 = vmatpush1.bf16.msra.mxu1 %v883_v31 }
  0x2f   :  { %625 = vmatprep.subr.bf16.mxu0 %v874_v32  ;;  %698 = vmatprep.subr.bf16.mxu1 %v876_v33 }
  0x30   :  { %525 = vmatprep.mubr.bf16.mxu0 %v906_v3  ;;  %598 = vmatprep.mubr.bf16.mxu1 %v906_v3 }
  0x32   :  { %626 = vmatpush1.bf16.msra.mxu0 %v873_v38  ;;  %699 = vmatpush1.bf16.msra.mxu1 %v875_v39 }
  0x33   :  { %627 = vmatprep.subr.bf16.mxu0 %v866_v40  ;;  %700 = vmatprep.subr.bf16.mxu1 %v868_v41 }
  0x35   :  { %526 = vmatmul.mubr.bf16.gmra.mxu0 %v904_v44  ;;  %599 = vmatmul.mubr.bf16.gmra.mxu1 %v904_v44 }
  0x36   :  { %628 = vmatpush1.bf16.msra.mxu0 %v865_v47  ;;  %701 = vmatpush1.bf16.msra.mxu1 %v867_v48 }
  0x37   :  { %629 = vmatprep.subr.bf16.mxu0 %v858_v49  ;;  %702 = vmatprep.subr.bf16.mxu1 %v860_v50 }
  0x38   :  { %535 = vmatprep.mubr.bf16.mxu0 %v906_v3  ;;  %608 = vmatprep.mubr.bf16.mxu1 %v906_v3 }
  0x3a   :  { %630 = vmatpush1.bf16.msra.mxu0 %v857_v55  ;;  %703 = vmatpush1.bf16.msra.mxu1 %v859_v56 }
  0x3b   :  { %631 = vmatprep.subr.bf16.mxu0 %v850_v57  ;;  %704 = vmatprep.subr.bf16.mxu1 %v852_v58 }
  0x3d   :  { %536 = vmatmul.mubr.bf16.gmra.mxu0 %v905_v61  ;;  %609 = vmatmul.mubr.bf16.gmra.mxu1 %v905_v61 }
  0x3e   :  { %632 = vmatpush1.bf16.msra.mxu0 %v849_v0  ;;  %705 = vmatpush1.bf16.msra.mxu1 %v851_v1 }
  0x3f   :  { %633 = vmatprep.subr.bf16.mxu0 %v842_v2  ;;  %706 = vmatprep.subr.bf16.mxu1 %v844_v4 }
  0x40   :  { %651 = vmatprep.mubr.bf16.mxu0 %v906_v3  ;;  %724 = vmatprep.mubr.bf16.mxu1 %v906_v3 }
  0x42   :  { %634 = vmatpush1.bf16.msra.mxu0 %v841_v5  ;;  %707 = vmatpush1.bf16.msra.mxu1 %v843_v6  ;;  %v107_v5 = vsub.s32 4, %v1159_v8 }
  0x45   :  { %652 = vmatmul.mubr.bf16.vlgmr.msra.gmra.mxu0 %v1046_v10  ;;  %725 = vmatmul.mubr.bf16.vlgmr.msra.gmra.mxu1 %v1046_v10  ;;  %v1165_v10 = vld [vmem:[%s1456_s2] sm:$0xff] }
  0x46   :  { %661 = vmatprep.mubr.bf16.mxu0 %v906_v3  ;;  %734 = vmatprep.mubr.bf16.mxu1 %v906_v3  ;;  %v1174_v14 = vrot.slane %v1165_v10, %v99_v11  ;;  %v1177_v15 = vrot.slane %v1165_v10, %v95_v12  ;;  %v1180_v17 = vrot.slane %v1165_v10, %v103_v13  ;;  %v111_v13 = vsub.s32 5, %v1159_v8 }
  0x4d   :  { %662 = vmatmul.mubr.bf16.gmra.mxu0 %v1079_v27  ;;  %735 = vmatmul.mubr.bf16.gmra.mxu1 %v1079_v27 }
  0x4e   :  { %671 = vmatprep.mubr.bf16.mxu0 %v906_v3  ;;  %744 = vmatprep.mubr.bf16.mxu1 %v906_v3 }
  0x55   :  { %672 = vmatmul.mubr.bf16.gmra.mxu0 %v904_v44  ;;  %745 = vmatmul.mubr.bf16.gmra.mxu1 %v904_v44 }
  0x56   :  { %681 = vmatprep.mubr.bf16.mxu0 %v906_v3  ;;  %754 = vmatprep.mubr.bf16.mxu1 %v906_v3  ;;  %v1171_v3 = vrot.slane %v1165_v10, %v91_v9  ;;  %v115_v9 = vsub.s32 6, %v1159_v8 }
  0x5d   :  { %682 = vmatmul.mubr.bf16.gmra.mxu0 %v905_v61  ;;  %755 = vmatmul.mubr.bf16.gmra.mxu1 %v905_v61 }
  0xe5   :  { %v507_v16 = vpop.f32.mrf.mxu0  ;;  %v580_v19 = vpop.f32.mrf.mxu1 }
  0xe6   :  { %v508_v18 = vadd.f32 %v507_v16, %v1171_v3  ;;  %v581_v20 = vadd.f32 %v580_v19, %v1174_v14  ;;  %v119_v19 = vsub.s32 7, %v1159_v8 }
  0xe7   :  { %v509_v21 = vpop.f32.mrf.mxu0  ;;  %v582_v23 = vpop.f32.mrf.mxu1 }
  0xe8   :  { %765 = vst [vmem:[%s1457_s3] sm:$0xff] %v508_v18  ;;  %v510_v22 = vadd.f32 %v509_v21, %v1177_v15  ;;  %767 = vst [vmem:[%s1457_s3 + $0x10] sm:$0xff] %v581_v20  ;;  %v583_v24 = vadd.f32 %v582_v23, %v1180_v17 }
  0xe9   :  { %v511_v25 = vpop.f32.mrf.mxu0  ;;  %v584_v27 = vpop.f32.mrf.mxu1 }
  0xea   :  { %766 = vst [vmem:[%s1457_s3 + $0x8] sm:$0xff] %v510_v22  ;;  %v512_v26 = vadd.f32 %v511_v25, %v1171_v3  ;;  %768 = vst [vmem:[%s1457_s3 + $0x18] sm:$0xff] %v583_v24  ;;  %v585_v28 = vadd.f32 %v584_v27, %v1174_v14  ;;  %v1297_v22 = vrot.slane %v1165_v10, %v107_v5 }
  0xeb   :  { %v513_v29 = vpop.f32.mrf.mxu0  ;;  %v586_v31 = vpop.f32.mrf.mxu1  ;;  %v1304_v25 = vrot.slane %v1165_v10, %v115_v9 }
  0xec   :  { %773 = vst [vmem:[%s1457_s3 + $0x40] sm:$0xff] %v512_v26  ;;  %v514_v30 = vadd.f32 %v513_v29, %v1177_v15  ;;  %775 = vst [vmem:[%s1457_s3 + $0x50] sm:$0xff] %v585_v28  ;;  %v587_v32 = vadd.f32 %v586_v31, %v1180_v17  ;;  %v1311_v26 = vrot.slane %v1165_v10, %v111_v13 }
  0xed   :  { %v517_v33 = vpop.f32.mrf.mxu0  ;;  %v590_v35 = vpop.f32.mrf.mxu1  ;;  %v1318_v28 = vrot.slane %v1165_v10, %v119_v19 }
  0xee   :  { %774 = vst [vmem:[%s1457_s3 + $0x48] sm:$0xff] %v514_v30  ;;  %v518_v34 = vadd.f32 %v517_v33, %v1171_v3  ;;  %776 = vst [vmem:[%s1457_s3 + $0x58] sm:$0xff] %v587_v32  ;;  %v591_v36 = vadd.f32 %v590_v35, %v1174_v14 }
  0xef   :  { %v519_v37 = vpop.f32.mrf.mxu0  ;;  %v592_v39 = vpop.f32.mrf.mxu1 }
  0xf0   :  { %781 = vst [vmem:[%s1457_s3 + $0x80] sm:$0xff] %v518_v34  ;;  %v520_v38 = vadd.f32 %v519_v37, %v1177_v15  ;;  %783 = vst [vmem:[%s1457_s3 + $0x90] sm:$0xff] %v591_v36  ;;  %v593_v40 = vadd.f32 %v592_v39, %v1180_v17 }
  0xf1   :  { %v521_v41 = vpop.f32.mrf.mxu0  ;;  %v594_v43 = vpop.f32.mrf.mxu1 }
  0xf2   :  { %782 = vst [vmem:[%s1457_s3 + $0x88] sm:$0xff] %v520_v38  ;;  %v522_v42 = vadd.f32 %v521_v41, %v1171_v3  ;;  %784 = vst [vmem:[%s1457_s3 + $0x98] sm:$0xff] %v593_v40  ;;  %v595_v44 = vadd.f32 %v594_v43, %v1174_v14 }
  0xf3   :  { %v523_v45 = vpop.f32.mrf.mxu0  ;;  %v596_v47 = vpop.f32.mrf.mxu1 }
  0xf4   :  { %789 = vst [vmem:[%s1457_s3 + $0xc0] sm:$0xff] %v522_v42  ;;  %v524_v46 = vadd.f32 %v523_v45, %v1177_v15  ;;  %791 = vst [vmem:[%s1457_s3 + $0xd0] sm:$0xff] %v595_v44  ;;  %v597_v48 = vadd.f32 %v596_v47, %v1180_v17 }
  0xf5   :  { %v527_v49 = vpop.f32.mrf.mxu0  ;;  %v600_v51 = vpop.f32.mrf.mxu1 }
  0xf6   :  { %790 = vst [vmem:[%s1457_s3 + $0xc8] sm:$0xff] %v524_v46  ;;  %v528_v50 = vadd.f32 %v527_v49, %v1171_v3  ;;  %792 = vst [vmem:[%s1457_s3 + $0xd8] sm:$0xff] %v597_v48  ;;  %v601_v52 = vadd.f32 %v600_v51, %v1174_v14 }
  0xf7   :  { %v529_v53 = vpop.f32.mrf.mxu0  ;;  %v602_v55 = vpop.f32.mrf.mxu1 }
  0xf8   :  { %797 = vst [vmem:[%s1457_s3 + $0x100] sm:$0xff] %v528_v50  ;;  %v530_v54 = vadd.f32 %v529_v53, %v1177_v15  ;;  %799 = vst [vmem:[%s1457_s3 + $0x110] sm:$0xff] %v601_v52  ;;  %v603_v56 = vadd.f32 %v602_v55, %v1180_v17 }
  0xf9   :  { %v531_v57 = vpop.f32.mrf.mxu0  ;;  %v604_v59 = vpop.f32.mrf.mxu1 }
  0xfa   :  { %798 = vst [vmem:[%s1457_s3 + $0x108] sm:$0xff] %v530_v54  ;;  %v532_v58 = vadd.f32 %v531_v57, %v1171_v3  ;;  %800 = vst [vmem:[%s1457_s3 + $0x118] sm:$0xff] %v603_v56  ;;  %v605_v60 = vadd.f32 %v604_v59, %v1174_v14 }
  0xfb   :  { %v533_v61 = vpop.f32.mrf.mxu0  ;;  %v606_v63 = vpop.f32.mrf.mxu1 }
  0xfc   :  { %805 = vst [vmem:[%s1457_s3 + $0x140] sm:$0xff] %v532_v58  ;;  %v534_v62 = vadd.f32 %v533_v61, %v1177_v15  ;;  %807 = vst [vmem:[%s1457_s3 + $0x150] sm:$0xff] %v605_v60  ;;  %v607_v0 = vadd.f32 %v606_v63, %v1180_v17 }
  0xfd   :  { %v537_v1 = vpop.f32.mrf.mxu0  ;;  %v610_v4 = vpop.f32.mrf.mxu1 }
  0xfe   :  { %806 = vst [vmem:[%s1457_s3 + $0x148] sm:$0xff] %v534_v62  ;;  %v538_v2 = vadd.f32 %v537_v1, %v1171_v3  ;;  %808 = vst [vmem:[%s1457_s3 + $0x158] sm:$0xff] %v607_v0  ;;  %v611_v6 = vadd.f32 %v610_v4, %v1174_v14 }
  0xff   :  { %v539_v7 = vpop.f32.mrf.mxu0  ;;  %v612_v12 = vpop.f32.mrf.mxu1 }
 0x100   :  { %813 = vst [vmem:[%s1457_s3 + $0x180] sm:$0xff] %v538_v2  ;;  %v540_v11 = vadd.f32 %v539_v7, %v1177_v15  ;;  %815 = vst [vmem:[%s1457_s3 + $0x190] sm:$0xff] %v611_v6  ;;  %v613_v16 = vadd.f32 %v612_v12, %v1180_v17 }
 0x101   :  { %v541_v18 = vpop.f32.mrf.mxu0  ;;  %v614_v21 = vpop.f32.mrf.mxu1 }
 0x102   :  { %814 = vst [vmem:[%s1457_s3 + $0x188] sm:$0xff] %v540_v11  ;;  %v542_v20 = vadd.f32 %v541_v18, %v1171_v3  ;;  %816 = vst [vmem:[%s1457_s3 + $0x198] sm:$0xff] %v613_v16  ;;  %v615_v23 = vadd.f32 %v614_v21, %v1174_v14 }
 0x103   :  { %v543_v24 = vpop.f32.mrf.mxu0  ;;  %v616_v3 = vpop.f32.mrf.mxu1 }
 0x104   :  { %821 = vst [vmem:[%s1457_s3 + $0x1c0] sm:$0xff] %v542_v20  ;;  %v544_v8 = vadd.f32 %v543_v24, %v1177_v15  ;;  %823 = vst [vmem:[%s1457_s3 + $0x1d0] sm:$0xff] %v615_v23  ;;  %v617_v14 = vadd.f32 %v616_v3, %v1180_v17 }
 0x105   :  { %v653_v27 = vpop.f32.mrf.mxu0  ;;  %v726_v29 = vpop.f32.mrf.mxu1 }
 0x106   :  { %822 = vst [vmem:[%s1457_s3 + $0x1c8] sm:$0xff] %v544_v8  ;;  %v654_v15 = vadd.f32 %v653_v27, %v1297_v22  ;;  %824 = vst [vmem:[%s1457_s3 + $0x1d8] sm:$0xff] %v617_v14  ;;  %v727_v30 = vadd.f32 %v726_v29, %v1304_v25 }
 0x107   :  { %v655_v31 = vpop.f32.mrf.mxu0  ;;  %v728_v17 = vpop.f32.mrf.mxu1 }
 0x108   :  { %769 = vst [vmem:[%s1457_s3 + $0x20] sm:$0xff] %v654_v15  ;;  %v656_v10 = vadd.f32 %v655_v31, %v1311_v26  ;;  %771 = vst [vmem:[%s1457_s3 + $0x30] sm:$0xff] %v727_v30  ;;  %v729_v32 = vadd.f32 %v728_v17, %v1318_v28 }
 0x109   :  { %v657_v33 = vpop.f32.mrf.mxu0  ;;  %v730_v35 = vpop.f32.mrf.mxu1 }
 0x10a   :  { %770 = vst [vmem:[%s1457_s3 + $0x28] sm:$0xff] %v656_v10  ;;  %v658_v34 = vadd.f32 %v657_v33, %v1297_v22  ;;  %772 = vst [vmem:[%s1457_s3 + $0x38] sm:$0xff] %v729_v32  ;;  %v731_v36 = vadd.f32 %v730_v35, %v1304_v25 }
 0x10b   :  { %v659_v37 = vpop.f32.mrf.mxu0  ;;  %v732_v39 = vpop.f32.mrf.mxu1 }
 0x10c   :  { %777 = vst [vmem:[%s1457_s3 + $0x60] sm:$0xff] %v658_v34  ;;  %v660_v38 = vadd.f32 %v659_v37, %v1311_v26  ;;  %779 = vst [vmem:[%s1457_s3 + $0x70] sm:$0xff] %v731_v36  ;;  %v733_v40 = vadd.f32 %v732_v39, %v1318_v28 }
 0x10d   :  { %v663_v41 = vpop.f32.mrf.mxu0  ;;  %v736_v43 = vpop.f32.mrf.mxu1 }
 0x10e   :  { %778 = vst [vmem:[%s1457_s3 + $0x68] sm:$0xff] %v660_v38  ;;  %v664_v42 = vadd.f32 %v663_v41, %v1297_v22  ;;  %780 = vst [vmem:[%s1457_s3 + $0x78] sm:$0xff] %v733_v40  ;;  %v737_v44 = vadd.f32 %v736_v43, %v1304_v25 }
 0x10f   :  { %v665_v45 = vpop.f32.mrf.mxu0  ;;  %v738_v47 = vpop.f32.mrf.mxu1 }
 0x110   :  { %785 = vst [vmem:[%s1457_s3 + $0xa0] sm:$0xff] %v664_v42  ;;  %v666_v46 = vadd.f32 %v665_v45, %v1311_v26  ;;  %787 = vst [vmem:[%s1457_s3 + $0xb0] sm:$0xff] %v737_v44  ;;  %v739_v48 = vadd.f32 %v738_v47, %v1318_v28 }
 0x111   :  { %v667_v49 = vpop.f32.mrf.mxu0  ;;  %v740_v51 = vpop.f32.mrf.mxu1 }
 0x112   :  { %786 = vst [vmem:[%s1457_s3 + $0xa8] sm:$0xff] %v666_v46  ;;  %v668_v50 = vadd.f32 %v667_v49, %v1297_v22  ;;  %788 = vst [vmem:[%s1457_s3 + $0xb8] sm:$0xff] %v739_v48  ;;  %v741_v52 = vadd.f32 %v740_v51, %v1304_v25 }
 0x113   :  { %v669_v53 = vpop.f32.mrf.mxu0  ;;  %v742_v55 = vpop.f32.mrf.mxu1 }
 0x114   :  { %793 = vst [vmem:[%s1457_s3 + $0xe0] sm:$0xff] %v668_v50  ;;  %v670_v54 = vadd.f32 %v669_v53, %v1311_v26  ;;  %795 = vst [vmem:[%s1457_s3 + $0xf0] sm:$0xff] %v741_v52  ;;  %v743_v56 = vadd.f32 %v742_v55, %v1318_v28 }
 0x115   :  { %v673_v57 = vpop.f32.mrf.mxu0  ;;  %v746_v59 = vpop.f32.mrf.mxu1 }
 0x116   :  { %794 = vst [vmem:[%s1457_s3 + $0xe8] sm:$0xff] %v670_v54  ;;  %v674_v58 = vadd.f32 %v673_v57, %v1297_v22  ;;  %796 = vst [vmem:[%s1457_s3 + $0xf8] sm:$0xff] %v743_v56  ;;  %v747_v60 = vadd.f32 %v746_v59, %v1304_v25 }
 0x117   :  { %v675_v61 = vpop.f32.mrf.mxu0  ;;  %v748_v63 = vpop.f32.mrf.mxu1 }
 0x118   :  { %801 = vst [vmem:[%s1457_s3 + $0x120] sm:$0xff] %v674_v58  ;;  %v676_v62 = vadd.f32 %v675_v61, %v1311_v26  ;;  %803 = vst [vmem:[%s1457_s3 + $0x130] sm:$0xff] %v747_v60  ;;  %v749_v0 = vadd.f32 %v748_v63, %v1318_v28 }
 0x119   :  { %v677_v1 = vpop.f32.mrf.mxu0  ;;  %v750_v4 = vpop.f32.mrf.mxu1 }
 0x11a   :  { %802 = vst [vmem:[%s1457_s3 + $0x128] sm:$0xff] %v676_v62  ;;  %v678_v2 = vadd.f32 %v677_v1, %v1297_v22  ;;  %804 = vst [vmem:[%s1457_s3 + $0x138] sm:$0xff] %v749_v0  ;;  %v751_v5 = vadd.f32 %v750_v4, %v1304_v25 }
 0x11b   :  { %v679_v6 = vpop.f32.mrf.mxu0  ;;  %v752_v9 = vpop.f32.mrf.mxu1 }
 0x11c   :  { %809 = vst [vmem:[%s1457_s3 + $0x160] sm:$0xff] %v678_v2  ;;  %v680_v7 = vadd.f32 %v679_v6, %v1311_v26  ;;  %811 = vst [vmem:[%s1457_s3 + $0x170] sm:$0xff] %v751_v5  ;;  %v753_v11 = vadd.f32 %v752_v9, %v1318_v28 }
 0x11d   :  { %v683_v12 = vpop.f32.mrf.mxu0  ;;  %v756_v16 = vpop.f32.mrf.mxu1 }
 0x11e   :  { %810 = vst [vmem:[%s1457_s3 + $0x168] sm:$0xff] %v680_v7  ;;  %v684_v13 = vadd.f32 %v683_v12, %v1297_v22  ;;  %812 = vst [vmem:[%s1457_s3 + $0x178] sm:$0xff] %v753_v11  ;;  %v757_v18 = vadd.f32 %v756_v16, %v1304_v25 }
 0x11f   :  { %v685_v19 = vpop.f32.mrf.mxu0  ;;  %v758_v21 = vpop.f32.mrf.mxu1 }
 0x120   :  { %817 = vst [vmem:[%s1457_s3 + $0x1a0] sm:$0xff] %v684_v13  ;;  %v686_v20 = vadd.f32 %v685_v19, %v1311_v26  ;;  %819 = vst [vmem:[%s1457_s3 + $0x1b0] sm:$0xff] %v757_v18  ;;  %v759_v23 = vadd.f32 %v758_v21, %v1318_v28 }
 0x121   :  { %v687_v24 = vpop.f32.mrf.mxu0  ;;  %v760_v3 = vpop.f32.mrf.mxu1 }
 0x122   :  { %818 = vst [vmem:[%s1457_s3 + $0x1a8] sm:$0xff] %v686_v20  ;;  %v688_v8 = vadd.f32 %v687_v24, %v1297_v22  ;;  %820 = vst [vmem:[%s1457_s3 + $0x1b8] sm:$0xff] %v759_v23  ;;  %v761_v14 = vadd.f32 %v760_v3, %v1304_v25 }
 0x123   :  { %v689_v27 = vpop.f32.mrf.mxu0  ;;  %v762_v29 = vpop.f32.mrf.mxu1 }
 0x124   :  { %825 = vst [vmem:[%s1457_s3 + $0x1e0] sm:$0xff] %v688_v8  ;;  %v690_v15 = vadd.f32 %v689_v27, %v1311_v26  ;;  %827 = vst [vmem:[%s1457_s3 + $0x1f0] sm:$0xff] %v761_v14  ;;  %v763_v22 = vadd.f32 %v762_v29, %v1318_v28 }
 0x126   :  { %826 = vst [vmem:[%s1457_s3 + $0x1e8] sm:$0xff] %v690_v15  ;;  %828 = vst [vmem:[%s1457_s3 + $0x1f8] sm:$0xff] %v763_v22 }

// kernel: base_language_model_forward.5
= control target key start
LH: loop header
LB: loop body
LE: loop exit
PB: predicated region body
PF: predicated region fallthrough
CT: control target
= control target key end

     0   :  { %s2151_s1 = inlined_call_operand.vmem [shape: bf16[256,1024], index: 1, kind: input, shape index: {}]   ;;  %s2152_s0 = inlined_call_operand.vmem [shape: bf16[64,256], index: 0, kind: input, shape index: {}]   ;;  %s2153_s2 = inlined_call_operand.vmem [shape: f32[1,1024], index: 2, kind: input, shape index: {}]   ;;  %s2154_s3 = inlined_call_operand.vmem [shape: f32[64,1024], index: 3, kind: output, shape index: {}]  }
   0x1   :  { %v78_v0 = vld [vmem:[%s2151_s1 + $0x1c0] sm:$0xff]  ;;  %v79_v2 = vld [vmem:[%s2151_s1 + $0x1c8] sm:$0xff] }
   0x2   :  { %v82_v1 = vld [vmem:[%s2151_s1 + $0x1e0] sm:$0xff]  ;;  %v83_v4 = vld [vmem:[%s2151_s1 + $0x1e8] sm:$0xff] }
   0x3   :  { %v1297_v3 = vcombine.high %v78_v0, %v82_v1  ;;  %v1296_v5 = vcombine.low %v78_v0, %v82_v1  ;;  %v70_v6 = vld [vmem:[%s2151_s1 + $0x180] sm:$0xff]  ;;  %v1299_v8 = vcombine.high %v79_v2, %v83_v4  ;;  %v1298_v9 = vcombine.low %v79_v2, %v83_v4  ;;  %v71_v11 = vld [vmem:[%s2151_s1 + $0x188] sm:$0xff] }
   0x4   :  { %v74_v7 = vld [vmem:[%s2151_s1 + $0x1a0] sm:$0xff]  ;;  %v75_v12 = vld [vmem:[%s2151_s1 + $0x1a8] sm:$0xff] }
   0x5   :  { %v1289_v10 = vcombine.high %v70_v6, %v74_v7  ;;  %v62_v13 = vld [vmem:[%s2151_s1 + $0x140] sm:$0xff]  ;;  %872 = vmatprep.subr.bf16.mxu0 %v1297_v3  ;;  %v1291_v14 = vcombine.high %v71_v11, %v75_v12  ;;  %v63_v16 = vld [vmem:[%s2151_s1 + $0x148] sm:$0xff]  ;;  %945 = vmatprep.subr.bf16.mxu1 %v1299_v8  ;;  %v1288_v18 = vcombine.low %v70_v6, %v74_v7 }
   0x6   :  { %v66_v15 = vld [vmem:[%s2151_s1 + $0x160] sm:$0xff]  ;;  %v67_v17 = vld [vmem:[%s2151_s1 + $0x168] sm:$0xff]  ;;  %873 = vmatpush1.bf16.msra.mxu0 %v1296_v5  ;;  %946 = vmatpush1.bf16.msra.mxu1 %v1298_v9  ;;  %v1290_v19 = vcombine.low %v71_v11, %v75_v12 }
   0x7   :  { %874 = vmatprep.subr.bf16.mxu0 %v1289_v10  ;;  %v1281_v20 = vcombine.high %v62_v13, %v66_v15  ;;  %947 = vmatprep.subr.bf16.mxu1 %v1291_v14  ;;  %v1283_v21 = vcombine.high %v63_v16, %v67_v17  ;;  %v54_v22 = vld [vmem:[%s2151_s1 + $0x100] sm:$0xff]  ;;  %v55_v24 = vld [vmem:[%s2151_s1 + $0x108] sm:$0xff]  ;;  %v1280_v26 = vcombine.low %v62_v13, %v66_v15 }
   0x8   :  { %v58_v23 = vld [vmem:[%s2151_s1 + $0x120] sm:$0xff]  ;;  %v59_v25 = vld [vmem:[%s2151_s1 + $0x128] sm:$0xff]  ;;  %v1282_v27 = vcombine.low %v63_v16, %v67_v17 }
   0x9   :  { %v1273_v28 = vcombine.high %v54_v22, %v58_v23  ;;  %v1275_v29 = vcombine.high %v55_v24, %v59_v25  ;;  %v46_v30 = vld [vmem:[%s2151_s1 + $0xc0] sm:$0xff]  ;;  %v47_v32 = vld [vmem:[%s2151_s1 + $0xc8] sm:$0xff]  ;;  %v1272_v34 = vcombine.low %v54_v22, %v58_v23  ;;  %v1274_v35 = vcombine.low %v55_v24, %v59_v25 }
   0xa   :  { %875 = vmatpush1.bf16.msra.mxu0 %v1288_v18  ;;  %948 = vmatpush1.bf16.msra.mxu1 %v1290_v19  ;;  %v50_v31 = vld [vmem:[%s2151_s1 + $0xe0] sm:$0xff]  ;;  %v51_v33 = vld [vmem:[%s2151_s1 + $0xe8] sm:$0xff] }
   0xb   :  { %876 = vmatprep.subr.bf16.mxu0 %v1281_v20  ;;  %949 = vmatprep.subr.bf16.mxu1 %v1283_v21  ;;  %v1265_v36 = vcombine.high %v46_v30, %v50_v31  ;;  %v1267_v37 = vcombine.high %v47_v32, %v51_v33  ;;  %v38_v38 = vld [vmem:[%s2151_s1 + $0x80] sm:$0xff]  ;;  %v39_v40 = vld [vmem:[%s2151_s1 + $0x88] sm:$0xff]  ;;  %v1264_v42 = vcombine.low %v46_v30, %v50_v31 }
   0xc   :  { %v42_v39 = vld [vmem:[%s2151_s1 + $0xa0] sm:$0xff]  ;;  %v43_v41 = vld [vmem:[%s2151_s1 + $0xa8] sm:$0xff]  ;;  %v1266_v43 = vcombine.low %v47_v32, %v51_v33 }
   0xd   :  { %v1257_v44 = vcombine.high %v38_v38, %v42_v39  ;;  %v1259_v45 = vcombine.high %v39_v40, %v43_v41  ;;  %v30_v46 = vld [vmem:[%s2151_s1 + $0x40] sm:$0xff]  ;;  %v31_v48 = vld [vmem:[%s2151_s1 + $0x48] sm:$0xff]  ;;  %v1256_v50 = vcombine.low %v38_v38, %v42_v39  ;;  %v1258_v51 = vcombine.low %v39_v40, %v43_v41 }
   0xe   :  { %877 = vmatpush1.bf16.msra.mxu0 %v1280_v26  ;;  %950 = vmatpush1.bf16.msra.mxu1 %v1282_v27  ;;  %v34_v47 = vld [vmem:[%s2151_s1 + $0x60] sm:$0xff]  ;;  %v35_v49 = vld [vmem:[%s2151_s1 + $0x68] sm:$0xff] }
   0xf   :  { %878 = vmatprep.subr.bf16.mxu0 %v1273_v28  ;;  %951 = vmatprep.subr.bf16.mxu1 %v1275_v29  ;;  %v1249_v52 = vcombine.high %v30_v46, %v34_v47  ;;  %v1251_v53 = vcombine.high %v31_v48, %v35_v49  ;;  %v22_v54 = vld [vmem:[%s2151_s1] sm:$0xff]  ;;  %v23_v57 = vld [vmem:[%s2151_s1 + $0x8] sm:$0xff]  ;;  %v1248_v59 = vcombine.low %v30_v46, %v34_v47 }
  0x10   :  { %v26_v55 = vld [vmem:[%s2151_s1 + $0x20] sm:$0xff]  ;;  %v27_v58 = vld [vmem:[%s2151_s1 + $0x28] sm:$0xff]  ;;  %v1250_v60 = vcombine.low %v31_v48, %v35_v49 }
  0x11   :  { %v1493_v56 = vld [vmem:[%s2152_s0 + $0x4] ss:$8 sps:$4 sm:$0xff]   ;;  %v1241_v61 = vcombine.high %v22_v54, %v26_v55  ;;  %v1243_v62 = vcombine.high %v23_v57, %v27_v58  ;;  %v1240_v3 = vcombine.low %v22_v54, %v26_v55  ;;  %v1242_v4 = vcombine.low %v23_v57, %v27_v58 }
  0x12   :  { %879 = vmatpush1.bf16.msra.mxu0 %v1272_v34  ;;  %952 = vmatpush1.bf16.msra.mxu1 %v1274_v35  ;;  %v142_v63 = vld [vmem:[%s2151_s1 + $0x3c0] sm:$0xff]  ;;  %v143_v1 = vld [vmem:[%s2151_s1 + $0x3c8] sm:$0xff] }
  0x13   :  { %880 = vmatprep.subr.bf16.mxu0 %v1265_v36  ;;  %953 = vmatprep.subr.bf16.mxu1 %v1267_v37  ;;  %v146_v0 = vld [vmem:[%s2151_s1 + $0x3e0] sm:$0xff]  ;;  %v147_v2 = vld [vmem:[%s2151_s1 + $0x3e8] sm:$0xff] }
  0x14   :  { %904 = vmatprep.mubr.bf16.mxu0 %v1493_v56  ;;  %977 = vmatprep.mubr.bf16.mxu1 %v1493_v56  ;;  %v1361_v5 = vcombine.high %v142_v63, %v146_v0  ;;  %v1363_v6 = vcombine.high %v143_v1, %v147_v2  ;;  %v134_v7 = vld [vmem:[%s2151_s1 + $0x380] sm:$0xff]  ;;  %v135_v9 = vld [vmem:[%s2151_s1 + $0x388] sm:$0xff]  ;;  %v1360_v11 = vcombine.low %v142_v63, %v146_v0  ;;  %v80_v0 = vld [vmem:[%s2151_s1 + $0x1d0] sm:$0xff] }
  0x15   :  { %v138_v8 = vld [vmem:[%s2151_s1 + $0x3a0] sm:$0xff]  ;;  %v139_v10 = vld [vmem:[%s2151_s1 + $0x3a8] sm:$0xff]  ;;  %v1362_v12 = vcombine.low %v143_v1, %v147_v2  ;;  %v84_v1 = vld [vmem:[%s2151_s1 + $0x1f0] sm:$0xff] }
  0x16   :  { %881 = vmatpush1.bf16.msra.mxu0 %v1264_v42  ;;  %954 = vmatpush1.bf16.msra.mxu1 %v1266_v43  ;;  %v1353_v13 = vcombine.high %v134_v7, %v138_v8  ;;  %v1355_v14 = vcombine.high %v135_v9, %v139_v10  ;;  %v126_v15 = vld [vmem:[%s2151_s1 + $0x340] sm:$0xff]  ;;  %v127_v17 = vld [vmem:[%s2151_s1 + $0x348] sm:$0xff]  ;;  %v1352_v19 = vcombine.low %v134_v7, %v138_v8  ;;  %v81_v2 = vld [vmem:[%s2151_s1 + $0x1d8] sm:$0xff] }
  0x17   :  { %882 = vmatprep.subr.bf16.mxu0 %v1257_v44  ;;  %955 = vmatprep.subr.bf16.mxu1 %v1259_v45  ;;  %v130_v16 = vld [vmem:[%s2151_s1 + $0x360] sm:$0xff]  ;;  %v131_v18 = vld [vmem:[%s2151_s1 + $0x368] sm:$0xff]  ;;  %v1354_v20 = vcombine.low %v135_v9, %v139_v10  ;;  %v72_v8 = vld [vmem:[%s2151_s1 + $0x190] sm:$0xff] }
  0x18   :  { %v1345_v21 = vcombine.high %v126_v15, %v130_v16  ;;  %v1347_v22 = vcombine.high %v127_v17, %v131_v18  ;;  %v118_v23 = vld [vmem:[%s2151_s1 + $0x300] sm:$0xff]  ;;  %v119_v25 = vld [vmem:[%s2151_s1 + $0x308] sm:$0xff]  ;;  %v1344_v27 = vcombine.low %v126_v15, %v130_v16  ;;  %v1346_v28 = vcombine.low %v127_v17, %v131_v18  ;;  %v76_v9 = vld [vmem:[%s2151_s1 + $0x1b0] sm:$0xff] }
  0x19   :  { %v122_v24 = vld [vmem:[%s2151_s1 + $0x320] sm:$0xff]  ;;  %v123_v26 = vld [vmem:[%s2151_s1 + $0x328] sm:$0xff]  ;;  %v1293_v15 = vcombine.high %v72_v8, %v76_v9  ;;  %v64_v17 = vld [vmem:[%s2151_s1 + $0x150] sm:$0xff] }
  0x1a   :  { %883 = vmatpush1.bf16.msra.mxu0 %v1256_v50  ;;  %956 = vmatpush1.bf16.msra.mxu1 %v1258_v51  ;;  %v1337_v29 = vcombine.high %v118_v23, %v122_v24  ;;  %v1339_v30 = vcombine.high %v119_v25, %v123_v26  ;;  %v110_v31 = vld [vmem:[%s2151_s1 + $0x2c0] sm:$0xff]  ;;  %v111_v33 = vld [vmem:[%s2151_s1 + $0x2c8] sm:$0xff]  ;;  %v1336_v35 = vcombine.low %v118_v23, %v122_v24  ;;  %v68_v18 = vld [vmem:[%s2151_s1 + $0x170] sm:$0xff] }
  0x1b   :  { %884 = vmatprep.subr.bf16.mxu0 %v1249_v52  ;;  %957 = vmatprep.subr.bf16.mxu1 %v1251_v53  ;;  %v114_v32 = vld [vmem:[%s2151_s1 + $0x2e0] sm:$0xff]  ;;  %v115_v34 = vld [vmem:[%s2151_s1 + $0x2e8] sm:$0xff]  ;;  %v1338_v36 = vcombine.low %v119_v25, %v123_v26  ;;  %v1285_v24 = vcombine.high %v64_v17, %v68_v18  ;;  %v56_v26 = vld [vmem:[%s2151_s1 + $0x110] sm:$0xff] }
  0x1c   :  { %v1329_v37 = vcombine.high %v110_v31, %v114_v32  ;;  %v1331_v38 = vcombine.high %v111_v33, %v115_v34  ;;  %v102_v39 = vld [vmem:[%s2151_s1 + $0x280] sm:$0xff]  ;;  %v103_v41 = vld [vmem:[%s2151_s1 + $0x288] sm:$0xff]  ;;  %v1328_v43 = vcombine.low %v110_v31, %v114_v32  ;;  %v1330_v44 = vcombine.low %v111_v33, %v115_v34 }
  0x1d   :  { %v106_v40 = vld [vmem:[%s2151_s1 + $0x2a0] sm:$0xff]  ;;  %v107_v42 = vld [vmem:[%s2151_s1 + $0x2a8] sm:$0xff]  ;;  %v1284_v31 = vcombine.low %v64_v17, %v68_v18  ;;  %v136_v17 = vld [vmem:[%s2151_s1 + $0x390] sm:$0xff] }
  0x1e   :  { %885 = vmatpush1.bf16.msra.mxu0 %v1248_v59  ;;  %958 = vmatpush1.bf16.msra.mxu1 %v1250_v60  ;;  %v1321_v45 = vcombine.high %v102_v39, %v106_v40  ;;  %v1323_v46 = vcombine.high %v103_v41, %v107_v42  ;;  %v94_v47 = vld [vmem:[%s2151_s1 + $0x240] sm:$0xff]  ;;  %v95_v49 = vld [vmem:[%s2151_s1 + $0x248] sm:$0xff]  ;;  %v1320_v51 = vcombine.low %v102_v39, %v106_v40  ;;  %v53_v39 = vld [vmem:[%s2151_s1 + $0xf8] sm:$0xff] }
  0x1f   :  { %886 = vmatprep.subr.bf16.mxu0 %v1241_v61  ;;  %959 = vmatprep.subr.bf16.mxu1 %v1243_v62  ;;  %v98_v48 = vld [vmem:[%s2151_s1 + $0x260] sm:$0xff]  ;;  %v99_v50 = vld [vmem:[%s2151_s1 + $0x268] sm:$0xff]  ;;  %v1322_v52 = vcombine.low %v103_v41, %v107_v42  ;;  %v140_v18 = vld [vmem:[%s2151_s1 + $0x3b0] sm:$0xff] }
  0x20   :  { %v1313_v53 = vcombine.high %v94_v47, %v98_v48  ;;  %v1315_v54 = vcombine.high %v95_v49, %v99_v50  ;;  %v86_v55 = vld [vmem:[%s2151_s1 + $0x200] sm:$0xff]  ;;  %v87_v58 = vld [vmem:[%s2151_s1 + $0x208] sm:$0xff]  ;;  %v1312_v60 = vcombine.low %v94_v47, %v98_v48  ;;  %v1314_v61 = vcombine.low %v95_v49, %v99_v50  ;;  %v45_v47 = vld [vmem:[%s2151_s1 + $0xb8] sm:$0xff] }
  0x21   :  { %v90_v57 = vld [vmem:[%s2151_s1 + $0x220] sm:$0xff]  ;;  %v91_v59 = vld [vmem:[%s2151_s1 + $0x228] sm:$0xff] }
  0x22   :  { %887 = vmatpush1.bf16.msra.mxu0 %v1240_v3  ;;  %960 = vmatpush1.bf16.msra.mxu1 %v1242_v4  ;;  %v1305_v62 = vcombine.high %v86_v55, %v90_v57  ;;  %v1307_v63 = vcombine.high %v87_v58, %v91_v59  ;;  %v85_v3 = vld [vmem:[%s2151_s1 + $0x1f8] sm:$0xff]  ;;  %v1304_v4 = vcombine.low %v86_v55, %v90_v57  ;;  %v1620_v10 = vld [vmem:[%s2152_s0] ss:$8 sps:$4 sm:$0xff]  }
  0x23   :  { %888 = vmatprep.subr.bf16.mxu0 %v1361_v5  ;;  %961 = vmatprep.subr.bf16.mxu1 %v1363_v6  ;;  %v1306_v5 = vcombine.low %v87_v58, %v91_v59  ;;  %v1301_v6 = vcombine.high %v80_v0, %v84_v1  ;;  %v1303_v7 = vcombine.high %v81_v2, %v85_v3  ;;  %v1702_v48 = vld [vmem:[%s2152_s0 + $0x20] ss:$8 sps:$4 sm:$0xff]   ;;  %v1713_v55 = vld [vmem:[%s2152_s0 + $0x34] ss:$8 sps:$4 sm:$0xff]  }
  0x24   :  { %v33_v57 = vld [vmem:[%s2151_s1 + $0x58] sm:$0xff] }
  0x25   :  { %v37_v58 = vld [vmem:[%s2151_s1 + $0x78] sm:$0xff] }
  0x26   :  { %889 = vmatpush2.bf16.msra.mxu0 %v1360_v11  ;;  %962 = vmatpush2.bf16.msra.mxu1 %v1362_v12  ;;  %v73_v11 = vld [vmem:[%s2151_s1 + $0x198] sm:$0xff] }
  0x27   :  { %890 = vmatprep.subr.bf16.mxu0 %v1353_v13  ;;  %963 = vmatprep.subr.bf16.mxu1 %v1355_v14  ;;  %v77_v12 = vld [vmem:[%s2151_s1 + $0x1b8] sm:$0xff]  ;;  %v1300_v13 = vcombine.low %v80_v0, %v84_v1  ;;  %v1302_v14 = vcombine.low %v81_v2, %v85_v3  ;;  %v28_v0 = vld [vmem:[%s2151_s1 + $0x30] sm:$0xff] }
  0x28   :  { %v1295_v16 = vcombine.high %v73_v11, %v77_v12  ;;  %v1294_v23 = vcombine.low %v73_v11, %v77_v12  ;;  %v25_v1 = vld [vmem:[%s2151_s1 + $0x18] sm:$0xff] }
  0x29   :  { %v29_v2 = vld [vmem:[%s2151_s1 + $0x38] sm:$0xff] }
  0x2a   :  { %891 = vmatpush2.bf16.msra.mxu0 %v1352_v19  ;;  %964 = vmatpush2.bf16.msra.mxu1 %v1354_v20  ;;  %v1637_v19 = vld [vmem:[%s2152_s0 + $0x14] ss:$8 sps:$4 sm:$0xff]   ;;  %v1740_v3 = vld [vmem:[%s2152_s0 + $0x30] ss:$8 sps:$4 sm:$0xff]  }
  0x2b   :  { %892 = vmatprep.subr.bf16.mxu0 %v1345_v21  ;;  %965 = vmatprep.subr.bf16.mxu1 %v1347_v22  ;;  %v65_v20 = vld [vmem:[%s2151_s1 + $0x158] sm:$0xff]  ;;  %v1292_v22 = vcombine.low %v72_v8, %v76_v9  ;;  %v144_v8 = vld [vmem:[%s2151_s1 + $0x3d0] sm:$0xff] }
  0x2c   :  { %v69_v21 = vld [vmem:[%s2151_s1 + $0x178] sm:$0xff]  ;;  %v148_v9 = vld [vmem:[%s2151_s1 + $0x3f0] sm:$0xff] }
  0x2d   :  { %v1287_v25 = vcombine.high %v65_v20, %v69_v21  ;;  %v1286_v32 = vcombine.low %v65_v20, %v69_v21  ;;  %v145_v11 = vld [vmem:[%s2151_s1 + $0x3d8] sm:$0xff] }
  0x2e   :  { %893 = vmatpush2.bf16.msra.mxu0 %v1344_v27  ;;  %966 = vmatpush2.bf16.msra.mxu1 %v1346_v28  ;;  %v60_v27 = vld [vmem:[%s2151_s1 + $0x130] sm:$0xff]  ;;  %v57_v28 = vld [vmem:[%s2151_s1 + $0x118] sm:$0xff] }
  0x2f   :  { %894 = vmatprep.subr.bf16.mxu0 %v1337_v29  ;;  %967 = vmatprep.subr.bf16.mxu1 %v1339_v30  ;;  %v61_v29 = vld [vmem:[%s2151_s1 + $0x138] sm:$0xff]  ;;  %v1277_v33 = vcombine.high %v56_v26, %v60_v27  ;;  %v1276_v40 = vcombine.low %v56_v26, %v60_v27  ;;  %v128_v26 = vld [vmem:[%s2151_s1 + $0x350] sm:$0xff] }
  0x30   :  { %v1664_v30 = vld [vmem:[%s2152_s0 + $0x10] ss:$8 sps:$4 sm:$0xff]   ;;  %v1279_v34 = vcombine.high %v57_v28, %v61_v29  ;;  %v1278_v41 = vcombine.low %v57_v28, %v61_v29  ;;  %v1356_v29 = vcombine.low %v136_v17, %v140_v18 }
  0x31   :  { %v149_v12 = vld [vmem:[%s2151_s1 + $0x3f8] sm:$0xff]  ;;  %v132_v27 = vld [vmem:[%s2151_s1 + $0x370] sm:$0xff] }
  0x32   :  { %895 = vmatpush2.bf16.msra.mxu0 %v1336_v35  ;;  %968 = vmatpush2.bf16.msra.mxu1 %v1338_v36  ;;  %v48_v35 = vld [vmem:[%s2151_s1 + $0xd0] sm:$0xff]  ;;  %v137_v20 = vld [vmem:[%s2151_s1 + $0x398] sm:$0xff] }
  0x33   :  { %896 = vmatprep.subr.bf16.mxu0 %v1329_v37  ;;  %969 = vmatprep.subr.bf16.mxu1 %v1331_v38  ;;  %v52_v36 = vld [vmem:[%s2151_s1 + $0xf0] sm:$0xff]  ;;  %v1675_v37 = vld [vmem:[%s2152_s0 + $0x24] ss:$8 sps:$4 sm:$0xff]   ;;  %v49_v38 = vld [vmem:[%s2151_s1 + $0xd8] sm:$0xff] }
  0x34   :  { %v1269_v42 = vcombine.high %v48_v35, %v52_v36  ;;  %v1268_v49 = vcombine.low %v48_v35, %v52_v36  ;;  %v1270_v50 = vcombine.low %v49_v38, %v53_v39  ;;  %v141_v21 = vld [vmem:[%s2151_s1 + $0x3b8] sm:$0xff]  ;;  %v124_v35 = vld [vmem:[%s2151_s1 + $0x330] sm:$0xff] }
  0x35   :  { %v133_v28 = vld [vmem:[%s2151_s1 + $0x378] sm:$0xff] }
  0x36   :  { %897 = vmatpush2.bf16.msra.mxu0 %v1328_v43  ;;  %970 = vmatpush2.bf16.msra.mxu1 %v1330_v44  ;;  %v1271_v43 = vcombine.high %v49_v38, %v53_v39  ;;  %v40_v44 = vld [vmem:[%s2151_s1 + $0x90] sm:$0xff]  ;;  %v121_v36 = vld [vmem:[%s2151_s1 + $0x318] sm:$0xff]  ;;  %v1348_v39 = vcombine.low %v128_v26, %v132_v27 }
  0x37   :  { %898 = vmatprep.subr.bf16.mxu0 %v1321_v45  ;;  %971 = vmatprep.subr.bf16.mxu1 %v1323_v46  ;;  %v44_v45 = vld [vmem:[%s2151_s1 + $0xb0] sm:$0xff]  ;;  %v41_v46 = vld [vmem:[%s2151_s1 + $0x98] sm:$0xff] }
  0x38   :  { %v1260_v59 = vcombine.low %v40_v44, %v44_v45  ;;  %v125_v38 = vld [vmem:[%s2151_s1 + $0x338] sm:$0xff] }
  0x3a   :  { %899 = vmatpush2.bf16.msra.mxu0 %v1320_v51  ;;  %972 = vmatpush2.bf16.msra.mxu1 %v1322_v52  ;;  %v1261_v51 = vcombine.high %v40_v44, %v44_v45  ;;  %v1263_v52 = vcombine.high %v41_v46, %v45_v47  ;;  %v116_v44 = vld [vmem:[%s2151_s1 + $0x2f0] sm:$0xff]  ;;  %v113_v45 = vld [vmem:[%s2151_s1 + $0x2d8] sm:$0xff] }
  0x3b   :  { %900 = vmatprep.subr.bf16.mxu0 %v1313_v53  ;;  %973 = vmatprep.subr.bf16.mxu1 %v1315_v54  ;;  %v32_v53 = vld [vmem:[%s2151_s1 + $0x50] sm:$0xff] }
  0x3c   :  { %v36_v54 = vld [vmem:[%s2151_s1 + $0x70] sm:$0xff] }
  0x3e   :  { %901 = vmatpush2.bf16.msra.mxu0 %v1312_v60  ;;  %974 = vmatpush2.bf16.msra.mxu1 %v1314_v61  ;;  %v1262_v60 = vcombine.low %v41_v46, %v45_v47  ;;  %v1253_v61 = vcombine.high %v32_v53, %v36_v54  ;;  %v117_v46 = vld [vmem:[%s2151_s1 + $0x2f8] sm:$0xff] }
  0x3f   :  { %902 = vmatprep.subr.bf16.mxu0 %v1305_v62  ;;  %975 = vmatprep.subr.bf16.mxu1 %v1307_v63  ;;  %v1255_v62 = vcombine.high %v33_v57, %v37_v58  ;;  %v24_v63 = vld [vmem:[%s2151_s1 + $0x10] sm:$0xff] }
  0x42   :  { %903 = vmatpush2.bf16.msra.mxu0 %v1304_v4  ;;  %976 = vmatpush2.bf16.msra.mxu1 %v1306_v5  ;;  %v1252_v4 = vcombine.low %v32_v53, %v36_v54  ;;  %v1254_v5 = vcombine.low %v33_v57, %v37_v58  ;;  %v108_v53 = vld [vmem:[%s2151_s1 + $0x2b0] sm:$0xff]  ;;  %v105_v54 = vld [vmem:[%s2151_s1 + $0x298] sm:$0xff] }
  0x43   :  { %1018 = vmatprep.subr.bf16.mxu0 %v1301_v6  ;;  %1091 = vmatprep.subr.bf16.mxu1 %v1303_v7  ;;  %v1245_v6 = vcombine.high %v24_v63, %v28_v0  ;;  %v1247_v7 = vcombine.high %v25_v1, %v29_v2  ;;  %v109_v57 = vld [vmem:[%s2151_s1 + $0x2b8] sm:$0xff] }
  0x45   :  { %905 = vmatmul.mubr.bf16.vlgmr.msra.gmra.mxu0 %v1620_v10  ;;  %978 = vmatmul.mubr.bf16.vlgmr.msra.gmra.mxu1 %v1620_v10 }
  0x46   :  { %1019 = vmatpush1.bf16.msra.mxu0 %v1300_v13  ;;  %1092 = vmatpush1.bf16.msra.mxu1 %v1302_v14  ;;  %v1244_v13 = vcombine.low %v24_v63, %v28_v0  ;;  %v1246_v14 = vcombine.low %v25_v1, %v29_v2  ;;  %v100_v63 = vld [vmem:[%s2151_s1 + $0x270] sm:$0xff]  ;;  %v97_v0 = vld [vmem:[%s2151_s1 + $0x258] sm:$0xff] }
  0x47   :  { %1020 = vmatprep.subr.bf16.mxu0 %v1293_v15  ;;  %1093 = vmatprep.subr.bf16.mxu1 %v1295_v16  ;;  %v1365_v15 = vcombine.high %v144_v8, %v148_v9  ;;  %v1367_v16 = vcombine.high %v145_v11, %v149_v12  ;;  %v101_v1 = vld [vmem:[%s2151_s1 + $0x278] sm:$0xff] }
  0x48   :  { %914 = vmatprep.mubr.bf16.mxu0 %v1637_v19  ;;  %987 = vmatprep.mubr.bf16.mxu1 %v1637_v19 }
  0x4a   :  { %1021 = vmatpush1.bf16.msra.mxu0 %v1292_v22  ;;  %1094 = vmatpush1.bf16.msra.mxu1 %v1294_v23  ;;  %v1364_v22 = vcombine.low %v144_v8, %v148_v9  ;;  %v1366_v23 = vcombine.low %v145_v11, %v149_v12  ;;  %v92_v8 = vld [vmem:[%s2151_s1 + $0x230] sm:$0xff]  ;;  %v89_v9 = vld [vmem:[%s2151_s1 + $0x218] sm:$0xff] }
  0x4b   :  { %1022 = vmatprep.subr.bf16.mxu0 %v1285_v24  ;;  %1095 = vmatprep.subr.bf16.mxu1 %v1287_v25  ;;  %v1357_v24 = vcombine.high %v136_v17, %v140_v18  ;;  %v1359_v25 = vcombine.high %v137_v20, %v141_v21  ;;  %v93_v11 = vld [vmem:[%s2151_s1 + $0x238] sm:$0xff] }
  0x4c   :  { %v1310_v17 = vcombine.low %v89_v9, %v93_v11 }
  0x4d   :  { %915 = vmatmul.mubr.bf16.gmra.mxu0 %v1664_v30  ;;  %988 = vmatmul.mubr.bf16.gmra.mxu1 %v1664_v30 }
  0x4e   :  { %1023 = vmatpush1.bf16.msra.mxu0 %v1284_v31  ;;  %1096 = vmatpush1.bf16.msra.mxu1 %v1286_v32  ;;  %v1358_v31 = vcombine.low %v137_v20, %v141_v21  ;;  %v1349_v32 = vcombine.high %v128_v26, %v132_v27 }
  0x4f   :  { %1024 = vmatprep.subr.bf16.mxu0 %v1277_v33  ;;  %1097 = vmatprep.subr.bf16.mxu1 %v1279_v34  ;;  %v120_v34 = vld [vmem:[%s2151_s1 + $0x310] sm:$0xff] }
  0x50   :  { %924 = vmatprep.mubr.bf16.mxu0 %v1675_v37  ;;  %997 = vmatprep.mubr.bf16.mxu1 %v1675_v37  ;;  %v1340_v47 = vcombine.low %v120_v34, %v124_v35 }
  0x52   :  { %1025 = vmatpush1.bf16.msra.mxu0 %v1276_v40  ;;  %1098 = vmatpush1.bf16.msra.mxu1 %v1278_v41  ;;  %v1341_v41 = vcombine.high %v120_v34, %v124_v35 }
  0x53   :  { %1026 = vmatprep.subr.bf16.mxu0 %v1269_v42  ;;  %1099 = vmatprep.subr.bf16.mxu1 %v1271_v43  ;;  %v1343_v42 = vcombine.high %v121_v36, %v125_v38  ;;  %v112_v43 = vld [vmem:[%s2151_s1 + $0x2d0] sm:$0xff] }
  0x54   :  { %v1332_v58 = vcombine.low %v112_v43, %v116_v44 }
  0x55   :  { %925 = vmatmul.mubr.bf16.gmra.mxu0 %v1702_v48  ;;  %998 = vmatmul.mubr.bf16.gmra.mxu1 %v1702_v48 }
  0x56   :  { %1027 = vmatpush1.bf16.msra.mxu0 %v1268_v49  ;;  %1100 = vmatpush1.bf16.msra.mxu1 %v1270_v50  ;;  %v1342_v49 = vcombine.low %v121_v36, %v125_v38  ;;  %v1333_v50 = vcombine.high %v112_v43, %v116_v44 }
  0x57   :  { %1028 = vmatprep.subr.bf16.mxu0 %v1261_v51  ;;  %1101 = vmatprep.subr.bf16.mxu1 %v1263_v52  ;;  %v1335_v51 = vcombine.high %v113_v45, %v117_v46  ;;  %v104_v52 = vld [vmem:[%s2151_s1 + $0x290] sm:$0xff] }
  0x58   :  { %934 = vmatprep.mubr.bf16.mxu0 %v1713_v55  ;;  %1007 = vmatprep.mubr.bf16.mxu1 %v1713_v55  ;;  %v1324_v2 = vcombine.low %v104_v52, %v108_v53 }
  0x5a   :  { %1029 = vmatpush1.bf16.msra.mxu0 %v1260_v59  ;;  %1102 = vmatpush1.bf16.msra.mxu1 %v1262_v60  ;;  %v1334_v59 = vcombine.low %v113_v45, %v117_v46  ;;  %v1325_v60 = vcombine.high %v104_v52, %v108_v53 }
  0x5b   :  { %1030 = vmatprep.subr.bf16.mxu0 %v1253_v61  ;;  %1103 = vmatprep.subr.bf16.mxu1 %v1255_v62  ;;  %v1327_v61 = vcombine.high %v105_v54, %v109_v57  ;;  %v96_v62 = vld [vmem:[%s2151_s1 + $0x250] sm:$0xff] }
  0x5c   :  { %v1316_v12 = vcombine.low %v96_v62, %v100_v63 }
  0x5d   :  { %935 = vmatmul.mubr.bf16.gmra.mxu0 %v1740_v3  ;;  %1008 = vmatmul.mubr.bf16.gmra.mxu1 %v1740_v3 }
  0x5e   :  { %1031 = vmatpush1.bf16.msra.mxu0 %v1252_v4  ;;  %1104 = vmatpush1.bf16.msra.mxu1 %v1254_v5  ;;  %v1326_v4 = vcombine.low %v105_v54, %v109_v57  ;;  %v1317_v5 = vcombine.high %v96_v62, %v100_v63 }
  0x5f   :  { %1032 = vmatprep.subr.bf16.mxu0 %v1245_v6  ;;  %1105 = vmatprep.subr.bf16.mxu1 %v1247_v7  ;;  %v1319_v6 = vcombine.high %v97_v0, %v101_v1  ;;  %v88_v7 = vld [vmem:[%s2151_s1 + $0x210] sm:$0xff] }
  0x60   :  { %1050 = vmatprep.mubr.bf16.mxu0 %v1493_v56  ;;  %1123 = vmatprep.mubr.bf16.mxu1 %v1493_v56  ;;  %v129_v56 = vld [vmem:[%s2151_s1 + $0x358] sm:$0xff] }
  0x61   :  { %v1351_v33 = vcombine.high %v129_v56, %v133_v28  ;;  %v1350_v40 = vcombine.low %v129_v56, %v133_v28 }
  0x62   :  { %1033 = vmatpush1.bf16.msra.mxu0 %v1244_v13  ;;  %1106 = vmatpush1.bf16.msra.mxu1 %v1246_v14  ;;  %v1318_v13 = vcombine.low %v97_v0, %v101_v1  ;;  %v1309_v14 = vcombine.high %v88_v7, %v92_v8 }
  0x63   :  { %1034 = vmatprep.subr.bf16.mxu0 %v1365_v15  ;;  %1107 = vmatprep.subr.bf16.mxu1 %v1367_v16  ;;  %v1311_v15 = vcombine.high %v89_v9, %v93_v11  ;;  %v1308_v16 = vcombine.low %v88_v7, %v92_v8 }
  0x66   :  { %1035 = vmatpush2.bf16.msra.mxu0 %v1364_v22  ;;  %1108 = vmatpush2.bf16.msra.mxu1 %v1366_v23 }
  0x67   :  { %1036 = vmatprep.subr.bf16.mxu0 %v1357_v24  ;;  %1109 = vmatprep.subr.bf16.mxu1 %v1359_v25 }
  0x6a   :  { %1037 = vmatpush2.bf16.msra.mxu0 %v1356_v29  ;;  %1110 = vmatpush2.bf16.msra.mxu1 %v1358_v31 }
  0x6b   :  { %1038 = vmatprep.subr.bf16.mxu0 %v1349_v32  ;;  %1111 = vmatprep.subr.bf16.mxu1 %v1351_v33 }
  0x6e   :  { %1039 = vmatpush2.bf16.msra.mxu0 %v1348_v39  ;;  %1112 = vmatpush2.bf16.msra.mxu1 %v1350_v40 }
  0x6f   :  { %1040 = vmatprep.subr.bf16.mxu0 %v1341_v41  ;;  %1113 = vmatprep.subr.bf16.mxu1 %v1343_v42 }
  0x72   :  { %1041 = vmatpush2.bf16.msra.mxu0 %v1340_v47  ;;  %1114 = vmatpush2.bf16.msra.mxu1 %v1342_v49 }
  0x73   :  { %1042 = vmatprep.subr.bf16.mxu0 %v1333_v50  ;;  %1115 = vmatprep.subr.bf16.mxu1 %v1335_v51 }
  0x76   :  { %1043 = vmatpush2.bf16.msra.mxu0 %v1332_v58  ;;  %1116 = vmatpush2.bf16.msra.mxu1 %v1334_v59 }
  0x77   :  { %1044 = vmatprep.subr.bf16.mxu0 %v1325_v60  ;;  %1117 = vmatprep.subr.bf16.mxu1 %v1327_v61 }
  0x7a   :  { %1045 = vmatpush2.bf16.msra.mxu0 %v1324_v2  ;;  %1118 = vmatpush2.bf16.msra.mxu1 %v1326_v4 }
  0x7b   :  { %1046 = vmatprep.subr.bf16.mxu0 %v1317_v5  ;;  %1119 = vmatprep.subr.bf16.mxu1 %v1319_v6 }
  0x7e   :  { %1047 = vmatpush2.bf16.msra.mxu0 %v1316_v12  ;;  %1120 = vmatpush2.bf16.msra.mxu1 %v1318_v13 }
  0x7f   :  { %1048 = vmatprep.subr.bf16.mxu0 %v1309_v14  ;;  %1121 = vmatprep.subr.bf16.mxu1 %v1311_v15 }
  0x82   :  { %1049 = vmatpush2.bf16.msra.mxu0 %v1308_v16  ;;  %1122 = vmatpush2.bf16.msra.mxu1 %v1310_v17 }
  0x85   :  { %1051 = vmatmul.mubr.bf16.vlgmr.msra.gmra.mxu0 %v1620_v10  ;;  %1124 = vmatmul.mubr.bf16.vlgmr.msra.gmra.mxu1 %v1620_v10  ;;  %v152_v10 = vlaneseq }
  0x86   :  { %1060 = vmatprep.mubr.bf16.mxu0 %v1637_v19  ;;  %1133 = vmatprep.mubr.bf16.mxu1 %v1637_v19 }
  0x87   :  { %v1856_v19 = vshrl.u32 %v152_v10, 7 }
  0x89   :  { %v158_v18 = vsub.s32 1, %v1856_v19 }
  0x8d   :  { %1061 = vmatmul.mubr.bf16.gmra.mxu0 %v1664_v30  ;;  %1134 = vmatmul.mubr.bf16.gmra.mxu1 %v1664_v30  ;;  %v154_v30 = vsub.s32 0, %v1856_v19 }
  0x8e   :  { %1070 = vmatprep.mubr.bf16.mxu0 %v1675_v37  ;;  %1143 = vmatprep.mubr.bf16.mxu1 %v1675_v37  ;;  %v1862_v37 = vld [vmem:[%s2153_s2] sm:$0xff] }
  0x8f   :  { %v1868_v20 = vrot.slane %v1862_v37, %v154_v30  ;;  %v1874_v21 = vrot.slane %v1862_v37, %v158_v18 }
  0x95   :  { %1071 = vmatmul.mubr.bf16.gmra.mxu0 %v1702_v48  ;;  %1144 = vmatmul.mubr.bf16.gmra.mxu1 %v1702_v48  ;;  %v162_v48 = vsub.s32 2, %v1856_v19 }
  0x96   :  { %1080 = vmatprep.mubr.bf16.mxu0 %v1713_v55  ;;  %1153 = vmatprep.mubr.bf16.mxu1 %v1713_v55  ;;  %v166_v55 = vsub.s32 3, %v1856_v19 }
  0x98   :  { %v1877_v23 = vrot.slane %v1862_v37, %v166_v55 }
  0x9d   :  { %1081 = vmatmul.mubr.bf16.gmra.mxu0 %v1740_v3  ;;  %1154 = vmatmul.mubr.bf16.gmra.mxu1 %v1740_v3  ;;  %v1871_v3 = vrot.slane %v1862_v37, %v162_v48 }
 0x105   :  { %v906_v22 = vpop.f32.mrf.mxu0  ;;  %v979_v25 = vpop.f32.mrf.mxu1 }
 0x106   :  { %v907_v24 = vadd.f32 %v906_v22, %v1868_v20  ;;  %v980_v26 = vadd.f32 %v979_v25, %v1871_v3 }
 0x107   :  { %v908_v27 = vpop.f32.mrf.mxu0  ;;  %v981_v28 = vpop.f32.mrf.mxu1 }
 0x108   :  { %1164 = vst [vmem:[%s2154_s3] sm:$0xff] %v907_v24  ;;  %v909_v56 = vadd.f32 %v908_v27, %v1874_v21  ;;  %1166 = vst [vmem:[%s2154_s3 + $0x10] sm:$0xff] %v980_v26  ;;  %v982_v29 = vadd.f32 %v981_v28, %v1877_v23  ;;  %v182_v28 = vsub.s32 7, %v1856_v19 }
 0x109   :  { %v910_v31 = vpop.f32.mrf.mxu0  ;;  %v983_v33 = vpop.f32.mrf.mxu1 }
 0x10a   :  { %1165 = vst [vmem:[%s2154_s3 + $0x8] sm:$0xff] %v909_v56  ;;  %v911_v32 = vadd.f32 %v910_v31, %v1868_v20  ;;  %1167 = vst [vmem:[%s2154_s3 + $0x18] sm:$0xff] %v982_v29  ;;  %v984_v34 = vadd.f32 %v983_v33, %v1871_v3  ;;  %v178_v56 = vsub.s32 6, %v1856_v19  ;;  %v2021_v33 = vrot.slane %v1862_v37, %v182_v28 }
 0x10b   :  { %v912_v35 = vpop.f32.mrf.mxu0  ;;  %v985_v38 = vpop.f32.mrf.mxu1 }
 0x10c   :  { %1172 = vst [vmem:[%s2154_s3 + $0x40] sm:$0xff] %v911_v32  ;;  %v913_v36 = vadd.f32 %v912_v35, %v1874_v21  ;;  %1174 = vst [vmem:[%s2154_s3 + $0x50] sm:$0xff] %v984_v34  ;;  %v986_v39 = vadd.f32 %v985_v38, %v1877_v23 }
 0x10d   :  { %v916_v40 = vpop.f32.mrf.mxu0  ;;  %v989_v42 = vpop.f32.mrf.mxu1 }
 0x10e   :  { %1173 = vst [vmem:[%s2154_s3 + $0x48] sm:$0xff] %v913_v36  ;;  %v917_v41 = vadd.f32 %v916_v40, %v1868_v20  ;;  %1175 = vst [vmem:[%s2154_s3 + $0x58] sm:$0xff] %v986_v39  ;;  %v990_v43 = vadd.f32 %v989_v42, %v1871_v3 }
 0x10f   :  { %v918_v44 = vpop.f32.mrf.mxu0  ;;  %v991_v46 = vpop.f32.mrf.mxu1 }
 0x110   :  { %1180 = vst [vmem:[%s2154_s3 + $0x80] sm:$0xff] %v917_v41  ;;  %v919_v45 = vadd.f32 %v918_v44, %v1874_v21  ;;  %1182 = vst [vmem:[%s2154_s3 + $0x90] sm:$0xff] %v990_v43  ;;  %v992_v47 = vadd.f32 %v991_v46, %v1877_v23 }
 0x111   :  { %v920_v49 = vpop.f32.mrf.mxu0  ;;  %v993_v51 = vpop.f32.mrf.mxu1 }
 0x112   :  { %1181 = vst [vmem:[%s2154_s3 + $0x88] sm:$0xff] %v919_v45  ;;  %v921_v50 = vadd.f32 %v920_v49, %v1868_v20  ;;  %1183 = vst [vmem:[%s2154_s3 + $0x98] sm:$0xff] %v992_v47  ;;  %v994_v52 = vadd.f32 %v993_v51, %v1871_v3 }
 0x113   :  { %v922_v53 = vpop.f32.mrf.mxu0  ;;  %v995_v57 = vpop.f32.mrf.mxu1 }
 0x114   :  { %1188 = vst [vmem:[%s2154_s3 + $0xc0] sm:$0xff] %v921_v50  ;;  %v923_v54 = vadd.f32 %v922_v53, %v1874_v21  ;;  %1190 = vst [vmem:[%s2154_s3 + $0xd0] sm:$0xff] %v994_v52  ;;  %v996_v58 = vadd.f32 %v995_v57, %v1877_v23 }
 0x115   :  { %v926_v59 = vpop.f32.mrf.mxu0  ;;  %v999_v61 = vpop.f32.mrf.mxu1 }
 0x116   :  { %1189 = vst [vmem:[%s2154_s3 + $0xc8] sm:$0xff] %v923_v54  ;;  %v927_v60 = vadd.f32 %v926_v59, %v1868_v20  ;;  %1191 = vst [vmem:[%s2154_s3 + $0xd8] sm:$0xff] %v996_v58  ;;  %v1000_v62 = vadd.f32 %v999_v61, %v1871_v3 }
 0x117   :  { %v928_v63 = vpop.f32.mrf.mxu0  ;;  %v1001_v1 = vpop.f32.mrf.mxu1 }
 0x118   :  { %1196 = vst [vmem:[%s2154_s3 + $0x100] sm:$0xff] %v927_v60  ;;  %v929_v0 = vadd.f32 %v928_v63, %v1874_v21  ;;  %1198 = vst [vmem:[%s2154_s3 + $0x110] sm:$0xff] %v1000_v62  ;;  %v1002_v2 = vadd.f32 %v1001_v1, %v1877_v23 }
 0x119   :  { %v930_v4 = vpop.f32.mrf.mxu0  ;;  %v1003_v6 = vpop.f32.mrf.mxu1 }
 0x11a   :  { %1197 = vst [vmem:[%s2154_s3 + $0x108] sm:$0xff] %v929_v0  ;;  %v931_v5 = vadd.f32 %v930_v4, %v1868_v20  ;;  %1199 = vst [vmem:[%s2154_s3 + $0x118] sm:$0xff] %v1002_v2  ;;  %v1004_v7 = vadd.f32 %v1003_v6, %v1871_v3 }
 0x11b   :  { %v932_v8 = vpop.f32.mrf.mxu0  ;;  %v1005_v11 = vpop.f32.mrf.mxu1 }
 0x11c   :  { %1204 = vst [vmem:[%s2154_s3 + $0x140] sm:$0xff] %v931_v5  ;;  %v933_v9 = vadd.f32 %v932_v8, %v1874_v21  ;;  %1206 = vst [vmem:[%s2154_s3 + $0x150] sm:$0xff] %v1004_v7  ;;  %v1006_v12 = vadd.f32 %v1005_v11, %v1877_v23 }
 0x11d   :  { %v936_v13 = vpop.f32.mrf.mxu0  ;;  %v1009_v15 = vpop.f32.mrf.mxu1 }
 0x11e   :  { %1205 = vst [vmem:[%s2154_s3 + $0x148] sm:$0xff] %v933_v9  ;;  %v937_v14 = vadd.f32 %v936_v13, %v1868_v20  ;;  %1207 = vst [vmem:[%s2154_s3 + $0x158] sm:$0xff] %v1006_v12  ;;  %v1010_v16 = vadd.f32 %v1009_v15, %v1871_v3 }
 0x11f   :  { %v938_v17 = vpop.f32.mrf.mxu0  ;;  %v1011_v30 = vpop.f32.mrf.mxu1 }
 0x120   :  { %1212 = vst [vmem:[%s2154_s3 + $0x180] sm:$0xff] %v937_v14  ;;  %v939_v10 = vadd.f32 %v938_v17, %v1874_v21  ;;  %1214 = vst [vmem:[%s2154_s3 + $0x190] sm:$0xff] %v1010_v16  ;;  %v1012_v48 = vadd.f32 %v1011_v30, %v1877_v23 }
 0x121   :  { %v940_v18 = vpop.f32.mrf.mxu0  ;;  %v1013_v22 = vpop.f32.mrf.mxu1 }
 0x122   :  { %1213 = vst [vmem:[%s2154_s3 + $0x188] sm:$0xff] %v939_v10  ;;  %v941_v55 = vadd.f32 %v940_v18, %v1868_v20  ;;  %1215 = vst [vmem:[%s2154_s3 + $0x198] sm:$0xff] %v1012_v48  ;;  %v1014_v24 = vadd.f32 %v1013_v22, %v1871_v3  ;;  %v170_v3 = vsub.s32 4, %v1856_v19 }
 0x123   :  { %v942_v25 = vpop.f32.mrf.mxu0  ;;  %v1015_v27 = vpop.f32.mrf.mxu1 }
 0x124   :  { %1220 = vst [vmem:[%s2154_s3 + $0x1c0] sm:$0xff] %v941_v55  ;;  %v943_v26 = vadd.f32 %v942_v25, %v1874_v21  ;;  %1222 = vst [vmem:[%s2154_s3 + $0x1d0] sm:$0xff] %v1014_v24  ;;  %v1016_v20 = vadd.f32 %v1015_v27, %v1877_v23  ;;  %v174_v21 = vsub.s32 5, %v1856_v19  ;;  %v2012_v29 = vrot.slane %v1862_v37, %v170_v3 }
 0x125   :  { %v2015_v23 = vrot.slane %v1862_v37, %v178_v56 }
 0x126   :  { %1221 = vst [vmem:[%s2154_s3 + $0x1c8] sm:$0xff] %v943_v26  ;;  %1223 = vst [vmem:[%s2154_s3 + $0x1d8] sm:$0xff] %v1016_v20  ;;  %v2018_v31 = vrot.slane %v1862_v37, %v174_v21 }
 0x145   :  { %v1052_v32 = vpop.f32.mrf.mxu0  ;;  %v1125_v35 = vpop.f32.mrf.mxu1 }
 0x146   :  { %v1053_v34 = vadd.f32 %v1052_v32, %v2012_v29  ;;  %v1126_v36 = vadd.f32 %v1125_v35, %v2015_v23 }
 0x147   :  { %v1054_v38 = vpop.f32.mrf.mxu0  ;;  %v1127_v39 = vpop.f32.mrf.mxu1 }
 0x148   :  { %1168 = vst [vmem:[%s2154_s3 + $0x20] sm:$0xff] %v1053_v34  ;;  %v1055_v19 = vadd.f32 %v1054_v38, %v2018_v31  ;;  %1170 = vst [vmem:[%s2154_s3 + $0x30] sm:$0xff] %v1126_v36  ;;  %v1128_v37 = vadd.f32 %v1127_v39, %v2021_v33 }
 0x149   :  { %v1056_v40 = vpop.f32.mrf.mxu0  ;;  %v1129_v42 = vpop.f32.mrf.mxu1 }
 0x14a   :  { %1169 = vst [vmem:[%s2154_s3 + $0x28] sm:$0xff] %v1055_v19  ;;  %v1057_v41 = vadd.f32 %v1056_v40, %v2012_v29  ;;  %1171 = vst [vmem:[%s2154_s3 + $0x38] sm:$0xff] %v1128_v37  ;;  %v1130_v43 = vadd.f32 %v1129_v42, %v2015_v23 }
 0x14b   :  { %v1058_v44 = vpop.f32.mrf.mxu0  ;;  %v1131_v46 = vpop.f32.mrf.mxu1 }
 0x14c   :  { %1176 = vst [vmem:[%s2154_s3 + $0x60] sm:$0xff] %v1057_v41  ;;  %v1059_v45 = vadd.f32 %v1058_v44, %v2018_v31  ;;  %1178 = vst [vmem:[%s2154_s3 + $0x70] sm:$0xff] %v1130_v43  ;;  %v1132_v47 = vadd.f32 %v1131_v46, %v2021_v33 }
 0x14d   :  { %v1062_v49 = vpop.f32.mrf.mxu0  ;;  %v1135_v51 = vpop.f32.mrf.mxu1 }
 0x14e   :  { %1177 = vst [vmem:[%s2154_s3 + $0x68] sm:$0xff] %v1059_v45  ;;  %v1063_v50 = vadd.f32 %v1062_v49, %v2012_v29  ;;  %1179 = vst [vmem:[%s2154_s3 + $0x78] sm:$0xff] %v1132_v47  ;;  %v1136_v52 = vadd.f32 %v1135_v51, %v2015_v23 }
 0x14f   :  { %v1064_v53 = vpop.f32.mrf.mxu0  ;;  %v1137_v57 = vpop.f32.mrf.mxu1 }
 0x150   :  { %1184 = vst [vmem:[%s2154_s3 + $0xa0] sm:$0xff] %v1063_v50  ;;  %v1065_v54 = vadd.f32 %v1064_v53, %v2018_v31  ;;  %1186 = vst [vmem:[%s2154_s3 + $0xb0] sm:$0xff] %v1136_v52  ;;  %v1138_v58 = vadd.f32 %v1137_v57, %v2021_v33 }
 0x151   :  { %v1066_v59 = vpop.f32.mrf.mxu0  ;;  %v1139_v61 = vpop.f32.mrf.mxu1 }
 0x152   :  { %1185 = vst [vmem:[%s2154_s3 + $0xa8] sm:$0xff] %v1065_v54  ;;  %v1067_v60 = vadd.f32 %v1066_v59, %v2012_v29  ;;  %1187 = vst [vmem:[%s2154_s3 + $0xb8] sm:$0xff] %v1138_v58  ;;  %v1140_v62 = vadd.f32 %v1139_v61, %v2015_v23 }
 0x153   :  { %v1068_v63 = vpop.f32.mrf.mxu0  ;;  %v1141_v1 = vpop.f32.mrf.mxu1 }
 0x154   :  { %1192 = vst [vmem:[%s2154_s3 + $0xe0] sm:$0xff] %v1067_v60  ;;  %v1069_v0 = vadd.f32 %v1068_v63, %v2018_v31  ;;  %1194 = vst [vmem:[%s2154_s3 + $0xf0] sm:$0xff] %v1140_v62  ;;  %v1142_v2 = vadd.f32 %v1141_v1, %v2021_v33 }
 0x155   :  { %v1072_v4 = vpop.f32.mrf.mxu0  ;;  %v1145_v6 = vpop.f32.mrf.mxu1 }
 0x156   :  { %1193 = vst [vmem:[%s2154_s3 + $0xe8] sm:$0xff] %v1069_v0  ;;  %v1073_v5 = vadd.f32 %v1072_v4, %v2012_v29  ;;  %1195 = vst [vmem:[%s2154_s3 + $0xf8] sm:$0xff] %v1142_v2  ;;  %v1146_v7 = vadd.f32 %v1145_v6, %v2015_v23 }
 0x157   :  { %v1074_v8 = vpop.f32.mrf.mxu0  ;;  %v1147_v11 = vpop.f32.mrf.mxu1 }
 0x158   :  { %1200 = vst [vmem:[%s2154_s3 + $0x120] sm:$0xff] %v1073_v5  ;;  %v1075_v9 = vadd.f32 %v1074_v8, %v2018_v31  ;;  %1202 = vst [vmem:[%s2154_s3 + $0x130] sm:$0xff] %v1146_v7  ;;  %v1148_v12 = vadd.f32 %v1147_v11, %v2021_v33 }
 0x159   :  { %v1076_v13 = vpop.f32.mrf.mxu0  ;;  %v1149_v15 = vpop.f32.mrf.mxu1 }
 0x15a   :  { %1201 = vst [vmem:[%s2154_s3 + $0x128] sm:$0xff] %v1075_v9  ;;  %v1077_v14 = vadd.f32 %v1076_v13, %v2012_v29  ;;  %1203 = vst [vmem:[%s2154_s3 + $0x138] sm:$0xff] %v1148_v12  ;;  %v1150_v16 = vadd.f32 %v1149_v15, %v2015_v23 }
 0x15b   :  { %v1078_v17 = vpop.f32.mrf.mxu0  ;;  %v1151_v30 = vpop.f32.mrf.mxu1 }
 0x15c   :  { %1208 = vst [vmem:[%s2154_s3 + $0x160] sm:$0xff] %v1077_v14  ;;  %v1079_v10 = vadd.f32 %v1078_v17, %v2018_v31  ;;  %1210 = vst [vmem:[%s2154_s3 + $0x170] sm:$0xff] %v1150_v16  ;;  %v1152_v48 = vadd.f32 %v1151_v30, %v2021_v33 }
 0x15d   :  { %v1082_v18 = vpop.f32.mrf.mxu0  ;;  %v1155_v22 = vpop.f32.mrf.mxu1 }
 0x15e   :  { %1209 = vst [vmem:[%s2154_s3 + $0x168] sm:$0xff] %v1079_v10  ;;  %v1083_v55 = vadd.f32 %v1082_v18, %v2012_v29  ;;  %1211 = vst [vmem:[%s2154_s3 + $0x178] sm:$0xff] %v1152_v48  ;;  %v1156_v24 = vadd.f32 %v1155_v22, %v2015_v23 }
 0x15f   :  { %v1084_v25 = vpop.f32.mrf.mxu0  ;;  %v1157_v27 = vpop.f32.mrf.mxu1 }
 0x160   :  { %1216 = vst [vmem:[%s2154_s3 + $0x1a0] sm:$0xff] %v1083_v55  ;;  %v1085_v26 = vadd.f32 %v1084_v25, %v2018_v31  ;;  %1218 = vst [vmem:[%s2154_s3 + $0x1b0] sm:$0xff] %v1156_v24  ;;  %v1158_v20 = vadd.f32 %v1157_v27, %v2021_v33 }
 0x161   :  { %v1086_v3 = vpop.f32.mrf.mxu0  ;;  %v1159_v21 = vpop.f32.mrf.mxu1 }
 0x162   :  { %1217 = vst [vmem:[%s2154_s3 + $0x1a8] sm:$0xff] %v1085_v26  ;;  %v1087_v56 = vadd.f32 %v1086_v3, %v2012_v29  ;;  %1219 = vst [vmem:[%s2154_s3 + $0x1b8] sm:$0xff] %v1158_v20  ;;  %v1160_v28 = vadd.f32 %v1159_v21, %v2015_v23 }
 0x163   :  { %v1088_v32 = vpop.f32.mrf.mxu0  ;;  %v1161_v35 = vpop.f32.mrf.mxu1 }
 0x164   :  { %1224 = vst [vmem:[%s2154_s3 + $0x1e0] sm:$0xff] %v1087_v56  ;;  %v1089_v34 = vadd.f32 %v1088_v32, %v2018_v31  ;;  %1226 = vst [vmem:[%s2154_s3 + $0x1f0] sm:$0xff] %v1160_v28  ;;  %v1162_v29 = vadd.f32 %v1161_v35, %v2021_v33 }
 0x166   :  { %1225 = vst [vmem:[%s2154_s3 + $0x1e8] sm:$0xff] %v1089_v34  ;;  %1227 = vst [vmem:[%s2154_s3 + $0x1f8] sm:$0xff] %v1162_v29 }

// kernel: base_language_model_forward.4
= control target key start
LH: loop header
LB: loop body
LE: loop exit
PB: predicated region body
PF: predicated region fallthrough
CT: control target
= control target key end

     0   :  { %v13797_v3 = vmov 0.0|0.0   ;;  %vm1672_vm0 = vcmask 1041409   ;;  %vm1675_vm1 = vcmask 1042434   ;;  %vm1678_vm2 = vcmask 1043459   ;;  %s13794_s1 = inlined_call_operand.vmem [shape: bf16[256,1024], index: 1, kind: input, shape index: {}]   ;;  %s13795_s0 = inlined_call_operand.vmem [shape: f32[8,8,1024], index: 0, kind: input, shape index: {}]   ;;  %s13796_s2 = inlined_call_operand.vmem [shape: bf16[8,8,256], index: 2, kind: output, shape index: {}]  }
   0x1   :  { %v79_v0 = vld [vmem:[%s13794_s1 + $0x1c0] sm:$0xff]  ;;  %v80_v2 = vld [vmem:[%s13794_s1 + $0x1c8] sm:$0xff]  ;;  %856 = vmatprep.mubr.bf16.mxu0 %v13797_v3  ;;  %897 = vmatprep.mubr.bf16.mxu1 %v13797_v3  ;;  %vm1608_vm3 = vcmask 1040384   ;;  %vm1609_vm4 = vsmask.f32 256  ;;  %vm1611_vm5 = vcmask 1044484  }
   0x2   :  { %v83_v1 = vld [vmem:[%s13794_s1 + $0x1e0] sm:$0xff]  ;;  %v84_v5 = vld [vmem:[%s13794_s1 + $0x1e8] sm:$0xff]  ;;  %vm1684_vm6 = vcmask 1045509   ;;  %vm1612_vm7 = vsmask.f32 4352  ;;  %vm1687_vm8 = vcmask 1046534   ;;  %vm10383_vm9 = vmand %vm1608_vm3, %vm1609_vm4 }
   0x3   :  { %v9297_v4 = vcombine.high %v79_v0, %v83_v1  ;;  %v9302_v6 = vcombine.low %v79_v0, %v83_v1  ;;  %v71_v7 = vld [vmem:[%s13794_s1 + $0x180] sm:$0xff]  ;;  %v9310_v9 = vcombine.high %v80_v2, %v84_v5  ;;  %v9312_v10 = vcombine.low %v80_v2, %v84_v5  ;;  %v72_v12 = vld [vmem:[%s13794_s1 + $0x188] sm:$0xff]  ;;  %vm1613_vm10 = vmand %vm1611_vm5, %vm1612_vm7 }
   0x4   :  { %v75_v8 = vld [vmem:[%s13794_s1 + $0x1a0] sm:$0xff]  ;;  %v76_v13 = vld [vmem:[%s13794_s1 + $0x1a8] sm:$0xff]  ;;  %vm1690_vm11 = vcmask 1047559   ;;  %vm10401_vm12 = vmor %vm1613_vm10, %vm10383_vm9  ;;  %vm2458_vm13 = vsmask.f32 7938 }
   0x5   :  { %14130 = vst [vmem:[#allocation4_spill] sm:$0xff] %v9297_v4  ;;  %14131 = vst [vmem:[#allocation5_spill] sm:$0xff] %v9302_v6  ;;  %v9314_v11 = vcombine.high %v71_v7, %v75_v8  ;;  %v63_v14 = vld [vmem:[%s13794_s1 + $0x140] sm:$0xff]  ;;  %824 = vmatprep.subr.bf16.mxu0 %v9297_v4  ;;  %v9326_v15 = vcombine.high %v72_v12, %v76_v13  ;;  %v64_v17 = vld [vmem:[%s13794_s1 + $0x148] sm:$0xff]  ;;  %865 = vmatprep.subr.bf16.mxu1 %v9310_v9  ;;  %vm2460_vm14 = vsmask.f32 7954 }
   0x6   :  { %14132 = vst [vmem:[#allocation6_spill] sm:$0xff] %v9310_v9  ;;  %14133 = vst [vmem:[#allocation7_spill] sm:$0xff] %v9312_v10  ;;  %v67_v16 = vld [vmem:[%s13794_s1 + $0x160] sm:$0xff]  ;;  %v68_v18 = vld [vmem:[%s13794_s1 + $0x168] sm:$0xff]  ;;  %825 = vmatpush1.bf16.msra.mxu0 %v9302_v6  ;;  %v9339_v19 = vcombine.low %v71_v7, %v75_v8  ;;  %866 = vmatpush1.bf16.msra.mxu1 %v9312_v10  ;;  %v9343_v20 = vcombine.low %v72_v12, %v76_v13  ;;  %vm3284_vm7 = vsmask.f32 1280 }
   0x7   :  { %14134 = vst [vmem:[#allocation8_spill] sm:$0xff] %v9314_v11  ;;  %14135 = vst [vmem:[#allocation9_spill] sm:$0xff] %v9326_v15  ;;  %826 = vmatprep.subr.bf16.mxu0 %v9314_v11  ;;  %v9345_v21 = vcombine.high %v63_v14, %v67_v16  ;;  %867 = vmatprep.subr.bf16.mxu1 %v9326_v15  ;;  %v9348_v22 = vcombine.high %v64_v17, %v68_v18  ;;  %v55_v23 = vld [vmem:[%s13794_s1 + $0x100] sm:$0xff]  ;;  %v56_v25 = vld [vmem:[%s13794_s1 + $0x108] sm:$0xff]  ;;  %vm3287_vm9 = vsmask.f32 5376 }
   0x8   :  { %14136 = vst [vmem:[#allocation10_spill] sm:$0xff] %v9339_v19  ;;  %14137 = vst [vmem:[#allocation11_spill] sm:$0xff] %v9343_v20  ;;  %v59_v24 = vld [vmem:[%s13794_s1 + $0x120] sm:$0xff]  ;;  %v60_v26 = vld [vmem:[%s13794_s1 + $0x128] sm:$0xff]  ;;  %v9363_v27 = vcombine.low %v63_v14, %v67_v16  ;;  %v9367_v28 = vcombine.low %v64_v17, %v68_v18 }
   0x9   :  { %14138 = vst [vmem:[#allocation12_spill] sm:$0xff] %v9345_v21  ;;  %14139 = vst [vmem:[#allocation13_spill] sm:$0xff] %v9348_v22  ;;  %v9369_v29 = vcombine.high %v55_v23, %v59_v24  ;;  %v9372_v30 = vcombine.high %v56_v25, %v60_v26  ;;  %v47_v31 = vld [vmem:[%s13794_s1 + $0xc0] sm:$0xff]  ;;  %v48_v33 = vld [vmem:[%s13794_s1 + $0xc8] sm:$0xff]  ;;  %v9387_v35 = vcombine.low %v55_v23, %v59_v24 }
   0xa   :  { %827 = vmatpush1.bf16.msra.mxu0 %v9339_v19  ;;  %14140 = vst [vmem:[#allocation14_spill] sm:$0xff] %v9363_v27  ;;  %868 = vmatpush1.bf16.msra.mxu1 %v9343_v20  ;;  %14141 = vst [vmem:[#allocation15_spill] sm:$0xff] %v9367_v28  ;;  %v51_v32 = vld [vmem:[%s13794_s1 + $0xe0] sm:$0xff]  ;;  %v52_v34 = vld [vmem:[%s13794_s1 + $0xe8] sm:$0xff]  ;;  %v9391_v36 = vcombine.low %v56_v25, %v60_v26 }
   0xb   :  { %828 = vmatprep.subr.bf16.mxu0 %v9345_v21  ;;  %14142 = vst [vmem:[#allocation16_spill] sm:$0xff] %v9369_v29  ;;  %869 = vmatprep.subr.bf16.mxu1 %v9348_v22  ;;  %14143 = vst [vmem:[#allocation17_spill] sm:$0xff] %v9372_v30  ;;  %v9393_v37 = vcombine.high %v47_v31, %v51_v32  ;;  %v9396_v38 = vcombine.high %v48_v33, %v52_v34  ;;  %v39_v39 = vld [vmem:[%s13794_s1 + $0x80] sm:$0xff]  ;;  %v40_v41 = vld [vmem:[%s13794_s1 + $0x88] sm:$0xff] }
   0xc   :  { %14144 = vst [vmem:[#allocation18_spill] sm:$0xff] %v9387_v35  ;;  %14145 = vst [vmem:[#allocation19_spill] sm:$0xff] %v9391_v36  ;;  %v43_v40 = vld [vmem:[%s13794_s1 + $0xa0] sm:$0xff]  ;;  %v44_v42 = vld [vmem:[%s13794_s1 + $0xa8] sm:$0xff]  ;;  %v9411_v43 = vcombine.low %v47_v31, %v51_v32  ;;  %v9415_v44 = vcombine.low %v48_v33, %v52_v34 }
   0xd   :  { %14146 = vst [vmem:[#allocation20_spill] sm:$0xff] %v9393_v37  ;;  %14147 = vst [vmem:[#allocation21_spill] sm:$0xff] %v9396_v38  ;;  %v9417_v45 = vcombine.high %v39_v39, %v43_v40  ;;  %v9420_v46 = vcombine.high %v40_v41, %v44_v42  ;;  %v31_v47 = vld [vmem:[%s13794_s1 + $0x40] sm:$0xff]  ;;  %v32_v49 = vld [vmem:[%s13794_s1 + $0x48] sm:$0xff]  ;;  %v9435_v51 = vcombine.low %v39_v39, %v43_v40 }
   0xe   :  { %829 = vmatpush1.bf16.msra.mxu0 %v9363_v27  ;;  %870 = vmatpush1.bf16.msra.mxu1 %v9367_v28  ;;  %14148 = vst [vmem:[#allocation22_spill] sm:$0xff] %v9411_v43  ;;  %14149 = vst [vmem:[#allocation23_spill] sm:$0xff] %v9415_v44  ;;  %v35_v48 = vld [vmem:[%s13794_s1 + $0x60] sm:$0xff]  ;;  %v36_v50 = vld [vmem:[%s13794_s1 + $0x68] sm:$0xff]  ;;  %v9439_v52 = vcombine.low %v40_v41, %v44_v42 }
   0xf   :  { %830 = vmatprep.subr.bf16.mxu0 %v9369_v29  ;;  %871 = vmatprep.subr.bf16.mxu1 %v9372_v30  ;;  %14150 = vst [vmem:[#allocation24_spill] sm:$0xff] %v9417_v45  ;;  %14151 = vst [vmem:[#allocation25_spill] sm:$0xff] %v9420_v46  ;;  %v9441_v53 = vcombine.high %v31_v47, %v35_v48  ;;  %v9444_v54 = vcombine.high %v32_v49, %v36_v50  ;;  %v23_v55 = vld [vmem:[%s13794_s1] sm:$0xff]  ;;  %v24_v57 = vld [vmem:[%s13794_s1 + $0x8] sm:$0xff] }
  0x10   :  { %14152 = vst [vmem:[#allocation26_spill] sm:$0xff] %v9435_v51  ;;  %14153 = vst [vmem:[#allocation27_spill] sm:$0xff] %v9439_v52  ;;  %v27_v56 = vld [vmem:[%s13794_s1 + $0x20] sm:$0xff]  ;;  %v28_v58 = vld [vmem:[%s13794_s1 + $0x28] sm:$0xff]  ;;  %v9459_v59 = vcombine.low %v31_v47, %v35_v48  ;;  %v9463_v60 = vcombine.low %v32_v49, %v36_v50 }
  0x11   :  { %14154 = vst [vmem:[#allocation28_spill] sm:$0xff] %v9441_v53  ;;  %14155 = vst [vmem:[#allocation29_spill] sm:$0xff] %v9444_v54  ;;  %v9465_v61 = vcombine.high %v23_v55, %v27_v56  ;;  %v9468_v62 = vcombine.high %v24_v57, %v28_v58  ;;  %v143_v63 = vld [vmem:[%s13794_s1 + $0x3c0] sm:$0xff]  ;;  %v144_v1 = vld [vmem:[%s13794_s1 + $0x3c8] sm:$0xff]  ;;  %v9483_v5 = vcombine.low %v23_v55, %v27_v56 }
  0x12   :  { %831 = vmatpush1.bf16.msra.mxu0 %v9387_v35  ;;  %872 = vmatpush1.bf16.msra.mxu1 %v9391_v36  ;;  %14156 = vst [vmem:[#allocation30_spill] sm:$0xff] %v9459_v59  ;;  %14157 = vst [vmem:[#allocation31_spill] sm:$0xff] %v9463_v60  ;;  %v147_v0 = vld [vmem:[%s13794_s1 + $0x3e0] sm:$0xff]  ;;  %v148_v2 = vld [vmem:[%s13794_s1 + $0x3e8] sm:$0xff]  ;;  %v9487_v7 = vcombine.low %v24_v57, %v28_v58 }
  0x13   :  { %832 = vmatprep.subr.bf16.mxu0 %v9393_v37  ;;  %873 = vmatprep.subr.bf16.mxu1 %v9396_v38  ;;  %14158 = vst [vmem:[#allocation32_spill] sm:$0xff] %v9465_v61  ;;  %14159 = vst [vmem:[#allocation33_spill] sm:$0xff] %v9468_v62  ;;  %v9489_v8 = vcombine.high %v143_v63, %v147_v0  ;;  %v9492_v12 = vcombine.high %v144_v1, %v148_v2  ;;  %v135_v13 = vld [vmem:[%s13794_s1 + $0x380] sm:$0xff]  ;;  %v136_v16 = vld [vmem:[%s13794_s1 + $0x388] sm:$0xff] }
  0x14   :  { %14160 = vst [vmem:[#allocation34_spill] sm:$0xff] %v9483_v5  ;;  %14161 = vst [vmem:[#allocation35_spill] sm:$0xff] %v9487_v7  ;;  %v139_v14 = vld [vmem:[%s13794_s1 + $0x3a0] sm:$0xff]  ;;  %v140_v17 = vld [vmem:[%s13794_s1 + $0x3a8] sm:$0xff]  ;;  %v9507_v18 = vcombine.low %v143_v63, %v147_v0  ;;  %v9511_v23 = vcombine.low %v144_v1, %v148_v2 }
  0x15   :  { %14162 = vst [vmem:[#allocation36_spill] sm:$0xff] %v9489_v8  ;;  %14163 = vst [vmem:[#allocation37_spill] sm:$0xff] %v9492_v12  ;;  %v9513_v24 = vcombine.high %v135_v13, %v139_v14  ;;  %v9516_v25 = vcombine.high %v136_v16, %v140_v17  ;;  %v127_v26 = vld [vmem:[%s13794_s1 + $0x340] sm:$0xff]  ;;  %v128_v32 = vld [vmem:[%s13794_s1 + $0x348] sm:$0xff]  ;;  %v9531_v34 = vcombine.low %v135_v13, %v139_v14 }
  0x16   :  { %833 = vmatpush1.bf16.msra.mxu0 %v9411_v43  ;;  %874 = vmatpush1.bf16.msra.mxu1 %v9415_v44  ;;  %14164 = vst [vmem:[#allocation38_spill] sm:$0xff] %v9507_v18  ;;  %14165 = vst [vmem:[#allocation39_spill] sm:$0xff] %v9511_v23  ;;  %v131_v31 = vld [vmem:[%s13794_s1 + $0x360] sm:$0xff]  ;;  %v132_v33 = vld [vmem:[%s13794_s1 + $0x368] sm:$0xff]  ;;  %v9535_v39 = vcombine.low %v136_v16, %v140_v17 }
  0x17   :  { %834 = vmatprep.subr.bf16.mxu0 %v9417_v45  ;;  %875 = vmatprep.subr.bf16.mxu1 %v9420_v46  ;;  %14166 = vst [vmem:[#allocation40_spill] sm:$0xff] %v9513_v24  ;;  %14167 = vst [vmem:[#allocation41_spill] sm:$0xff] %v9516_v25  ;;  %v9537_v40 = vcombine.high %v127_v26, %v131_v31  ;;  %v9540_v41 = vcombine.high %v128_v32, %v132_v33  ;;  %v119_v42 = vld [vmem:[%s13794_s1 + $0x300] sm:$0xff]  ;;  %v120_v48 = vld [vmem:[%s13794_s1 + $0x308] sm:$0xff] }
  0x18   :  { %14168 = vst [vmem:[#allocation42_spill] sm:$0xff] %v9531_v34  ;;  %14169 = vst [vmem:[#allocation43_spill] sm:$0xff] %v9535_v39  ;;  %v123_v47 = vld [vmem:[%s13794_s1 + $0x320] sm:$0xff]  ;;  %v124_v49 = vld [vmem:[%s13794_s1 + $0x328] sm:$0xff]  ;;  %v9555_v50 = vcombine.low %v127_v26, %v131_v31  ;;  %v9559_v55 = vcombine.low %v128_v32, %v132_v33 }
  0x19   :  { %14170 = vst [vmem:[#allocation44_spill] sm:$0xff] %v9537_v40  ;;  %14171 = vst [vmem:[#allocation45_spill] sm:$0xff] %v9540_v41  ;;  %v9561_v56 = vcombine.high %v119_v42, %v123_v47  ;;  %v9564_v57 = vcombine.high %v120_v48, %v124_v49  ;;  %v111_v58 = vld [vmem:[%s13794_s1 + $0x2c0] sm:$0xff]  ;;  %v112_v0 = vld [vmem:[%s13794_s1 + $0x2c8] sm:$0xff]  ;;  %v9579_v2 = vcombine.low %v119_v42, %v123_v47 }
  0x1a   :  { %835 = vmatpush1.bf16.msra.mxu0 %v9435_v51  ;;  %876 = vmatpush1.bf16.msra.mxu1 %v9439_v52  ;;  %14172 = vst [vmem:[#allocation46_spill] sm:$0xff] %v9555_v50  ;;  %14173 = vst [vmem:[#allocation47_spill] sm:$0xff] %v9559_v55  ;;  %v115_v63 = vld [vmem:[%s13794_s1 + $0x2e0] sm:$0xff]  ;;  %v116_v1 = vld [vmem:[%s13794_s1 + $0x2e8] sm:$0xff]  ;;  %v9583_v13 = vcombine.low %v120_v48, %v124_v49 }
  0x1b   :  { %836 = vmatprep.subr.bf16.mxu0 %v9441_v53  ;;  %877 = vmatprep.subr.bf16.mxu1 %v9444_v54  ;;  %14174 = vst [vmem:[#allocation48_spill] sm:$0xff] %v9561_v56  ;;  %14175 = vst [vmem:[#allocation49_spill] sm:$0xff] %v9564_v57  ;;  %v9585_v14 = vcombine.high %v111_v58, %v115_v63  ;;  %v9588_v16 = vcombine.high %v112_v0, %v116_v1  ;;  %v103_v17 = vld [vmem:[%s13794_s1 + $0x280] sm:$0xff]  ;;  %v104_v31 = vld [vmem:[%s13794_s1 + $0x288] sm:$0xff] }
  0x1c   :  { %14176 = vst [vmem:[#allocation50_spill] sm:$0xff] %v9579_v2  ;;  %14177 = vst [vmem:[#allocation51_spill] sm:$0xff] %v9583_v13  ;;  %v107_v26 = vld [vmem:[%s13794_s1 + $0x2a0] sm:$0xff]  ;;  %v108_v32 = vld [vmem:[%s13794_s1 + $0x2a8] sm:$0xff]  ;;  %v9603_v33 = vcombine.low %v111_v58, %v115_v63  ;;  %v9607_v42 = vcombine.low %v112_v0, %v116_v1 }
  0x1d   :  { %14178 = vst [vmem:[#allocation52_spill] sm:$0xff] %v9585_v14  ;;  %14179 = vst [vmem:[#allocation53_spill] sm:$0xff] %v9588_v16  ;;  %v9609_v47 = vcombine.high %v103_v17, %v107_v26  ;;  %v9612_v48 = vcombine.high %v104_v31, %v108_v32  ;;  %v95_v49 = vld [vmem:[%s13794_s1 + $0x240] sm:$0xff]  ;;  %v96_v63 = vld [vmem:[%s13794_s1 + $0x248] sm:$0xff]  ;;  %v9627_v1 = vcombine.low %v103_v17, %v107_v26 }
  0x1e   :  { %837 = vmatpush1.bf16.msra.mxu0 %v9459_v59  ;;  %878 = vmatpush1.bf16.msra.mxu1 %v9463_v60  ;;  %14180 = vst [vmem:[#allocation54_spill] sm:$0xff] %v9603_v33  ;;  %14181 = vst [vmem:[#allocation55_spill] sm:$0xff] %v9607_v42  ;;  %v99_v58 = vld [vmem:[%s13794_s1 + $0x260] sm:$0xff]  ;;  %v100_v0 = vld [vmem:[%s13794_s1 + $0x268] sm:$0xff]  ;;  %v9631_v3 = vcombine.low %v104_v31, %v108_v32 }
  0x1f   :  { %838 = vmatprep.subr.bf16.mxu0 %v9465_v61  ;;  %879 = vmatprep.subr.bf16.mxu1 %v9468_v62  ;;  %14182 = vst [vmem:[#allocation56_spill] sm:$0xff] %v9609_v47  ;;  %14183 = vst [vmem:[#allocation57_spill] sm:$0xff] %v9612_v48  ;;  %v91_v17 = vld [vmem:[%s13794_s1 + $0x220] sm:$0xff]  ;;  %v88_v26 = vld [vmem:[%s13794_s1 + $0x208] sm:$0xff]  ;;  %v9651_v32 = vcombine.low %v95_v49, %v99_v58 }
  0x20   :  { %14184 = vst [vmem:[#allocation58_spill] sm:$0xff] %v9627_v1  ;;  %14185 = vst [vmem:[#allocation59_spill] sm:$0xff] %v9631_v3  ;;  %v92_v31 = vld [vmem:[%s13794_s1 + $0x228] sm:$0xff] }
  0x21   :  { %14188 = vst [vmem:[#allocation62_spill] sm:$0xff] %v9651_v32  ;;  %vm10872_vm15 = vmand %vm1608_vm3, %vm2458_vm13 }
  0x22   :  { %839 = vmatpush1.bf16.msra.mxu0 %v9483_v5  ;;  %880 = vmatpush1.bf16.msra.mxu1 %v9487_v7  ;;  %vm2461_vm4 = vmand %vm1611_vm5, %vm2460_vm14  ;;  %vm4134_vm14 = vsmask.f32 7942 }
  0x23   :  { %840 = vmatprep.subr.bf16.mxu0 %v9489_v8  ;;  %881 = vmatprep.subr.bf16.mxu1 %v9492_v12  ;;  %vm10896_vm3 = vmor %vm2461_vm4, %vm10872_vm15  ;;  %vm4136_vm15 = vsmask.f32 7958 }
  0x24   :  { %vm11362_vm10 = vmand %vm1672_vm0, %vm3284_vm7 }
  0x25   :  { %vm11862_vm4 = vmand %vm1672_vm0, %vm4134_vm14 }
  0x26   :  { %841 = vmatpush2.bf16.msra.mxu0 %v9507_v18  ;;  %882 = vmatpush2.bf16.msra.mxu1 %v9511_v23 }
  0x27   :  { %842 = vmatprep.subr.bf16.mxu0 %v9513_v24  ;;  %883 = vmatprep.subr.bf16.mxu1 %v9516_v25 }
  0x2a   :  { %843 = vmatpush2.bf16.msra.mxu0 %v9531_v34  ;;  %884 = vmatpush2.bf16.msra.mxu1 %v9535_v39 }
  0x2b   :  { %844 = vmatprep.subr.bf16.mxu0 %v9537_v40  ;;  %885 = vmatprep.subr.bf16.mxu1 %v9540_v41 }
  0x2e   :  { %845 = vmatpush2.bf16.msra.mxu0 %v9555_v50  ;;  %886 = vmatpush2.bf16.msra.mxu1 %v9559_v55 }
  0x2f   :  { %846 = vmatprep.subr.bf16.mxu0 %v9561_v56  ;;  %887 = vmatprep.subr.bf16.mxu1 %v9564_v57 }
  0x32   :  { %847 = vmatpush2.bf16.msra.mxu0 %v9579_v2  ;;  %888 = vmatpush2.bf16.msra.mxu1 %v9583_v13  ;;  %v87_v13 = vld [vmem:[%s13794_s1 + $0x200] sm:$0xff]  ;;  %v57_v2 = vld [vmem:[%s13794_s1 + $0x110] sm:$0xff] }
  0x33   :  { %848 = vmatprep.subr.bf16.mxu0 %v9585_v14  ;;  %889 = vmatprep.subr.bf16.mxu1 %v9588_v16  ;;  %v9633_v16 = vcombine.high %v95_v49, %v99_v58  ;;  %v9636_v14 = vcombine.high %v96_v63, %v100_v0  ;;  %v85_v49 = vld [vmem:[%s13794_s1 + $0x1f0] sm:$0xff]  ;;  %v82_v58 = vld [vmem:[%s13794_s1 + $0x1d8] sm:$0xff] }
  0x35   :  { %14186 = vst [vmem:[#allocation60_spill] sm:$0xff] %v9633_v16  ;;  %14187 = vst [vmem:[#allocation61_spill] sm:$0xff] %v9636_v14 }
  0x36   :  { %849 = vmatpush2.bf16.msra.mxu0 %v9603_v33  ;;  %890 = vmatpush2.bf16.msra.mxu1 %v9607_v42  ;;  %v9660_v42 = vcombine.high %v88_v26, %v92_v31  ;;  %v81_v33 = vld [vmem:[%s13794_s1 + $0x1d0] sm:$0xff] }
  0x37   :  { %850 = vmatprep.subr.bf16.mxu0 %v9609_v47  ;;  %891 = vmatprep.subr.bf16.mxu1 %v9612_v48  ;;  %v9655_v48 = vcombine.low %v96_v63, %v100_v0  ;;  %v9657_v47 = vcombine.high %v87_v13, %v91_v17  ;;  %v86_v63 = vld [vmem:[%s13794_s1 + $0x1f8] sm:$0xff]  ;;  %v9675_v0 = vcombine.low %v87_v13, %v91_v17  ;;  %v77_v13 = vld [vmem:[%s13794_s1 + $0x1b0] sm:$0xff] }
  0x38   :  { %14191 = vst [vmem:[#allocation65_spill] sm:$0xff] %v9660_v42  ;;  %v74_v17 = vld [vmem:[%s13794_s1 + $0x198] sm:$0xff] }
  0x39   :  { %14189 = vst [vmem:[#allocation63_spill] sm:$0xff] %v9655_v48  ;;  %14190 = vst [vmem:[#allocation64_spill] sm:$0xff] %v9657_v47 }
  0x3a   :  { %851 = vmatpush2.bf16.msra.mxu0 %v9627_v1  ;;  %892 = vmatpush2.bf16.msra.mxu1 %v9631_v3  ;;  %14192 = vst [vmem:[#allocation66_spill] sm:$0xff] %v9675_v0  ;;  %v9684_v3 = vcombine.high %v82_v58, %v86_v63  ;;  %v73_v1 = vld [vmem:[%s13794_s1 + $0x190] sm:$0xff] }
  0x3b   :  { %852 = vmatprep.subr.bf16.mxu0 %v9633_v16  ;;  %893 = vmatprep.subr.bf16.mxu1 %v9636_v14  ;;  %v9679_v14 = vcombine.low %v88_v26, %v92_v31  ;;  %v9681_v16 = vcombine.high %v81_v33, %v85_v49  ;;  %v78_v26 = vld [vmem:[%s13794_s1 + $0x1b8] sm:$0xff]  ;;  %v9699_v31 = vcombine.low %v81_v33, %v85_v49  ;;  %v69_v33 = vld [vmem:[%s13794_s1 + $0x170] sm:$0xff]  ;;  %v14200_v49 = vmov 0.0|0.0  }
  0x3c   :  { %14195 = vst [vmem:[#allocation69_spill] sm:$0xff] %v9684_v3 }
  0x3d   :  { %14193 = vst [vmem:[#allocation67_spill] sm:$0xff] %v9679_v14  ;;  %14194 = vst [vmem:[#allocation68_spill] sm:$0xff] %v9681_v16 }
  0x3e   :  { %853 = vmatpush2.bf16.msra.mxu0 %v9651_v32  ;;  %894 = vmatpush2.bf16.msra.mxu1 %v9655_v48  ;;  %14196 = vst [vmem:[#allocation70_spill] sm:$0xff] %v9699_v31  ;;  %v9708_v48 = vcombine.high %v74_v17, %v78_v26  ;;  %v65_v32 = vld [vmem:[%s13794_s1 + $0x150] sm:$0xff] }
  0x3f   :  { %854 = vmatprep.subr.bf16.mxu0 %v9657_v47  ;;  %895 = vmatprep.subr.bf16.mxu1 %v9660_v42  ;;  %v9703_v42 = vcombine.low %v82_v58, %v86_v63  ;;  %v9705_v47 = vcombine.high %v73_v1, %v77_v13  ;;  %v66_v58 = vld [vmem:[%s13794_s1 + $0x158] sm:$0xff] }
  0x40   :  { %14199 = vst [vmem:[#allocation73_spill] sm:$0xff] %v9708_v48  ;;  %v70_v63 = vld [vmem:[%s13794_s1 + $0x178] sm:$0xff] }
  0x41   :  { %14197 = vst [vmem:[#allocation71_spill] sm:$0xff] %v9703_v42  ;;  %14198 = vst [vmem:[#allocation72_spill] sm:$0xff] %v9705_v47 }
  0x42   :  { %855 = vmatpush2.bf16.msra.mxu0 %v9675_v0  ;;  %896 = vmatpush2.bf16.msra.mxu1 %v9679_v14  ;;  %v9731_v14 = vcombine.high %v65_v32, %v69_v33  ;;  %v9734_v0 = vcombine.high %v66_v58, %v70_v63 }
  0x43   :  { %906 = vmatprep.subr.bf16.mxu0 %v9681_v16  ;;  %947 = vmatprep.subr.bf16.mxu1 %v9684_v3  ;;  %v9725_v3 = vcombine.low %v73_v1, %v77_v13  ;;  %v9729_v16 = vcombine.low %v74_v17, %v78_v26  ;;  %v61_v1 = vld [vmem:[%s13794_s1 + $0x130] sm:$0xff]  ;;  %v58_v13 = vld [vmem:[%s13794_s1 + $0x118] sm:$0xff]  ;;  %v9751_v26 = vcombine.low %v65_v32, %v69_v33 }
  0x44   :  { %14203 = vst [vmem:[#allocation76_spill] sm:$0xff] %v9731_v14  ;;  %14204 = vst [vmem:[#allocation77_spill] sm:$0xff] %v9734_v0  ;;  %v62_v17 = vld [vmem:[%s13794_s1 + $0x138] sm:$0xff]  ;;  %v53_v32 = vld [vmem:[%s13794_s1 + $0xf0] sm:$0xff] }
  0x45   :  { %857 = vmatmul.mubr.bf16.vlgmr.msra.gmra.mxu0 %v14200_v49  ;;  %898 = vmatmul.mubr.bf16.vlgmr.msra.gmra.mxu1 %v14200_v49  ;;  %14201 = vst [vmem:[#allocation74_spill] sm:$0xff] %v9725_v3  ;;  %14202 = vst [vmem:[#allocation75_spill] sm:$0xff] %v9729_v16  ;;  %v50_v33 = vld [vmem:[%s13794_s1 + $0xd8] sm:$0xff] }
  0x46   :  { %907 = vmatpush1.bf16.msra.mxu0 %v9699_v31  ;;  %948 = vmatpush1.bf16.msra.mxu1 %v9703_v42  ;;  %14205 = vst [vmem:[#allocation78_spill] sm:$0xff] %v9751_v26  ;;  %v9760_v42 = vcombine.high %v58_v13, %v62_v17  ;;  %v49_v31 = vld [vmem:[%s13794_s1 + $0xd0] sm:$0xff] }
  0x47   :  { %908 = vmatprep.subr.bf16.mxu0 %v9705_v47  ;;  %949 = vmatprep.subr.bf16.mxu1 %v9708_v48  ;;  %v9755_v48 = vcombine.low %v66_v58, %v70_v63  ;;  %v9757_v47 = vcombine.high %v57_v2, %v61_v1  ;;  %v54_v58 = vld [vmem:[%s13794_s1 + $0xf8] sm:$0xff]  ;;  %v9775_v63 = vcombine.low %v57_v2, %v61_v1  ;;  %v45_v2 = vld [vmem:[%s13794_s1 + $0xb0] sm:$0xff] }
  0x48   :  { %938 = vmatprep.mubr.bf16.mxu0 %v14200_v49  ;;  %979 = vmatprep.mubr.bf16.mxu1 %v14200_v49  ;;  %14208 = vst [vmem:[#allocation81_spill] sm:$0xff] %v9760_v42  ;;  %v42_v1 = vld [vmem:[%s13794_s1 + $0x98] sm:$0xff] }
  0x49   :  { %14206 = vst [vmem:[#allocation79_spill] sm:$0xff] %v9755_v48  ;;  %14207 = vst [vmem:[#allocation80_spill] sm:$0xff] %v9757_v47 }
  0x4a   :  { %909 = vmatpush1.bf16.msra.mxu0 %v9725_v3  ;;  %950 = vmatpush1.bf16.msra.mxu1 %v9729_v16  ;;  %14209 = vst [vmem:[#allocation82_spill] sm:$0xff] %v9775_v63  ;;  %v9784_v16 = vcombine.high %v50_v33, %v54_v58  ;;  %v41_v3 = vld [vmem:[%s13794_s1 + $0x90] sm:$0xff] }
  0x4b   :  { %910 = vmatprep.subr.bf16.mxu0 %v9731_v14  ;;  %951 = vmatprep.subr.bf16.mxu1 %v9734_v0  ;;  %v9779_v0 = vcombine.low %v58_v13, %v62_v17  ;;  %v9781_v14 = vcombine.high %v49_v31, %v53_v32  ;;  %v46_v13 = vld [vmem:[%s13794_s1 + $0xb8] sm:$0xff]  ;;  %v9799_v17 = vcombine.low %v49_v31, %v53_v32  ;;  %v37_v31 = vld [vmem:[%s13794_s1 + $0x70] sm:$0xff] }
  0x4c   :  { %14212 = vst [vmem:[#allocation85_spill] sm:$0xff] %v9784_v16  ;;  %v34_v32 = vld [vmem:[%s13794_s1 + $0x58] sm:$0xff] }
  0x4d   :  { %14210 = vst [vmem:[#allocation83_spill] sm:$0xff] %v9779_v0  ;;  %14211 = vst [vmem:[#allocation84_spill] sm:$0xff] %v9781_v14 }
  0x4e   :  { %911 = vmatpush1.bf16.msra.mxu0 %v9751_v26  ;;  %952 = vmatpush1.bf16.msra.mxu1 %v9755_v48  ;;  %14213 = vst [vmem:[#allocation86_spill] sm:$0xff] %v9799_v17  ;;  %v9808_v48 = vcombine.high %v42_v1, %v46_v13  ;;  %v33_v26 = vld [vmem:[%s13794_s1 + $0x50] sm:$0xff] }
  0x4f   :  { %912 = vmatprep.subr.bf16.mxu0 %v9757_v47  ;;  %953 = vmatprep.subr.bf16.mxu1 %v9760_v42  ;;  %v9803_v42 = vcombine.low %v50_v33, %v54_v58  ;;  %v9805_v47 = vcombine.high %v41_v3, %v45_v2  ;;  %v38_v33 = vld [vmem:[%s13794_s1 + $0x78] sm:$0xff]  ;;  %v9823_v58 = vcombine.low %v41_v3, %v45_v2  ;;  %v29_v3 = vld [vmem:[%s13794_s1 + $0x30] sm:$0xff] }
  0x50   :  { %14216 = vst [vmem:[#allocation89_spill] sm:$0xff] %v9808_v48  ;;  %v26_v2 = vld [vmem:[%s13794_s1 + $0x18] sm:$0xff] }
  0x51   :  { %14214 = vst [vmem:[#allocation87_spill] sm:$0xff] %v9803_v42  ;;  %14215 = vst [vmem:[#allocation88_spill] sm:$0xff] %v9805_v47 }
  0x52   :  { %913 = vmatpush1.bf16.msra.mxu0 %v9775_v63  ;;  %954 = vmatpush1.bf16.msra.mxu1 %v9779_v0  ;;  %14217 = vst [vmem:[#allocation90_spill] sm:$0xff] %v9823_v58  ;;  %v9832_v0 = vcombine.high %v34_v32, %v38_v33  ;;  %v25_v63 = vld [vmem:[%s13794_s1 + $0x10] sm:$0xff] }
  0x53   :  { %914 = vmatprep.subr.bf16.mxu0 %v9781_v14  ;;  %955 = vmatprep.subr.bf16.mxu1 %v9784_v16  ;;  %v9827_v16 = vcombine.low %v42_v1, %v46_v13  ;;  %v9829_v14 = vcombine.high %v33_v26, %v37_v31  ;;  %v30_v1 = vld [vmem:[%s13794_s1 + $0x38] sm:$0xff]  ;;  %v9847_v13 = vcombine.low %v33_v26, %v37_v31  ;;  %v149_v26 = vld [vmem:[%s13794_s1 + $0x3f0] sm:$0xff] }
  0x54   :  { %14220 = vst [vmem:[#allocation93_spill] sm:$0xff] %v9832_v0  ;;  %v146_v31 = vld [vmem:[%s13794_s1 + $0x3d8] sm:$0xff] }
  0x55   :  { %14218 = vst [vmem:[#allocation91_spill] sm:$0xff] %v9827_v16  ;;  %14219 = vst [vmem:[#allocation92_spill] sm:$0xff] %v9829_v14 }
  0x56   :  { %915 = vmatpush1.bf16.msra.mxu0 %v9799_v17  ;;  %956 = vmatpush1.bf16.msra.mxu1 %v9803_v42  ;;  %14221 = vst [vmem:[#allocation94_spill] sm:$0xff] %v9847_v13  ;;  %v9856_v42 = vcombine.high %v26_v2, %v30_v1  ;;  %v145_v17 = vld [vmem:[%s13794_s1 + $0x3d0] sm:$0xff] }
  0x57   :  { %916 = vmatprep.subr.bf16.mxu0 %v9805_v47  ;;  %957 = vmatprep.subr.bf16.mxu1 %v9808_v48  ;;  %v9851_v48 = vcombine.low %v34_v32, %v38_v33  ;;  %v9853_v47 = vcombine.high %v25_v63, %v29_v3  ;;  %v150_v32 = vld [vmem:[%s13794_s1 + $0x3f8] sm:$0xff]  ;;  %v9871_v33 = vcombine.low %v25_v63, %v29_v3  ;;  %v141_v63 = vld [vmem:[%s13794_s1 + $0x3b0] sm:$0xff] }
  0x58   :  { %14224 = vst [vmem:[#allocation97_spill] sm:$0xff] %v9856_v42  ;;  %v138_v3 = vld [vmem:[%s13794_s1 + $0x398] sm:$0xff] }
  0x59   :  { %14222 = vst [vmem:[#allocation95_spill] sm:$0xff] %v9851_v48  ;;  %14223 = vst [vmem:[#allocation96_spill] sm:$0xff] %v9853_v47 }
  0x5a   :  { %917 = vmatpush1.bf16.msra.mxu0 %v9823_v58  ;;  %958 = vmatpush1.bf16.msra.mxu1 %v9827_v16  ;;  %14225 = vst [vmem:[#allocation98_spill] sm:$0xff] %v9871_v33  ;;  %v9880_v16 = vcombine.high %v146_v31, %v150_v32  ;;  %v137_v58 = vld [vmem:[%s13794_s1 + $0x390] sm:$0xff] }
  0x5b   :  { %918 = vmatprep.subr.bf16.mxu0 %v9829_v14  ;;  %959 = vmatprep.subr.bf16.mxu1 %v9832_v0  ;;  %v9875_v0 = vcombine.low %v26_v2, %v30_v1  ;;  %v9877_v14 = vcombine.high %v145_v17, %v149_v26  ;;  %v142_v2 = vld [vmem:[%s13794_s1 + $0x3b8] sm:$0xff]  ;;  %v9895_v1 = vcombine.low %v145_v17, %v149_v26  ;;  %v133_v17 = vld [vmem:[%s13794_s1 + $0x370] sm:$0xff] }
  0x5c   :  { %14228 = vst [vmem:[#allocation101_spill] sm:$0xff] %v9880_v16  ;;  %v130_v26 = vld [vmem:[%s13794_s1 + $0x358] sm:$0xff] }
  0x5d   :  { %14226 = vst [vmem:[#allocation99_spill] sm:$0xff] %v9875_v0  ;;  %14227 = vst [vmem:[#allocation100_spill] sm:$0xff] %v9877_v14 }
  0x5e   :  { %919 = vmatpush1.bf16.msra.mxu0 %v9847_v13  ;;  %960 = vmatpush1.bf16.msra.mxu1 %v9851_v48  ;;  %14229 = vst [vmem:[#allocation102_spill] sm:$0xff] %v9895_v1  ;;  %v9904_v48 = vcombine.high %v138_v3, %v142_v2  ;;  %v129_v13 = vld [vmem:[%s13794_s1 + $0x350] sm:$0xff] }
  0x5f   :  { %920 = vmatprep.subr.bf16.mxu0 %v9853_v47  ;;  %961 = vmatprep.subr.bf16.mxu1 %v9856_v42  ;;  %v9899_v42 = vcombine.low %v146_v31, %v150_v32  ;;  %v9901_v47 = vcombine.high %v137_v58, %v141_v63  ;;  %v134_v31 = vld [vmem:[%s13794_s1 + $0x378] sm:$0xff]  ;;  %v9919_v32 = vcombine.low %v137_v58, %v141_v63  ;;  %v125_v58 = vld [vmem:[%s13794_s1 + $0x330] sm:$0xff] }
  0x60   :  { %14232 = vst [vmem:[#allocation105_spill] sm:$0xff] %v9904_v48  ;;  %v122_v63 = vld [vmem:[%s13794_s1 + $0x318] sm:$0xff] }
  0x61   :  { %14230 = vst [vmem:[#allocation103_spill] sm:$0xff] %v9899_v42  ;;  %14231 = vst [vmem:[#allocation104_spill] sm:$0xff] %v9901_v47 }
  0x62   :  { %921 = vmatpush1.bf16.msra.mxu0 %v9871_v33  ;;  %962 = vmatpush1.bf16.msra.mxu1 %v9875_v0  ;;  %14233 = vst [vmem:[#allocation106_spill] sm:$0xff] %v9919_v32  ;;  %v9928_v0 = vcombine.high %v130_v26, %v134_v31  ;;  %v121_v33 = vld [vmem:[%s13794_s1 + $0x310] sm:$0xff] }
  0x63   :  { %922 = vmatprep.subr.bf16.mxu0 %v9877_v14  ;;  %963 = vmatprep.subr.bf16.mxu1 %v9880_v16  ;;  %v9923_v16 = vcombine.low %v138_v3, %v142_v2  ;;  %v9925_v14 = vcombine.high %v129_v13, %v133_v17  ;;  %v126_v3 = vld [vmem:[%s13794_s1 + $0x338] sm:$0xff]  ;;  %v9943_v2 = vcombine.low %v129_v13, %v133_v17  ;;  %v117_v13 = vld [vmem:[%s13794_s1 + $0x2f0] sm:$0xff] }
  0x64   :  { %14236 = vst [vmem:[#allocation109_spill] sm:$0xff] %v9928_v0  ;;  %v114_v17 = vld [vmem:[%s13794_s1 + $0x2d8] sm:$0xff] }
  0x65   :  { %14234 = vst [vmem:[#allocation107_spill] sm:$0xff] %v9923_v16  ;;  %14235 = vst [vmem:[#allocation108_spill] sm:$0xff] %v9925_v14 }
  0x66   :  { %923 = vmatpush2.bf16.msra.mxu0 %v9895_v1  ;;  %964 = vmatpush2.bf16.msra.mxu1 %v9899_v42  ;;  %14237 = vst [vmem:[#allocation110_spill] sm:$0xff] %v9943_v2  ;;  %v9952_v42 = vcombine.high %v122_v63, %v126_v3  ;;  %v113_v1 = vld [vmem:[%s13794_s1 + $0x2d0] sm:$0xff] }
  0x67   :  { %924 = vmatprep.subr.bf16.mxu0 %v9901_v47  ;;  %965 = vmatprep.subr.bf16.mxu1 %v9904_v48  ;;  %v9947_v48 = vcombine.low %v130_v26, %v134_v31  ;;  %v9949_v47 = vcombine.high %v121_v33, %v125_v58  ;;  %v118_v26 = vld [vmem:[%s13794_s1 + $0x2f8] sm:$0xff]  ;;  %v9967_v31 = vcombine.low %v121_v33, %v125_v58  ;;  %v109_v33 = vld [vmem:[%s13794_s1 + $0x2b0] sm:$0xff] }
  0x68   :  { %14240 = vst [vmem:[#allocation113_spill] sm:$0xff] %v9952_v42  ;;  %v106_v58 = vld [vmem:[%s13794_s1 + $0x298] sm:$0xff] }
  0x69   :  { %14238 = vst [vmem:[#allocation111_spill] sm:$0xff] %v9947_v48  ;;  %14239 = vst [vmem:[#allocation112_spill] sm:$0xff] %v9949_v47 }
  0x6a   :  { %925 = vmatpush2.bf16.msra.mxu0 %v9919_v32  ;;  %966 = vmatpush2.bf16.msra.mxu1 %v9923_v16  ;;  %14241 = vst [vmem:[#allocation114_spill] sm:$0xff] %v9967_v31  ;;  %v9976_v16 = vcombine.high %v114_v17, %v118_v26  ;;  %v105_v32 = vld [vmem:[%s13794_s1 + $0x290] sm:$0xff] }
  0x6b   :  { %926 = vmatprep.subr.bf16.mxu0 %v9925_v14  ;;  %967 = vmatprep.subr.bf16.mxu1 %v9928_v0  ;;  %v9971_v0 = vcombine.low %v122_v63, %v126_v3  ;;  %v9973_v14 = vcombine.high %v113_v1, %v117_v13  ;;  %v110_v63 = vld [vmem:[%s13794_s1 + $0x2b8] sm:$0xff]  ;;  %v9991_v3 = vcombine.low %v113_v1, %v117_v13  ;;  %v101_v1 = vld [vmem:[%s13794_s1 + $0x270] sm:$0xff] }
  0x6c   :  { %14244 = vst [vmem:[#allocation117_spill] sm:$0xff] %v9976_v16  ;;  %v98_v13 = vld [vmem:[%s13794_s1 + $0x258] sm:$0xff] }
  0x6d   :  { %14242 = vst [vmem:[#allocation115_spill] sm:$0xff] %v9971_v0  ;;  %14243 = vst [vmem:[#allocation116_spill] sm:$0xff] %v9973_v14 }
  0x6e   :  { %927 = vmatpush2.bf16.msra.mxu0 %v9943_v2  ;;  %968 = vmatpush2.bf16.msra.mxu1 %v9947_v48  ;;  %14245 = vst [vmem:[#allocation118_spill] sm:$0xff] %v9991_v3  ;;  %v10000_v48 = vcombine.high %v106_v58, %v110_v63  ;;  %v97_v2 = vld [vmem:[%s13794_s1 + $0x250] sm:$0xff] }
  0x6f   :  { %928 = vmatprep.subr.bf16.mxu0 %v9949_v47  ;;  %969 = vmatprep.subr.bf16.mxu1 %v9952_v42  ;;  %v9995_v42 = vcombine.low %v114_v17, %v118_v26  ;;  %v9997_v47 = vcombine.high %v105_v32, %v109_v33  ;;  %v102_v17 = vld [vmem:[%s13794_s1 + $0x278] sm:$0xff]  ;;  %v10015_v26 = vcombine.low %v105_v32, %v109_v33  ;;  %v93_v32 = vld [vmem:[%s13794_s1 + $0x230] sm:$0xff] }
  0x70   :  { %14248 = vst [vmem:[#allocation121_spill] sm:$0xff] %v10000_v48  ;;  %v90_v33 = vld [vmem:[%s13794_s1 + $0x218] sm:$0xff] }
  0x71   :  { %14246 = vst [vmem:[#allocation119_spill] sm:$0xff] %v9995_v42  ;;  %14247 = vst [vmem:[#allocation120_spill] sm:$0xff] %v9997_v47 }
  0x72   :  { %929 = vmatpush2.bf16.msra.mxu0 %v9967_v31  ;;  %970 = vmatpush2.bf16.msra.mxu1 %v9971_v0  ;;  %14249 = vst [vmem:[#allocation122_spill] sm:$0xff] %v10015_v26  ;;  %v10024_v0 = vcombine.high %v98_v13, %v102_v17  ;;  %v89_v31 = vld [vmem:[%s13794_s1 + $0x210] sm:$0xff] }
  0x73   :  { %930 = vmatprep.subr.bf16.mxu0 %v9973_v14  ;;  %971 = vmatprep.subr.bf16.mxu1 %v9976_v16  ;;  %v10019_v16 = vcombine.low %v106_v58, %v110_v63  ;;  %v10021_v14 = vcombine.high %v97_v2, %v101_v1  ;;  %v94_v58 = vld [vmem:[%s13794_s1 + $0x238] sm:$0xff]  ;;  %v10039_v63 = vcombine.low %v97_v2, %v101_v1  ;;  %v14261_v1 = vld [vmem:[#allocation52_spill] sm:$0xff] }
  0x74   :  { %14252 = vst [vmem:[#allocation125_spill] sm:$0xff] %v10024_v0  ;;  %v10055_v2 = vcombine.low %v90_v33, %v94_v58 }
  0x75   :  { %14250 = vst [vmem:[#allocation123_spill] sm:$0xff] %v10019_v16  ;;  %14251 = vst [vmem:[#allocation124_spill] sm:$0xff] %v10021_v14 }
  0x76   :  { %931 = vmatpush2.bf16.msra.mxu0 %v9991_v3  ;;  %972 = vmatpush2.bf16.msra.mxu1 %v9995_v42  ;;  %14253 = vst [vmem:[#allocation126_spill] sm:$0xff] %v10039_v63  ;;  %v10048_v42 = vcombine.high %v90_v33, %v94_v58  ;;  %v10051_v3 = vcombine.low %v89_v31, %v93_v32  ;;  %14258 = vst [vmem:[#allocation131_spill] sm:$0xff] %v10055_v2  ;;  %v14265_v33 = vld [vmem:[#allocation56_spill] sm:$0xff]  ;;  %v14266_v58 = vld [vmem:[#allocation57_spill] sm:$0xff] }
  0x77   :  { %932 = vmatprep.subr.bf16.mxu0 %v9997_v47  ;;  %973 = vmatprep.subr.bf16.mxu1 %v10000_v48  ;;  %v10043_v48 = vcombine.low %v98_v13, %v102_v17  ;;  %v10045_v47 = vcombine.high %v89_v31, %v93_v32  ;;  %v14260_v31 = vld [vmem:[#allocation51_spill] sm:$0xff]  ;;  %v14262_v13 = vld [vmem:[#allocation53_spill] sm:$0xff]  ;;  %v14263_v17 = vld [vmem:[#allocation54_spill] sm:$0xff] }
  0x78   :  { %14256 = vst [vmem:[#allocation129_spill] sm:$0xff] %v10048_v42  ;;  %14257 = vst [vmem:[#allocation130_spill] sm:$0xff] %v10051_v3  ;;  %v14264_v32 = vld [vmem:[#allocation55_spill] sm:$0xff] }
  0x79   :  { %14254 = vst [vmem:[#allocation127_spill] sm:$0xff] %v10043_v48  ;;  %14255 = vst [vmem:[#allocation128_spill] sm:$0xff] %v10045_v47 }
  0x7a   :  { %933 = vmatpush2.bf16.msra.mxu0 %v10015_v26  ;;  %974 = vmatpush2.bf16.msra.mxu1 %v10019_v16 }
  0x7b   :  { %934 = vmatprep.subr.bf16.mxu0 %v10021_v14  ;;  %975 = vmatprep.subr.bf16.mxu1 %v10024_v0 }
  0x7e   :  { %935 = vmatpush2.bf16.msra.mxu0 %v10039_v63  ;;  %976 = vmatpush2.bf16.msra.mxu1 %v10043_v48 }
  0x7f   :  { %936 = vmatprep.subr.bf16.mxu0 %v10045_v47  ;;  %977 = vmatprep.subr.bf16.mxu1 %v10048_v42 }
  0x82   :  { %937 = vmatpush2.bf16.msra.mxu0 %v10051_v3  ;;  %978 = vmatpush2.bf16.msra.mxu1 %v10055_v2 }
  0x83   :  { %1710 = vmatprep.subr.bf16.mxu0 %v9297_v4  ;;  %1751 = vmatprep.subr.bf16.mxu1 %v9310_v9 }
  0x85   :  { %939 = vmatmul.mubr.bf16.vlgmr.msra.gmra.mxu0 %v14200_v49  ;;  %980 = vmatmul.mubr.bf16.vlgmr.msra.gmra.mxu1 %v14200_v49  ;;  %v14259_v49 = vld [vmem:[#allocation50_spill] sm:$0xff] }
  0x86   :  { %1711 = vmatpush1.bf16.msra.mxu0 %v9302_v6  ;;  %1752 = vmatpush1.bf16.msra.mxu1 %v9312_v10 }
  0x87   :  { %1712 = vmatprep.subr.bf16.mxu0 %v9314_v11  ;;  %1753 = vmatprep.subr.bf16.mxu1 %v9326_v15 }
  0x8a   :  { %1713 = vmatpush1.bf16.msra.mxu0 %v9339_v19  ;;  %1754 = vmatpush1.bf16.msra.mxu1 %v9343_v20 }
  0x8b   :  { %1714 = vmatprep.subr.bf16.mxu0 %v9345_v21  ;;  %1755 = vmatprep.subr.bf16.mxu1 %v9348_v22 }
  0x8e   :  { %1715 = vmatpush1.bf16.msra.mxu0 %v9363_v27  ;;  %1756 = vmatpush1.bf16.msra.mxu1 %v9367_v28 }
  0x8f   :  { %1716 = vmatprep.subr.bf16.mxu0 %v9369_v29  ;;  %1757 = vmatprep.subr.bf16.mxu1 %v9372_v30 }
  0x92   :  { %1717 = vmatpush1.bf16.msra.mxu0 %v9387_v35  ;;  %1758 = vmatpush1.bf16.msra.mxu1 %v9391_v36 }
  0x93   :  { %1718 = vmatprep.subr.bf16.mxu0 %v9393_v37  ;;  %1759 = vmatprep.subr.bf16.mxu1 %v9396_v38 }
  0x96   :  { %1719 = vmatpush1.bf16.msra.mxu0 %v9411_v43  ;;  %1760 = vmatpush1.bf16.msra.mxu1 %v9415_v44 }
  0x97   :  { %1720 = vmatprep.subr.bf16.mxu0 %v9417_v45  ;;  %1761 = vmatprep.subr.bf16.mxu1 %v9420_v46 }
  0x9a   :  { %1721 = vmatpush1.bf16.msra.mxu0 %v9435_v51  ;;  %1762 = vmatpush1.bf16.msra.mxu1 %v9439_v52  ;;  %v7678_v52 = vld [vmem:[%s13795_s0 + $0x180] ss:$8 sm:$0xf0] }
  0x9b   :  { %1722 = vmatprep.subr.bf16.mxu0 %v9441_v53  ;;  %1763 = vmatprep.subr.bf16.mxu1 %v9444_v54 }
  0x9e   :  { %1723 = vmatpush1.bf16.msra.mxu0 %v9459_v59  ;;  %1764 = vmatpush1.bf16.msra.mxu1 %v9463_v60  ;;  %v7675_v60 = vld [vmem:[%s13795_s0 + $0x140] ss:$8 sm:$0xf] }
  0x9f   :  { %1724 = vmatprep.subr.bf16.mxu0 %v9465_v61  ;;  %1765 = vmatprep.subr.bf16.mxu1 %v9468_v62  ;;  %v7674_v62 = vld [vmem:[%s13795_s0 + $0x100] ss:$8 sm:$0xf0] }
  0xa2   :  { %1725 = vmatpush1.bf16.msra.mxu0 %v9483_v5  ;;  %1766 = vmatpush1.bf16.msra.mxu1 %v9487_v7  ;;  %v7673_v5 = vld [vmem:[%s13795_s0 + $0x100] ss:$8 sm:$0xf] }
  0xa3   :  { %1726 = vmatprep.subr.bf16.mxu0 %v9489_v8  ;;  %1767 = vmatprep.subr.bf16.mxu1 %v9492_v12 }
  0xa6   :  { %1727 = vmatpush2.bf16.msra.mxu0 %v9507_v18  ;;  %1768 = vmatpush2.bf16.msra.mxu1 %v9511_v23 }
  0xa7   :  { %1728 = vmatprep.subr.bf16.mxu0 %v9513_v24  ;;  %1769 = vmatprep.subr.bf16.mxu1 %v9516_v25 }
  0xaa   :  { %1729 = vmatpush2.bf16.msra.mxu0 %v9531_v34  ;;  %1770 = vmatpush2.bf16.msra.mxu1 %v9535_v39 }
  0xab   :  { %1730 = vmatprep.subr.bf16.mxu0 %v9537_v40  ;;  %1771 = vmatprep.subr.bf16.mxu1 %v9540_v41 }
  0xae   :  { %1731 = vmatpush2.bf16.msra.mxu0 %v9555_v50  ;;  %1772 = vmatpush2.bf16.msra.mxu1 %v9559_v55  ;;  %v14267_v55 = vld [vmem:[#allocation58_spill] sm:$0xff]  ;;  %v1007_v50 = vlaneseq }
  0xaf   :  { %1732 = vmatprep.subr.bf16.mxu0 %v9561_v56  ;;  %1773 = vmatprep.subr.bf16.mxu1 %v9564_v57  ;;  %v14268_v56 = vld [vmem:[#allocation59_spill] sm:$0xff]  ;;  %v14269_v57 = vld [vmem:[#allocation60_spill] sm:$0xff] }
  0xb0   :  { %v10128_v41 = vshrl.u32 %v1007_v50, 7 }
  0xb2   :  { %1733 = vmatpush2.bf16.msra.mxu0 %v14259_v49  ;;  %1774 = vmatpush2.bf16.msra.mxu1 %v14260_v31  ;;  %v14270_v49 = vld [vmem:[#allocation61_spill] sm:$0xff]  ;;  %v14271_v31 = vld [vmem:[#allocation62_spill] sm:$0xff] }
  0xb3   :  { %1734 = vmatprep.subr.bf16.mxu0 %v14261_v1  ;;  %1775 = vmatprep.subr.bf16.mxu1 %v14262_v13  ;;  %v14272_v1 = vld [vmem:[#allocation63_spill] sm:$0xff]  ;;  %v14273_v13 = vld [vmem:[#allocation64_spill] sm:$0xff] }
  0xb6   :  { %1735 = vmatpush2.bf16.msra.mxu0 %v14263_v17  ;;  %1776 = vmatpush2.bf16.msra.mxu1 %v14264_v32  ;;  %v14274_v17 = vld [vmem:[#allocation65_spill] sm:$0xff]  ;;  %v14275_v32 = vld [vmem:[#allocation66_spill] sm:$0xff] }
  0xb7   :  { %1736 = vmatprep.subr.bf16.mxu0 %v14265_v33  ;;  %1777 = vmatprep.subr.bf16.mxu1 %v14266_v58  ;;  %v14276_v33 = vld [vmem:[#allocation67_spill] sm:$0xff]  ;;  %v14277_v58 = vld [vmem:[#allocation68_spill] sm:$0xff] }
  0xba   :  { %1737 = vmatpush2.bf16.msra.mxu0 %v14267_v55  ;;  %1778 = vmatpush2.bf16.msra.mxu1 %v14268_v56  ;;  %v14278_v55 = vld [vmem:[#allocation69_spill] sm:$0xff]  ;;  %v9269_v56 = vmov 1966171168  }
  0xbb   :  { %1738 = vmatprep.subr.bf16.mxu0 %v14269_v57  ;;  %1779 = vmatprep.subr.bf16.mxu1 %v14270_v49  ;;  %v1005_v57 = vunpack.c.l.s4 %v9269_v56 }
  0xbd   :  { %v1006_v49 = vunpack.c.0.s8 %v1005_v57 }
  0xbe   :  { %1739 = vmatpush2.bf16.msra.mxu0 %v14271_v31  ;;  %1780 = vmatpush2.bf16.msra.mxu1 %v14272_v1 }
  0xbf   :  { %1740 = vmatprep.subr.bf16.mxu0 %v14273_v13  ;;  %1781 = vmatprep.subr.bf16.mxu1 %v14274_v17  ;;  %v10131_v13 = vsub.s32 %v1006_v49, %v10128_v41 }
  0xc1   :  { %14279 = vst [vmem:[#allocation132_spill] sm:$0xff] %v10131_v13 }
  0xc2   :  { %1741 = vmatpush2.bf16.msra.mxu0 %v14275_v32  ;;  %1782 = vmatpush2.bf16.msra.mxu1 %v14276_v33 }
  0xc3   :  { %1792 = vmatprep.subr.bf16.mxu0 %v14277_v58  ;;  %1833 = vmatprep.subr.bf16.mxu1 %v14278_v55 }
 0x105   :  { %v858_v31 = vpop.f32.mrf.mxu0  ;;  %v899_v1 = vpop.f32.mrf.mxu1 }
 0x107   :  { %v860_v17 = vpop.f32.mrf.mxu0  ;;  %v901_v39 = vpop.f32.mrf.mxu1 }
 0x108   :  { %v996_v40 = vcombine.low %v858_v31, %v860_v17  ;;  %v997_v32 = vcombine.high %v858_v31, %v860_v17  ;;  %v998_v33 = vcombine.low %v899_v1, %v901_v39  ;;  %v999_v34 = vcombine.high %v899_v1, %v901_v39  ;;  %v151_v39 = vld [vmem:[%s13795_s0] ss:$8 sm:$0xf] }
 0x109   :  { %v862_v58 = vpop.f32.mrf.mxu0  ;;  %v903_v25 = vpop.f32.mrf.mxu1  ;;  %v7670_v1 = vld [vmem:[%s13795_s0 + $0x80] ss:$8 sm:$0xf0] }
 0x10a   :  { %v1010_v55 = vrot.slane %v996_v40, %v10131_v13  ;;  %v1017_v56 = vrot.slane %v997_v32, %v10131_v13  ;;  %v1024_v50 = vrot.slane %v998_v33, %v10131_v13  ;;  %v1031_v57 = vrot.slane %v999_v34, %v10131_v13  ;;  %v152_v25 = vld [vmem:[%s13795_s0] ss:$8 sm:$0xf0] }
 0x10b   :  { %v863_v24 = vpop.f32.mrf.mxu0  ;;  %v904_v23 = vpop.f32.mrf.mxu1  ;;  %v7671_v33 = vld [vmem:[%s13795_s0 + $0xc0] ss:$8 sm:$0xf] }
 0x10c   :  { %v1060_v49 = vcombine.low %v1010_v55, %v1024_v50  ;;  %v1061_v18 = vcombine.high %v1010_v55, %v1024_v50  ;;  %v1062_v12 = vcombine.low %v1017_v56, %v1031_v57  ;;  %v1063_v8 = vcombine.high %v1017_v56, %v1031_v57  ;;  %v7667_v24 = vld [vmem:[%s13795_s0 + $0x40] ss:$8 sm:$0xf] }
 0x10d   :  { %v7668_v23 = vld [vmem:[%s13795_s0 + $0x40] ss:$8 sm:$0xf0] }
 0x10e   :  { %v7669_v55 = vld [vmem:[%s13795_s0 + $0x80] ss:$8 sm:$0xf]  ;;  %v157_v59 = vor.u32 %v7668_v23, %v7667_v24  ;;  %v1088_v44 = vrot.slane %v1061_v18, %v10131_v13 }
 0x10f   :  { %v7672_v58 = vld [vmem:[%s13795_s0 + $0xc0] ss:$8 sm:$0xf0]  ;;  %v161_v54 = vor.u32 %v7670_v1, %v7669_v55  ;;  %v1074_v1 = vrot.slane %v1060_v49, %v10131_v13 }
 0x110   :  { %v165_v53 = vor.u32 %v7672_v58, %v7671_v33  ;;  %v1081_v33 = vrot.slane %v1062_v12, %v10131_v13  ;;  %v169_v58 = vor.u32 %v7674_v62, %v7673_v5 }
 0x145   :  { %v940_v31 = vpop.f32.mrf.mxu0  ;;  %v981_v17 = vpop.f32.mrf.mxu1 }
 0x147   :  { %v942_v7 = vpop.f32.mrf.mxu0  ;;  %v983_v32 = vpop.f32.mrf.mxu1 }
 0x148   :  { %v1000_v34 = vcombine.low %v940_v31, %v942_v7  ;;  %v1001_v40 = vcombine.high %v940_v31, %v942_v7  ;;  %v1002_v56 = vcombine.low %v981_v17, %v983_v32  ;;  %v1003_v50 = vcombine.high %v981_v17, %v983_v32  ;;  %v7676_v17 = vld [vmem:[%s13795_s0 + $0x140] ss:$8 sm:$0xf0] }
 0x149   :  { %v944_v7 = vpop.f32.mrf.mxu0  ;;  %v985_v61 = vpop.f32.mrf.mxu1 }
 0x14a   :  { %v1038_v57 = vrot.slane %v1000_v34, %v10131_v13  ;;  %v1045_v31 = vrot.slane %v1001_v40, %v10131_v13  ;;  %v1052_v34 = vrot.slane %v1002_v56, %v10131_v13  ;;  %v1059_v40 = vrot.slane %v1003_v50, %v10131_v13  ;;  %v7677_v61 = vld [vmem:[%s13795_s0 + $0x180] ss:$8 sm:$0xf] }
 0x14b   :  { %v945_v32 = vpop.f32.mrf.mxu0  ;;  %v153_v7 = vor.u32 %v152_v25, %v151_v39  ;;  %v986_v51 = vpop.f32.mrf.mxu1  ;;  %v7679_v56 = vld [vmem:[%s13795_s0 + $0x1c0] ss:$8 sm:$0xf]  ;;  %v173_v50 = vor.u32 %v7676_v17, %v7675_v60 }
 0x14c   :  { %v7680_v39 = vld [vmem:[%s13795_s0 + $0x1c0] ss:$8 sm:$0xf0]  ;;  %v1064_v25 = vcombine.low %v1038_v57, %v1052_v34  ;;  %v1065_v24 = vcombine.high %v1038_v57, %v1052_v34  ;;  %v1066_v23 = vcombine.low %v1045_v31, %v1059_v40  ;;  %v1067_v55 = vcombine.high %v1045_v31, %v1059_v40 }
 0x14d   :  { %v1095_v57 = vrot.slane %v1063_v8, %v10131_v13  ;;  %v177_v34 = vor.u32 %v7678_v52, %v7677_v61  ;;  %v181_v31 = vor.u32 %v7680_v39, %v7679_v56 }
 0x14e   :  { %v1102_v51 = vrot.slane %v1064_v25, %v10131_v13  ;;  %v1109_v32 = vrot.slane %v1066_v23, %v10131_v13  ;;  %v1116_v46 = vrot.slane %v1065_v24, %v10131_v13  ;;  %v1123_v45 = vrot.slane %v1067_v55, %v10131_v13 }
 0x150   :  { %v1124_v40 = vcombine.low %v1074_v1, %v1102_v51  ;;  %v1125_v49 = vcombine.high %v1074_v1, %v1102_v51  ;;  %v1126_v43 = vcombine.low %v1081_v33, %v1109_v32  ;;  %v1127_v12 = vcombine.high %v1081_v33, %v1109_v32 }
 0x151   :  { %v1128_v62 = vcombine.low %v1088_v44, %v1116_v46  ;;  %v1129_v60 = vcombine.high %v1088_v44, %v1116_v46  ;;  %v1130_v5 = vcombine.low %v1095_v57, %v1123_v45  ;;  %v1131_v17 = vcombine.high %v1095_v57, %v1123_v45 }
 0x152   :  { %v10197_v25 = vadd.f32 %v1124_v40, %v153_v7  ;;  %v10199_v23 = vadd.f32 %v1125_v49, %v161_v54  ;;  %v10201_v24 = vadd.f32 %v1126_v43, %v169_v58  ;;  %v10209_v8 = vadd.f32 %v1127_v12, %v177_v34 }
 0x153   :  { %v10203_v55 = vadd.f32 %v1128_v62, %v157_v59  ;;  %v10205_v18 = vadd.f32 %v1129_v60, %v165_v53  ;;  %v10207_v52 = vadd.f32 %v1130_v5, %v173_v50  ;;  %v10213_v46 = vadd.f32 %v1131_v17, %v181_v31 }
 0x154   :  { %v7809_v61 = vmul.f32 -1.442695, %v10197_v25  ;;  %v7811_v44 = vmul.f32 -1.442695, %v10199_v23  ;;  %v7813_v43 = vmul.f32 -1.442695, %v10201_v24 }
 0x155   :  { %v7810_v45 = vmul.f32 -1.442695, %v10203_v55  ;;  %v7812_v54 = vmul.f32 -1.442695, %v10205_v18  ;;  %v1204_v53 = vrot.slane %v10197_v25, 2  ;;  %v1205_v7 = vrot.slane %v10203_v55, 2 }
 0x156   :  { %8244 = vpow2.f32 %v7809_v61  ;;  %v7814_v59 = vmul.f32 -1.442695, %v10207_v52  ;;  %v7815_v56 = vmul.f32 -1.442695, %v10209_v8  ;;  %v1206_v39 = vrot.slane %v10199_v23, 2 }
 0x157   :  { %8246 = vpow2.f32 %v7810_v45  ;;  %v7816_v1 = vmul.f32 -1.442695, %v10213_v46  ;;  %v1207_v33 = vrot.slane %v10205_v18, 2  ;;  %v1208_v58 = vrot.slane %v10201_v24, 2 }
 0x158   :  { %8248 = vpow2.f32 %v7811_v44  ;;  %v7817_v50 = vmul.f32 -1.442695, %v1204_v53  ;;  %v1209_v51 = vrot.slane %v10207_v52, 2  ;;  %v7818_v32 = vmul.f32 -1.442695, %v1205_v7 }
 0x159   :  { %8250 = vpow2.f32 %v7812_v54  ;;  %v1210_v57 = vrot.slane %v10209_v8, 2  ;;  %v7819_v34 = vmul.f32 -1.442695, %v1206_v39  ;;  %v1211_v31 = vrot.slane %v10213_v46, 2 }
 0x15a   :  { %8252 = vpow2.f32 %v7813_v43  ;;  %v7820_v40 = vmul.f32 -1.442695, %v1207_v33  ;;  %v7821_v49 = vmul.f32 -1.442695, %v1208_v58  ;;  %v7822_v12 = vmul.f32 -1.442695, %v1209_v51 }
 0x15b   :  { %8254 = vpow2.f32 %v7814_v59  ;;  %v7823_v62 = vmul.f32 -1.442695, %v1210_v57  ;;  %v7824_v60 = vmul.f32 -1.442695, %v1211_v31 }
 0x15c   :  { %8256 = vpow2.f32 %v7815_v56 }
 0x15d   :  { %8258 = vpow2.f32 %v7816_v1 }
 0x15e   :  { %8260 = vpow2.f32 %v7817_v50 }
 0x15f   :  { %8262 = vpow2.f32 %v7818_v32 }
 0x160   :  { %8264 = vpow2.f32 %v7819_v34 }
 0x161   :  { %8266 = vpow2.f32 %v7820_v40 }
 0x162   :  { %8268 = vpow2.f32 %v7821_v49 }
 0x163   :  { %v8245_v5 = vpop.eup %8244  ;;  %8270 = vpow2.f32 %v7822_v12 }
 0x164   :  { %v8247_v17 = vpop.eup %8246  ;;  %v1172_v61 = vadd.f32 1.0, %v8245_v5  ;;  %8272 = vpow2.f32 %v7823_v62 }
 0x165   :  { %v8249_v44 = vpop.eup %8248  ;;  %v1173_v45 = vadd.f32 1.0, %v8247_v17  ;;  %8274 = vpow2.f32 %v7824_v60 }
 0x166   :  { %v8251_v54 = vpop.eup %8250  ;;  %v1174_v43 = vadd.f32 1.0, %v8249_v44  ;;  %8276 = vrcp.f32 %v1172_v61  ;;  %v9270_v44 = vmov 0.0  }
 0x167   :  { %v8253_v53 = vpop.eup %8252  ;;  %v1175_v59 = vadd.f32 1.0, %v8251_v54  ;;  %8278 = vrcp.f32 %v1173_v45  ;;  %v1358_v45 = vcombine.low %v9270_v44, %v9270_v44 }
 0x168   :  { %v8255_v7 = vpop.eup %8254  ;;  %v1176_v56 = vadd.f32 1.0, %v8253_v53  ;;  %8280 = vrcp.f32 %v1174_v43  ;;  %v1268_v53 = vrot.slane %v10197_v25, 4 }
 0x169   :  { %v8257_v39 = vpop.eup %8256  ;;  %v1177_v1 = vadd.f32 1.0, %v8255_v7  ;;  %8282 = vrcp.f32 %v1175_v59 }
 0x16a   :  { %v8259_v33 = vpop.eup %8258  ;;  %v1178_v58 = vadd.f32 1.0, %v8257_v39  ;;  %8284 = vrcp.f32 %v1176_v56  ;;  %v1269_v56 = vrot.slane %v10203_v55, 4 }
 0x16b   :  { %v8261_v50 = vpop.eup %8260  ;;  %v1179_v51 = vadd.f32 1.0, %v8259_v33  ;;  %8286 = vrcp.f32 %v1177_v1  ;;  %v1270_v1 = vrot.slane %v10199_v23, 4 }
 0x16c   :  { %v8263_v32 = vpop.eup %8262  ;;  %8288 = vrcp.f32 %v1178_v58  ;;  %v1244_v57 = vadd.f32 1.0, %v8261_v50  ;;  %v1271_v58 = vrot.slane %v10205_v18, 4  ;;  %v1366_v50 = vrot.slane %v1358_v45, %v10131_v13 }
 0x16d   :  { %v8265_v34 = vpop.eup %8264  ;;  %8290 = vrcp.f32 %v1179_v51  ;;  %v1245_v31 = vadd.f32 1.0, %v8263_v32  ;;  %v1272_v32 = vrot.slane %v10201_v24, 4 }
 0x16e   :  { %v8267_v40 = vpop.eup %8266  ;;  %v1246_v49 = vadd.f32 1.0, %v8265_v34  ;;  %8292 = vrcp.f32 %v1244_v57  ;;  %v1292_v57 = vrot.slane %v10197_v25, 6  ;;  %v1295_v25 = vrot.slane %v10205_v18, 6 }
 0x16f   :  { %v8269_v12 = vpop.eup %8268  ;;  %v1247_v62 = vadd.f32 1.0, %v8267_v40  ;;  %8294 = vrcp.f32 %v1245_v31  ;;  %v1273_v31 = vrot.slane %v10207_v52, 4  ;;  %v1293_v40 = vrot.slane %v10203_v55, 6 }
 0x170   :  { %v8271_v60 = vpop.eup %8270  ;;  %v1248_v5 = vadd.f32 1.0, %v8269_v12  ;;  %8296 = vrcp.f32 %v1246_v49  ;;  %v1359_v49 = vcombine.high %v9270_v44, %v9270_v44  ;;  %v1296_v55 = vrot.slane %v10201_v24, 6 }
 0x171   :  { %v8273_v17 = vpop.eup %8272  ;;  %v1249_v61 = vadd.f32 1.0, %v8271_v60  ;;  %8298 = vrcp.f32 %v1247_v62  ;;  %v1274_v62 = vrot.slane %v10209_v8, 4  ;;  %v1294_v60 = vrot.slane %v10199_v23, 6 }
 0x172   :  { %v8275_v54 = vpop.eup %8274  ;;  %v1250_v43 = vadd.f32 1.0, %v8273_v17  ;;  %8300 = vrcp.f32 %v1248_v5  ;;  %v1275_v17 = vrot.slane %v10213_v46, 4  ;;  %v7825_v44 = vmul.f32 -1.442695, %v1292_v57 }
 0x173   :  { %v10230_v59 = vpop.eup %8276  ;;  %v1251_v7 = vadd.f32 1.0, %v8275_v54  ;;  %8302 = vrcp.f32 %v1249_v61  ;;  %v1374_v61 = vcombine.high %v1366_v50, %v1366_v50  ;;  %v1373_v23 = vrot.slane %v1359_v49, %v10131_v13 }
 0x174   :  { %v10233_v39 = vpop.eup %8278  ;;  %8304 = vrcp.f32 %v1250_v43  ;;  %v1297_v43 = vrot.slane %v10207_v52, 6  ;;  %v1382_v18 = vrot.slane %v1366_v50, %v10131_v13  ;;  %v7828_v24 = vmul.f32 -1.442695, %v1295_v25 }
 0x175   :  { %v10236_v33 = vpop.eup %8280  ;;  %8306 = vrcp.f32 %v1251_v7  ;;  %v1396_v57 = vrot.slane %v1374_v61, %v10131_v13  ;;  %v7829_v52 = vmul.f32 -1.442695, %v1296_v55  ;;  %v1375_v37 = vcombine.high %v1373_v23, %v1373_v23 }
 0x176   :  { %v10240_v51 = vpop.eup %8282  ;;  %8308 = vtanh.f32 %v1268_v53  ;;  %v7826_v53 = vmul.f32 -1.442695, %v1293_v40  ;;  %v7830_v49 = vmul.f32 -1.442695, %v1297_v43  ;;  %v1389_v55 = vrot.slane %v1373_v23, %v10131_v13 }
 0x177   :  { %v10244_v34 = vpop.eup %8284  ;;  %8310 = vtanh.f32 %v1269_v56  ;;  %v1298_v56 = vrot.slane %v10209_v8, 6  ;;  %v1404_v8 = vcombine.high %v1382_v18, %v1382_v18 }
 0x178   :  { %v10248_v12 = vpop.eup %8286  ;;  %8312 = vtanh.f32 %v1270_v1  ;;  %v7827_v1 = vmul.f32 -1.442695, %v1294_v60 }
 0x179   :  { %v10252_v5 = vpop.eup %8288  ;;  %8314 = vtanh.f32 %v1271_v58 }
 0x17a   :  { %v10256_v45 = vpop.eup %8290  ;;  %8316 = vtanh.f32 %v1272_v32  ;;  %v1299_v32 = vrot.slane %v10213_v46, 6 }
 0x17b   :  { %v8293_v54 = vpop.eup %8292  ;;  %8318 = vtanh.f32 %v1273_v31 }
 0x17c   :  { %v8295_v7 = vpop.eup %8294  ;;  %8320 = vtanh.f32 %v1274_v62  ;;  %v7831_v62 = vmul.f32 -1.442695, %v1298_v56  ;;  %v7832_v50 = vmul.f32 -1.442695, %v1299_v32  ;;  %v1416_v46 = vmul.f32 %v8293_v54, %v1382_v18 }
 0x17d   :  { %v8297_v58 = vpop.eup %8296  ;;  %8322 = vtanh.f32 %v1275_v17  ;;  %v1406_v17 = vcombine.high %v1396_v57, %v1396_v57  ;;  %v1417_v61 = vmul.f32 %v8295_v7, %v1396_v57 }
 0x17e   :  { %v8299_v31 = vpop.eup %8298  ;;  %8324 = vpow2.f32 %v7825_v44  ;;  %v1418_v43 = vmul.f32 %v8297_v58, %v1404_v8 }
 0x17f   :  { %v8301_v40 = vpop.eup %8300  ;;  %8326 = vpow2.f32 %v7826_v53  ;;  %v1419_v32 = vmul.f32 %v8299_v31, %v1406_v17 }
 0x180   :  { %v8303_v38 = vpop.eup %8302  ;;  %8328 = vpow2.f32 %v7827_v1  ;;  %v1403_v1 = vrot.slane %v1375_v37, %v10131_v13 }
 0x181   :  { %v8305_v60 = vpop.eup %8304  ;;  %8330 = vpow2.f32 %v7828_v24 }
 0x182   :  { %v8307_v36 = vpop.eup %8306  ;;  %8332 = vpow2.f32 %v7829_v52  ;;  %v1420_v52 = vmul.f32 %v8301_v40, %v1389_v55  ;;  %v1421_v57 = vmul.f32 %v8303_v38, %v1403_v1 }
 0x183   :  { %v8309_v25 = vpop.eup %8308  ;;  %8334 = vpow2.f32 %v7830_v49 }
 0x184   :  { %v8311_v44 = vpop.eup %8310  ;;  %8336 = vpow2.f32 %v7831_v62  ;;  %v1424_v53 = vmul.f32 %v8309_v25, %v10230_v59 }
 0x185   :  { %v8313_v56 = vpop.eup %8312  ;;  %8338 = vpow2.f32 %v7832_v50  ;;  %v1425_v24 = vmul.f32 %v8311_v44, %v10233_v39 }
 0x186   :  { %v8315_v35 = vpop.eup %8314  ;;  %v1426_v54 = vmul.f32 %v8313_v56, %v10236_v33  ;;  %v10270_v18 = vadd.f32 %v1424_v53, %v1416_v46 }
 0x187   :  { %v8317_v7 = vpop.eup %8316  ;;  %v1427_v23 = vmul.f32 %v8315_v35, %v10240_v51  ;;  %v10273_v58 = vadd.f32 %v1425_v24, %v1417_v61  ;;  %v1405_v35 = vcombine.high %v1389_v55, %v1389_v55 }
 0x188   :  { %v8319_v59 = vpop.eup %8318  ;;  %v1428_v49 = vmul.f32 %v8317_v7, %v10244_v34  ;;  %v10276_v62 = vadd.f32 %v1426_v54, %v1418_v43  ;;  %8340 = vtanh.f32 %v10270_v18  ;;  %v1407_v34 = vcombine.high %v1403_v1, %v1403_v1 }
 0x189   :  { %v8321_v37 = vpop.eup %8320  ;;  %v1429_v39 = vmul.f32 %v8319_v59, %v10248_v12  ;;  %v10280_v31 = vadd.f32 %v1427_v23, %v1419_v32  ;;  %8342 = vtanh.f32 %v10273_v58  ;;  %v1422_v61 = vmul.f32 %v8305_v60, %v1405_v35 }
 0x18a   :  { %14280 = vst [vmem:[#allocation133_spill] sm:$0xff] %v10276_v62  ;;  %v8323_v33 = vpop.eup %8322  ;;  %v10283_v38 = vadd.f32 %v1428_v49, %v1420_v52  ;;  %8344 = vtanh.f32 %v10276_v62  ;;  %v1423_v43 = vmul.f32 %v8307_v36, %v1407_v34  ;;  %v1430_v1 = vmul.f32 %v8321_v37, %v10252_v5 }
 0x18b   :  { %14281 = vst [vmem:[#allocation134_spill] sm:$0xff] %v10280_v31  ;;  %v8325_v51 = vpop.eup %8324  ;;  %v10286_v40 = vadd.f32 %v1429_v39, %v1421_v57  ;;  %8346 = vtanh.f32 %v10280_v31  ;;  %v1431_v52 = vmul.f32 %v8323_v33, %v10256_v45  ;;  %v10300_v39 = vsub.s32 1, %v10128_v41 }
 0x18c   :  { %14282 = vst [vmem:[#allocation135_spill] sm:$0xff] %v10283_v38  ;;  %v8327_v8 = vpop.eup %8326  ;;  %v1332_v50 = vadd.f32 1.0, %v8325_v51  ;;  %8348 = vtanh.f32 %v10283_v38  ;;  %v10293_v57 = vadd.f32 %v1430_v1, %v1422_v61  ;;  %v10303_v35 = vsub.s32 0, %v10128_v41 }
 0x18d   :  { %14283 = vst [vmem:[#allocation136_spill] sm:$0xff] %v10286_v40  ;;  %v8329_v12 = vpop.eup %8328  ;;  %v1333_v17 = vadd.f32 1.0, %v8327_v8  ;;  %8350 = vtanh.f32 %v10286_v40  ;;  %v10295_v23 = vadd.f32 %v1431_v52, %v1423_v43  ;;  %14286 = vst [vmem:[#allocation139_spill] sm:$0xff] %v10300_v39 }
 0x18e   :  { %v8331_v46 = vpop.eup %8330  ;;  %v1334_v25 = vadd.f32 1.0, %v8329_v12  ;;  %8352 = vrcp.f32 %v1332_v50  ;;  %14284 = vst [vmem:[#allocation137_spill] sm:$0xff] %v10293_v57  ;;  %14287 = vst [vmem:[#allocation140_spill] sm:$0xff] %v10303_v35 }
 0x18f   :  { %v8333_v44 = vpop.eup %8332  ;;  %v1335_v55 = vadd.f32 1.0, %v8331_v46  ;;  %8354 = vrcp.f32 %v1333_v17  ;;  %14285 = vst [vmem:[#allocation138_spill] sm:$0xff] %v10295_v23 }
 0x190   :  { %v8335_v53 = vpop.eup %8334  ;;  %v1336_v56 = vadd.f32 1.0, %v8333_v44  ;;  %8356 = vrcp.f32 %v1334_v25 }
 0x191   :  { %v8337_v32 = vpop.eup %8336  ;;  %v1337_v24 = vadd.f32 1.0, %v8335_v53  ;;  %8358 = vrcp.f32 %v1335_v55 }
 0x192   :  { %v8339_v54 = vpop.eup %8338  ;;  %v1338_v7 = vadd.f32 1.0, %v8337_v32  ;;  %8360 = vrcp.f32 %v1336_v56 }
 0x193   :  { %v1339_v60 = vadd.f32 1.0, %v8339_v54  ;;  %8362 = vrcp.f32 %v1337_v24 }
 0x194   :  { %8364 = vrcp.f32 %v1338_v7 }
 0x195   :  { %v8341_v36 = vpop.eup %8340  ;;  %8366 = vrcp.f32 %v1339_v60 }
 0x196   :  { %v8343_v59 = vpop.eup %8342  ;;  %8368 = vtanh.f32 %v10293_v57 }
 0x197   :  { %v8345_v5 = vpop.eup %8344  ;;  %8370 = vtanh.f32 %v10295_v23 }
 0x198   :  { %v8347_v49 = vpop.eup %8346 }
 0x199   :  { %v8349_v45 = vpop.eup %8348 }
 0x19a   :  { %v8351_v37 = vpop.eup %8350 }
 0x19b   :  { %v8353_v33 = vpop.eup %8352 }
 0x19c   :  { %v8355_v51 = vpop.eup %8354  ;;  %v1448_v34 = vmul.f32 %v8353_v33, %v8341_v36 }
 0x19d   :  { %v8357_v8 = vpop.eup %8356  ;;  %v1449_v50 = vmul.f32 %v8355_v51, %v8343_v59 }
 0x19e   :  { %v8359_v12 = vpop.eup %8358  ;;  %v1450_v17 = vmul.f32 %v8357_v8, %v8345_v5  ;;  %v10306_v46 = vrot.slane %v1448_v34, %v10300_v39  ;;  %v10312_v41 = vrot.slane %v1448_v34, %v10303_v35 }
 0x19f   :  { %v8361_v25 = vpop.eup %8360  ;;  %v1451_v61 = vmul.f32 %v8359_v12, %v8347_v49  ;;  %v10309_v44 = vrot.slane %v1449_v50, %v10300_v39  ;;  %v10315_v55 = vrot.slane %v1449_v50, %v10303_v35 }
 0x1a0   :  { %v8363_v43 = vpop.eup %8362  ;;  %v1452_v53 = vmul.f32 %v8361_v25, %v8349_v45  ;;  %v10318_v56 = vrot.slane %v1450_v17, %v10300_v39  ;;  %v1545_v1 = vpack.c.bf16 %v10306_v46, %v10306_v46  ;;  %v10323_v32 = vrot.slane %v1450_v17, %v10303_v35 }
 0x1a1   :  { %v8365_v24 = vpop.eup %8364  ;;  %v1453_v52 = vmul.f32 %v8363_v43, %v8351_v37  ;;  %v10326_v54 = vrot.slane %v1451_v61, %v10300_v39  ;;  %v1547_v7 = vpack.c.bf16 %v10309_v44, %v10309_v44  ;;  %v10331_v60 = vrot.slane %v1451_v61, %v10303_v35 }
 0x1a2   :  { %v8367_v36 = vpop.eup %8366  ;;  %v10334_v59 = vrot.slane %v1452_v53, %v10300_v39  ;;  %v1549_v5 = vpack.c.bf16 %v10318_v56, %v10318_v56  ;;  %v1577_v49 = vunpack.c.l.b16 %v1545_v1  ;;  %v10339_v45 = vrot.slane %v1452_v53, %v10303_v35 }
 0x1a3   :  { %v8369_v37 = vpop.eup %8368  ;;  %v10342_v33 = vrot.slane %v1453_v52, %v10300_v39  ;;  %v1551_v51 = vpack.c.bf16 %v10326_v54, %v10326_v54  ;;  %v1579_v34 = vunpack.c.l.b16 %v1547_v7  ;;  %v10347_v8 = vrot.slane %v1453_v52, %v10303_v35 }
 0x1a4   :  { %v8371_v50 = vpop.eup %8370  ;;  %v1454_v12 = vmul.f32 %v8369_v37, %v8365_v24  ;;  %v1553_v17 = vpack.c.bf16 %v10334_v59, %v10334_v59  ;;  %v1581_v25 = vunpack.c.l.b16 %v1549_v5  ;;  %v1544_v61 = vpack.c.bf16 %v10312_v41, %v10312_v41 }
 0x1a5   :  { %v1455_v43 = vmul.f32 %v8371_v50, %v8367_v36  ;;  %v1555_v53 = vpack.c.bf16 %v10342_v33, %v10342_v33  ;;  %v1583_v1 = vunpack.c.l.b16 %v1551_v51  ;;  %v1692_v23 = vrot.slane %v1579_v34, 7 }
 0x1a6   :  { %v10356_v7 = vrot.slane %v1454_v12, %v10300_v39  ;;  %v1585_v52 = vunpack.c.l.b16 %v1553_v17  ;;  %v1694_v57 = vrot.slane %v1581_v25, 6  ;;  %v10359_v24 = vrot.slane %v1454_v12, %v10303_v35 }
 0x1a7   :  { %v10362_v37 = vrot.slane %v1455_v43, %v10300_v39  ;;  %v1587_v5 = vunpack.c.l.b16 %v1555_v53  ;;  %v1693_v40 = vsel %vm1672_vm0, %v1692_v23, %v1577_v49  ;;  %v1696_v36 = vrot.slane %v1583_v1, 5 }
 0x1a8   :  { %v1557_v50 = vpack.c.bf16 %v10356_v7, %v10356_v7  ;;  %v1695_v51 = vsel %vm1675_vm1, %v1694_v57, %v1693_v40  ;;  %v1698_v34 = vrot.slane %v1585_v52, 4  ;;  %v10369_v38 = vrot.slane %v1455_v43, %v10303_v35  ;;  %v1621_v57 = vld [vmem:[%s13796_s2 + $0x10] sm:$0x11] }
 0x1a9   :  { %v1559_v12 = vpack.c.bf16 %v10362_v37, %v10362_v37  ;;  %v1697_v17 = vsel %vm1678_vm2, %v1696_v36, %v1695_v51  ;;  %v1700_v25 = vrot.slane %v1587_v5, 3  ;;  %v1546_v53 = vpack.c.bf16 %v10315_v55, %v10315_v55 }
 0x1aa   :  { %v1589_v23 = vunpack.c.l.b16 %v1557_v50  ;;  %v1699_v49 = vsel %vm1611_vm5, %v1698_v34, %v1697_v17  ;;  %v1548_v1 = vpack.c.bf16 %v10323_v32, %v10323_v32  ;;  %v1550_v40 = vpack.c.bf16 %v10331_v60, %v10331_v60 }
 0x1ab   :  { %v1591_v43 = vunpack.c.l.b16 %v1559_v12  ;;  %v1701_v52 = vsel %vm1684_vm6, %v1700_v25, %v1699_v49  ;;  %v1552_v5 = vpack.c.bf16 %v10339_v45, %v10339_v45  ;;  %v1554_v36 = vpack.c.bf16 %v10347_v8, %v10347_v8 }
 0x1ac   :  { %v1702_v50 = vrot.slane %v1589_v23, 2  ;;  %v1556_v51 = vpack.c.bf16 %v10359_v24, %v10359_v24  ;;  %v1558_v12 = vpack.c.bf16 %v10369_v38, %v10369_v38  ;;  %v1576_v17 = vunpack.c.l.b16 %v1544_v61  ;;  %v1615_v23 = vld [vmem:[%s13796_s2] sm:$0x11]  ;;  %v1618_v61 = vld [vmem:[%s13796_s2 + $0x8] sm:$0x11] }
 0x1ad   :  { %v1704_v34 = vrot.slane %v1591_v43, 1  ;;  %v1578_v25 = vunpack.c.l.b16 %v1546_v53  ;;  %v1580_v35 = vunpack.c.l.b16 %v1548_v1  ;;  %v1582_v39 = vunpack.c.l.b16 %v1550_v40 }
 0x1ae   :  { %v1703_v49 = vsel %vm1687_vm8, %v1702_v50, %v1701_v52  ;;  %v1584_v31 = vunpack.c.l.b16 %v1552_v5  ;;  %v1586_v43 = vunpack.c.l.b16 %v1554_v36  ;;  %v8177_v1 = vpack.c.bf16 %v10306_v46, %v10312_v41  ;;  %v1624_v52 = vld [vmem:[%s13796_s2 + $0x18] sm:$0x11]  ;;  %v1627_v5 = vld [vmem:[%s13796_s2 + $0x20] sm:$0x11]  ;;  %v1630_v41 = vld [vmem:[%s13796_s2 + $0x28] sm:$0x11] }
 0x1af   :  { %v1705_v53 = vsel %vm1690_vm11, %v1704_v34, %v1703_v49  ;;  %v8178_v40 = vpack.c.bf16 %v10309_v44, %v10315_v55  ;;  %v8179_v36 = vpack.c.bf16 %v10318_v56, %v10323_v32  ;;  %v8180_v46 = vpack.c.bf16 %v10326_v54, %v10331_v60  ;;  %v1633_v55 = vld [vmem:[%s13796_s2 + $0x30] sm:$0x11]  ;;  %v1636_v34 = vld [vmem:[%s13796_s2 + $0x38] sm:$0x11] }
 0x1b0   :  { %v1707_v50 = vpack.c.b16 %v1705_v53, %v1705_v53  ;;  %v8181_v44 = vpack.c.bf16 %v10334_v59, %v10339_v45  ;;  %v8182_v56 = vpack.c.bf16 %v10342_v33, %v10347_v8  ;;  %v8183_v32 = vpack.c.bf16 %v10356_v7, %v10359_v24 }
 0x1b1   :  { %v8184_v54 = vpack.c.bf16 %v10362_v37, %v10369_v38  ;;  %v1616_v60 = vsel %vm10401_vm12, %v8177_v1, %v1615_v23  ;;  %v1619_v59 = vsel %vm10401_vm12, %v8178_v40, %v1618_v61  ;;  %v1622_v45 = vsel %vm10401_vm12, %v8179_v36, %v1621_v57 }
 0x1b2   :  { %1742 = vmatprep.mubr.bf16.mxu0 %v1707_v50  ;;  %1783 = vmatprep.mubr.bf16.mxu1 %v1707_v50  ;;  %1617 = vst [vmem:[%s13796_s2] sm:$0x11] %v1616_v60  ;;  %v1625_v33 = vsel %vm10401_vm12, %v8180_v46, %v1624_v52  ;;  %v1671_v8 = vrot.slane %v1578_v25, 7  ;;  %1620 = vst [vmem:[%s13796_s2 + $0x8] sm:$0x11] %v1619_v59  ;;  %v1628_v38 = vsel %vm10401_vm12, %v8181_v44, %v1627_v5  ;;  %v14303_v60 = vld [vmem:[#allocation81_spill] sm:$0xff]  ;;  %v14305_v59 = vld [vmem:[#allocation83_spill] sm:$0xff] }
 0x1b3   :  { %1623 = vst [vmem:[%s13796_s2 + $0x10] sm:$0x11] %v1622_v45  ;;  %1626 = vst [vmem:[%s13796_s2 + $0x18] sm:$0x11] %v1625_v33  ;;  %v1631_v7 = vsel %vm10401_vm12, %v8182_v56, %v1630_v41  ;;  %v1634_v24 = vsel %vm10401_vm12, %v8183_v32, %v1633_v55  ;;  %v1637_v37 = vsel %vm10401_vm12, %v8184_v54, %v1636_v34  ;;  %v1588_v25 = vunpack.c.l.b16 %v1556_v51  ;;  %v14297_v41 = vld [vmem:[#allocation75_spill] sm:$0xff]  ;;  %v14298_v55 = vld [vmem:[#allocation76_spill] sm:$0xff] }
 0x1b4   :  { %1629 = vst [vmem:[%s13796_s2 + $0x20] sm:$0x11] %v1628_v38  ;;  %1632 = vst [vmem:[%s13796_s2 + $0x28] sm:$0x11] %v1631_v7  ;;  %v1673_v62 = vsel %vm1672_vm0, %v1671_v8, %v1576_v17  ;;  %v1674_v49 = vrot.slane %v1580_v35, 6  ;;  %v1590_v51 = vunpack.c.l.b16 %v1558_v12  ;;  %v1677_v23 = vrot.slane %v1582_v39, 5 }
 0x1b5   :  { %1635 = vst [vmem:[%s13796_s2 + $0x30] sm:$0x11] %v1634_v24  ;;  %1638 = vst [vmem:[%s13796_s2 + $0x38] sm:$0x11] %v1637_v37  ;;  %v1680_v53 = vrot.slane %v1584_v31, 4  ;;  %v1683_v40 = vrot.slane %v1586_v43, 3 }
 0x1b6   :  { %v1676_v61 = vsel %vm1675_vm1, %v1674_v49, %v1673_v62  ;;  %v1686_v52 = vrot.slane %v1588_v25, 2  ;;  %v1689_v36 = vrot.slane %v1590_v51, 1  ;;  %v14292_v31 = vld [vmem:[#allocation70_spill] sm:$0xff]  ;;  %v14293_v39 = vld [vmem:[#allocation71_spill] sm:$0xff]  ;;  %v14294_v35 = vld [vmem:[#allocation72_spill] sm:$0xff] }
 0x1b7   :  { %v1679_v1 = vsel %vm1678_vm2, %v1677_v23, %v1676_v61  ;;  %v14295_v12 = vld [vmem:[#allocation73_spill] sm:$0xff]  ;;  %v14296_v43 = vld [vmem:[#allocation74_spill] sm:$0xff]  ;;  %v14301_v32 = vld [vmem:[#allocation79_spill] sm:$0xff] }
 0x1b8   :  { %v1682_v57 = vsel %vm1611_vm5, %v1680_v53, %v1679_v1  ;;  %v14299_v34 = vld [vmem:[#allocation77_spill] sm:$0xff]  ;;  %v14300_v56 = vld [vmem:[#allocation78_spill] sm:$0xff]  ;;  %v14302_v54 = vld [vmem:[#allocation80_spill] sm:$0xff] }
 0x1b9   :  { %v1685_v5 = vsel %vm1684_vm6, %v1683_v40, %v1682_v57  ;;  %v14306_v45 = vld [vmem:[#allocation84_spill] sm:$0xff]  ;;  %v14307_v33 = vld [vmem:[#allocation85_spill] sm:$0xff]  ;;  %v14308_v8 = vld [vmem:[#allocation86_spill] sm:$0xff] }
 0x1ba   :  { %v1688_v46 = vsel %vm1687_vm8, %v1686_v52, %v1685_v5  ;;  %v14309_v38 = vld [vmem:[#allocation87_spill] sm:$0xff]  ;;  %v14310_v7 = vld [vmem:[#allocation88_spill] sm:$0xff]  ;;  %v14311_v24 = vld [vmem:[#allocation89_spill] sm:$0xff] }
 0x1bb   :  { %v1691_v44 = vsel %vm1690_vm11, %v1689_v36, %v1688_v46  ;;  %v14312_v37 = vld [vmem:[#allocation90_spill] sm:$0xff]  ;;  %v14313_v25 = vld [vmem:[#allocation91_spill] sm:$0xff]  ;;  %v14314_v62 = vld [vmem:[#allocation92_spill] sm:$0xff] }
 0x1bc   :  { %v10493_v17 = vpack.c.b16 %v1691_v44, %v1691_v44  ;;  %v14315_v49 = vld [vmem:[#allocation93_spill] sm:$0xff]  ;;  %v14316_v51 = vld [vmem:[#allocation94_spill] sm:$0xff]  ;;  %v14317_v23 = vld [vmem:[#allocation95_spill] sm:$0xff] }
 0x1bd   :  { %v14318_v61 = vld [vmem:[#allocation96_spill] sm:$0xff]  ;;  %v14319_v53 = vld [vmem:[#allocation97_spill] sm:$0xff]  ;;  %v14320_v1 = vld [vmem:[#allocation98_spill] sm:$0xff] }
 0x1be   :  { %1743 = vmatmul.mubr.bf16.vlgmr.msra.gmra.mxu0 %v10493_v17  ;;  %1784 = vmatmul.mubr.bf16.vlgmr.msra.gmra.mxu1 %v10493_v17  ;;  %v14321_v40 = vld [vmem:[#allocation99_spill] sm:$0xff]  ;;  %v14322_v57 = vld [vmem:[#allocation100_spill] sm:$0xff]  ;;  %v14323_v52 = vld [vmem:[#allocation101_spill] sm:$0xff] }
 0x1bf   :  { %1793 = vmatpush1.bf16.msra.mxu0 %v14292_v31  ;;  %1834 = vmatpush1.bf16.msra.mxu1 %v14293_v39  ;;  %v14324_v5 = vld [vmem:[#allocation102_spill] sm:$0xff]  ;;  %v14325_v36 = vld [vmem:[#allocation103_spill] sm:$0xff]  ;;  %v14326_v46 = vld [vmem:[#allocation104_spill] sm:$0xff] }
 0x1c0   :  { %1824 = vmatprep.mubr.bf16.mxu0 %v1707_v50  ;;  %1865 = vmatprep.mubr.bf16.mxu1 %v1707_v50  ;;  %v14304_v50 = vld [vmem:[#allocation82_spill] sm:$0xff]  ;;  %v14327_v44 = vld [vmem:[#allocation105_spill] sm:$0xff]  ;;  %vm11370_vm12 = vmand %vm1684_vm6, %vm3287_vm9  ;;  %vm4960_vm9 = vsmask.f32 2304 }
 0x1c1   :  { %1794 = vmatprep.subr.bf16.mxu0 %v14294_v35  ;;  %1835 = vmatprep.subr.bf16.mxu1 %v14295_v12  ;;  %vm11399_vm13 = vmor %vm11370_vm12, %vm11362_vm10  ;;  %vm4963_vm10 = vsmask.f32 6400 }
 0x1c2   :  { %vm12368_vm12 = vmand %vm1675_vm1, %vm4960_vm9 }
 0x1c3   :  { %1795 = vmatpush1.bf16.msra.mxu0 %v14296_v43  ;;  %1836 = vmatpush1.bf16.msra.mxu1 %v14297_v41 }
 0x1c4   :  { %1796 = vmatprep.subr.bf16.mxu0 %v14298_v55  ;;  %1837 = vmatprep.subr.bf16.mxu1 %v14299_v34 }
 0x1c7   :  { %1797 = vmatpush1.bf16.msra.mxu0 %v14300_v56  ;;  %1838 = vmatpush1.bf16.msra.mxu1 %v14301_v32 }
 0x1c8   :  { %1798 = vmatprep.subr.bf16.mxu0 %v14302_v54  ;;  %1839 = vmatprep.subr.bf16.mxu1 %v14303_v60 }
 0x1cb   :  { %1799 = vmatpush1.bf16.msra.mxu0 %v14304_v50  ;;  %1840 = vmatpush1.bf16.msra.mxu1 %v14305_v59 }
 0x1cc   :  { %1800 = vmatprep.subr.bf16.mxu0 %v14306_v45  ;;  %1841 = vmatprep.subr.bf16.mxu1 %v14307_v33 }
 0x1cf   :  { %1801 = vmatpush1.bf16.msra.mxu0 %v14308_v8  ;;  %1842 = vmatpush1.bf16.msra.mxu1 %v14309_v38 }
 0x1d0   :  { %1802 = vmatprep.subr.bf16.mxu0 %v14310_v7  ;;  %1843 = vmatprep.subr.bf16.mxu1 %v14311_v24 }
 0x1d3   :  { %1803 = vmatpush1.bf16.msra.mxu0 %v14312_v37  ;;  %1844 = vmatpush1.bf16.msra.mxu1 %v14313_v25 }
 0x1d4   :  { %1804 = vmatprep.subr.bf16.mxu0 %v14314_v62  ;;  %1845 = vmatprep.subr.bf16.mxu1 %v14315_v49 }
 0x1d7   :  { %1805 = vmatpush1.bf16.msra.mxu0 %v14316_v51  ;;  %1846 = vmatpush1.bf16.msra.mxu1 %v14317_v23  ;;  %v14328_v23 = vld [vmem:[#allocation106_spill] sm:$0xff] }
 0x1d8   :  { %1806 = vmatprep.subr.bf16.mxu0 %v14318_v61  ;;  %1847 = vmatprep.subr.bf16.mxu1 %v14319_v53  ;;  %v14329_v61 = vld [vmem:[#allocation107_spill] sm:$0xff]  ;;  %v14330_v53 = vld [vmem:[#allocation108_spill] sm:$0xff] }
 0x1db   :  { %1807 = vmatpush1.bf16.msra.mxu0 %v14320_v1  ;;  %1848 = vmatpush1.bf16.msra.mxu1 %v14321_v40  ;;  %v14331_v1 = vld [vmem:[#allocation109_spill] sm:$0xff]  ;;  %v14332_v40 = vld [vmem:[#allocation110_spill] sm:$0xff] }
 0x1dc   :  { %1808 = vmatprep.subr.bf16.mxu0 %v14322_v57  ;;  %1849 = vmatprep.subr.bf16.mxu1 %v14323_v52  ;;  %v14333_v57 = vld [vmem:[#allocation111_spill] sm:$0xff]  ;;  %v14334_v52 = vld [vmem:[#allocation112_spill] sm:$0xff] }
 0x1df   :  { %1809 = vmatpush2.bf16.msra.mxu0 %v14324_v5  ;;  %1850 = vmatpush2.bf16.msra.mxu1 %v14325_v36  ;;  %v14335_v5 = vld [vmem:[#allocation113_spill] sm:$0xff]  ;;  %v14336_v36 = vld [vmem:[#allocation114_spill] sm:$0xff] }
 0x1e0   :  { %1810 = vmatprep.subr.bf16.mxu0 %v14326_v46  ;;  %1851 = vmatprep.subr.bf16.mxu1 %v14327_v44  ;;  %v14337_v46 = vld [vmem:[#allocation115_spill] sm:$0xff]  ;;  %v14338_v44 = vld [vmem:[#allocation116_spill] sm:$0xff] }
 0x1e3   :  { %1811 = vmatpush2.bf16.msra.mxu0 %v14328_v23  ;;  %1852 = vmatpush2.bf16.msra.mxu1 %v14329_v61  ;;  %v14339_v23 = vld [vmem:[#allocation117_spill] sm:$0xff]  ;;  %v14340_v61 = vld [vmem:[#allocation118_spill] sm:$0xff] }
 0x1e4   :  { %1812 = vmatprep.subr.bf16.mxu0 %v14330_v53  ;;  %1853 = vmatprep.subr.bf16.mxu1 %v14331_v1  ;;  %v14341_v53 = vld [vmem:[#allocation119_spill] sm:$0xff]  ;;  %v14342_v1 = vld [vmem:[#allocation120_spill] sm:$0xff] }
 0x1e7   :  { %1813 = vmatpush2.bf16.msra.mxu0 %v14332_v40  ;;  %1854 = vmatpush2.bf16.msra.mxu1 %v14333_v57  ;;  %v14343_v40 = vld [vmem:[#allocation121_spill] sm:$0xff] }
 0x1e8   :  { %1814 = vmatprep.subr.bf16.mxu0 %v14334_v52  ;;  %1855 = vmatprep.subr.bf16.mxu1 %v14335_v5 }
 0x1eb   :  { %1815 = vmatpush2.bf16.msra.mxu0 %v14336_v36  ;;  %1856 = vmatpush2.bf16.msra.mxu1 %v14337_v46 }
 0x1ec   :  { %1816 = vmatprep.subr.bf16.mxu0 %v14338_v44  ;;  %1857 = vmatprep.subr.bf16.mxu1 %v14339_v23 }
 0x1ef   :  { %1817 = vmatpush2.bf16.msra.mxu0 %v14340_v61  ;;  %1858 = vmatpush2.bf16.msra.mxu1 %v14341_v53 }
 0x1f0   :  { %1818 = vmatprep.subr.bf16.mxu0 %v14342_v1  ;;  %1859 = vmatprep.subr.bf16.mxu1 %v14343_v40 }
 0x1f3   :  { %1819 = vmatpush2.bf16.msra.mxu0 %v10015_v26  ;;  %1860 = vmatpush2.bf16.msra.mxu1 %v10019_v16  ;;  %v7851_v26 = vld [vmem:[%s13795_s0 + $0x141] ss:$8 sm:$0xf] }
 0x1f4   :  { %1820 = vmatprep.subr.bf16.mxu0 %v10021_v14  ;;  %1861 = vmatprep.subr.bf16.mxu1 %v10024_v0  ;;  %v7850_v0 = vld [vmem:[%s13795_s0 + $0x101] ss:$8 sm:$0xf0] }
 0x1f7   :  { %1821 = vmatpush2.bf16.msra.mxu0 %v10039_v63  ;;  %1862 = vmatpush2.bf16.msra.mxu1 %v10043_v48 }
 0x1f8   :  { %1822 = vmatprep.subr.bf16.mxu0 %v10045_v47  ;;  %1863 = vmatprep.subr.bf16.mxu1 %v10048_v42 }
 0x1fb   :  { %1823 = vmatpush2.bf16.msra.mxu0 %v10051_v3  ;;  %1864 = vmatpush2.bf16.msra.mxu1 %v10055_v2 }
 0x1fc   :  { %2551 = vmatprep.subr.bf16.mxu0 %v9297_v4  ;;  %2592 = vmatprep.subr.bf16.mxu1 %v9310_v9 }
 0x1fe   :  { %1825 = vmatmul.mubr.bf16.vlgmr.msra.gmra.mxu0 %v10493_v17  ;;  %1866 = vmatmul.mubr.bf16.vlgmr.msra.gmra.mxu1 %v10493_v17  ;;  %v14344_v17 = vld [vmem:[#allocation18_spill] sm:$0xff] }
 0x1ff   :  { %2552 = vmatpush1.bf16.msra.mxu0 %v9302_v6  ;;  %2593 = vmatpush1.bf16.msra.mxu1 %v9312_v10 }
 0x200   :  { %2553 = vmatprep.subr.bf16.mxu0 %v9314_v11  ;;  %2594 = vmatprep.subr.bf16.mxu1 %v9326_v15  ;;  %v14345_v11 = vld [vmem:[#allocation19_spill] sm:$0xff]  ;;  %v14346_v15 = vld [vmem:[#allocation20_spill] sm:$0xff] }
 0x203   :  { %2554 = vmatpush1.bf16.msra.mxu0 %v9339_v19  ;;  %2595 = vmatpush1.bf16.msra.mxu1 %v9343_v20  ;;  %v14347_v19 = vld [vmem:[#allocation21_spill] sm:$0xff]  ;;  %v14348_v20 = vld [vmem:[#allocation22_spill] sm:$0xff] }
 0x204   :  { %2555 = vmatprep.subr.bf16.mxu0 %v9345_v21  ;;  %2596 = vmatprep.subr.bf16.mxu1 %v9348_v22  ;;  %v14349_v21 = vld [vmem:[#allocation23_spill] sm:$0xff]  ;;  %v14350_v22 = vld [vmem:[#allocation24_spill] sm:$0xff] }
 0x207   :  { %2556 = vmatpush1.bf16.msra.mxu0 %v9363_v27  ;;  %2597 = vmatpush1.bf16.msra.mxu1 %v9367_v28  ;;  %v14351_v27 = vld [vmem:[#allocation25_spill] sm:$0xff]  ;;  %v14352_v28 = vld [vmem:[#allocation26_spill] sm:$0xff] }
 0x208   :  { %2557 = vmatprep.subr.bf16.mxu0 %v9369_v29  ;;  %2598 = vmatprep.subr.bf16.mxu1 %v9372_v30  ;;  %v14353_v29 = vld [vmem:[#allocation27_spill] sm:$0xff]  ;;  %v14354_v30 = vld [vmem:[#allocation28_spill] sm:$0xff] }
 0x20b   :  { %2558 = vmatpush1.bf16.msra.mxu0 %v14344_v17  ;;  %2599 = vmatpush1.bf16.msra.mxu1 %v14345_v11  ;;  %v14355_v17 = vld [vmem:[#allocation29_spill] sm:$0xff]  ;;  %v14356_v11 = vld [vmem:[#allocation30_spill] sm:$0xff] }
 0x20c   :  { %2559 = vmatprep.subr.bf16.mxu0 %v14346_v15  ;;  %2600 = vmatprep.subr.bf16.mxu1 %v14347_v19  ;;  %v14357_v15 = vld [vmem:[#allocation31_spill] sm:$0xff]  ;;  %v14358_v19 = vld [vmem:[#allocation32_spill] sm:$0xff] }
 0x20f   :  { %2560 = vmatpush1.bf16.msra.mxu0 %v14348_v20  ;;  %2601 = vmatpush1.bf16.msra.mxu1 %v14349_v21  ;;  %v14359_v20 = vld [vmem:[#allocation33_spill] sm:$0xff]  ;;  %v14360_v21 = vld [vmem:[#allocation34_spill] sm:$0xff] }
 0x210   :  { %2561 = vmatprep.subr.bf16.mxu0 %v14350_v22  ;;  %2602 = vmatprep.subr.bf16.mxu1 %v14351_v27  ;;  %v14361_v22 = vld [vmem:[#allocation35_spill] sm:$0xff]  ;;  %v14362_v27 = vld [vmem:[#allocation36_spill] sm:$0xff] }
 0x213   :  { %2562 = vmatpush1.bf16.msra.mxu0 %v14352_v28  ;;  %2603 = vmatpush1.bf16.msra.mxu1 %v14353_v29  ;;  %v14363_v28 = vld [vmem:[#allocation37_spill] sm:$0xff]  ;;  %v14364_v29 = vld [vmem:[#allocation38_spill] sm:$0xff] }
 0x214   :  { %2563 = vmatprep.subr.bf16.mxu0 %v14354_v30  ;;  %2604 = vmatprep.subr.bf16.mxu1 %v14355_v17  ;;  %v14365_v30 = vld [vmem:[#allocation39_spill] sm:$0xff]  ;;  %v14366_v17 = vld [vmem:[#allocation40_spill] sm:$0xff] }
 0x217   :  { %2564 = vmatpush1.bf16.msra.mxu0 %v14356_v11  ;;  %2605 = vmatpush1.bf16.msra.mxu1 %v14357_v15  ;;  %v14367_v11 = vld [vmem:[#allocation41_spill] sm:$0xff]  ;;  %v14368_v15 = vld [vmem:[#allocation42_spill] sm:$0xff] }
 0x218   :  { %2565 = vmatprep.subr.bf16.mxu0 %v14358_v19  ;;  %2606 = vmatprep.subr.bf16.mxu1 %v14359_v20  ;;  %v14369_v19 = vld [vmem:[#allocation43_spill] sm:$0xff]  ;;  %v14370_v20 = vld [vmem:[#allocation44_spill] sm:$0xff] }
 0x21b   :  { %2566 = vmatpush1.bf16.msra.mxu0 %v14360_v21  ;;  %2607 = vmatpush1.bf16.msra.mxu1 %v14361_v22  ;;  %v14371_v21 = vld [vmem:[#allocation45_spill] sm:$0xff]  ;;  %v14372_v22 = vld [vmem:[#allocation46_spill] sm:$0xff] }
 0x21c   :  { %2567 = vmatprep.subr.bf16.mxu0 %v14362_v27  ;;  %2608 = vmatprep.subr.bf16.mxu1 %v14363_v28  ;;  %v14373_v27 = vld [vmem:[#allocation47_spill] sm:$0xff]  ;;  %v14374_v28 = vld [vmem:[#allocation48_spill] sm:$0xff] }
 0x21f   :  { %2568 = vmatpush2.bf16.msra.mxu0 %v14364_v29  ;;  %2609 = vmatpush2.bf16.msra.mxu1 %v14365_v30  ;;  %v14375_v29 = vld [vmem:[#allocation49_spill] sm:$0xff]  ;;  %v14376_v30 = vld [vmem:[#allocation50_spill] sm:$0xff] }
 0x220   :  { %2569 = vmatprep.subr.bf16.mxu0 %v14366_v17  ;;  %2610 = vmatprep.subr.bf16.mxu1 %v14367_v11  ;;  %v14377_v17 = vld [vmem:[#allocation51_spill] sm:$0xff]  ;;  %v14378_v11 = vld [vmem:[#allocation52_spill] sm:$0xff] }
 0x223   :  { %2570 = vmatpush2.bf16.msra.mxu0 %v14368_v15  ;;  %2611 = vmatpush2.bf16.msra.mxu1 %v14369_v19  ;;  %v14379_v15 = vld [vmem:[#allocation53_spill] sm:$0xff]  ;;  %v14380_v19 = vld [vmem:[#allocation54_spill] sm:$0xff] }
 0x224   :  { %2571 = vmatprep.subr.bf16.mxu0 %v14370_v20  ;;  %2612 = vmatprep.subr.bf16.mxu1 %v14371_v21  ;;  %v14381_v20 = vld [vmem:[#allocation55_spill] sm:$0xff]  ;;  %v14382_v21 = vld [vmem:[#allocation56_spill] sm:$0xff] }
 0x227   :  { %2572 = vmatpush2.bf16.msra.mxu0 %v14372_v22  ;;  %2613 = vmatpush2.bf16.msra.mxu1 %v14373_v27  ;;  %v14383_v22 = vld [vmem:[#allocation57_spill] sm:$0xff]  ;;  %v14384_v27 = vld [vmem:[#allocation58_spill] sm:$0xff] }
 0x228   :  { %2573 = vmatprep.subr.bf16.mxu0 %v14374_v28  ;;  %2614 = vmatprep.subr.bf16.mxu1 %v14375_v29  ;;  %v14385_v28 = vld [vmem:[#allocation59_spill] sm:$0xff]  ;;  %v14386_v29 = vld [vmem:[#allocation60_spill] sm:$0xff] }
 0x22b   :  { %2574 = vmatpush2.bf16.msra.mxu0 %v14376_v30  ;;  %2615 = vmatpush2.bf16.msra.mxu1 %v14377_v17  ;;  %v14387_v30 = vld [vmem:[#allocation61_spill] sm:$0xff]  ;;  %v14388_v17 = vld [vmem:[#allocation62_spill] sm:$0xff] }
 0x22c   :  { %2575 = vmatprep.subr.bf16.mxu0 %v14378_v11  ;;  %2616 = vmatprep.subr.bf16.mxu1 %v14379_v15  ;;  %v14389_v11 = vld [vmem:[#allocation63_spill] sm:$0xff]  ;;  %v14390_v15 = vld [vmem:[#allocation64_spill] sm:$0xff] }
 0x22f   :  { %2576 = vmatpush2.bf16.msra.mxu0 %v14380_v19  ;;  %2617 = vmatpush2.bf16.msra.mxu1 %v14381_v20  ;;  %v14391_v19 = vld [vmem:[#allocation65_spill] sm:$0xff]  ;;  %v14392_v20 = vld [vmem:[#allocation66_spill] sm:$0xff] }
 0x230   :  { %2577 = vmatprep.subr.bf16.mxu0 %v14382_v21  ;;  %2618 = vmatprep.subr.bf16.mxu1 %v14383_v22  ;;  %v14393_v21 = vld [vmem:[#allocation67_spill] sm:$0xff]  ;;  %v14394_v22 = vld [vmem:[#allocation68_spill] sm:$0xff] }
 0x233   :  { %2578 = vmatpush2.bf16.msra.mxu0 %v14384_v27  ;;  %2619 = vmatpush2.bf16.msra.mxu1 %v14385_v28  ;;  %v14395_v27 = vld [vmem:[#allocation69_spill] sm:$0xff] }
 0x234   :  { %2579 = vmatprep.subr.bf16.mxu0 %v14386_v29  ;;  %2620 = vmatprep.subr.bf16.mxu1 %v14387_v30 }
 0x237   :  { %2580 = vmatpush2.bf16.msra.mxu0 %v14388_v17  ;;  %2621 = vmatpush2.bf16.msra.mxu1 %v14389_v11 }
 0x238   :  { %2581 = vmatprep.subr.bf16.mxu0 %v14390_v15  ;;  %2622 = vmatprep.subr.bf16.mxu1 %v14391_v19 }
 0x23b   :  { %2582 = vmatpush2.bf16.msra.mxu0 %v14392_v20  ;;  %2623 = vmatpush2.bf16.msra.mxu1 %v14393_v21 }
 0x23c   :  { %2633 = vmatprep.subr.bf16.mxu0 %v14394_v22  ;;  %2674 = vmatprep.subr.bf16.mxu1 %v14395_v27 }
 0x27e   :  { %v1744_v28 = vpop.f32.mrf.mxu0  ;;  %v1785_v29 = vpop.f32.mrf.mxu1 }
 0x280   :  { %v1746_v10 = vpop.f32.mrf.mxu0  ;;  %v1787_v30 = vpop.f32.mrf.mxu1 }
 0x281   :  { %v1882_v6 = vcombine.low %v1744_v28, %v1746_v10  ;;  %v1883_v17 = vcombine.high %v1744_v28, %v1746_v10  ;;  %v1884_v9 = vcombine.low %v1785_v29, %v1787_v30  ;;  %v1885_v11 = vcombine.high %v1785_v29, %v1787_v30  ;;  %v7847_v28 = vld [vmem:[%s13795_s0 + $0xc1] ss:$8 sm:$0xf] }
 0x282   :  { %v1748_v4 = vpop.f32.mrf.mxu0  ;;  %v1789_v15 = vpop.f32.mrf.mxu1  ;;  %v7848_v29 = vld [vmem:[%s13795_s0 + $0xc1] ss:$8 sm:$0xf0] }
 0x283   :  { %v1896_v19 = vrot.slane %v1882_v6, %v10131_v13  ;;  %v1903_v20 = vrot.slane %v1883_v17, %v10131_v13  ;;  %v1910_v21 = vrot.slane %v1884_v9, %v10131_v13  ;;  %v1917_v22 = vrot.slane %v1885_v11, %v10131_v13  ;;  %v7841_v4 = vld [vmem:[%s13795_s0 + $0x1] ss:$8 sm:$0xf] }
 0x284   :  { %v1749_v2 = vpop.f32.mrf.mxu0  ;;  %v1790_v27 = vpop.f32.mrf.mxu1  ;;  %v7842_v6 = vld [vmem:[%s13795_s0 + $0x1] ss:$8 sm:$0xf0] }
 0x285   :  { %v1946_v3 = vcombine.low %v1896_v19, %v1910_v21  ;;  %v1947_v42 = vcombine.high %v1896_v19, %v1910_v21  ;;  %v1948_v47 = vcombine.low %v1903_v20, %v1917_v22  ;;  %v1949_v48 = vcombine.high %v1903_v20, %v1917_v22  ;;  %v7843_v9 = vld [vmem:[%s13795_s0 + $0x41] ss:$8 sm:$0xf] }
 0x286   :  { %v7844_v11 = vld [vmem:[%s13795_s0 + $0x41] ss:$8 sm:$0xf0]  ;;  %v1642_v1 = vor.u32 %v7842_v6, %v7841_v4 }
 0x287   :  { %v7845_v19 = vld [vmem:[%s13795_s0 + $0x81] ss:$8 sm:$0xf]  ;;  %v1646_v53 = vor.u32 %v7844_v11, %v7843_v9  ;;  %v1974_v36 = vrot.slane %v1947_v42, %v10131_v13 }
 0x288   :  { %v7846_v20 = vld [vmem:[%s13795_s0 + $0x81] ss:$8 sm:$0xf0] }
 0x289   :  { %v7849_v17 = vld [vmem:[%s13795_s0 + $0x101] ss:$8 sm:$0xf] }
 0x28a   :  { %v7856_v4 = vld [vmem:[%s13795_s0 + $0x1c1] ss:$8 sm:$0xf0] }
 0x2be   :  { %v1826_v63 = vpop.f32.mrf.mxu0  ;;  %v1867_v10 = vpop.f32.mrf.mxu1 }
 0x2c0   :  { %v1828_v15 = vpop.f32.mrf.mxu0  ;;  %v1869_v21 = vpop.f32.mrf.mxu1 }
 0x2c1   :  { %v1886_v22 = vcombine.low %v1826_v63, %v1828_v15  ;;  %v1887_v27 = vcombine.high %v1826_v63, %v1828_v15  ;;  %v1888_v30 = vcombine.low %v1867_v10, %v1869_v21  ;;  %v1889_v2 = vcombine.high %v1867_v10, %v1869_v21  ;;  %v7852_v10 = vld [vmem:[%s13795_s0 + $0x141] ss:$8 sm:$0xf0] }
 0x2c2   :  { %v1830_v14 = vpop.f32.mrf.mxu0  ;;  %v1871_v63 = vpop.f32.mrf.mxu1 }
 0x2c3   :  { %v1924_v15 = vrot.slane %v1886_v22, %v10131_v13  ;;  %v1931_v16 = vrot.slane %v1887_v27, %v10131_v13  ;;  %v1938_v21 = vrot.slane %v1888_v30, %v10131_v13  ;;  %v1945_v40 = vrot.slane %v1889_v2, %v10131_v13  ;;  %v7853_v22 = vld [vmem:[%s13795_s0 + $0x181] ss:$8 sm:$0xf] }
 0x2c4   :  { %v1650_v14 = vor.u32 %v7846_v20, %v7845_v19  ;;  %v1654_v63 = vor.u32 %v7848_v29, %v7847_v28  ;;  %v7854_v27 = vld [vmem:[%s13795_s0 + $0x181] ss:$8 sm:$0xf0]  ;;  %v1831_v61 = vpop.f32.mrf.mxu0  ;;  %v1872_v23 = vpop.f32.mrf.mxu1  ;;  %v1960_v20 = vrot.slane %v1946_v3, %v10131_v13  ;;  %v1967_v28 = vrot.slane %v1948_v47, %v10131_v13 }
 0x2c5   :  { %v7855_v30 = vld [vmem:[%s13795_s0 + $0x1c1] ss:$8 sm:$0xf]  ;;  %v1950_v6 = vcombine.low %v1924_v15, %v1938_v21  ;;  %v1951_v9 = vcombine.high %v1924_v15, %v1938_v21  ;;  %v1952_v11 = vcombine.low %v1931_v16, %v1945_v40  ;;  %v1953_v19 = vcombine.high %v1931_v16, %v1945_v40 }
 0x2c6   :  { %v1658_v29 = vor.u32 %v7850_v0, %v7849_v17  ;;  %v1662_v2 = vor.u32 %v7852_v10, %v7851_v26  ;;  %v1981_v15 = vrot.slane %v1949_v48, %v10131_v13  ;;  %v1666_v21 = vor.u32 %v7854_v27, %v7853_v22 }
 0x2c7   :  { %v1988_v23 = vrot.slane %v1950_v6, %v10131_v13  ;;  %v1995_v61 = vrot.slane %v1952_v11, %v10131_v13  ;;  %v2002_v44 = vrot.slane %v1951_v9, %v10131_v13  ;;  %v2009_v46 = vrot.slane %v1953_v19, %v10131_v13 }
 0x2c8   :  { %v1670_v16 = vor.u32 %v7856_v4, %v7855_v30 }
 0x2c9   :  { %v2010_v40 = vcombine.low %v1960_v20, %v1988_v23  ;;  %v2011_v3 = vcombine.high %v1960_v20, %v1988_v23  ;;  %v2012_v5 = vcombine.low %v1967_v28, %v1995_v61  ;;  %v2013_v47 = vcombine.high %v1967_v28, %v1995_v61 }
 0x2ca   :  { %v2014_v0 = vcombine.low %v1974_v36, %v2002_v44  ;;  %v2015_v26 = vcombine.high %v1974_v36, %v2002_v44  ;;  %v2016_v17 = vcombine.low %v1981_v15, %v2009_v46  ;;  %v2017_v10 = vcombine.high %v1981_v15, %v2009_v46 }
 0x2cb   :  { %v10691_v6 = vadd.f32 %v2010_v40, %v1642_v1  ;;  %v10693_v11 = vadd.f32 %v2011_v3, %v1650_v14  ;;  %v10695_v9 = vadd.f32 %v2012_v5, %v1658_v29  ;;  %v10703_v22 = vadd.f32 %v2013_v47, %v1666_v21 }
 0x2cc   :  { %v10697_v19 = vadd.f32 %v2014_v0, %v1646_v53  ;;  %v10699_v42 = vadd.f32 %v2015_v26, %v1654_v63  ;;  %v10701_v48 = vadd.f32 %v2016_v17, %v1662_v2  ;;  %v10707_v44 = vadd.f32 %v2017_v10, %v1670_v16 }
 0x2cd   :  { %v7857_v27 = vmul.f32 -1.442695, %v10691_v6  ;;  %v7859_v36 = vmul.f32 -1.442695, %v10693_v11  ;;  %v7861_v53 = vmul.f32 -1.442695, %v10695_v9 }
 0x2ce   :  { %v7858_v1 = vmul.f32 -1.442695, %v10697_v19  ;;  %v7860_v46 = vmul.f32 -1.442695, %v10699_v42  ;;  %v2090_v5 = vrot.slane %v10691_v6, 2  ;;  %v2091_v63 = vrot.slane %v10697_v19, 2 }
 0x2cf   :  { %8372 = vpow2.f32 %v7857_v27  ;;  %v7862_v14 = vmul.f32 -1.442695, %v10701_v48  ;;  %v7863_v30 = vmul.f32 -1.442695, %v10703_v22  ;;  %v2092_v4 = vrot.slane %v10693_v11, 2 }
 0x2d0   :  { %8374 = vpow2.f32 %v7858_v1  ;;  %v7864_v20 = vmul.f32 -1.442695, %v10707_v44  ;;  %v2093_v28 = vrot.slane %v10699_v42, 2  ;;  %v2094_v29 = vrot.slane %v10695_v9, 2 }
 0x2d1   :  { %8376 = vpow2.f32 %v7859_v36  ;;  %v7865_v2 = vmul.f32 -1.442695, %v2090_v5  ;;  %v2095_v23 = vrot.slane %v10701_v48, 2  ;;  %v7866_v61 = vmul.f32 -1.442695, %v2091_v63 }
 0x2d2   :  { %8378 = vpow2.f32 %v7860_v46  ;;  %v2096_v15 = vrot.slane %v10703_v22, 2  ;;  %v7867_v21 = vmul.f32 -1.442695, %v2092_v4  ;;  %v2097_v16 = vrot.slane %v10707_v44, 2 }
 0x2d3   :  { %8380 = vpow2.f32 %v7861_v53  ;;  %v7868_v40 = vmul.f32 -1.442695, %v2093_v28  ;;  %v7869_v3 = vmul.f32 -1.442695, %v2094_v29  ;;  %v7870_v47 = vmul.f32 -1.442695, %v2095_v23 }
 0x2d4   :  { %8382 = vpow2.f32 %v7862_v14  ;;  %v7871_v0 = vmul.f32 -1.442695, %v2096_v15  ;;  %v7872_v26 = vmul.f32 -1.442695, %v2097_v16 }
 0x2d5   :  { %8384 = vpow2.f32 %v7863_v30 }
 0x2d6   :  { %8386 = vpow2.f32 %v7864_v20 }
 0x2d7   :  { %8388 = vpow2.f32 %v7865_v2 }
 0x2d8   :  { %8390 = vpow2.f32 %v7866_v61 }
 0x2d9   :  { %8392 = vpow2.f32 %v7867_v21 }
 0x2da   :  { %8394 = vpow2.f32 %v7868_v40 }
 0x2db   :  { %8396 = vpow2.f32 %v7869_v3 }
 0x2dc   :  { %v8373_v17 = vpop.eup %8372  ;;  %8398 = vpow2.f32 %v7870_v47 }
 0x2dd   :  { %v8375_v10 = vpop.eup %8374  ;;  %v2058_v27 = vadd.f32 1.0, %v8373_v17  ;;  %8400 = vpow2.f32 %v7871_v0 }
 0x2de   :  { %v8377_v36 = vpop.eup %8376  ;;  %v2059_v1 = vadd.f32 1.0, %v8375_v10  ;;  %8402 = vpow2.f32 %v7872_v26 }
 0x2df   :  { %v8379_v46 = vpop.eup %8378  ;;  %v2060_v53 = vadd.f32 1.0, %v8377_v36  ;;  %8404 = vrcp.f32 %v2058_v27 }
 0x2e0   :  { %v8381_v5 = vpop.eup %8380  ;;  %v2061_v14 = vadd.f32 1.0, %v8379_v46  ;;  %8406 = vrcp.f32 %v2059_v1  ;;  %v2154_v46 = vrot.slane %v10691_v6, 4 }
 0x2e1   :  { %v8383_v63 = vpop.eup %8382  ;;  %v2062_v30 = vadd.f32 1.0, %v8381_v5  ;;  %8408 = vrcp.f32 %v2060_v53 }
 0x2e2   :  { %v8385_v4 = vpop.eup %8384  ;;  %v2063_v20 = vadd.f32 1.0, %v8383_v63  ;;  %8410 = vrcp.f32 %v2061_v14  ;;  %v2155_v14 = vrot.slane %v10697_v19, 4 }
 0x2e3   :  { %v8387_v28 = vpop.eup %8386  ;;  %v2064_v29 = vadd.f32 1.0, %v8385_v4  ;;  %8412 = vrcp.f32 %v2062_v30  ;;  %v2156_v30 = vrot.slane %v10693_v11, 4 }
 0x2e4   :  { %v8389_v2 = vpop.eup %8388  ;;  %v2065_v23 = vadd.f32 1.0, %v8387_v28  ;;  %8414 = vrcp.f32 %v2063_v20  ;;  %v2157_v20 = vrot.slane %v10699_v42, 4 }
 0x2e5   :  { %v8391_v61 = vpop.eup %8390  ;;  %8416 = vrcp.f32 %v2064_v29  ;;  %v2130_v15 = vadd.f32 1.0, %v8389_v2  ;;  %v2158_v29 = vrot.slane %v10695_v9, 4  ;;  %v2178_v2 = vrot.slane %v10691_v6, 6 }
 0x2e6   :  { %v8393_v21 = vpop.eup %8392  ;;  %8418 = vrcp.f32 %v2065_v23  ;;  %v2131_v16 = vadd.f32 1.0, %v8391_v61  ;;  %v2159_v61 = vrot.slane %v10701_v48, 4  ;;  %v2181_v6 = vrot.slane %v10699_v42, 6 }
 0x2e7   :  { %v8395_v40 = vpop.eup %8394  ;;  %v2132_v3 = vadd.f32 1.0, %v8393_v21  ;;  %8420 = vrcp.f32 %v2130_v15  ;;  %v2179_v15 = vrot.slane %v10697_v19, 6  ;;  %v7873_v19 = vmul.f32 -1.442695, %v2178_v2 }
 0x2e8   :  { %v8397_v47 = vpop.eup %8396  ;;  %v2133_v0 = vadd.f32 1.0, %v8395_v40  ;;  %8422 = vrcp.f32 %v2131_v16  ;;  %v2160_v16 = vrot.slane %v10703_v22, 4  ;;  %v2180_v40 = vrot.slane %v10693_v11, 6 }
 0x2e9   :  { %v8399_v26 = vpop.eup %8398  ;;  %v2134_v17 = vadd.f32 1.0, %v8397_v47  ;;  %8424 = vrcp.f32 %v2132_v3  ;;  %v2161_v47 = vrot.slane %v10707_v44, 4  ;;  %v2184_v11 = vrot.slane %v10703_v22, 6 }
 0x2ea   :  { %v8401_v10 = vpop.eup %8400  ;;  %v2135_v27 = vadd.f32 1.0, %v8399_v26  ;;  %8426 = vrcp.f32 %v2133_v0  ;;  %v2182_v26 = vrot.slane %v10695_v9, 6  ;;  %v2185_v42 = vrot.slane %v10707_v44, 6 }
 0x2eb   :  { %v8403_v36 = vpop.eup %8402  ;;  %v2136_v1 = vadd.f32 1.0, %v8401_v10  ;;  %8428 = vrcp.f32 %v2134_v17  ;;  %v2183_v10 = vrot.slane %v10701_v48, 6  ;;  %v7879_v48 = vmul.f32 -1.442695, %v2184_v11 }
 0x2ec   :  { %v10724_v53 = vpop.eup %8404  ;;  %v2137_v5 = vadd.f32 1.0, %v8403_v36  ;;  %8430 = vrcp.f32 %v2135_v27  ;;  %v7874_v27 = vmul.f32 -1.442695, %v2179_v15 }
 0x2ed   :  { %v10727_v63 = vpop.eup %8406  ;;  %8432 = vrcp.f32 %v2136_v1  ;;  %v7875_v1 = vmul.f32 -1.442695, %v2180_v40 }
 0x2ee   :  { %v10730_v4 = vpop.eup %8408  ;;  %8434 = vrcp.f32 %v2137_v5  ;;  %v7876_v5 = vmul.f32 -1.442695, %v2181_v6 }
 0x2ef   :  { %v10733_v28 = vpop.eup %8410  ;;  %8436 = vtanh.f32 %v2154_v46 }
 0x2f0   :  { %v10737_v23 = vpop.eup %8412  ;;  %8438 = vtanh.f32 %v2155_v14 }
 0x2f1   :  { %v10741_v21 = vpop.eup %8414  ;;  %8440 = vtanh.f32 %v2156_v30  ;;  %v7877_v30 = vmul.f32 -1.442695, %v2182_v26 }
 0x2f2   :  { %v10745_v3 = vpop.eup %8416  ;;  %8442 = vtanh.f32 %v2157_v20  ;;  %v7878_v20 = vmul.f32 -1.442695, %v2183_v10  ;;  %v14397_v10 = vld [vmem:[#allocation134_spill] sm:$0xff] }
 0x2f3   :  { %v10749_v0 = vpop.eup %8418  ;;  %8444 = vtanh.f32 %v2158_v29 }
 0x2f4   :  { %v8421_v17 = vpop.eup %8420  ;;  %8446 = vtanh.f32 %v2159_v61  ;;  %v7880_v61 = vmul.f32 -1.442695, %v2185_v42  ;;  %v14398_v42 = vld [vmem:[#allocation135_spill] sm:$0xff] }
 0x2f5   :  { %v8423_v36 = vpop.eup %8422  ;;  %8448 = vtanh.f32 %v2160_v16  ;;  %v2242_v22 = vmul.f32 %v8421_v17, %v10270_v18 }
 0x2f6   :  { %v8425_v46 = vpop.eup %8424  ;;  %8450 = vtanh.f32 %v2161_v47  ;;  %v2243_v44 = vmul.f32 %v8423_v36, %v10273_v58  ;;  %v14396_v47 = vld [vmem:[#allocation133_spill] sm:$0xff]  ;;  %v14400_v36 = vld [vmem:[#allocation136_spill] sm:$0xff] }
 0x2f7   :  { %v8427_v14 = vpop.eup %8426  ;;  %8452 = vpow2.f32 %v7873_v19  ;;  %v2244_v6 = vmul.f32 %v8425_v46, %v14396_v47 }
 0x2f8   :  { %v8429_v9 = vpop.eup %8428  ;;  %8454 = vpow2.f32 %v7874_v27  ;;  %v2245_v27 = vmul.f32 %v8427_v14, %v14397_v10 }
 0x2f9   :  { %v8431_v29 = vpop.eup %8430  ;;  %8456 = vpow2.f32 %v7875_v1 }
 0x2fa   :  { %v8433_v2 = vpop.eup %8432  ;;  %8458 = vpow2.f32 %v7876_v5  ;;  %v2246_v5 = vmul.f32 %v8429_v9, %v14398_v42 }
 0x2fb   :  { %v8435_v15 = vpop.eup %8434  ;;  %8460 = vpow2.f32 %v7877_v30  ;;  %v2247_v30 = vmul.f32 %v8431_v29, %v14400_v36 }
 0x2fc   :  { %v8437_v16 = vpop.eup %8436  ;;  %8462 = vpow2.f32 %v7878_v20 }
 0x2fd   :  { %v8439_v40 = vpop.eup %8438  ;;  %8464 = vpow2.f32 %v7879_v48  ;;  %v2250_v26 = vmul.f32 %v8437_v16, %v10724_v53 }
 0x2fe   :  { %v8441_v19 = vpop.eup %8440  ;;  %8466 = vpow2.f32 %v7880_v61  ;;  %v2251_v11 = vmul.f32 %v8439_v40, %v10727_v63 }
 0x2ff   :  { %v8443_v1 = vpop.eup %8442  ;;  %v2252_v18 = vmul.f32 %v8441_v19, %v10730_v4  ;;  %v10763_v17 = vadd.f32 %v2250_v26, %v2242_v22 }
 0x300   :  { %v8445_v58 = vpop.eup %8444  ;;  %v2253_v46 = vmul.f32 %v8443_v1, %v10733_v28  ;;  %v10767_v20 = vadd.f32 %v2251_v11, %v2243_v44 }
 0x301   :  { %14399 = vst [vmem:[#allocation70_spill] sm:$0xff] %v10763_v17  ;;  %v8447_v53 = vpop.eup %8446  ;;  %v2254_v48 = vmul.f32 %v8445_v58, %v10737_v23  ;;  %v10770_v14 = vadd.f32 %v2252_v18, %v2244_v6  ;;  %8468 = vtanh.f32 %v10763_v17  ;;  %v14406_v6 = vld [vmem:[#allocation137_spill] sm:$0xff] }
 0x302   :  { %14401 = vst [vmem:[#allocation71_spill] sm:$0xff] %v10767_v20  ;;  %v8449_v63 = vpop.eup %8448  ;;  %v2255_v9 = vmul.f32 %v8447_v53, %v10741_v21  ;;  %v10774_v4 = vadd.f32 %v2253_v46, %v2245_v27  ;;  %8470 = vtanh.f32 %v10767_v20  ;;  %v2248_v26 = vmul.f32 %v8433_v2, %v14406_v6  ;;  %v14407_v27 = vld [vmem:[#allocation138_spill] sm:$0xff]  ;;  %v14410_v6 = vld [vmem:[#allocation139_spill] sm:$0xff] }
 0x303   :  { %14402 = vst [vmem:[#allocation72_spill] sm:$0xff] %v10770_v14  ;;  %v8451_v61 = vpop.eup %8450  ;;  %v10777_v29 = vadd.f32 %v2254_v48, %v2246_v5  ;;  %8472 = vtanh.f32 %v10770_v14  ;;  %v2249_v11 = vmul.f32 %v8435_v15, %v14407_v27  ;;  %v2256_v5 = vmul.f32 %v8449_v63, %v10745_v3 }
 0x304   :  { %14403 = vst [vmem:[#allocation73_spill] sm:$0xff] %v10774_v4  ;;  %v8453_v28 = vpop.eup %8452  ;;  %v10780_v22 = vadd.f32 %v2255_v9, %v2247_v30  ;;  %8474 = vtanh.f32 %v10774_v4  ;;  %v2257_v36 = vmul.f32 %v8451_v61, %v10749_v0 }
 0x305   :  { %14404 = vst [vmem:[#allocation74_spill] sm:$0xff] %v10777_v29  ;;  %v8455_v23 = vpop.eup %8454  ;;  %v2218_v16 = vadd.f32 1.0, %v8453_v28  ;;  %8476 = vtanh.f32 %v10777_v29  ;;  %v10789_v53 = vadd.f32 %v2256_v5, %v2248_v26 }
 0x306   :  { %14405 = vst [vmem:[#allocation75_spill] sm:$0xff] %v10780_v22  ;;  %v8457_v44 = vpop.eup %8456  ;;  %v2219_v21 = vadd.f32 1.0, %v8455_v23  ;;  %8478 = vtanh.f32 %v10780_v22  ;;  %v10791_v48 = vadd.f32 %v2257_v36, %v2249_v11  ;;  %v14411_v11 = vld [vmem:[#allocation140_spill] sm:$0xff] }
 0x307   :  { %v8459_v40 = vpop.eup %8458  ;;  %v2220_v47 = vadd.f32 1.0, %v8457_v44  ;;  %8480 = vrcp.f32 %v2218_v16  ;;  %14408 = vst [vmem:[#allocation76_spill] sm:$0xff] %v10789_v53 }
 0x308   :  { %v8461_v19 = vpop.eup %8460  ;;  %v2221_v10 = vadd.f32 1.0, %v8459_v40  ;;  %8482 = vrcp.f32 %v2219_v21  ;;  %14409 = vst [vmem:[#allocation77_spill] sm:$0xff] %v10791_v48 }
 0x309   :  { %v8463_v1 = vpop.eup %8462  ;;  %v2222_v42 = vadd.f32 1.0, %v8461_v19  ;;  %8484 = vrcp.f32 %v2220_v47 }
 0x30a   :  { %v8465_v18 = vpop.eup %8464  ;;  %v2223_v58 = vadd.f32 1.0, %v8463_v1  ;;  %8486 = vrcp.f32 %v2221_v10 }
 0x30b   :  { %v8467_v30 = vpop.eup %8466  ;;  %v2224_v46 = vadd.f32 1.0, %v8465_v18  ;;  %8488 = vrcp.f32 %v2222_v42 }
 0x30c   :  { %v2225_v2 = vadd.f32 1.0, %v8467_v30  ;;  %8490 = vrcp.f32 %v2223_v58 }
 0x30d   :  { %8492 = vrcp.f32 %v2224_v46 }
 0x30e   :  { %v8469_v15 = vpop.eup %8468  ;;  %8494 = vrcp.f32 %v2225_v2 }
 0x30f   :  { %v8471_v9 = vpop.eup %8470  ;;  %8496 = vtanh.f32 %v10789_v53 }
 0x310   :  { %v8473_v3 = vpop.eup %8472  ;;  %8498 = vtanh.f32 %v10791_v48 }
 0x311   :  { %v8475_v63 = vpop.eup %8474 }
 0x312   :  { %v8477_v0 = vpop.eup %8476 }
 0x313   :  { %v8479_v61 = vpop.eup %8478 }
 0x314   :  { %v8481_v28 = vpop.eup %8480 }
 0x315   :  { %v8483_v23 = vpop.eup %8482  ;;  %v2274_v16 = vmul.f32 %v8481_v28, %v8469_v15 }
 0x316   :  { %v8485_v44 = vpop.eup %8484  ;;  %v2275_v21 = vmul.f32 %v8483_v23, %v8471_v9 }
 0x317   :  { %v8487_v40 = vpop.eup %8486  ;;  %v2276_v47 = vmul.f32 %v8485_v44, %v8473_v3  ;;  %v10796_v26 = vrot.slane %v2274_v16, %v14410_v6  ;;  %v10802_v1 = vrot.slane %v2274_v16, %v14411_v11 }
 0x318   :  { %v8489_v19 = vpop.eup %8488  ;;  %v2277_v10 = vmul.f32 %v8487_v40, %v8475_v63  ;;  %v10799_v27 = vrot.slane %v2275_v21, %v14410_v6  ;;  %v10805_v42 = vrot.slane %v2275_v21, %v14411_v11 }
 0x319   :  { %v8491_v5 = vpop.eup %8490  ;;  %v2278_v18 = vmul.f32 %v8489_v19, %v8477_v0  ;;  %v10808_v58 = vrot.slane %v2276_v47, %v14410_v6  ;;  %v2371_v36 = vpack.c.bf16 %v10796_v26, %v10796_v26  ;;  %v10813_v30 = vrot.slane %v2276_v47, %v14411_v11 }
 0x31a   :  { %v8493_v46 = vpop.eup %8492  ;;  %v2279_v2 = vmul.f32 %v8491_v5, %v8479_v61  ;;  %v10816_v15 = vrot.slane %v2277_v10, %v14410_v6  ;;  %v2373_v9 = vpack.c.bf16 %v10799_v27, %v10799_v27  ;;  %v10821_v3 = vrot.slane %v2277_v10, %v14411_v11 }
 0x31b   :  { %v8495_v63 = vpop.eup %8494  ;;  %v10824_v0 = vrot.slane %v2278_v18, %v14410_v6  ;;  %v2375_v28 = vpack.c.bf16 %v10808_v58, %v10808_v58  ;;  %v2403_v23 = vunpack.c.l.b16 %v2371_v36  ;;  %v10829_v61 = vrot.slane %v2278_v18, %v14411_v11 }
 0x31c   :  { %v8497_v16 = vpop.eup %8496  ;;  %v10832_v44 = vrot.slane %v2279_v2, %v14410_v6  ;;  %v2377_v21 = vpack.c.bf16 %v10816_v15, %v10816_v15  ;;  %v2405_v40 = vunpack.c.l.b16 %v2373_v9  ;;  %v10837_v47 = vrot.slane %v2279_v2, %v14411_v11 }
 0x31d   :  { %v8499_v19 = vpop.eup %8498  ;;  %v2280_v10 = vmul.f32 %v8497_v16, %v8493_v46  ;;  %v2379_v5 = vpack.c.bf16 %v10824_v0, %v10824_v0  ;;  %v2407_v36 = vunpack.c.l.b16 %v2375_v28  ;;  %v2370_v18 = vpack.c.bf16 %v10802_v1, %v10802_v1 }
 0x31e   :  { %v2281_v48 = vmul.f32 %v8499_v19, %v8495_v63  ;;  %v2381_v53 = vpack.c.bf16 %v10832_v44, %v10832_v44  ;;  %v2409_v22 = vunpack.c.l.b16 %v2377_v21  ;;  %v2533_v29 = vrot.slane %v2405_v40, 7 }
 0x31f   :  { %v2345_v9 = vrot.slane %v2280_v10, %v14410_v6  ;;  %v2411_v4 = vunpack.c.l.b16 %v2379_v5  ;;  %v2535_v2 = vrot.slane %v2407_v36, 6  ;;  %v10847_v14 = vrot.slane %v2280_v10, %v14411_v11 }
 0x320   :  { %v2353_v46 = vrot.slane %v2281_v48, %v14410_v6  ;;  %v2413_v16 = vunpack.c.l.b16 %v2381_v53  ;;  %v2534_v28 = vsel %vm1672_vm0, %v2533_v29, %v2403_v23  ;;  %v2537_v20 = vrot.slane %v2409_v22, 5 }
 0x321   :  { %v2383_v17 = vpack.c.bf16 %v2345_v9, %v2345_v9  ;;  %v2536_v63 = vsel %vm1675_vm1, %v2535_v2, %v2534_v28  ;;  %v2539_v19 = vrot.slane %v2411_v4, 4  ;;  %v10853_v21 = vrot.slane %v2281_v48, %v14411_v11 }
 0x322   :  { %v2385_v40 = vpack.c.bf16 %v2353_v46, %v2353_v46  ;;  %v2538_v5 = vsel %vm1678_vm2, %v2537_v20, %v2536_v63  ;;  %v2541_v36 = vrot.slane %v2413_v16, 3  ;;  %v2372_v10 = vpack.c.bf16 %v10805_v42, %v10805_v42  ;;  %v2481_v16 = vld [vmem:[%s13796_s2 + $0x30] sm:$0x11] }
 0x323   :  { %v2415_v13 = vunpack.c.l.b16 %v2383_v17  ;;  %v2540_v53 = vsel %vm1611_vm5, %v2539_v19, %v2538_v5  ;;  %v2374_v29 = vpack.c.bf16 %v10813_v30, %v10813_v30  ;;  %v2376_v22 = vpack.c.bf16 %v10821_v3, %v10821_v3 }
 0x324   :  { %v2417_v4 = vunpack.c.l.b16 %v2385_v40  ;;  %v2542_v48 = vsel %vm1684_vm6, %v2541_v36, %v2540_v53  ;;  %v2378_v23 = vpack.c.bf16 %v10829_v61, %v10829_v61  ;;  %v2380_v20 = vpack.c.bf16 %v10837_v47, %v10837_v47 }
 0x325   :  { %v2543_v2 = vrot.slane %v2415_v13, 2  ;;  %v2382_v17 = vpack.c.bf16 %v10847_v14, %v10847_v14  ;;  %v2384_v63 = vpack.c.bf16 %v10853_v21, %v10853_v21  ;;  %v2402_v19 = vunpack.c.l.b16 %v2370_v18 }
 0x326   :  { %v2545_v28 = vrot.slane %v2417_v4, 1  ;;  %v2404_v40 = vunpack.c.l.b16 %v2372_v10  ;;  %v2406_v5 = vunpack.c.l.b16 %v2374_v29  ;;  %v2408_v36 = vunpack.c.l.b16 %v2376_v22 }
 0x327   :  { %v2544_v13 = vsel %vm1687_vm8, %v2543_v2, %v2542_v48  ;;  %v2410_v53 = vunpack.c.l.b16 %v2378_v23  ;;  %v2412_v6 = vunpack.c.l.b16 %v2380_v20  ;;  %v8185_v52 = vpack.c.bf16 %v10796_v26, %v10802_v1  ;;  %v2463_v26 = vld [vmem:[%s13796_s2] sm:$0x11]  ;;  %v2478_v2 = vld [vmem:[%s13796_s2 + $0x28] sm:$0x11] }
 0x328   :  { %v2546_v11 = vsel %vm1690_vm11, %v2545_v28, %v2544_v13  ;;  %v8186_v4 = vpack.c.bf16 %v10799_v27, %v10805_v42  ;;  %v8187_v18 = vpack.c.bf16 %v10808_v58, %v10813_v30  ;;  %v8188_v10 = vpack.c.bf16 %v10816_v15, %v10821_v3  ;;  %v2466_v58 = vld [vmem:[%s13796_s2 + $0x8] sm:$0x11]  ;;  %v2469_v30 = vld [vmem:[%s13796_s2 + $0x10] sm:$0x11]  ;;  %v2484_v28 = vld [vmem:[%s13796_s2 + $0x38] sm:$0x11] }
 0x329   :  { %v10886_v57 = vpack.c.b16 %v2546_v11, %v2546_v11  ;;  %v8189_v29 = vpack.c.bf16 %v10824_v0, %v10829_v61  ;;  %v8190_v27 = vpack.c.bf16 %v10832_v44, %v10837_v47  ;;  %v8191_v11 = vpack.c.bf16 %v2345_v9, %v10847_v14 }
 0x32a   :  { %v8192_v1 = vpack.c.bf16 %v2353_v46, %v10853_v21  ;;  %v2427_v42 = vshll.u32 %v8185_v52, 16  ;;  %v2430_v15 = vshll.u32 %v8186_v4, 16  ;;  %v2433_v3 = vshll.u32 %v8187_v18, 16  ;;  %v2472_v52 = vld [vmem:[%s13796_s2 + $0x18] sm:$0x11] }
 0x32b   :  { %2583 = vmatprep.mubr.bf16.mxu0 %v10886_v57  ;;  %2624 = vmatprep.mubr.bf16.mxu1 %v10886_v57  ;;  %v2436_v0 = vshll.u32 %v8188_v10, 16  ;;  %v2439_v61 = vshll.u32 %v8189_v29, 16  ;;  %v2442_v14 = vshll.u32 %v8190_v27, 16  ;;  %v2445_v44 = vshll.u32 %v8191_v11, 16  ;;  %v2475_v46 = vld [vmem:[%s13796_s2 + $0x20] sm:$0x11] }
 0x32c   :  { %v2448_v47 = vshll.u32 %v8192_v1, 16  ;;  %v2464_v9 = vsel %vm10896_vm3, %v2427_v42, %v2463_v26  ;;  %v2467_v21 = vsel %vm10896_vm3, %v2430_v15, %v2466_v58  ;;  %v2470_v48 = vsel %vm10896_vm3, %v2433_v3, %v2469_v30 }
 0x32d   :  { %2465 = vst [vmem:[%s13796_s2] sm:$0x11] %v2464_v9  ;;  %v2473_v23 = vsel %vm10896_vm3, %v2436_v0, %v2472_v52  ;;  %v2476_v20 = vsel %vm10896_vm3, %v2439_v61, %v2475_v46  ;;  %2468 = vst [vmem:[%s13796_s2 + $0x8] sm:$0x11] %v2467_v21  ;;  %v2479_v13 = vsel %vm10896_vm3, %v2442_v14, %v2478_v2  ;;  %v2519_v10 = vrot.slane %v2404_v40, 7  ;;  %v14421_v61 = vld [vmem:[#allocation100_spill] sm:$0xff]  ;;  %v14422_v52 = vld [vmem:[#allocation101_spill] sm:$0xff] }
 0x32e   :  { %2471 = vst [vmem:[%s13796_s2 + $0x10] sm:$0x11] %v2470_v48  ;;  %2474 = vst [vmem:[%s13796_s2 + $0x18] sm:$0x11] %v2473_v23  ;;  %v2482_v4 = vsel %vm10896_vm3, %v2445_v44, %v2481_v16  ;;  %v2485_v18 = vsel %vm10896_vm3, %v2448_v47, %v2484_v28  ;;  %v2414_v29 = vunpack.c.l.b16 %v2382_v17  ;;  %v2521_v26 = vrot.slane %v2406_v5, 6  ;;  %v14423_v14 = vld [vmem:[#allocation102_spill] sm:$0xff] }
 0x32f   :  { %2477 = vst [vmem:[%s13796_s2 + $0x20] sm:$0x11] %v2476_v20  ;;  %2480 = vst [vmem:[%s13796_s2 + $0x28] sm:$0x11] %v2479_v13  ;;  %v2416_v27 = vunpack.c.l.b16 %v2384_v63  ;;  %v2520_v11 = vsel %vm1672_vm0, %v2519_v10, %v2402_v19  ;;  %v2523_v22 = vrot.slane %v2408_v36, 5  ;;  %v2525_v17 = vrot.slane %v2410_v53, 4 }
 0x330   :  { %2483 = vst [vmem:[%s13796_s2 + $0x30] sm:$0x11] %v2482_v4  ;;  %2486 = vst [vmem:[%s13796_s2 + $0x38] sm:$0x11] %v2485_v18  ;;  %v2522_v40 = vsel %vm1675_vm1, %v2521_v26, %v2520_v11  ;;  %v2527_v42 = vrot.slane %v2412_v6, 3  ;;  %v2529_v30 = vrot.slane %v2414_v29, 2 }
 0x331   :  { %v2524_v1 = vsel %vm1678_vm2, %v2523_v22, %v2522_v40  ;;  %v2531_v3 = vrot.slane %v2416_v27, 1  ;;  %v14417_v6 = vld [vmem:[#allocation96_spill] sm:$0xff]  ;;  %v14418_v19 = vld [vmem:[#allocation97_spill] sm:$0xff]  ;;  %v14419_v36 = vld [vmem:[#allocation98_spill] sm:$0xff] }
 0x332   :  { %v2526_v58 = vsel %vm1611_vm5, %v2525_v17, %v2524_v1  ;;  %v14420_v53 = vld [vmem:[#allocation99_spill] sm:$0xff]  ;;  %v14425_v47 = vld [vmem:[#allocation104_spill] sm:$0xff]  ;;  %v14426_v9 = vld [vmem:[#allocation105_spill] sm:$0xff] }
 0x333   :  { %v2528_v15 = vsel %vm1684_vm6, %v2527_v42, %v2526_v58  ;;  %v14424_v44 = vld [vmem:[#allocation103_spill] sm:$0xff]  ;;  %v14427_v46 = vld [vmem:[#allocation106_spill] sm:$0xff]  ;;  %v14429_v48 = vld [vmem:[#allocation108_spill] sm:$0xff] }
 0x334   :  { %v2530_v0 = vsel %vm1687_vm8, %v2529_v30, %v2528_v15  ;;  %v14428_v21 = vld [vmem:[#allocation107_spill] sm:$0xff]  ;;  %v14430_v23 = vld [vmem:[#allocation109_spill] sm:$0xff]  ;;  %v14431_v20 = vld [vmem:[#allocation110_spill] sm:$0xff] }
 0x335   :  { %v2532_v5 = vsel %vm1690_vm11, %v2531_v3, %v2530_v0  ;;  %v14432_v2 = vld [vmem:[#allocation111_spill] sm:$0xff]  ;;  %v14433_v16 = vld [vmem:[#allocation112_spill] sm:$0xff]  ;;  %v14434_v28 = vld [vmem:[#allocation113_spill] sm:$0xff] }
 0x336   :  { %v10977_v63 = vpack.c.b16 %v2532_v5, %v2532_v5  ;;  %v14435_v13 = vld [vmem:[#allocation114_spill] sm:$0xff]  ;;  %v14436_v4 = vld [vmem:[#allocation115_spill] sm:$0xff]  ;;  %v14437_v18 = vld [vmem:[#allocation116_spill] sm:$0xff] }
 0x337   :  { %v14438_v10 = vld [vmem:[#allocation117_spill] sm:$0xff]  ;;  %v14439_v29 = vld [vmem:[#allocation118_spill] sm:$0xff]  ;;  %v14440_v26 = vld [vmem:[#allocation119_spill] sm:$0xff] }
 0x338   :  { %2584 = vmatmul.mubr.bf16.vlgmr.msra.gmra.mxu0 %v10977_v63  ;;  %2625 = vmatmul.mubr.bf16.vlgmr.msra.gmra.mxu1 %v10977_v63  ;;  %v14441_v27 = vld [vmem:[#allocation120_spill] sm:$0xff]  ;;  %v14442_v11 = vld [vmem:[#allocation121_spill] sm:$0xff]  ;;  %v14443_v22 = vld [vmem:[#allocation122_spill] sm:$0xff] }
 0x339   :  { %2634 = vmatpush1.bf16.msra.mxu0 %v14292_v31  ;;  %2675 = vmatpush1.bf16.msra.mxu1 %v14293_v39  ;;  %v14444_v40 = vld [vmem:[#allocation123_spill] sm:$0xff]  ;;  %v14445_v17 = vld [vmem:[#allocation124_spill] sm:$0xff]  ;;  %v14446_v1 = vld [vmem:[#allocation125_spill] sm:$0xff] }
 0x33a   :  { %2665 = vmatprep.mubr.bf16.mxu0 %v10886_v57  ;;  %2706 = vmatprep.mubr.bf16.mxu1 %v10886_v57  ;;  %v14416_v57 = vld [vmem:[#allocation95_spill] sm:$0xff]  ;;  %v14447_v42 = vld [vmem:[#allocation126_spill] sm:$0xff]  ;;  %v14449_v30 = vld [vmem:[#allocation128_spill] sm:$0xff] }
 0x33b   :  { %2635 = vmatprep.subr.bf16.mxu0 %v14294_v35  ;;  %2676 = vmatprep.subr.bf16.mxu1 %v14295_v12  ;;  %v14448_v58 = vld [vmem:[#allocation127_spill] sm:$0xff]  ;;  %v14450_v15 = vld [vmem:[#allocation129_spill] sm:$0xff]  ;;  %v14451_v3 = vld [vmem:[#allocation130_spill] sm:$0xff] }
 0x33c   :  { %v14452_v0 = vld [vmem:[#allocation131_spill] sm:$0xff]  ;;  %v14453_v5 = vld [vmem:[#allocation4_spill] sm:$0xff]  ;;  %vm11874_vm3 = vmand %vm1684_vm6, %vm4136_vm15  ;;  %vm5810_vm15 = vsmask.f32 7946 }
 0x33d   :  { %2636 = vmatpush1.bf16.msra.mxu0 %v14296_v43  ;;  %2677 = vmatpush1.bf16.msra.mxu1 %v14297_v41  ;;  %vm11896_vm7 = vmor %vm11874_vm3, %vm11862_vm4  ;;  %vm5812_vm4 = vsmask.f32 7962 }
 0x33e   :  { %2637 = vmatprep.subr.bf16.mxu0 %v14298_v55  ;;  %2678 = vmatprep.subr.bf16.mxu1 %v14299_v34  ;;  %vm12868_vm3 = vmand %vm1675_vm1, %vm5810_vm15 }
 0x341   :  { %2638 = vmatpush1.bf16.msra.mxu0 %v14300_v56  ;;  %2679 = vmatpush1.bf16.msra.mxu1 %v14301_v32 }
 0x342   :  { %2639 = vmatprep.subr.bf16.mxu0 %v14302_v54  ;;  %2680 = vmatprep.subr.bf16.mxu1 %v14303_v60 }
 0x345   :  { %2640 = vmatpush1.bf16.msra.mxu0 %v14304_v50  ;;  %2681 = vmatpush1.bf16.msra.mxu1 %v14305_v59 }
 0x346   :  { %2641 = vmatprep.subr.bf16.mxu0 %v14306_v45  ;;  %2682 = vmatprep.subr.bf16.mxu1 %v14307_v33 }
 0x349   :  { %2642 = vmatpush1.bf16.msra.mxu0 %v14308_v8  ;;  %2683 = vmatpush1.bf16.msra.mxu1 %v14309_v38 }
 0x34a   :  { %2643 = vmatprep.subr.bf16.mxu0 %v14310_v7  ;;  %2684 = vmatprep.subr.bf16.mxu1 %v14311_v24 }
 0x34d   :  { %2644 = vmatpush1.bf16.msra.mxu0 %v14312_v37  ;;  %2685 = vmatpush1.bf16.msra.mxu1 %v14313_v25 }
 0x34e   :  { %2645 = vmatprep.subr.bf16.mxu0 %v14314_v62  ;;  %2686 = vmatprep.subr.bf16.mxu1 %v14315_v49 }
 0x351   :  { %2646 = vmatpush1.bf16.msra.mxu0 %v14316_v51  ;;  %2687 = vmatpush1.bf16.msra.mxu1 %v14416_v57 }
 0x352   :  { %2647 = vmatprep.subr.bf16.mxu0 %v14417_v6  ;;  %2688 = vmatprep.subr.bf16.mxu1 %v14418_v19 }
 0x355   :  { %2648 = vmatpush1.bf16.msra.mxu0 %v14419_v36  ;;  %2689 = vmatpush1.bf16.msra.mxu1 %v14420_v53 }
 0x356   :  { %2649 = vmatprep.subr.bf16.mxu0 %v14421_v61  ;;  %2690 = vmatprep.subr.bf16.mxu1 %v14422_v52 }
 0x359   :  { %2650 = vmatpush2.bf16.msra.mxu0 %v14423_v14  ;;  %2691 = vmatpush2.bf16.msra.mxu1 %v14424_v44 }
 0x35a   :  { %2651 = vmatprep.subr.bf16.mxu0 %v14425_v47  ;;  %2692 = vmatprep.subr.bf16.mxu1 %v14426_v9 }
 0x35d   :  { %2652 = vmatpush2.bf16.msra.mxu0 %v14427_v46  ;;  %2693 = vmatpush2.bf16.msra.mxu1 %v14428_v21 }
 0x35e   :  { %2653 = vmatprep.subr.bf16.mxu0 %v14429_v48  ;;  %2694 = vmatprep.subr.bf16.mxu1 %v14430_v23  ;;  %v7899_v48 = vld [vmem:[%s13795_s0 + $0x142] ss:$8 sm:$0xf] }
 0x361   :  { %2654 = vmatpush2.bf16.msra.mxu0 %v14431_v20  ;;  %2695 = vmatpush2.bf16.msra.mxu1 %v14432_v2  ;;  %v7898_v2 = vld [vmem:[%s13795_s0 + $0x102] ss:$8 sm:$0xf0] }
 0x362   :  { %2655 = vmatprep.subr.bf16.mxu0 %v14433_v16  ;;  %2696 = vmatprep.subr.bf16.mxu1 %v14434_v28 }
 0x365   :  { %2656 = vmatpush2.bf16.msra.mxu0 %v14435_v13  ;;  %2697 = vmatpush2.bf16.msra.mxu1 %v14436_v4 }
 0x366   :  { %2657 = vmatprep.subr.bf16.mxu0 %v14437_v18  ;;  %2698 = vmatprep.subr.bf16.mxu1 %v14438_v10 }
 0x369   :  { %2658 = vmatpush2.bf16.msra.mxu0 %v14439_v29  ;;  %2699 = vmatpush2.bf16.msra.mxu1 %v14440_v26  ;;  %v14519_v29 = vld [vmem:[#allocation132_spill] sm:$0xff] }
 0x36a   :  { %2659 = vmatprep.subr.bf16.mxu0 %v14441_v27  ;;  %2700 = vmatprep.subr.bf16.mxu1 %v14442_v11 }
 0x36d   :  { %2660 = vmatpush2.bf16.msra.mxu0 %v14443_v22  ;;  %2701 = vmatpush2.bf16.msra.mxu1 %v14444_v40  ;;  %v14454_v22 = vld [vmem:[#allocation6_spill] sm:$0xff] }
 0x36e   :  { %2661 = vmatprep.subr.bf16.mxu0 %v14445_v17  ;;  %2702 = vmatprep.subr.bf16.mxu1 %v14446_v1  ;;  %v14455_v1 = vld [vmem:[#allocation5_spill] sm:$0xff]  ;;  %v14464_v17 = vld [vmem:[#allocation15_spill] sm:$0xff] }
 0x371   :  { %2662 = vmatpush2.bf16.msra.mxu0 %v14447_v42  ;;  %2703 = vmatpush2.bf16.msra.mxu1 %v14448_v58  ;;  %v14456_v42 = vld [vmem:[#allocation7_spill] sm:$0xff]  ;;  %v14457_v58 = vld [vmem:[#allocation8_spill] sm:$0xff] }
 0x372   :  { %2663 = vmatprep.subr.bf16.mxu0 %v14449_v30  ;;  %2704 = vmatprep.subr.bf16.mxu1 %v14450_v15  ;;  %v14458_v30 = vld [vmem:[#allocation9_spill] sm:$0xff]  ;;  %v14459_v15 = vld [vmem:[#allocation10_spill] sm:$0xff] }
 0x375   :  { %2664 = vmatpush2.bf16.msra.mxu0 %v14451_v3  ;;  %2705 = vmatpush2.bf16.msra.mxu1 %v14452_v0  ;;  %v14460_v3 = vld [vmem:[#allocation11_spill] sm:$0xff]  ;;  %v14461_v0 = vld [vmem:[#allocation12_spill] sm:$0xff] }
 0x376   :  { %3378 = vmatprep.subr.bf16.mxu0 %v14453_v5  ;;  %3419 = vmatprep.subr.bf16.mxu1 %v14454_v22  ;;  %v14462_v5 = vld [vmem:[#allocation13_spill] sm:$0xff]  ;;  %v14463_v22 = vld [vmem:[#allocation14_spill] sm:$0xff] }
 0x378   :  { %2666 = vmatmul.mubr.bf16.vlgmr.msra.gmra.mxu0 %v10977_v63  ;;  %2707 = vmatmul.mubr.bf16.vlgmr.msra.gmra.mxu1 %v10977_v63  ;;  %v14465_v63 = vld [vmem:[#allocation16_spill] sm:$0xff] }
 0x379   :  { %3379 = vmatpush1.bf16.msra.mxu0 %v14455_v1  ;;  %3420 = vmatpush1.bf16.msra.mxu1 %v14456_v42  ;;  %v14466_v1 = vld [vmem:[#allocation17_spill] sm:$0xff]  ;;  %v14467_v42 = vld [vmem:[#allocation18_spill] sm:$0xff] }
 0x37a   :  { %3380 = vmatprep.subr.bf16.mxu0 %v14457_v58  ;;  %3421 = vmatprep.subr.bf16.mxu1 %v14458_v30  ;;  %v14468_v58 = vld [vmem:[#allocation19_spill] sm:$0xff]  ;;  %v14469_v30 = vld [vmem:[#allocation20_spill] sm:$0xff] }
 0x37d   :  { %3381 = vmatpush1.bf16.msra.mxu0 %v14459_v15  ;;  %3422 = vmatpush1.bf16.msra.mxu1 %v14460_v3  ;;  %v14470_v15 = vld [vmem:[#allocation21_spill] sm:$0xff]  ;;  %v14471_v3 = vld [vmem:[#allocation22_spill] sm:$0xff] }
 0x37e   :  { %3382 = vmatprep.subr.bf16.mxu0 %v14461_v0  ;;  %3423 = vmatprep.subr.bf16.mxu1 %v14462_v5  ;;  %v14472_v0 = vld [vmem:[#allocation23_spill] sm:$0xff]  ;;  %v14473_v5 = vld [vmem:[#allocation24_spill] sm:$0xff] }
 0x381   :  { %3383 = vmatpush1.bf16.msra.mxu0 %v14463_v22  ;;  %3424 = vmatpush1.bf16.msra.mxu1 %v14464_v17  ;;  %v14474_v22 = vld [vmem:[#allocation25_spill] sm:$0xff]  ;;  %v14475_v17 = vld [vmem:[#allocation26_spill] sm:$0xff] }
 0x382   :  { %3384 = vmatprep.subr.bf16.mxu0 %v14465_v63  ;;  %3425 = vmatprep.subr.bf16.mxu1 %v14466_v1  ;;  %v14476_v63 = vld [vmem:[#allocation27_spill] sm:$0xff]  ;;  %v14477_v1 = vld [vmem:[#allocation28_spill] sm:$0xff] }
 0x385   :  { %3385 = vmatpush1.bf16.msra.mxu0 %v14467_v42  ;;  %3426 = vmatpush1.bf16.msra.mxu1 %v14468_v58  ;;  %v14478_v42 = vld [vmem:[#allocation29_spill] sm:$0xff]  ;;  %v14479_v58 = vld [vmem:[#allocation30_spill] sm:$0xff] }
 0x386   :  { %3386 = vmatprep.subr.bf16.mxu0 %v14469_v30  ;;  %3427 = vmatprep.subr.bf16.mxu1 %v14470_v15  ;;  %v14480_v30 = vld [vmem:[#allocation31_spill] sm:$0xff]  ;;  %v14481_v15 = vld [vmem:[#allocation32_spill] sm:$0xff] }
 0x389   :  { %3387 = vmatpush1.bf16.msra.mxu0 %v14471_v3  ;;  %3428 = vmatpush1.bf16.msra.mxu1 %v14472_v0  ;;  %v14482_v3 = vld [vmem:[#allocation33_spill] sm:$0xff]  ;;  %v14483_v0 = vld [vmem:[#allocation34_spill] sm:$0xff] }
 0x38a   :  { %3388 = vmatprep.subr.bf16.mxu0 %v14473_v5  ;;  %3429 = vmatprep.subr.bf16.mxu1 %v14474_v22  ;;  %v14484_v5 = vld [vmem:[#allocation35_spill] sm:$0xff]  ;;  %v14485_v22 = vld [vmem:[#allocation36_spill] sm:$0xff] }
 0x38d   :  { %3389 = vmatpush1.bf16.msra.mxu0 %v14475_v17  ;;  %3430 = vmatpush1.bf16.msra.mxu1 %v14476_v63  ;;  %v14486_v17 = vld [vmem:[#allocation37_spill] sm:$0xff]  ;;  %v14487_v63 = vld [vmem:[#allocation38_spill] sm:$0xff] }
 0x38e   :  { %3390 = vmatprep.subr.bf16.mxu0 %v14477_v1  ;;  %3431 = vmatprep.subr.bf16.mxu1 %v14478_v42  ;;  %v14488_v1 = vld [vmem:[#allocation39_spill] sm:$0xff]  ;;  %v14489_v42 = vld [vmem:[#allocation40_spill] sm:$0xff] }
 0x391   :  { %3391 = vmatpush1.bf16.msra.mxu0 %v14479_v58  ;;  %3432 = vmatpush1.bf16.msra.mxu1 %v14480_v30  ;;  %v14490_v58 = vld [vmem:[#allocation41_spill] sm:$0xff]  ;;  %v14491_v30 = vld [vmem:[#allocation42_spill] sm:$0xff] }
 0x392   :  { %3392 = vmatprep.subr.bf16.mxu0 %v14481_v15  ;;  %3433 = vmatprep.subr.bf16.mxu1 %v14482_v3  ;;  %v14492_v15 = vld [vmem:[#allocation43_spill] sm:$0xff]  ;;  %v14493_v3 = vld [vmem:[#allocation44_spill] sm:$0xff] }
 0x395   :  { %3393 = vmatpush1.bf16.msra.mxu0 %v14483_v0  ;;  %3434 = vmatpush1.bf16.msra.mxu1 %v14484_v5  ;;  %v14494_v0 = vld [vmem:[#allocation45_spill] sm:$0xff]  ;;  %v14495_v5 = vld [vmem:[#allocation46_spill] sm:$0xff] }
 0x396   :  { %3394 = vmatprep.subr.bf16.mxu0 %v14485_v22  ;;  %3435 = vmatprep.subr.bf16.mxu1 %v14486_v17  ;;  %v14496_v22 = vld [vmem:[#allocation47_spill] sm:$0xff]  ;;  %v14497_v17 = vld [vmem:[#allocation48_spill] sm:$0xff] }
 0x399   :  { %3395 = vmatpush2.bf16.msra.mxu0 %v14487_v63  ;;  %3436 = vmatpush2.bf16.msra.mxu1 %v14488_v1  ;;  %v14498_v63 = vld [vmem:[#allocation49_spill] sm:$0xff]  ;;  %v14499_v1 = vld [vmem:[#allocation50_spill] sm:$0xff] }
 0x39a   :  { %3396 = vmatprep.subr.bf16.mxu0 %v14489_v42  ;;  %3437 = vmatprep.subr.bf16.mxu1 %v14490_v58  ;;  %v14500_v42 = vld [vmem:[#allocation51_spill] sm:$0xff]  ;;  %v14501_v58 = vld [vmem:[#allocation52_spill] sm:$0xff] }
 0x39d   :  { %3397 = vmatpush2.bf16.msra.mxu0 %v14491_v30  ;;  %3438 = vmatpush2.bf16.msra.mxu1 %v14492_v15  ;;  %v14502_v30 = vld [vmem:[#allocation53_spill] sm:$0xff]  ;;  %v14503_v15 = vld [vmem:[#allocation54_spill] sm:$0xff] }
 0x39e   :  { %3398 = vmatprep.subr.bf16.mxu0 %v14493_v3  ;;  %3439 = vmatprep.subr.bf16.mxu1 %v14494_v0  ;;  %v14504_v3 = vld [vmem:[#allocation55_spill] sm:$0xff]  ;;  %v14505_v0 = vld [vmem:[#allocation56_spill] sm:$0xff] }
 0x3a1   :  { %3399 = vmatpush2.bf16.msra.mxu0 %v14495_v5  ;;  %3440 = vmatpush2.bf16.msra.mxu1 %v14496_v22  ;;  %v14506_v5 = vld [vmem:[#allocation57_spill] sm:$0xff]  ;;  %v14507_v22 = vld [vmem:[#allocation58_spill] sm:$0xff] }
 0x3a2   :  { %3400 = vmatprep.subr.bf16.mxu0 %v14497_v17  ;;  %3441 = vmatprep.subr.bf16.mxu1 %v14498_v63  ;;  %v14508_v17 = vld [vmem:[#allocation59_spill] sm:$0xff]  ;;  %v14509_v63 = vld [vmem:[#allocation60_spill] sm:$0xff] }
 0x3a5   :  { %3401 = vmatpush2.bf16.msra.mxu0 %v14499_v1  ;;  %3442 = vmatpush2.bf16.msra.mxu1 %v14500_v42  ;;  %v14510_v1 = vld [vmem:[#allocation61_spill] sm:$0xff]  ;;  %v14511_v42 = vld [vmem:[#allocation62_spill] sm:$0xff] }
 0x3a6   :  { %3402 = vmatprep.subr.bf16.mxu0 %v14501_v58  ;;  %3443 = vmatprep.subr.bf16.mxu1 %v14502_v30  ;;  %v14512_v58 = vld [vmem:[#allocation63_spill] sm:$0xff]  ;;  %v14513_v30 = vld [vmem:[#allocation64_spill] sm:$0xff] }
 0x3a9   :  { %3403 = vmatpush2.bf16.msra.mxu0 %v14503_v15  ;;  %3444 = vmatpush2.bf16.msra.mxu1 %v14504_v3  ;;  %v14514_v15 = vld [vmem:[#allocation65_spill] sm:$0xff]  ;;  %v14515_v3 = vld [vmem:[#allocation66_spill] sm:$0xff] }
 0x3aa   :  { %3404 = vmatprep.subr.bf16.mxu0 %v14505_v0  ;;  %3445 = vmatprep.subr.bf16.mxu1 %v14506_v5  ;;  %v14516_v0 = vld [vmem:[#allocation67_spill] sm:$0xff]  ;;  %v14517_v5 = vld [vmem:[#allocation68_spill] sm:$0xff] }
 0x3ad   :  { %3405 = vmatpush2.bf16.msra.mxu0 %v14507_v22  ;;  %3446 = vmatpush2.bf16.msra.mxu1 %v14508_v17  ;;  %v14518_v22 = vld [vmem:[#allocation69_spill] sm:$0xff] }
 0x3ae   :  { %3406 = vmatprep.subr.bf16.mxu0 %v14509_v63  ;;  %3447 = vmatprep.subr.bf16.mxu1 %v14510_v1 }
 0x3b1   :  { %3407 = vmatpush2.bf16.msra.mxu0 %v14511_v42  ;;  %3448 = vmatpush2.bf16.msra.mxu1 %v14512_v58 }
 0x3b2   :  { %3408 = vmatprep.subr.bf16.mxu0 %v14513_v30  ;;  %3449 = vmatprep.subr.bf16.mxu1 %v14514_v15 }
 0x3b5   :  { %3409 = vmatpush2.bf16.msra.mxu0 %v14515_v3  ;;  %3450 = vmatpush2.bf16.msra.mxu1 %v14516_v0 }
 0x3b6   :  { %3460 = vmatprep.subr.bf16.mxu0 %v14517_v5  ;;  %3501 = vmatprep.subr.bf16.mxu1 %v14518_v22 }
 0x3f8   :  { %v2585_v17 = vpop.f32.mrf.mxu0  ;;  %v2626_v63 = vpop.f32.mrf.mxu1 }
 0x3fa   :  { %v2587_v40 = vpop.f32.mrf.mxu0  ;;  %v2628_v1 = vpop.f32.mrf.mxu1 }
 0x3fb   :  { %v2723_v11 = vcombine.low %v2585_v17, %v2587_v40  ;;  %v2724_v42 = vcombine.high %v2585_v17, %v2587_v40  ;;  %v2725_v27 = vcombine.low %v2626_v63, %v2628_v1  ;;  %v2726_v58 = vcombine.high %v2626_v63, %v2628_v1  ;;  %v7893_v17 = vld [vmem:[%s13795_s0 + $0x82] ss:$8 sm:$0xf] }
 0x3fc   :  { %v2589_v26 = vpop.f32.mrf.mxu0  ;;  %v2630_v30 = vpop.f32.mrf.mxu1  ;;  %v7894_v1 = vld [vmem:[%s13795_s0 + $0x82] ss:$8 sm:$0xf0] }
 0x3fd   :  { %v2737_v15 = vrot.slane %v2723_v11, %v14519_v29  ;;  %v2744_v3 = vrot.slane %v2724_v42, %v14519_v29  ;;  %v2751_v0 = vrot.slane %v2725_v27, %v14519_v29  ;;  %v2758_v5 = vrot.slane %v2726_v58, %v14519_v29  ;;  %v7889_v26 = vld [vmem:[%s13795_s0 + $0x2] ss:$8 sm:$0xf] }
 0x3fe   :  { %v2590_v10 = vpop.f32.mrf.mxu0  ;;  %v2631_v22 = vpop.f32.mrf.mxu1  ;;  %v7890_v11 = vld [vmem:[%s13795_s0 + $0x2] ss:$8 sm:$0xf0] }
 0x3ff   :  { %v2787_v18 = vcombine.low %v2737_v15, %v2751_v0  ;;  %v2788_v4 = vcombine.high %v2737_v15, %v2751_v0  ;;  %v2789_v13 = vcombine.low %v2744_v3, %v2758_v5  ;;  %v2790_v28 = vcombine.high %v2744_v3, %v2758_v5  ;;  %v7891_v27 = vld [vmem:[%s13795_s0 + $0x42] ss:$8 sm:$0xf] }
 0x400   :  { %v7892_v10 = vld [vmem:[%s13795_s0 + $0x42] ss:$8 sm:$0xf0]  ;;  %v2490_v46 = vor.u32 %v7890_v11, %v7889_v26 }
 0x401   :  { %v7895_v15 = vld [vmem:[%s13795_s0 + $0xc2] ss:$8 sm:$0xf]  ;;  %v2494_v9 = vor.u32 %v7892_v10, %v7891_v27  ;;  %v2815_v61 = vrot.slane %v2788_v4, %v14519_v29 }
 0x402   :  { %v7896_v3 = vld [vmem:[%s13795_s0 + $0xc2] ss:$8 sm:$0xf0] }
 0x403   :  { %v7897_v63 = vld [vmem:[%s13795_s0 + $0x102] ss:$8 sm:$0xf] }
 0x404   :  { %v7904_v26 = vld [vmem:[%s13795_s0 + $0x1c2] ss:$8 sm:$0xf0] }
 0x438   :  { %v2667_v16 = vpop.f32.mrf.mxu0  ;;  %v2708_v40 = vpop.f32.mrf.mxu1 }
 0x43a   :  { %v2669_v22 = vpop.f32.mrf.mxu0  ;;  %v2710_v42 = vpop.f32.mrf.mxu1 }
 0x43b   :  { %v2727_v58 = vcombine.low %v2667_v16, %v2669_v22  ;;  %v2728_v30 = vcombine.high %v2667_v16, %v2669_v22  ;;  %v2729_v0 = vcombine.low %v2708_v40, %v2710_v42  ;;  %v2730_v5 = vcombine.high %v2708_v40, %v2710_v42  ;;  %v7900_v40 = vld [vmem:[%s13795_s0 + $0x142] ss:$8 sm:$0xf0] }
 0x43c   :  { %v2671_v20 = vpop.f32.mrf.mxu0  ;;  %v2712_v16 = vpop.f32.mrf.mxu1 }
 0x43d   :  { %v2765_v22 = vrot.slane %v2727_v58, %v14519_v29  ;;  %v2772_v23 = vrot.slane %v2728_v30, %v14519_v29  ;;  %v2779_v42 = vrot.slane %v2729_v0, %v14519_v29  ;;  %v2786_v21 = vrot.slane %v2730_v5, %v14519_v29  ;;  %v7901_v58 = vld [vmem:[%s13795_s0 + $0x182] ss:$8 sm:$0xf] }
 0x43e   :  { %v2498_v20 = vor.u32 %v7894_v1, %v7893_v17  ;;  %v2502_v16 = vor.u32 %v7896_v3, %v7895_v15  ;;  %v7902_v30 = vld [vmem:[%s13795_s0 + $0x182] ss:$8 sm:$0xf0]  ;;  %v2672_v47 = vpop.f32.mrf.mxu0  ;;  %v2713_v44 = vpop.f32.mrf.mxu1  ;;  %v2801_v1 = vrot.slane %v2787_v18, %v14519_v29  ;;  %v2808_v15 = vrot.slane %v2789_v13, %v14519_v29 }
 0x43f   :  { %v7903_v0 = vld [vmem:[%s13795_s0 + $0x1c2] ss:$8 sm:$0xf]  ;;  %v2791_v11 = vcombine.low %v2765_v22, %v2779_v42  ;;  %v2792_v27 = vcombine.high %v2765_v22, %v2779_v42  ;;  %v2793_v10 = vcombine.low %v2772_v23, %v2786_v21  ;;  %v2794_v17 = vcombine.high %v2772_v23, %v2786_v21 }
 0x440   :  { %v2506_v3 = vor.u32 %v7898_v2, %v7897_v63  ;;  %v2510_v5 = vor.u32 %v7900_v40, %v7899_v48  ;;  %v2822_v22 = vrot.slane %v2790_v28, %v14519_v29  ;;  %v2514_v42 = vor.u32 %v7902_v30, %v7901_v58 }
 0x441   :  { %v2829_v44 = vrot.slane %v2791_v11, %v14519_v29  ;;  %v2836_v47 = vrot.slane %v2793_v10, %v14519_v29  ;;  %v2843_v14 = vrot.slane %v2792_v27, %v14519_v29  ;;  %v2850_v52 = vrot.slane %v2794_v17, %v14519_v29 }
 0x442   :  { %v2518_v21 = vor.u32 %v7904_v26, %v7903_v0 }
 0x443   :  { %v2851_v23 = vcombine.low %v2801_v1, %v2829_v44  ;;  %v2852_v18 = vcombine.high %v2801_v1, %v2829_v44  ;;  %v2853_v53 = vcombine.low %v2808_v15, %v2836_v47  ;;  %v2854_v13 = vcombine.high %v2808_v15, %v2836_v47 }
 0x444   :  { %v2855_v2 = vcombine.low %v2815_v61, %v2843_v14  ;;  %v2856_v48 = vcombine.high %v2815_v61, %v2843_v14  ;;  %v2857_v63 = vcombine.low %v2822_v22, %v2850_v52  ;;  %v2858_v40 = vcombine.high %v2822_v22, %v2850_v52 }
 0x445   :  { %v11177_v11 = vadd.f32 %v2851_v23, %v2490_v46  ;;  %v11179_v10 = vadd.f32 %v2852_v18, %v2498_v20  ;;  %v11181_v27 = vadd.f32 %v2853_v53, %v2506_v3  ;;  %v11189_v58 = vadd.f32 %v2854_v13, %v2514_v42 }
 0x446   :  { %v11183_v17 = vadd.f32 %v2855_v2, %v2494_v9  ;;  %v11185_v4 = vadd.f32 %v2856_v48, %v2502_v16  ;;  %v11187_v28 = vadd.f32 %v2857_v63, %v2510_v5  ;;  %v11193_v14 = vadd.f32 %v2858_v40, %v2518_v21 }
 0x447   :  { %v7905_v30 = vmul.f32 -1.442695, %v11177_v11  ;;  %v7907_v61 = vmul.f32 -1.442695, %v11179_v10  ;;  %v7909_v53 = vmul.f32 -1.442695, %v11181_v27 }
 0x448   :  { %v7906_v52 = vmul.f32 -1.442695, %v11183_v17  ;;  %v7908_v46 = vmul.f32 -1.442695, %v11185_v4  ;;  %v2931_v9 = vrot.slane %v11177_v11, 2  ;;  %v2932_v16 = vrot.slane %v11183_v17, 2 }
 0x449   :  { %8500 = vpow2.f32 %v7905_v30  ;;  %v7910_v20 = vmul.f32 -1.442695, %v11187_v28  ;;  %v7911_v0 = vmul.f32 -1.442695, %v11189_v58  ;;  %v2933_v26 = vrot.slane %v11179_v10, 2 }
 0x44a   :  { %8502 = vpow2.f32 %v7906_v52  ;;  %v7912_v1 = vmul.f32 -1.442695, %v11193_v14  ;;  %v2934_v15 = vrot.slane %v11185_v4, 2  ;;  %v2935_v3 = vrot.slane %v11181_v27, 2 }
 0x44b   :  { %8504 = vpow2.f32 %v7907_v61  ;;  %v7913_v5 = vmul.f32 -1.442695, %v2931_v9  ;;  %v2936_v44 = vrot.slane %v11187_v28, 2  ;;  %v7914_v47 = vmul.f32 -1.442695, %v2932_v16 }
 0x44c   :  { %8506 = vpow2.f32 %v7908_v46  ;;  %v2937_v22 = vrot.slane %v11189_v58, 2  ;;  %v7915_v42 = vmul.f32 -1.442695, %v2933_v26  ;;  %v2938_v21 = vrot.slane %v11193_v14, 2 }
 0x44d   :  { %8508 = vpow2.f32 %v7909_v53  ;;  %v7916_v23 = vmul.f32 -1.442695, %v2934_v15  ;;  %v7917_v18 = vmul.f32 -1.442695, %v2935_v3  ;;  %v7918_v13 = vmul.f32 -1.442695, %v2936_v44 }
 0x44e   :  { %8510 = vpow2.f32 %v7910_v20  ;;  %v7919_v2 = vmul.f32 -1.442695, %v2937_v22  ;;  %v7920_v48 = vmul.f32 -1.442695, %v2938_v21 }
 0x44f   :  { %8512 = vpow2.f32 %v7911_v0 }
 0x450   :  { %8514 = vpow2.f32 %v7912_v1 }
 0x451   :  { %8516 = vpow2.f32 %v7913_v5 }
 0x452   :  { %8518 = vpow2.f32 %v7914_v47 }
 0x453   :  { %8520 = vpow2.f32 %v7915_v42 }
 0x454   :  { %8522 = vpow2.f32 %v7916_v23 }
 0x455   :  { %8524 = vpow2.f32 %v7917_v18 }
 0x456   :  { %v8501_v63 = vpop.eup %8500  ;;  %8526 = vpow2.f32 %v7918_v13 }
 0x457   :  { %v8503_v40 = vpop.eup %8502  ;;  %v2899_v30 = vadd.f32 1.0, %v8501_v63  ;;  %8528 = vpow2.f32 %v7919_v2 }
 0x458   :  { %v8505_v61 = vpop.eup %8504  ;;  %v2900_v52 = vadd.f32 1.0, %v8503_v40  ;;  %8530 = vpow2.f32 %v7920_v48 }
 0x459   :  { %v8507_v46 = vpop.eup %8506  ;;  %v2901_v53 = vadd.f32 1.0, %v8505_v61  ;;  %8532 = vrcp.f32 %v2899_v30 }
 0x45a   :  { %v8509_v9 = vpop.eup %8508  ;;  %v2902_v20 = vadd.f32 1.0, %v8507_v46  ;;  %8534 = vrcp.f32 %v2900_v52  ;;  %v2995_v46 = vrot.slane %v11177_v11, 4 }
 0x45b   :  { %v8511_v16 = vpop.eup %8510  ;;  %v2903_v0 = vadd.f32 1.0, %v8509_v9  ;;  %8536 = vrcp.f32 %v2901_v53 }
 0x45c   :  { %v8513_v26 = vpop.eup %8512  ;;  %v2904_v1 = vadd.f32 1.0, %v8511_v16  ;;  %8538 = vrcp.f32 %v2902_v20  ;;  %v2996_v20 = vrot.slane %v11183_v17, 4 }
 0x45d   :  { %v8515_v15 = vpop.eup %8514  ;;  %v2905_v3 = vadd.f32 1.0, %v8513_v26  ;;  %8540 = vrcp.f32 %v2903_v0  ;;  %v2997_v0 = vrot.slane %v11179_v10, 4 }
 0x45e   :  { %v8517_v5 = vpop.eup %8516  ;;  %v2906_v44 = vadd.f32 1.0, %v8515_v15  ;;  %8542 = vrcp.f32 %v2904_v1  ;;  %v2998_v1 = vrot.slane %v11185_v4, 4 }
 0x45f   :  { %v8519_v47 = vpop.eup %8518  ;;  %8544 = vrcp.f32 %v2905_v3  ;;  %v2971_v22 = vadd.f32 1.0, %v8517_v5  ;;  %v2999_v3 = vrot.slane %v11181_v27, 4  ;;  %v3019_v5 = vrot.slane %v11177_v11, 6 }
 0x460   :  { %v8521_v42 = vpop.eup %8520  ;;  %8546 = vrcp.f32 %v2906_v44  ;;  %v2972_v21 = vadd.f32 1.0, %v8519_v47  ;;  %v3000_v47 = vrot.slane %v11187_v28, 4  ;;  %v3022_v11 = vrot.slane %v11185_v4, 6 }
 0x461   :  { %v8523_v23 = vpop.eup %8522  ;;  %v2973_v18 = vadd.f32 1.0, %v8521_v42  ;;  %8548 = vrcp.f32 %v2971_v22  ;;  %v3020_v22 = vrot.slane %v11183_v17, 6  ;;  %v7921_v17 = vmul.f32 -1.442695, %v3019_v5 }
 0x462   :  { %v8525_v13 = vpop.eup %8524  ;;  %v2974_v2 = vadd.f32 1.0, %v8523_v23  ;;  %8550 = vrcp.f32 %v2972_v21  ;;  %v3001_v21 = vrot.slane %v11189_v58, 4  ;;  %v3021_v23 = vrot.slane %v11179_v10, 6 }
 0x463   :  { %v8527_v48 = vpop.eup %8526  ;;  %v2975_v63 = vadd.f32 1.0, %v8525_v13  ;;  %8552 = vrcp.f32 %v2973_v18  ;;  %v3002_v13 = vrot.slane %v11193_v14, 4  ;;  %v3025_v10 = vrot.slane %v11189_v58, 6  ;;  %v14520_v58 = vld [vmem:[#allocation70_spill] sm:$0xff] }
 0x464   :  { %v8529_v40 = vpop.eup %8528  ;;  %v2976_v30 = vadd.f32 1.0, %v8527_v48  ;;  %8554 = vrcp.f32 %v2974_v2  ;;  %v3023_v48 = vrot.slane %v11181_v27, 6  ;;  %v3026_v4 = vrot.slane %v11193_v14, 6  ;;  %v14521_v14 = vld [vmem:[#allocation71_spill] sm:$0xff] }
 0x465   :  { %v8531_v61 = vpop.eup %8530  ;;  %v2977_v52 = vadd.f32 1.0, %v8529_v40  ;;  %8556 = vrcp.f32 %v2975_v63  ;;  %v3024_v40 = vrot.slane %v11187_v28, 6  ;;  %v7927_v28 = vmul.f32 -1.442695, %v3025_v10  ;;  %v14523_v10 = vld [vmem:[#allocation73_spill] sm:$0xff] }
 0x466   :  { %v11210_v53 = vpop.eup %8532  ;;  %v2978_v9 = vadd.f32 1.0, %v8531_v61  ;;  %8558 = vrcp.f32 %v2976_v30  ;;  %v7922_v30 = vmul.f32 -1.442695, %v3020_v22 }
 0x467   :  { %v11213_v16 = vpop.eup %8534  ;;  %8560 = vrcp.f32 %v2977_v52  ;;  %v7923_v52 = vmul.f32 -1.442695, %v3021_v23 }
 0x468   :  { %v11216_v26 = vpop.eup %8536  ;;  %8562 = vrcp.f32 %v2978_v9  ;;  %v7924_v9 = vmul.f32 -1.442695, %v3022_v11 }
 0x469   :  { %v11219_v15 = vpop.eup %8538  ;;  %8564 = vtanh.f32 %v2995_v46 }
 0x46a   :  { %v11223_v44 = vpop.eup %8540  ;;  %8566 = vtanh.f32 %v2996_v20 }
 0x46b   :  { %v11227_v42 = vpop.eup %8542  ;;  %8568 = vtanh.f32 %v2997_v0  ;;  %v7925_v0 = vmul.f32 -1.442695, %v3023_v48  ;;  %v14522_v48 = vld [vmem:[#allocation72_spill] sm:$0xff] }
 0x46c   :  { %v11231_v18 = vpop.eup %8544  ;;  %8570 = vtanh.f32 %v2998_v1  ;;  %v7926_v1 = vmul.f32 -1.442695, %v3024_v40 }
 0x46d   :  { %v11235_v2 = vpop.eup %8546  ;;  %8572 = vtanh.f32 %v2999_v3 }
 0x46e   :  { %v8549_v63 = vpop.eup %8548  ;;  %8574 = vtanh.f32 %v3000_v47  ;;  %v7928_v47 = vmul.f32 -1.442695, %v3026_v4 }
 0x46f   :  { %v8551_v61 = vpop.eup %8550  ;;  %8576 = vtanh.f32 %v3001_v21  ;;  %v3083_v21 = vmul.f32 %v8549_v63, %v14520_v58  ;;  %v14526_v58 = vld [vmem:[#allocation75_spill] sm:$0xff] }
 0x470   :  { %v8553_v46 = vpop.eup %8552  ;;  %8578 = vtanh.f32 %v3002_v13  ;;  %v3084_v13 = vmul.f32 %v8551_v61, %v14521_v14 }
 0x471   :  { %v8555_v20 = vpop.eup %8554  ;;  %8580 = vpow2.f32 %v7921_v17  ;;  %v3085_v17 = vmul.f32 %v8553_v46, %v14522_v48 }
 0x472   :  { %v8557_v27 = vpop.eup %8556  ;;  %8582 = vpow2.f32 %v7922_v30 }
 0x473   :  { %v8559_v3 = vpop.eup %8558  ;;  %8584 = vpow2.f32 %v7923_v52  ;;  %v3086_v52 = vmul.f32 %v8555_v20, %v14523_v10 }
 0x474   :  { %v8561_v5 = vpop.eup %8560  ;;  %8586 = vpow2.f32 %v7924_v9 }
 0x475   :  { %v8563_v22 = vpop.eup %8562  ;;  %8588 = vpow2.f32 %v7925_v0  ;;  %v14524_v0 = vld [vmem:[#allocation74_spill] sm:$0xff] }
 0x476   :  { %v8565_v23 = vpop.eup %8564  ;;  %8590 = vpow2.f32 %v7926_v1  ;;  %v3087_v29 = vmul.f32 %v8557_v27, %v14524_v0 }
 0x477   :  { %v8567_v11 = vpop.eup %8566  ;;  %8592 = vpow2.f32 %v7927_v28  ;;  %v3091_v40 = vmul.f32 %v8565_v23, %v11210_v53  ;;  %v3088_v28 = vmul.f32 %v8559_v3, %v14526_v58 }
 0x478   :  { %v8569_v30 = vpop.eup %8568  ;;  %8594 = vpow2.f32 %v7928_v47  ;;  %v3092_v4 = vmul.f32 %v8567_v11, %v11213_v16 }
 0x479   :  { %v8571_v9 = vpop.eup %8570  ;;  %v3093_v63 = vmul.f32 %v8569_v30, %v11216_v26  ;;  %v11249_v1 = vadd.f32 %v3091_v40, %v3083_v21 }
 0x47a   :  { %v8573_v61 = vpop.eup %8572  ;;  %v3094_v46 = vmul.f32 %v8571_v9, %v11219_v15  ;;  %v11253_v14 = vadd.f32 %v3092_v4, %v3084_v13 }
 0x47b   :  { %14525 = vst [vmem:[#allocation78_spill] sm:$0xff] %v11249_v1  ;;  %v8575_v53 = vpop.eup %8574  ;;  %v3095_v47 = vmul.f32 %v8573_v61, %v11223_v44  ;;  %v11256_v20 = vadd.f32 %v3093_v63, %v3085_v17  ;;  %8596 = vtanh.f32 %v11249_v1 }
 0x47c   :  { %14527 = vst [vmem:[#allocation79_spill] sm:$0xff] %v11253_v14  ;;  %v8577_v16 = vpop.eup %8576  ;;  %v3096_v27 = vmul.f32 %v8575_v53, %v11227_v42  ;;  %v11260_v26 = vadd.f32 %v3094_v46, %v3086_v52  ;;  %8598 = vtanh.f32 %v11253_v14  ;;  %v14533_v52 = vld [vmem:[#allocation77_spill] sm:$0xff] }
 0x47d   :  { %14528 = vst [vmem:[#allocation80_spill] sm:$0xff] %v11256_v20  ;;  %v8579_v21 = vpop.eup %8578  ;;  %v11263_v3 = vadd.f32 %v3095_v47, %v3087_v29  ;;  %8600 = vtanh.f32 %v11256_v20  ;;  %v14532_v29 = vld [vmem:[#allocation76_spill] sm:$0xff]  ;;  %v3090_v4 = vmul.f32 %v8563_v22, %v14533_v52  ;;  %v3097_v63 = vmul.f32 %v8577_v16, %v11231_v18 }
 0x47e   :  { %14529 = vst [vmem:[#allocation81_spill] sm:$0xff] %v11260_v26  ;;  %v8581_v15 = vpop.eup %8580  ;;  %v11266_v23 = vadd.f32 %v3096_v27, %v3088_v28  ;;  %8602 = vtanh.f32 %v11260_v26  ;;  %v3089_v40 = vmul.f32 %v8561_v5, %v14532_v29  ;;  %v3098_v28 = vmul.f32 %v8579_v21, %v11235_v2 }
 0x47f   :  { %14530 = vst [vmem:[#allocation82_spill] sm:$0xff] %v11263_v3  ;;  %v8583_v44 = vpop.eup %8582  ;;  %v3059_v13 = vadd.f32 1.0, %v8581_v15  ;;  %8604 = vtanh.f32 %v11263_v3 }
 0x480   :  { %14531 = vst [vmem:[#allocation83_spill] sm:$0xff] %v11266_v23  ;;  %v8585_v11 = vpop.eup %8584  ;;  %v3060_v42 = vadd.f32 1.0, %v8583_v44  ;;  %8606 = vtanh.f32 %v11266_v23  ;;  %v11275_v47 = vadd.f32 %v3097_v63, %v3089_v40  ;;  %v11277_v27 = vadd.f32 %v3098_v28, %v3090_v4  ;;  %v14536_v40 = vld [vmem:[#allocation139_spill] sm:$0xff] }
 0x481   :  { %v8587_v48 = vpop.eup %8586  ;;  %v3061_v17 = vadd.f32 1.0, %v8585_v11  ;;  %8608 = vrcp.f32 %v3059_v13 }
 0x482   :  { %v8589_v30 = vpop.eup %8588  ;;  %v3062_v10 = vadd.f32 1.0, %v8587_v48  ;;  %8610 = vrcp.f32 %v3060_v42  ;;  %14534 = vst [vmem:[#allocation84_spill] sm:$0xff] %v11275_v47  ;;  %14535 = vst [vmem:[#allocation85_spill] sm:$0xff] %v11277_v27 }
 0x483   :  { %v8591_v9 = vpop.eup %8590  ;;  %v3063_v0 = vadd.f32 1.0, %v8589_v30  ;;  %8612 = vrcp.f32 %v3061_v17 }
 0x484   :  { %v8593_v61 = vpop.eup %8592  ;;  %v3064_v58 = vadd.f32 1.0, %v8591_v9  ;;  %8614 = vrcp.f32 %v3062_v10  ;;  %v14537_v9 = vld [vmem:[#allocation140_spill] sm:$0xff] }
 0x485   :  { %v8595_v46 = vpop.eup %8594  ;;  %v3065_v53 = vadd.f32 1.0, %v8593_v61  ;;  %8616 = vrcp.f32 %v3063_v0 }
 0x486   :  { %v3066_v5 = vadd.f32 1.0, %v8595_v46  ;;  %8618 = vrcp.f32 %v3064_v58 }
 0x487   :  { %8620 = vrcp.f32 %v3065_v53 }
 0x488   :  { %v8597_v22 = vpop.eup %8596  ;;  %8622 = vrcp.f32 %v3066_v5 }
 0x489   :  { %v8599_v15 = vpop.eup %8598  ;;  %8624 = vtanh.f32 %v11275_v47 }
 0x48a   :  { %v8601_v18 = vpop.eup %8600  ;;  %8626 = vtanh.f32 %v11277_v27 }
 0x48b   :  { %v8603_v16 = vpop.eup %8602 }
 0x48c   :  { %v8605_v2 = vpop.eup %8604 }
 0x48d   :  { %v8607_v21 = vpop.eup %8606 }
 0x48e   :  { %v8609_v44 = vpop.eup %8608 }
 0x48f   :  { %v8611_v13 = vpop.eup %8610  ;;  %v3115_v11 = vmul.f32 %v8609_v44, %v8597_v22 }
 0x490   :  { %v8613_v42 = vpop.eup %8612  ;;  %v3116_v48 = vmul.f32 %v8611_v13, %v8599_v15 }
 0x491   :  { %v8615_v17 = vpop.eup %8614  ;;  %v3117_v29 = vmul.f32 %v8613_v42, %v8601_v18  ;;  %v11282_v30 = vrot.slane %v3115_v11, %v14536_v40  ;;  %v11288_v0 = vrot.slane %v3115_v11, %v14537_v9 }
 0x492   :  { %v8617_v10 = vpop.eup %8616  ;;  %v3118_v52 = vmul.f32 %v8615_v17, %v8603_v16  ;;  %v11285_v4 = vrot.slane %v3116_v48, %v14536_v40  ;;  %v11291_v63 = vrot.slane %v3116_v48, %v14537_v9 }
 0x493   :  { %v8619_v61 = vpop.eup %8618  ;;  %v3119_v58 = vmul.f32 %v8617_v10, %v8605_v2  ;;  %v11294_v28 = vrot.slane %v3117_v29, %v14536_v40  ;;  %v3212_v46 = vpack.c.bf16 %v11282_v30, %v11282_v30  ;;  %v11299_v53 = vrot.slane %v3117_v29, %v14537_v9 }
 0x494   :  { %v8621_v5 = vpop.eup %8620  ;;  %v3120_v22 = vmul.f32 %v8619_v61, %v8607_v21  ;;  %v11302_v15 = vrot.slane %v3118_v52, %v14536_v40  ;;  %v3214_v18 = vpack.c.bf16 %v11285_v4, %v11285_v4  ;;  %v11307_v16 = vrot.slane %v3118_v52, %v14537_v9 }
 0x495   :  { %v8623_v2 = vpop.eup %8622  ;;  %v11310_v44 = vrot.slane %v3119_v58, %v14536_v40  ;;  %v3216_v13 = vpack.c.bf16 %v11294_v28, %v11294_v28  ;;  %v3244_v11 = vunpack.c.l.b16 %v3212_v46  ;;  %v11315_v21 = vrot.slane %v3119_v58, %v14537_v9 }
 0x496   :  { %v8625_v42 = vpop.eup %8624  ;;  %v11318_v48 = vrot.slane %v3120_v22, %v14536_v40  ;;  %v3218_v17 = vpack.c.bf16 %v11302_v15, %v11302_v15  ;;  %v3246_v29 = vunpack.c.l.b16 %v3214_v18  ;;  %v11323_v10 = vrot.slane %v3120_v22, %v14537_v9 }
 0x497   :  { %v8627_v52 = vpop.eup %8626  ;;  %v3121_v61 = vmul.f32 %v8625_v42, %v8621_v5  ;;  %v3220_v46 = vpack.c.bf16 %v11310_v44, %v11310_v44  ;;  %v3248_v27 = vunpack.c.l.b16 %v3216_v13  ;;  %v3211_v58 = vpack.c.bf16 %v11288_v0, %v11288_v0 }
 0x498   :  { %v3122_v47 = vmul.f32 %v8627_v52, %v8623_v2  ;;  %v3222_v23 = vpack.c.bf16 %v11318_v48, %v11318_v48  ;;  %v3250_v3 = vunpack.c.l.b16 %v3218_v17  ;;  %v3360_v26 = vrot.slane %v3246_v29, 7 }
 0x499   :  { %v11332_v18 = vrot.slane %v3121_v61, %v14536_v40  ;;  %v3252_v22 = vunpack.c.l.b16 %v3220_v46  ;;  %v3362_v20 = vrot.slane %v3248_v27, 6  ;;  %v11335_v5 = vrot.slane %v3121_v61, %v14537_v9 }
 0x49a   :  { %v3194_v42 = vrot.slane %v3122_v47, %v14536_v40  ;;  %v3254_v13 = vunpack.c.l.b16 %v3222_v23  ;;  %v3361_v14 = vsel %vm1672_vm0, %v3360_v26, %v3244_v11  ;;  %v3364_v1 = vrot.slane %v3250_v3, 5 }
 0x49b   :  { %v3224_v2 = vpack.c.bf16 %v11332_v18, %v11332_v18  ;;  %v3363_v17 = vsel %vm1675_vm1, %v3362_v20, %v3361_v14  ;;  %v3366_v29 = vrot.slane %v3252_v22, 4  ;;  %v11343_v52 = vrot.slane %v3122_v47, %v14537_v9 }
 0x49c   :  { %v3226_v46 = vpack.c.bf16 %v3194_v42, %v3194_v42  ;;  %v3365_v27 = vsel %vm1678_vm2, %v3364_v1, %v3363_v17  ;;  %v3368_v61 = vrot.slane %v3254_v13, 3  ;;  %v3213_v40 = vpack.c.bf16 %v11291_v63, %v11291_v63 }
 0x49d   :  { %v3256_v23 = vunpack.c.l.b16 %v3224_v2  ;;  %v3367_v26 = vsel %vm1611_vm5, %v3366_v29, %v3365_v27  ;;  %v3215_v3 = vpack.c.bf16 %v11299_v53, %v11299_v53  ;;  %v3217_v14 = vpack.c.bf16 %v11307_v16, %v11307_v16 }
 0x49e   :  { %v3258_v20 = vunpack.c.l.b16 %v3226_v46  ;;  %v3369_v47 = vsel %vm1684_vm6, %v3368_v61, %v3367_v26  ;;  %v3219_v11 = vpack.c.bf16 %v11315_v21, %v11315_v21  ;;  %v3221_v1 = vpack.c.bf16 %v11323_v10, %v11323_v10 }
 0x49f   :  { %v3370_v22 = vrot.slane %v3256_v23, 2  ;;  %v3223_v13 = vpack.c.bf16 %v11335_v5, %v11335_v5  ;;  %v3225_v29 = vpack.c.bf16 %v11343_v52, %v11343_v52  ;;  %v3243_v46 = vunpack.c.l.b16 %v3211_v58  ;;  %v3290_v58 = vld [vmem:[%s13796_s2] sm:$0x22] }
 0x4a0   :  { %v3372_v17 = vrot.slane %v3258_v20, 1  ;;  %v3245_v27 = vunpack.c.l.b16 %v3213_v40  ;;  %v3247_v26 = vunpack.c.l.b16 %v3215_v3  ;;  %v3249_v9 = vunpack.c.l.b16 %v3217_v14  ;;  %v3296_v3 = vld [vmem:[%s13796_s2 + $0x10] sm:$0x22] }
 0x4a1   :  { %v3371_v23 = vsel %vm1687_vm8, %v3370_v22, %v3369_v47  ;;  %v3251_v36 = vunpack.c.l.b16 %v3219_v11  ;;  %v3253_v6 = vunpack.c.l.b16 %v3221_v1  ;;  %v8193_v20 = vpack.c.bf16 %v11282_v30, %v11288_v0  ;;  %v3293_v47 = vld [vmem:[%s13796_s2 + $0x8] sm:$0x22] }
 0x4a2   :  { %v3373_v19 = vsel %vm1690_vm11, %v3372_v17, %v3371_v23  ;;  %v8194_v40 = vpack.c.bf16 %v11285_v4, %v11291_v63  ;;  %v8195_v11 = vpack.c.bf16 %v11294_v28, %v11299_v53  ;;  %v8196_v30 = vpack.c.bf16 %v11302_v15, %v11307_v16  ;;  %v3302_v63 = vld [vmem:[%s13796_s2 + $0x20] sm:$0x22] }
 0x4a3   :  { %v3375_v14 = vpack.c.b16 %v3373_v19, %v3373_v19  ;;  %v8197_v4 = vpack.c.bf16 %v11310_v44, %v11315_v21  ;;  %v3299_v19 = vld [vmem:[%s13796_s2 + $0x18] sm:$0x22]  ;;  %v8198_v28 = vpack.c.bf16 %v11318_v48, %v11323_v10  ;;  %v8199_v53 = vpack.c.bf16 %v11332_v18, %v11335_v5  ;;  %v3305_v44 = vld [vmem:[%s13796_s2 + $0x28] sm:$0x22]  ;;  %v3308_v21 = vld [vmem:[%s13796_s2 + $0x30] sm:$0x22] }
 0x4a4   :  { %v8200_v15 = vpack.c.bf16 %v3194_v42, %v11343_v52  ;;  %v3267_v16 = vrot.slane %v8193_v20, 7  ;;  %v3268_v1 = vrot.slane %v8194_v40, 7  ;;  %v3269_v22 = vrot.slane %v8195_v11, 7  ;;  %v3311_v10 = vld [vmem:[%s13796_s2 + $0x38] sm:$0x22] }
 0x4a5   :  { %3410 = vmatprep.mubr.bf16.mxu0 %v3375_v14  ;;  %3451 = vmatprep.mubr.bf16.mxu1 %v3375_v14  ;;  %v3270_v2 = vrot.slane %v8196_v30, 7  ;;  %v3271_v48 = vrot.slane %v8197_v4, 7  ;;  %v3272_v18 = vrot.slane %v8198_v28, 7  ;;  %v3273_v5 = vrot.slane %v8199_v53, 7 }
 0x4a6   :  { %v3274_v42 = vrot.slane %v8200_v15, 7  ;;  %v3291_v52 = vsel %vm11399_vm13, %v3267_v16, %v3290_v58  ;;  %v3294_v17 = vsel %vm11399_vm13, %v3268_v1, %v3293_v47  ;;  %v3297_v61 = vsel %vm11399_vm13, %v3269_v22, %v3296_v3  ;;  %v14549_v1 = vld [vmem:[#allocation101_spill] sm:$0xff]  ;;  %v14550_v22 = vld [vmem:[#allocation102_spill] sm:$0xff] }
 0x4a7   :  { %3292 = vst [vmem:[%s13796_s2] sm:$0x22] %v3291_v52  ;;  %v3300_v23 = vsel %vm11399_vm13, %v3270_v2, %v3299_v19  ;;  %v3303_v20 = vsel %vm11399_vm13, %v3271_v48, %v3302_v63  ;;  %3295 = vst [vmem:[%s13796_s2 + $0x8] sm:$0x22] %v3294_v17  ;;  %v3306_v40 = vsel %vm11399_vm13, %v3272_v18, %v3305_v44  ;;  %v3346_v3 = vrot.slane %v3245_v27, 7  ;;  %v14551_v2 = vld [vmem:[#allocation103_spill] sm:$0xff]  ;;  %v14552_v48 = vld [vmem:[#allocation104_spill] sm:$0xff] }
 0x4a8   :  { %3298 = vst [vmem:[%s13796_s2 + $0x10] sm:$0x22] %v3297_v61  ;;  %3301 = vst [vmem:[%s13796_s2 + $0x18] sm:$0x22] %v3300_v23  ;;  %v3309_v58 = vsel %vm11399_vm13, %v3273_v5, %v3308_v21  ;;  %v3312_v47 = vsel %vm11399_vm13, %v3274_v42, %v3311_v10  ;;  %v3255_v11 = vunpack.c.l.b16 %v3223_v13  ;;  %v3348_v30 = vrot.slane %v3247_v26, 6  ;;  %v14553_v10 = vld [vmem:[#allocation105_spill] sm:$0xff] }
 0x4a9   :  { %3304 = vst [vmem:[%s13796_s2 + $0x20] sm:$0x22] %v3303_v20  ;;  %3307 = vst [vmem:[%s13796_s2 + $0x28] sm:$0x22] %v3306_v40  ;;  %v3257_v4 = vunpack.c.l.b16 %v3225_v29  ;;  %v3347_v19 = vsel %vm1672_vm0, %v3346_v3, %v3243_v46  ;;  %v3350_v0 = vrot.slane %v3249_v9, 5  ;;  %v3352_v13 = vrot.slane %v3251_v36, 4 }
 0x4aa   :  { %3310 = vst [vmem:[%s13796_s2 + $0x30] sm:$0x22] %v3309_v58  ;;  %3313 = vst [vmem:[%s13796_s2 + $0x38] sm:$0x22] %v3312_v47  ;;  %v3349_v27 = vsel %vm1675_vm1, %v3348_v30, %v3347_v19  ;;  %v3354_v28 = vrot.slane %v3253_v6, 3  ;;  %v3356_v15 = vrot.slane %v3255_v11, 2 }
 0x4ab   :  { %v3351_v63 = vsel %vm1678_vm2, %v3350_v0, %v3349_v27  ;;  %v3358_v44 = vrot.slane %v3257_v4, 1  ;;  %v14544_v6 = vld [vmem:[#allocation96_spill] sm:$0xff]  ;;  %v14545_v36 = vld [vmem:[#allocation97_spill] sm:$0xff]  ;;  %v14546_v9 = vld [vmem:[#allocation98_spill] sm:$0xff] }
 0x4ac   :  { %v3353_v53 = vsel %vm1611_vm5, %v3352_v13, %v3351_v63  ;;  %v14547_v46 = vld [vmem:[#allocation99_spill] sm:$0xff]  ;;  %v14554_v18 = vld [vmem:[#allocation106_spill] sm:$0xff]  ;;  %v14556_v42 = vld [vmem:[#allocation108_spill] sm:$0xff] }
 0x4ad   :  { %v3355_v16 = vsel %vm1684_vm6, %v3354_v28, %v3353_v53  ;;  %v14555_v5 = vld [vmem:[#allocation107_spill] sm:$0xff]  ;;  %v14557_v52 = vld [vmem:[#allocation109_spill] sm:$0xff]  ;;  %v14558_v17 = vld [vmem:[#allocation110_spill] sm:$0xff] }
 0x4ae   :  { %v3357_v21 = vsel %vm1687_vm8, %v3356_v15, %v3355_v16  ;;  %v14559_v61 = vld [vmem:[#allocation111_spill] sm:$0xff]  ;;  %v14560_v23 = vld [vmem:[#allocation112_spill] sm:$0xff]  ;;  %v14561_v20 = vld [vmem:[#allocation113_spill] sm:$0xff] }
 0x4af   :  { %v3359_v26 = vsel %vm1690_vm11, %v3358_v44, %v3357_v21  ;;  %v14562_v40 = vld [vmem:[#allocation114_spill] sm:$0xff]  ;;  %v14563_v58 = vld [vmem:[#allocation115_spill] sm:$0xff]  ;;  %v14564_v47 = vld [vmem:[#allocation116_spill] sm:$0xff] }
 0x4b0   :  { %v11470_v29 = vpack.c.b16 %v3359_v26, %v3359_v26  ;;  %v14565_v3 = vld [vmem:[#allocation117_spill] sm:$0xff]  ;;  %v14566_v11 = vld [vmem:[#allocation118_spill] sm:$0xff]  ;;  %v14567_v30 = vld [vmem:[#allocation119_spill] sm:$0xff] }
 0x4b1   :  { %v14568_v4 = vld [vmem:[#allocation120_spill] sm:$0xff]  ;;  %v14569_v19 = vld [vmem:[#allocation121_spill] sm:$0xff]  ;;  %v14570_v0 = vld [vmem:[#allocation122_spill] sm:$0xff] }
 0x4b2   :  { %3411 = vmatmul.mubr.bf16.vlgmr.msra.gmra.mxu0 %v11470_v29  ;;  %3452 = vmatmul.mubr.bf16.vlgmr.msra.gmra.mxu1 %v11470_v29  ;;  %v14571_v27 = vld [vmem:[#allocation123_spill] sm:$0xff]  ;;  %v14572_v13 = vld [vmem:[#allocation124_spill] sm:$0xff]  ;;  %v14573_v63 = vld [vmem:[#allocation125_spill] sm:$0xff] }
 0x4b3   :  { %3461 = vmatpush1.bf16.msra.mxu0 %v14292_v31  ;;  %3502 = vmatpush1.bf16.msra.mxu1 %v14293_v39  ;;  %v14574_v28 = vld [vmem:[#allocation126_spill] sm:$0xff]  ;;  %v14575_v53 = vld [vmem:[#allocation127_spill] sm:$0xff]  ;;  %v14576_v15 = vld [vmem:[#allocation128_spill] sm:$0xff] }
 0x4b4   :  { %3492 = vmatprep.mubr.bf16.mxu0 %v3375_v14  ;;  %3533 = vmatprep.mubr.bf16.mxu1 %v3375_v14  ;;  %v14548_v14 = vld [vmem:[#allocation100_spill] sm:$0xff]  ;;  %v14577_v16 = vld [vmem:[#allocation129_spill] sm:$0xff]  ;;  %v14578_v44 = vld [vmem:[#allocation130_spill] sm:$0xff] }
 0x4b5   :  { %3462 = vmatprep.subr.bf16.mxu0 %v14294_v35  ;;  %3503 = vmatprep.subr.bf16.mxu1 %v14295_v12  ;;  %v14579_v21 = vld [vmem:[#allocation131_spill] sm:$0xff]  ;;  %v14580_v26 = vld [vmem:[#allocation4_spill] sm:$0xff]  ;;  %vm12376_vm13 = vmand %vm1687_vm8, %vm4963_vm10  ;;  %vm6636_vm10 = vsmask.f32 3328 }
 0x4b6   :  { %vm12405_vm14 = vmor %vm12376_vm13, %vm12368_vm12  ;;  %vm6639_vm12 = vsmask.f32 7424 }
 0x4b7   :  { %3463 = vmatpush1.bf16.msra.mxu0 %v14296_v43  ;;  %3504 = vmatpush1.bf16.msra.mxu1 %v14297_v41  ;;  %vm13374_vm13 = vmand %vm1678_vm2, %vm6636_vm10 }
 0x4b8   :  { %3464 = vmatprep.subr.bf16.mxu0 %v14298_v55  ;;  %3505 = vmatprep.subr.bf16.mxu1 %v14299_v34 }
 0x4bb   :  { %3465 = vmatpush1.bf16.msra.mxu0 %v14300_v56  ;;  %3506 = vmatpush1.bf16.msra.mxu1 %v14301_v32 }
 0x4bc   :  { %3466 = vmatprep.subr.bf16.mxu0 %v14302_v54  ;;  %3507 = vmatprep.subr.bf16.mxu1 %v14303_v60 }
 0x4bf   :  { %3467 = vmatpush1.bf16.msra.mxu0 %v14304_v50  ;;  %3508 = vmatpush1.bf16.msra.mxu1 %v14305_v59 }
 0x4c0   :  { %3468 = vmatprep.subr.bf16.mxu0 %v14306_v45  ;;  %3509 = vmatprep.subr.bf16.mxu1 %v14307_v33 }
 0x4c3   :  { %3469 = vmatpush1.bf16.msra.mxu0 %v14308_v8  ;;  %3510 = vmatpush1.bf16.msra.mxu1 %v14309_v38 }
 0x4c4   :  { %3470 = vmatprep.subr.bf16.mxu0 %v14310_v7  ;;  %3511 = vmatprep.subr.bf16.mxu1 %v14311_v24 }
 0x4c7   :  { %3471 = vmatpush1.bf16.msra.mxu0 %v14312_v37  ;;  %3512 = vmatpush1.bf16.msra.mxu1 %v14313_v25 }
 0x4c8   :  { %3472 = vmatprep.subr.bf16.mxu0 %v14314_v62  ;;  %3513 = vmatprep.subr.bf16.mxu1 %v14315_v49 }
 0x4cb   :  { %3473 = vmatpush1.bf16.msra.mxu0 %v14316_v51  ;;  %3514 = vmatpush1.bf16.msra.mxu1 %v14416_v57 }
 0x4cc   :  { %3474 = vmatprep.subr.bf16.mxu0 %v14544_v6  ;;  %3515 = vmatprep.subr.bf16.mxu1 %v14545_v36 }
 0x4cf   :  { %3475 = vmatpush1.bf16.msra.mxu0 %v14546_v9  ;;  %3516 = vmatpush1.bf16.msra.mxu1 %v14547_v46 }
 0x4d0   :  { %3476 = vmatprep.subr.bf16.mxu0 %v14548_v14  ;;  %3517 = vmatprep.subr.bf16.mxu1 %v14549_v1 }
 0x4d3   :  { %3477 = vmatpush2.bf16.msra.mxu0 %v14550_v22  ;;  %3518 = vmatpush2.bf16.msra.mxu1 %v14551_v2 }
 0x4d4   :  { %3478 = vmatprep.subr.bf16.mxu0 %v14552_v48  ;;  %3519 = vmatprep.subr.bf16.mxu1 %v14553_v10 }
 0x4d7   :  { %3479 = vmatpush2.bf16.msra.mxu0 %v14554_v18  ;;  %3520 = vmatpush2.bf16.msra.mxu1 %v14555_v5 }
 0x4d8   :  { %3480 = vmatprep.subr.bf16.mxu0 %v14556_v42  ;;  %3521 = vmatprep.subr.bf16.mxu1 %v14557_v52  ;;  %v7947_v42 = vld [vmem:[%s13795_s0 + $0x143] ss:$8 sm:$0xf] }
 0x4db   :  { %3481 = vmatpush2.bf16.msra.mxu0 %v14558_v17  ;;  %3522 = vmatpush2.bf16.msra.mxu1 %v14559_v61  ;;  %v7946_v61 = vld [vmem:[%s13795_s0 + $0x103] ss:$8 sm:$0xf0] }
 0x4dc   :  { %3482 = vmatprep.subr.bf16.mxu0 %v14560_v23  ;;  %3523 = vmatprep.subr.bf16.mxu1 %v14561_v20 }
 0x4df   :  { %3483 = vmatpush2.bf16.msra.mxu0 %v14562_v40  ;;  %3524 = vmatpush2.bf16.msra.mxu1 %v14563_v58 }
 0x4e0   :  { %3484 = vmatprep.subr.bf16.mxu0 %v14564_v47  ;;  %3525 = vmatprep.subr.bf16.mxu1 %v14565_v3 }
 0x4e3   :  { %3485 = vmatpush2.bf16.msra.mxu0 %v14566_v11  ;;  %3526 = vmatpush2.bf16.msra.mxu1 %v14567_v30  ;;  %v14646_v11 = vld [vmem:[#allocation132_spill] sm:$0xff] }
 0x4e4   :  { %3486 = vmatprep.subr.bf16.mxu0 %v14568_v4  ;;  %3527 = vmatprep.subr.bf16.mxu1 %v14569_v19 }
 0x4e7   :  { %3487 = vmatpush2.bf16.msra.mxu0 %v14570_v0  ;;  %3528 = vmatpush2.bf16.msra.mxu1 %v14571_v27  ;;  %v14581_v0 = vld [vmem:[#allocation6_spill] sm:$0xff] }
 0x4e8   :  { %3488 = vmatprep.subr.bf16.mxu0 %v14572_v13  ;;  %3529 = vmatprep.subr.bf16.mxu1 %v14573_v63  ;;  %v14582_v63 = vld [vmem:[#allocation5_spill] sm:$0xff]  ;;  %v14591_v13 = vld [vmem:[#allocation15_spill] sm:$0xff] }
 0x4eb   :  { %3489 = vmatpush2.bf16.msra.mxu0 %v14574_v28  ;;  %3530 = vmatpush2.bf16.msra.mxu1 %v14575_v53  ;;  %v14583_v28 = vld [vmem:[#allocation7_spill] sm:$0xff]  ;;  %v14584_v53 = vld [vmem:[#allocation8_spill] sm:$0xff] }
 0x4ec   :  { %3490 = vmatprep.subr.bf16.mxu0 %v14576_v15  ;;  %3531 = vmatprep.subr.bf16.mxu1 %v14577_v16  ;;  %v14585_v15 = vld [vmem:[#allocation9_spill] sm:$0xff]  ;;  %v14586_v16 = vld [vmem:[#allocation10_spill] sm:$0xff] }
 0x4ef   :  { %3491 = vmatpush2.bf16.msra.mxu0 %v14578_v44  ;;  %3532 = vmatpush2.bf16.msra.mxu1 %v14579_v21  ;;  %v14587_v44 = vld [vmem:[#allocation11_spill] sm:$0xff]  ;;  %v14588_v21 = vld [vmem:[#allocation12_spill] sm:$0xff] }
 0x4f0   :  { %4227 = vmatprep.subr.bf16.mxu0 %v14580_v26  ;;  %4268 = vmatprep.subr.bf16.mxu1 %v14581_v0  ;;  %v14589_v26 = vld [vmem:[#allocation13_spill] sm:$0xff]  ;;  %v14590_v0 = vld [vmem:[#allocation14_spill] sm:$0xff] }
 0x4f2   :  { %3493 = vmatmul.mubr.bf16.vlgmr.msra.gmra.mxu0 %v11470_v29  ;;  %3534 = vmatmul.mubr.bf16.vlgmr.msra.gmra.mxu1 %v11470_v29  ;;  %v14592_v29 = vld [vmem:[#allocation16_spill] sm:$0xff] }
 0x4f3   :  { %4228 = vmatpush1.bf16.msra.mxu0 %v14582_v63  ;;  %4269 = vmatpush1.bf16.msra.mxu1 %v14583_v28  ;;  %v14593_v63 = vld [vmem:[#allocation17_spill] sm:$0xff]  ;;  %v14594_v28 = vld [vmem:[#allocation18_spill] sm:$0xff] }
 0x4f4   :  { %4229 = vmatprep.subr.bf16.mxu0 %v14584_v53  ;;  %4270 = vmatprep.subr.bf16.mxu1 %v14585_v15  ;;  %v14595_v53 = vld [vmem:[#allocation19_spill] sm:$0xff]  ;;  %v14596_v15 = vld [vmem:[#allocation20_spill] sm:$0xff] }
 0x4f7   :  { %4230 = vmatpush1.bf16.msra.mxu0 %v14586_v16  ;;  %4271 = vmatpush1.bf16.msra.mxu1 %v14587_v44  ;;  %v14597_v16 = vld [vmem:[#allocation21_spill] sm:$0xff]  ;;  %v14598_v44 = vld [vmem:[#allocation22_spill] sm:$0xff] }
 0x4f8   :  { %4231 = vmatprep.subr.bf16.mxu0 %v14588_v21  ;;  %4272 = vmatprep.subr.bf16.mxu1 %v14589_v26  ;;  %v14599_v21 = vld [vmem:[#allocation23_spill] sm:$0xff]  ;;  %v14600_v26 = vld [vmem:[#allocation24_spill] sm:$0xff] }
 0x4fb   :  { %4232 = vmatpush1.bf16.msra.mxu0 %v14590_v0  ;;  %4273 = vmatpush1.bf16.msra.mxu1 %v14591_v13  ;;  %v14601_v0 = vld [vmem:[#allocation25_spill] sm:$0xff]  ;;  %v14602_v13 = vld [vmem:[#allocation26_spill] sm:$0xff] }
 0x4fc   :  { %4233 = vmatprep.subr.bf16.mxu0 %v14592_v29  ;;  %4274 = vmatprep.subr.bf16.mxu1 %v14593_v63  ;;  %v14603_v29 = vld [vmem:[#allocation27_spill] sm:$0xff]  ;;  %v14604_v63 = vld [vmem:[#allocation28_spill] sm:$0xff] }
 0x4ff   :  { %4234 = vmatpush1.bf16.msra.mxu0 %v14594_v28  ;;  %4275 = vmatpush1.bf16.msra.mxu1 %v14595_v53  ;;  %v14605_v28 = vld [vmem:[#allocation29_spill] sm:$0xff]  ;;  %v14606_v53 = vld [vmem:[#allocation30_spill] sm:$0xff] }
 0x500   :  { %4235 = vmatprep.subr.bf16.mxu0 %v14596_v15  ;;  %4276 = vmatprep.subr.bf16.mxu1 %v14597_v16  ;;  %v14607_v15 = vld [vmem:[#allocation31_spill] sm:$0xff]  ;;  %v14608_v16 = vld [vmem:[#allocation32_spill] sm:$0xff] }
 0x503   :  { %4236 = vmatpush1.bf16.msra.mxu0 %v14598_v44  ;;  %4277 = vmatpush1.bf16.msra.mxu1 %v14599_v21  ;;  %v14609_v44 = vld [vmem:[#allocation33_spill] sm:$0xff]  ;;  %v14610_v21 = vld [vmem:[#allocation34_spill] sm:$0xff] }
 0x504   :  { %4237 = vmatprep.subr.bf16.mxu0 %v14600_v26  ;;  %4278 = vmatprep.subr.bf16.mxu1 %v14601_v0  ;;  %v14611_v26 = vld [vmem:[#allocation35_spill] sm:$0xff]  ;;  %v14612_v0 = vld [vmem:[#allocation36_spill] sm:$0xff] }
 0x507   :  { %4238 = vmatpush1.bf16.msra.mxu0 %v14602_v13  ;;  %4279 = vmatpush1.bf16.msra.mxu1 %v14603_v29  ;;  %v14613_v13 = vld [vmem:[#allocation37_spill] sm:$0xff]  ;;  %v14614_v29 = vld [vmem:[#allocation38_spill] sm:$0xff] }
 0x508   :  { %4239 = vmatprep.subr.bf16.mxu0 %v14604_v63  ;;  %4280 = vmatprep.subr.bf16.mxu1 %v14605_v28  ;;  %v14615_v63 = vld [vmem:[#allocation39_spill] sm:$0xff]  ;;  %v14616_v28 = vld [vmem:[#allocation40_spill] sm:$0xff] }
 0x50b   :  { %4240 = vmatpush1.bf16.msra.mxu0 %v14606_v53  ;;  %4281 = vmatpush1.bf16.msra.mxu1 %v14607_v15  ;;  %v14617_v53 = vld [vmem:[#allocation41_spill] sm:$0xff]  ;;  %v14618_v15 = vld [vmem:[#allocation42_spill] sm:$0xff] }
 0x50c   :  { %4241 = vmatprep.subr.bf16.mxu0 %v14608_v16  ;;  %4282 = vmatprep.subr.bf16.mxu1 %v14609_v44  ;;  %v14619_v16 = vld [vmem:[#allocation43_spill] sm:$0xff]  ;;  %v14620_v44 = vld [vmem:[#allocation44_spill] sm:$0xff] }
 0x50f   :  { %4242 = vmatpush1.bf16.msra.mxu0 %v14610_v21  ;;  %4283 = vmatpush1.bf16.msra.mxu1 %v14611_v26  ;;  %v14621_v21 = vld [vmem:[#allocation45_spill] sm:$0xff]  ;;  %v14622_v26 = vld [vmem:[#allocation46_spill] sm:$0xff] }
 0x510   :  { %4243 = vmatprep.subr.bf16.mxu0 %v14612_v0  ;;  %4284 = vmatprep.subr.bf16.mxu1 %v14613_v13  ;;  %v14623_v0 = vld [vmem:[#allocation47_spill] sm:$0xff]  ;;  %v14624_v13 = vld [vmem:[#allocation48_spill] sm:$0xff] }
 0x513   :  { %4244 = vmatpush2.bf16.msra.mxu0 %v14614_v29  ;;  %4285 = vmatpush2.bf16.msra.mxu1 %v14615_v63  ;;  %v14625_v29 = vld [vmem:[#allocation49_spill] sm:$0xff]  ;;  %v14626_v63 = vld [vmem:[#allocation50_spill] sm:$0xff] }
 0x514   :  { %4245 = vmatprep.subr.bf16.mxu0 %v14616_v28  ;;  %4286 = vmatprep.subr.bf16.mxu1 %v14617_v53  ;;  %v14627_v28 = vld [vmem:[#allocation51_spill] sm:$0xff]  ;;  %v14628_v53 = vld [vmem:[#allocation52_spill] sm:$0xff] }
 0x517   :  { %4246 = vmatpush2.bf16.msra.mxu0 %v14618_v15  ;;  %4287 = vmatpush2.bf16.msra.mxu1 %v14619_v16  ;;  %v14629_v15 = vld [vmem:[#allocation53_spill] sm:$0xff]  ;;  %v14630_v16 = vld [vmem:[#allocation54_spill] sm:$0xff] }
 0x518   :  { %4247 = vmatprep.subr.bf16.mxu0 %v14620_v44  ;;  %4288 = vmatprep.subr.bf16.mxu1 %v14621_v21  ;;  %v14631_v44 = vld [vmem:[#allocation55_spill] sm:$0xff]  ;;  %v14632_v21 = vld [vmem:[#allocation56_spill] sm:$0xff] }
 0x51b   :  { %4248 = vmatpush2.bf16.msra.mxu0 %v14622_v26  ;;  %4289 = vmatpush2.bf16.msra.mxu1 %v14623_v0  ;;  %v14633_v26 = vld [vmem:[#allocation57_spill] sm:$0xff]  ;;  %v14634_v0 = vld [vmem:[#allocation58_spill] sm:$0xff] }
 0x51c   :  { %4249 = vmatprep.subr.bf16.mxu0 %v14624_v13  ;;  %4290 = vmatprep.subr.bf16.mxu1 %v14625_v29  ;;  %v14635_v13 = vld [vmem:[#allocation59_spill] sm:$0xff]  ;;  %v14636_v29 = vld [vmem:[#allocation60_spill] sm:$0xff] }
 0x51f   :  { %4250 = vmatpush2.bf16.msra.mxu0 %v14626_v63  ;;  %4291 = vmatpush2.bf16.msra.mxu1 %v14627_v28  ;;  %v14637_v63 = vld [vmem:[#allocation61_spill] sm:$0xff]  ;;  %v14638_v28 = vld [vmem:[#allocation62_spill] sm:$0xff] }
 0x520   :  { %4251 = vmatprep.subr.bf16.mxu0 %v14628_v53  ;;  %4292 = vmatprep.subr.bf16.mxu1 %v14629_v15  ;;  %v14639_v53 = vld [vmem:[#allocation63_spill] sm:$0xff]  ;;  %v14640_v15 = vld [vmem:[#allocation64_spill] sm:$0xff] }
 0x523   :  { %4252 = vmatpush2.bf16.msra.mxu0 %v14630_v16  ;;  %4293 = vmatpush2.bf16.msra.mxu1 %v14631_v44  ;;  %v14641_v16 = vld [vmem:[#allocation65_spill] sm:$0xff]  ;;  %v14642_v44 = vld [vmem:[#allocation66_spill] sm:$0xff] }
 0x524   :  { %4253 = vmatprep.subr.bf16.mxu0 %v14632_v21  ;;  %4294 = vmatprep.subr.bf16.mxu1 %v14633_v26  ;;  %v14643_v21 = vld [vmem:[#allocation67_spill] sm:$0xff]  ;;  %v14644_v26 = vld [vmem:[#allocation68_spill] sm:$0xff] }
 0x527   :  { %4254 = vmatpush2.bf16.msra.mxu0 %v14634_v0  ;;  %4295 = vmatpush2.bf16.msra.mxu1 %v14635_v13  ;;  %v14645_v0 = vld [vmem:[#allocation69_spill] sm:$0xff] }
 0x528   :  { %4255 = vmatprep.subr.bf16.mxu0 %v14636_v29  ;;  %4296 = vmatprep.subr.bf16.mxu1 %v14637_v63 }
 0x52b   :  { %4256 = vmatpush2.bf16.msra.mxu0 %v14638_v28  ;;  %4297 = vmatpush2.bf16.msra.mxu1 %v14639_v53 }
 0x52c   :  { %4257 = vmatprep.subr.bf16.mxu0 %v14640_v15  ;;  %4298 = vmatprep.subr.bf16.mxu1 %v14641_v16 }
 0x52f   :  { %4258 = vmatpush2.bf16.msra.mxu0 %v14642_v44  ;;  %4299 = vmatpush2.bf16.msra.mxu1 %v14643_v21 }
 0x530   :  { %4309 = vmatprep.subr.bf16.mxu0 %v14644_v26  ;;  %4350 = vmatprep.subr.bf16.mxu1 %v14645_v0 }
 0x572   :  { %v3412_v13 = vpop.f32.mrf.mxu0  ;;  %v3453_v29 = vpop.f32.mrf.mxu1 }
 0x574   :  { %v3414_v27 = vpop.f32.mrf.mxu0  ;;  %v3455_v63 = vpop.f32.mrf.mxu1 }
 0x575   :  { %v3550_v19 = vcombine.low %v3412_v13, %v3414_v27  ;;  %v3551_v28 = vcombine.high %v3412_v13, %v3414_v27  ;;  %v3552_v4 = vcombine.low %v3453_v29, %v3455_v63  ;;  %v3553_v53 = vcombine.high %v3453_v29, %v3455_v63  ;;  %v7941_v13 = vld [vmem:[%s13795_s0 + $0x83] ss:$8 sm:$0xf] }
 0x576   :  { %v3416_v30 = vpop.f32.mrf.mxu0  ;;  %v3457_v15 = vpop.f32.mrf.mxu1  ;;  %v7942_v63 = vld [vmem:[%s13795_s0 + $0x83] ss:$8 sm:$0xf0] }
 0x577   :  { %v3564_v16 = vrot.slane %v3550_v19, %v14646_v11  ;;  %v3571_v44 = vrot.slane %v3551_v28, %v14646_v11  ;;  %v3578_v21 = vrot.slane %v3552_v4, %v14646_v11  ;;  %v3585_v26 = vrot.slane %v3553_v53, %v14646_v11  ;;  %v7937_v30 = vld [vmem:[%s13795_s0 + $0x3] ss:$8 sm:$0xf] }
 0x578   :  { %v3417_v3 = vpop.f32.mrf.mxu0  ;;  %v3458_v0 = vpop.f32.mrf.mxu1  ;;  %v7938_v19 = vld [vmem:[%s13795_s0 + $0x3] ss:$8 sm:$0xf0] }
 0x579   :  { %v3614_v47 = vcombine.low %v3564_v16, %v3578_v21  ;;  %v3615_v58 = vcombine.high %v3564_v16, %v3578_v21  ;;  %v3616_v40 = vcombine.low %v3571_v44, %v3585_v26  ;;  %v3617_v20 = vcombine.high %v3571_v44, %v3585_v26  ;;  %v7939_v4 = vld [vmem:[%s13795_s0 + $0x43] ss:$8 sm:$0xf] }
 0x57a   :  { %v7940_v3 = vld [vmem:[%s13795_s0 + $0x43] ss:$8 sm:$0xf0]  ;;  %v3317_v18 = vor.u32 %v7938_v19, %v7937_v30 }
 0x57b   :  { %v7943_v16 = vld [vmem:[%s13795_s0 + $0xc3] ss:$8 sm:$0xf]  ;;  %v3321_v10 = vor.u32 %v7940_v3, %v7939_v4  ;;  %v3642_v14 = vrot.slane %v3615_v58, %v14646_v11 }
 0x57c   :  { %v7944_v44 = vld [vmem:[%s13795_s0 + $0xc3] ss:$8 sm:$0xf0] }
 0x57d   :  { %v7945_v29 = vld [vmem:[%s13795_s0 + $0x103] ss:$8 sm:$0xf] }
 0x57e   :  { %v7952_v30 = vld [vmem:[%s13795_s0 + $0x1c3] ss:$8 sm:$0xf0] }
 0x5b2   :  { %v3494_v23 = vpop.f32.mrf.mxu0  ;;  %v3535_v27 = vpop.f32.mrf.mxu1 }
 0x5b4   :  { %v3496_v0 = vpop.f32.mrf.mxu0  ;;  %v3537_v28 = vpop.f32.mrf.mxu1 }
 0x5b5   :  { %v3554_v53 = vcombine.low %v3494_v23, %v3496_v0  ;;  %v3555_v15 = vcombine.high %v3494_v23, %v3496_v0  ;;  %v3556_v21 = vcombine.low %v3535_v27, %v3537_v28  ;;  %v3557_v26 = vcombine.high %v3535_v27, %v3537_v28  ;;  %v7948_v27 = vld [vmem:[%s13795_s0 + $0x143] ss:$8 sm:$0xf0] }
 0x5b6   :  { %v3498_v17 = vpop.f32.mrf.mxu0  ;;  %v3539_v23 = vpop.f32.mrf.mxu1 }
 0x5b7   :  { %v3592_v0 = vrot.slane %v3554_v53, %v14646_v11  ;;  %v3599_v52 = vrot.slane %v3555_v15, %v14646_v11  ;;  %v3606_v28 = vrot.slane %v3556_v21, %v14646_v11  ;;  %v3613_v5 = vrot.slane %v3557_v26, %v14646_v11  ;;  %v7949_v53 = vld [vmem:[%s13795_s0 + $0x183] ss:$8 sm:$0xf] }
 0x5b8   :  { %v3325_v17 = vor.u32 %v7942_v63, %v7941_v13  ;;  %v3329_v23 = vor.u32 %v7944_v44, %v7943_v16  ;;  %v7950_v15 = vld [vmem:[%s13795_s0 + $0x183] ss:$8 sm:$0xf0]  ;;  %v3499_v48 = vpop.f32.mrf.mxu0  ;;  %v3540_v2 = vpop.f32.mrf.mxu1  ;;  %v3628_v63 = vrot.slane %v3614_v47, %v14646_v11  ;;  %v3635_v16 = vrot.slane %v3616_v40, %v14646_v11 }
 0x5b9   :  { %v7951_v21 = vld [vmem:[%s13795_s0 + $0x1c3] ss:$8 sm:$0xf]  ;;  %v3618_v19 = vcombine.low %v3592_v0, %v3606_v28  ;;  %v3619_v4 = vcombine.high %v3592_v0, %v3606_v28  ;;  %v3620_v3 = vcombine.low %v3599_v52, %v3613_v5  ;;  %v3621_v13 = vcombine.high %v3599_v52, %v3613_v5 }
 0x5ba   :  { %v3333_v44 = vor.u32 %v7946_v61, %v7945_v29  ;;  %v3337_v26 = vor.u32 %v7948_v27, %v7947_v42  ;;  %v3649_v0 = vrot.slane %v3617_v20, %v14646_v11  ;;  %v3341_v28 = vor.u32 %v7950_v15, %v7949_v53 }
 0x5bb   :  { %v3656_v2 = vrot.slane %v3618_v19, %v14646_v11  ;;  %v3663_v48 = vrot.slane %v3620_v3, %v14646_v11  ;;  %v3670_v22 = vrot.slane %v3619_v4, %v14646_v11  ;;  %v3677_v1 = vrot.slane %v3621_v13, %v14646_v11 }
 0x5bc   :  { %v3345_v5 = vor.u32 %v7952_v30, %v7951_v21 }
 0x5bd   :  { %v3678_v52 = vcombine.low %v3628_v63, %v3656_v2  ;;  %v3679_v47 = vcombine.high %v3628_v63, %v3656_v2  ;;  %v3680_v46 = vcombine.low %v3635_v16, %v3663_v48  ;;  %v3681_v40 = vcombine.high %v3635_v16, %v3663_v48 }
 0x5be   :  { %v3682_v61 = vcombine.low %v3642_v14, %v3670_v22  ;;  %v3683_v42 = vcombine.high %v3642_v14, %v3670_v22  ;;  %v3684_v29 = vcombine.low %v3649_v0, %v3677_v1  ;;  %v3685_v27 = vcombine.high %v3649_v0, %v3677_v1 }
 0x5bf   :  { %v11668_v19 = vadd.f32 %v3678_v52, %v3317_v18  ;;  %v11670_v3 = vadd.f32 %v3679_v47, %v3325_v17  ;;  %v11672_v4 = vadd.f32 %v3680_v46, %v3333_v44  ;;  %v11680_v53 = vadd.f32 %v3681_v40, %v3341_v28 }
 0x5c0   :  { %v11674_v13 = vadd.f32 %v3682_v61, %v3321_v10  ;;  %v11676_v58 = vadd.f32 %v3683_v42, %v3329_v23  ;;  %v11678_v20 = vadd.f32 %v3684_v29, %v3337_v26  ;;  %v11684_v22 = vadd.f32 %v3685_v27, %v3345_v5 }
 0x5c1   :  { %v7953_v15 = vmul.f32 -1.442695, %v11668_v19  ;;  %v7955_v14 = vmul.f32 -1.442695, %v11670_v3  ;;  %v7957_v46 = vmul.f32 -1.442695, %v11672_v4 }
 0x5c2   :  { %v7954_v1 = vmul.f32 -1.442695, %v11674_v13  ;;  %v7956_v18 = vmul.f32 -1.442695, %v11676_v58  ;;  %v3758_v10 = vrot.slane %v11668_v19, 2  ;;  %v3759_v23 = vrot.slane %v11674_v13, 2 }
 0x5c3   :  { %8628 = vpow2.f32 %v7953_v15  ;;  %v7958_v17 = vmul.f32 -1.442695, %v11678_v20  ;;  %v7959_v21 = vmul.f32 -1.442695, %v11680_v53  ;;  %v3760_v30 = vrot.slane %v11670_v3, 2 }
 0x5c4   :  { %8630 = vpow2.f32 %v7954_v1  ;;  %v7960_v63 = vmul.f32 -1.442695, %v11684_v22  ;;  %v3761_v16 = vrot.slane %v11676_v58, 2  ;;  %v3762_v44 = vrot.slane %v11672_v4, 2 }
 0x5c5   :  { %8632 = vpow2.f32 %v7955_v14  ;;  %v7961_v26 = vmul.f32 -1.442695, %v3758_v10  ;;  %v3763_v2 = vrot.slane %v11678_v20, 2  ;;  %v7962_v48 = vmul.f32 -1.442695, %v3759_v23 }
 0x5c6   :  { %8634 = vpow2.f32 %v7956_v18  ;;  %v3764_v0 = vrot.slane %v11680_v53, 2  ;;  %v7963_v28 = vmul.f32 -1.442695, %v3760_v30  ;;  %v3765_v5 = vrot.slane %v11684_v22, 2 }
 0x5c7   :  { %8636 = vpow2.f32 %v7957_v46  ;;  %v7964_v52 = vmul.f32 -1.442695, %v3761_v16  ;;  %v7965_v47 = vmul.f32 -1.442695, %v3762_v44  ;;  %v7966_v40 = vmul.f32 -1.442695, %v3763_v2 }
 0x5c8   :  { %8638 = vpow2.f32 %v7958_v17  ;;  %v7967_v61 = vmul.f32 -1.442695, %v3764_v0  ;;  %v7968_v42 = vmul.f32 -1.442695, %v3765_v5 }
 0x5c9   :  { %8640 = vpow2.f32 %v7959_v21 }
 0x5ca   :  { %8642 = vpow2.f32 %v7960_v63 }
 0x5cb   :  { %8644 = vpow2.f32 %v7961_v26 }
 0x5cc   :  { %8646 = vpow2.f32 %v7962_v48 }
 0x5cd   :  { %8648 = vpow2.f32 %v7963_v28 }
 0x5ce   :  { %8650 = vpow2.f32 %v7964_v52 }
 0x5cf   :  { %8652 = vpow2.f32 %v7965_v47 }
 0x5d0   :  { %v8629_v29 = vpop.eup %8628  ;;  %8654 = vpow2.f32 %v7966_v40 }
 0x5d1   :  { %v8631_v27 = vpop.eup %8630  ;;  %v3726_v15 = vadd.f32 1.0, %v8629_v29  ;;  %8656 = vpow2.f32 %v7967_v61 }
 0x5d2   :  { %v8633_v14 = vpop.eup %8632  ;;  %v3727_v1 = vadd.f32 1.0, %v8631_v27  ;;  %8658 = vpow2.f32 %v7968_v42 }
 0x5d3   :  { %v8635_v18 = vpop.eup %8634  ;;  %v3728_v46 = vadd.f32 1.0, %v8633_v14  ;;  %8660 = vrcp.f32 %v3726_v15 }
 0x5d4   :  { %v8637_v10 = vpop.eup %8636  ;;  %v3729_v17 = vadd.f32 1.0, %v8635_v18  ;;  %8662 = vrcp.f32 %v3727_v1  ;;  %v3822_v18 = vrot.slane %v11668_v19, 4 }
 0x5d5   :  { %v8639_v23 = vpop.eup %8638  ;;  %v3730_v21 = vadd.f32 1.0, %v8637_v10  ;;  %8664 = vrcp.f32 %v3728_v46 }
 0x5d6   :  { %v8641_v30 = vpop.eup %8640  ;;  %v3731_v63 = vadd.f32 1.0, %v8639_v23  ;;  %8666 = vrcp.f32 %v3729_v17  ;;  %v3823_v17 = vrot.slane %v11674_v13, 4 }
 0x5d7   :  { %v8643_v16 = vpop.eup %8642  ;;  %v3732_v44 = vadd.f32 1.0, %v8641_v30  ;;  %8668 = vrcp.f32 %v3730_v21  ;;  %v3824_v21 = vrot.slane %v11670_v3, 4 }
 0x5d8   :  { %v8645_v26 = vpop.eup %8644  ;;  %v3733_v2 = vadd.f32 1.0, %v8643_v16  ;;  %8670 = vrcp.f32 %v3731_v63  ;;  %v3825_v63 = vrot.slane %v11676_v58, 4 }
 0x5d9   :  { %v8647_v48 = vpop.eup %8646  ;;  %8672 = vrcp.f32 %v3732_v44  ;;  %v3798_v0 = vadd.f32 1.0, %v8645_v26  ;;  %v3826_v44 = vrot.slane %v11672_v4, 4  ;;  %v3846_v26 = vrot.slane %v11668_v19, 6 }
 0x5da   :  { %v8649_v28 = vpop.eup %8648  ;;  %8674 = vrcp.f32 %v3733_v2  ;;  %v3799_v5 = vadd.f32 1.0, %v8647_v48  ;;  %v3827_v48 = vrot.slane %v11678_v20, 4  ;;  %v3849_v19 = vrot.slane %v11676_v58, 6 }
 0x5db   :  { %v8651_v52 = vpop.eup %8650  ;;  %v3800_v47 = vadd.f32 1.0, %v8649_v28  ;;  %8676 = vrcp.f32 %v3798_v0  ;;  %v3847_v0 = vrot.slane %v11674_v13, 6  ;;  %v7969_v13 = vmul.f32 -1.442695, %v3846_v26 }
 0x5dc   :  { %v8653_v40 = vpop.eup %8652  ;;  %v3801_v61 = vadd.f32 1.0, %v8651_v52  ;;  %8678 = vrcp.f32 %v3799_v5  ;;  %v3828_v5 = vrot.slane %v11680_v53, 4  ;;  %v3848_v52 = vrot.slane %v11670_v3, 6 }
 0x5dd   :  { %v8655_v42 = vpop.eup %8654  ;;  %v3802_v29 = vadd.f32 1.0, %v8653_v40  ;;  %8680 = vrcp.f32 %v3800_v47  ;;  %v3829_v40 = vrot.slane %v11684_v22, 4  ;;  %v3852_v3 = vrot.slane %v11680_v53, 6  ;;  %v14647_v53 = vld [vmem:[#allocation78_spill] sm:$0xff] }
 0x5de   :  { %v8657_v27 = vpop.eup %8656  ;;  %v3803_v15 = vadd.f32 1.0, %v8655_v42  ;;  %8682 = vrcp.f32 %v3801_v61  ;;  %v3850_v42 = vrot.slane %v11672_v4, 6  ;;  %v3853_v58 = vrot.slane %v11684_v22, 6  ;;  %v14648_v22 = vld [vmem:[#allocation79_spill] sm:$0xff] }
 0x5df   :  { %v8659_v14 = vpop.eup %8658  ;;  %v3804_v1 = vadd.f32 1.0, %v8657_v27  ;;  %8684 = vrcp.f32 %v3802_v29  ;;  %v3851_v27 = vrot.slane %v11678_v20, 6  ;;  %v7975_v20 = vmul.f32 -1.442695, %v3852_v3  ;;  %v14650_v3 = vld [vmem:[#allocation81_spill] sm:$0xff] }
 0x5e0   :  { %v11701_v46 = vpop.eup %8660  ;;  %v3805_v10 = vadd.f32 1.0, %v8659_v14  ;;  %8686 = vrcp.f32 %v3803_v15  ;;  %v7970_v15 = vmul.f32 -1.442695, %v3847_v0 }
 0x5e1   :  { %v11704_v23 = vpop.eup %8662  ;;  %8688 = vrcp.f32 %v3804_v1  ;;  %v7971_v1 = vmul.f32 -1.442695, %v3848_v52 }
 0x5e2   :  { %v11707_v30 = vpop.eup %8664  ;;  %8690 = vrcp.f32 %v3805_v10  ;;  %v7972_v10 = vmul.f32 -1.442695, %v3849_v19 }
 0x5e3   :  { %v11710_v16 = vpop.eup %8666  ;;  %8692 = vtanh.f32 %v3822_v18 }
 0x5e4   :  { %v11714_v2 = vpop.eup %8668  ;;  %8694 = vtanh.f32 %v3823_v17 }
 0x5e5   :  { %v11718_v28 = vpop.eup %8670  ;;  %8696 = vtanh.f32 %v3824_v21  ;;  %v7973_v21 = vmul.f32 -1.442695, %v3850_v42  ;;  %v14649_v42 = vld [vmem:[#allocation80_spill] sm:$0xff] }
 0x5e6   :  { %v11722_v47 = vpop.eup %8672  ;;  %8698 = vtanh.f32 %v3825_v63  ;;  %v7974_v63 = vmul.f32 -1.442695, %v3851_v27 }
 0x5e7   :  { %v11726_v61 = vpop.eup %8674  ;;  %8700 = vtanh.f32 %v3826_v44 }
 0x5e8   :  { %v8677_v29 = vpop.eup %8676  ;;  %8702 = vtanh.f32 %v3827_v48  ;;  %v7976_v48 = vmul.f32 -1.442695, %v3853_v58 }
 0x5e9   :  { %v8679_v14 = vpop.eup %8678  ;;  %8704 = vtanh.f32 %v3828_v5  ;;  %v3910_v5 = vmul.f32 %v8677_v29, %v14647_v53  ;;  %v14653_v53 = vld [vmem:[#allocation83_spill] sm:$0xff] }
 0x5ea   :  { %v8681_v18 = vpop.eup %8680  ;;  %8706 = vtanh.f32 %v3829_v40  ;;  %v3911_v40 = vmul.f32 %v8679_v14, %v14648_v22 }
 0x5eb   :  { %v8683_v17 = vpop.eup %8682  ;;  %8708 = vpow2.f32 %v7969_v13  ;;  %v3912_v13 = vmul.f32 %v8681_v18, %v14649_v42 }
 0x5ec   :  { %v8685_v4 = vpop.eup %8684  ;;  %8710 = vpow2.f32 %v7970_v15 }
 0x5ed   :  { %v8687_v44 = vpop.eup %8686  ;;  %8712 = vpow2.f32 %v7971_v1  ;;  %v3913_v1 = vmul.f32 %v8683_v17, %v14650_v3 }
 0x5ee   :  { %v8689_v26 = vpop.eup %8688  ;;  %8714 = vpow2.f32 %v7972_v10 }
 0x5ef   :  { %v8691_v0 = vpop.eup %8690  ;;  %8716 = vpow2.f32 %v7973_v21  ;;  %v14651_v21 = vld [vmem:[#allocation82_spill] sm:$0xff] }
 0x5f0   :  { %v8693_v52 = vpop.eup %8692  ;;  %8718 = vpow2.f32 %v7974_v63  ;;  %v3914_v11 = vmul.f32 %v8685_v4, %v14651_v21 }
 0x5f1   :  { %v8695_v19 = vpop.eup %8694  ;;  %8720 = vpow2.f32 %v7975_v20  ;;  %v3918_v27 = vmul.f32 %v8693_v52, %v11701_v46  ;;  %v3915_v20 = vmul.f32 %v8687_v44, %v14653_v53 }
 0x5f2   :  { %v8697_v15 = vpop.eup %8696  ;;  %8722 = vpow2.f32 %v7976_v48  ;;  %v3919_v58 = vmul.f32 %v8695_v19, %v11704_v23 }
 0x5f3   :  { %v8699_v10 = vpop.eup %8698  ;;  %v3920_v29 = vmul.f32 %v8697_v15, %v11707_v30  ;;  %v11740_v63 = vadd.f32 %v3918_v27, %v3910_v5 }
 0x5f4   :  { %v8701_v14 = vpop.eup %8700  ;;  %v3921_v18 = vmul.f32 %v8699_v10, %v11710_v16  ;;  %v11744_v22 = vadd.f32 %v3919_v58, %v3911_v40 }
 0x5f5   :  { %14652 = vst [vmem:[#allocation86_spill] sm:$0xff] %v11740_v63  ;;  %v8703_v46 = vpop.eup %8702  ;;  %v3922_v48 = vmul.f32 %v8701_v14, %v11714_v2  ;;  %v11747_v17 = vadd.f32 %v3920_v29, %v3912_v13  ;;  %8724 = vtanh.f32 %v11740_v63 }
 0x5f6   :  { %14654 = vst [vmem:[#allocation87_spill] sm:$0xff] %v11744_v22  ;;  %v8705_v23 = vpop.eup %8704  ;;  %v3923_v4 = vmul.f32 %v8703_v46, %v11718_v28  ;;  %v11751_v30 = vadd.f32 %v3921_v18, %v3913_v1  ;;  %8726 = vtanh.f32 %v11744_v22  ;;  %v14660_v1 = vld [vmem:[#allocation85_spill] sm:$0xff] }
 0x5f7   :  { %14655 = vst [vmem:[#allocation88_spill] sm:$0xff] %v11747_v17  ;;  %v8707_v5 = vpop.eup %8706  ;;  %v11754_v44 = vadd.f32 %v3922_v48, %v3914_v11  ;;  %8728 = vtanh.f32 %v11747_v17  ;;  %v14659_v11 = vld [vmem:[#allocation84_spill] sm:$0xff]  ;;  %v3917_v58 = vmul.f32 %v8691_v0, %v14660_v1  ;;  %v3924_v29 = vmul.f32 %v8705_v23, %v11722_v47 }
 0x5f8   :  { %14656 = vst [vmem:[#allocation89_spill] sm:$0xff] %v11751_v30  ;;  %v8709_v16 = vpop.eup %8708  ;;  %v11757_v52 = vadd.f32 %v3923_v4, %v3915_v20  ;;  %8730 = vtanh.f32 %v11751_v30  ;;  %v3916_v27 = vmul.f32 %v8689_v26, %v14659_v11  ;;  %v3925_v20 = vmul.f32 %v8707_v5, %v11726_v61 }
 0x5f9   :  { %14657 = vst [vmem:[#allocation90_spill] sm:$0xff] %v11754_v44  ;;  %v8711_v2 = vpop.eup %8710  ;;  %v3886_v40 = vadd.f32 1.0, %v8709_v16  ;;  %8732 = vtanh.f32 %v11754_v44 }
 0x5fa   :  { %14658 = vst [vmem:[#allocation91_spill] sm:$0xff] %v11757_v52  ;;  %v8713_v19 = vpop.eup %8712  ;;  %v3887_v28 = vadd.f32 1.0, %v8711_v2  ;;  %8734 = vtanh.f32 %v11757_v52  ;;  %v11766_v48 = vadd.f32 %v3924_v29, %v3916_v27  ;;  %v11768_v4 = vadd.f32 %v3925_v20, %v3917_v58  ;;  %v14663_v27 = vld [vmem:[#allocation139_spill] sm:$0xff] }
 0x5fb   :  { %v8715_v42 = vpop.eup %8714  ;;  %v3888_v13 = vadd.f32 1.0, %v8713_v19  ;;  %8736 = vrcp.f32 %v3886_v40 }
 0x5fc   :  { %v8717_v15 = vpop.eup %8716  ;;  %v3889_v3 = vadd.f32 1.0, %v8715_v42  ;;  %8738 = vrcp.f32 %v3887_v28  ;;  %14661 = vst [vmem:[#allocation92_spill] sm:$0xff] %v11766_v48  ;;  %14662 = vst [vmem:[#allocation93_spill] sm:$0xff] %v11768_v4 }
 0x5fd   :  { %v8719_v10 = vpop.eup %8718  ;;  %v3890_v21 = vadd.f32 1.0, %v8717_v15  ;;  %8740 = vrcp.f32 %v3888_v13 }
 0x5fe   :  { %v8721_v14 = vpop.eup %8720  ;;  %v3891_v53 = vadd.f32 1.0, %v8719_v10  ;;  %8742 = vrcp.f32 %v3889_v3  ;;  %v14664_v10 = vld [vmem:[#allocation140_spill] sm:$0xff] }
 0x5ff   :  { %v8723_v18 = vpop.eup %8722  ;;  %v3892_v46 = vadd.f32 1.0, %v8721_v14  ;;  %8744 = vrcp.f32 %v3890_v21 }
 0x600   :  { %v3893_v26 = vadd.f32 1.0, %v8723_v18  ;;  %8746 = vrcp.f32 %v3891_v53 }
 0x601   :  { %8748 = vrcp.f32 %v3892_v46 }
 0x602   :  { %v8725_v0 = vpop.eup %8724  ;;  %8750 = vrcp.f32 %v3893_v26 }
 0x603   :  { %v8727_v16 = vpop.eup %8726  ;;  %8752 = vtanh.f32 %v11766_v48 }
 0x604   :  { %v8729_v47 = vpop.eup %8728  ;;  %8754 = vtanh.f32 %v11768_v4 }
 0x605   :  { %v8731_v23 = vpop.eup %8730 }
 0x606   :  { %v8733_v61 = vpop.eup %8732 }
 0x607   :  { %v8735_v5 = vpop.eup %8734 }
 0x608   :  { %v8737_v2 = vpop.eup %8736 }
 0x609   :  { %v8739_v40 = vpop.eup %8738  ;;  %v3942_v19 = vmul.f32 %v8737_v2, %v8725_v0 }
 0x60a   :  { %v8741_v28 = vpop.eup %8740  ;;  %v3943_v42 = vmul.f32 %v8739_v40, %v8727_v16 }
 0x60b   :  { %v8743_v13 = vpop.eup %8742  ;;  %v3944_v11 = vmul.f32 %v8741_v28, %v8729_v47  ;;  %v11773_v15 = vrot.slane %v3942_v19, %v14663_v27  ;;  %v11779_v21 = vrot.slane %v3942_v19, %v14664_v10 }
 0x60c   :  { %v8745_v3 = vpop.eup %8744  ;;  %v3945_v1 = vmul.f32 %v8743_v13, %v8731_v23  ;;  %v11776_v58 = vrot.slane %v3943_v42, %v14663_v27  ;;  %v11782_v29 = vrot.slane %v3943_v42, %v14664_v10 }
 0x60d   :  { %v8747_v14 = vpop.eup %8746  ;;  %v3946_v53 = vmul.f32 %v8745_v3, %v8733_v61  ;;  %v11785_v20 = vrot.slane %v3944_v11, %v14663_v27  ;;  %v4039_v18 = vpack.c.bf16 %v11773_v15, %v11773_v15  ;;  %v11790_v46 = vrot.slane %v3944_v11, %v14664_v10 }
 0x60e   :  { %v8749_v26 = vpop.eup %8748  ;;  %v3947_v0 = vmul.f32 %v8747_v14, %v8735_v5  ;;  %v11793_v16 = vrot.slane %v3945_v1, %v14663_v27  ;;  %v4041_v47 = vpack.c.bf16 %v11776_v58, %v11776_v58  ;;  %v11798_v23 = vrot.slane %v3945_v1, %v14664_v10 }
 0x60f   :  { %v8751_v61 = vpop.eup %8750  ;;  %v11801_v2 = vrot.slane %v3946_v53, %v14663_v27  ;;  %v4043_v40 = vpack.c.bf16 %v11785_v20, %v11785_v20  ;;  %v4071_v19 = vunpack.c.l.b16 %v4039_v18  ;;  %v11806_v28 = vrot.slane %v3946_v53, %v14664_v10 }
 0x610   :  { %v8753_v5 = vpop.eup %8752  ;;  %v11809_v42 = vrot.slane %v3947_v0, %v14663_v27  ;;  %v4045_v13 = vpack.c.bf16 %v11793_v16, %v11793_v16  ;;  %v4073_v11 = vunpack.c.l.b16 %v4041_v47  ;;  %v11814_v3 = vrot.slane %v3947_v0, %v14664_v10 }
 0x611   :  { %v8755_v1 = vpop.eup %8754  ;;  %v3948_v14 = vmul.f32 %v8753_v5, %v8749_v26  ;;  %v4047_v18 = vpack.c.bf16 %v11801_v2, %v11801_v2  ;;  %v4075_v4 = vunpack.c.l.b16 %v4043_v40  ;;  %v4038_v53 = vpack.c.bf16 %v11779_v21, %v11779_v21 }
 0x612   :  { %v3949_v48 = vmul.f32 %v8755_v1, %v8751_v61  ;;  %v4049_v52 = vpack.c.bf16 %v11809_v42, %v11809_v42  ;;  %v4077_v44 = vunpack.c.l.b16 %v4045_v13  ;;  %v4209_v30 = vrot.slane %v4073_v11, 7 }
 0x613   :  { %v4013_v47 = vrot.slane %v3948_v14, %v14663_v27  ;;  %v4079_v0 = vunpack.c.l.b16 %v4047_v18  ;;  %v4211_v17 = vrot.slane %v4075_v4, 6  ;;  %v11824_v22 = vrot.slane %v3948_v14, %v14664_v10 }
 0x614   :  { %v4021_v26 = vrot.slane %v3949_v48, %v14663_v27  ;;  %v4081_v5 = vunpack.c.l.b16 %v4049_v52  ;;  %v4210_v40 = vsel %vm1672_vm0, %v4209_v30, %v4071_v19  ;;  %v4213_v63 = vrot.slane %v4077_v44, 5 }
 0x615   :  { %v4051_v9 = vpack.c.bf16 %v4013_v47, %v4013_v47  ;;  %v4212_v61 = vsel %vm1675_vm1, %v4211_v17, %v4210_v40  ;;  %v4215_v1 = vrot.slane %v4079_v0, 4  ;;  %v11830_v13 = vrot.slane %v3949_v48, %v14664_v10 }
 0x616   :  { %v4053_v11 = vpack.c.bf16 %v4021_v26, %v4021_v26  ;;  %v4214_v18 = vsel %vm1678_vm2, %v4213_v63, %v4212_v61  ;;  %v4217_v4 = vrot.slane %v4081_v5, 3  ;;  %v4040_v14 = vpack.c.bf16 %v11782_v29, %v11782_v29 }
 0x617   :  { %v4083_v36 = vunpack.c.l.b16 %v4051_v9  ;;  %v4216_v52 = vsel %vm1611_vm5, %v4215_v1, %v4214_v18  ;;  %v4042_v30 = vpack.c.bf16 %v11790_v46, %v11790_v46  ;;  %v4044_v17 = vpack.c.bf16 %v11798_v23, %v11798_v23 }
 0x618   :  { %v4085_v44 = vunpack.c.l.b16 %v4053_v11  ;;  %v4218_v48 = vsel %vm1684_vm6, %v4217_v4, %v4216_v52  ;;  %v4046_v19 = vpack.c.bf16 %v11806_v28, %v11806_v28  ;;  %v4048_v63 = vpack.c.bf16 %v11814_v3, %v11814_v3 }
 0x619   :  { %v4219_v0 = vrot.slane %v4083_v36, 2  ;;  %v4050_v9 = vpack.c.bf16 %v11824_v22, %v11824_v22  ;;  %v4052_v40 = vpack.c.bf16 %v11830_v13, %v11830_v13  ;;  %v11849_v61 = vunpack.c.l.b16 %v4038_v53 }
 0x61a   :  { %v4221_v5 = vrot.slane %v4085_v44, 1  ;;  %v11851_v1 = vunpack.c.l.b16 %v4040_v14  ;;  %v11854_v18 = vunpack.c.l.b16 %v4042_v30  ;;  %v11856_v4 = vunpack.c.l.b16 %v4044_v17  ;;  %v4148_v17 = vld [vmem:[%s13796_s2 + $0x18] sm:$0x22] }
 0x61b   :  { %v4220_v11 = vsel %vm1687_vm8, %v4219_v0, %v4218_v48  ;;  %v11858_v52 = vunpack.c.l.b16 %v4046_v19  ;;  %v11867_v53 = vunpack.c.l.b16 %v4048_v63  ;;  %v8201_v14 = vpack.c.bf16 %v11773_v15, %v11779_v21 }
 0x61c   :  { %v4222_v44 = vsel %vm1690_vm11, %v4221_v5, %v4220_v11  ;;  %v8202_v30 = vpack.c.bf16 %v11776_v58, %v11782_v29  ;;  %v8203_v19 = vpack.c.bf16 %v11785_v20, %v11790_v46  ;;  %v8204_v63 = vpack.c.bf16 %v11793_v16, %v11798_v23  ;;  %v4139_v23 = vld [vmem:[%s13796_s2] sm:$0x22] }
 0x61d   :  { %v11878_v48 = vpack.c.b16 %v4222_v44, %v4222_v44  ;;  %v8205_v0 = vpack.c.bf16 %v11801_v2, %v11806_v28  ;;  %v8206_v15 = vpack.c.bf16 %v11809_v42, %v11814_v3  ;;  %v8207_v58 = vpack.c.bf16 %v4013_v47, %v11824_v22  ;;  %v4142_v47 = vld [vmem:[%s13796_s2 + $0x8] sm:$0x22] }
 0x61e   :  { %v8208_v21 = vpack.c.bf16 %v4021_v26, %v11830_v13  ;;  %v4095_v29 = vshll.u32 %v8201_v14, 16  ;;  %v4099_v5 = vshll.u32 %v8202_v30, 16  ;;  %v4103_v20 = vshll.u32 %v8203_v19, 16  ;;  %v4145_v26 = vld [vmem:[%s13796_s2 + $0x10] sm:$0x22] }
 0x61f   :  { %4259 = vmatprep.mubr.bf16.mxu0 %v11878_v48  ;;  %4300 = vmatprep.mubr.bf16.mxu1 %v11878_v48  ;;  %v4107_v46 = vshll.u32 %v8204_v63, 16  ;;  %v4111_v11 = vshll.u32 %v8205_v0, 16  ;;  %v4115_v28 = vshll.u32 %v8206_v15, 16  ;;  %v4119_v42 = vshll.u32 %v8207_v58, 16  ;;  %v4151_v58 = vld [vmem:[%s13796_s2 + $0x20] sm:$0x22] }
 0x620   :  { %v4097_v2 = vrot.slane %v4095_v29, 7  ;;  %v4123_v3 = vshll.u32 %v8208_v21, 16  ;;  %v4101_v36 = vrot.slane %v4099_v5, 7  ;;  %v4105_v44 = vrot.slane %v4103_v20, 7 }
 0x621   :  { %v4109_v14 = vrot.slane %v4107_v46, 7  ;;  %v4113_v30 = vrot.slane %v4111_v11, 7  ;;  %v4117_v19 = vrot.slane %v4115_v28, 7  ;;  %v4121_v63 = vrot.slane %v4119_v42, 7  ;;  %v4154_v46 = vld [vmem:[%s13796_s2 + $0x28] sm:$0x22] }
 0x622   :  { %v4125_v0 = vrot.slane %v4123_v3, 7  ;;  %v4140_v15 = vsel %vm11896_vm7, %v4097_v2, %v4139_v23  ;;  %v4143_v21 = vsel %vm11896_vm7, %v4101_v36, %v4142_v47  ;;  %v4146_v29 = vsel %vm11896_vm7, %v4105_v44, %v4145_v26  ;;  %v4157_v11 = vld [vmem:[%s13796_s2 + $0x30] sm:$0x22]  ;;  %v4160_v23 = vld [vmem:[%s13796_s2 + $0x38] sm:$0x22] }
 0x623   :  { %4141 = vst [vmem:[%s13796_s2] sm:$0x22] %v4140_v15  ;;  %v4149_v5 = vsel %vm11896_vm7, %v4109_v14, %v4148_v17  ;;  %v4152_v20 = vsel %vm11896_vm7, %v4113_v30, %v4151_v58  ;;  %4144 = vst [vmem:[%s13796_s2 + $0x8] sm:$0x22] %v4143_v21  ;;  %v4155_v2 = vsel %vm11896_vm7, %v4117_v19, %v4154_v46  ;;  %v4195_v3 = vrot.slane %v11851_v1, 7  ;;  %v14677_v15 = vld [vmem:[#allocation103_spill] sm:$0xff]  ;;  %v14678_v58 = vld [vmem:[#allocation104_spill] sm:$0xff] }
 0x624   :  { %4147 = vst [vmem:[%s13796_s2 + $0x10] sm:$0x22] %v4146_v29  ;;  %4150 = vst [vmem:[%s13796_s2 + $0x18] sm:$0x22] %v4149_v5  ;;  %v4158_v28 = vsel %vm11896_vm7, %v4121_v63, %v4157_v11  ;;  %v4161_v42 = vsel %vm11896_vm7, %v4125_v0, %v4160_v23  ;;  %v4082_v47 = vunpack.c.l.b16 %v4050_v9  ;;  %v4197_v16 = vrot.slane %v11854_v18, 6  ;;  %v14675_v63 = vld [vmem:[#allocation101_spill] sm:$0xff] }
 0x625   :  { %4153 = vst [vmem:[%s13796_s2 + $0x20] sm:$0x22] %v4152_v20  ;;  %4156 = vst [vmem:[%s13796_s2 + $0x28] sm:$0x22] %v4155_v2  ;;  %v4084_v1 = vunpack.c.l.b16 %v4052_v40  ;;  %v4196_v22 = vsel %vm1672_vm0, %v4195_v3, %v11849_v61  ;;  %v4199_v9 = vrot.slane %v11856_v4, 5  ;;  %v4201_v36 = vrot.slane %v11858_v52, 4 }
 0x626   :  { %4159 = vst [vmem:[%s13796_s2 + $0x30] sm:$0x22] %v4158_v28  ;;  %4162 = vst [vmem:[%s13796_s2 + $0x38] sm:$0x22] %v4161_v42  ;;  %v4198_v26 = vsel %vm1675_vm1, %v4197_v16, %v4196_v22  ;;  %v4203_v14 = vrot.slane %v11867_v53, 3  ;;  %v4205_v18 = vrot.slane %v4082_v47, 2 }
 0x627   :  { %v4200_v44 = vsel %vm1678_vm2, %v4199_v9, %v4198_v26  ;;  %v4207_v13 = vrot.slane %v4084_v1, 1  ;;  %v14671_v4 = vld [vmem:[#allocation97_spill] sm:$0xff]  ;;  %v14672_v52 = vld [vmem:[#allocation98_spill] sm:$0xff]  ;;  %v14673_v53 = vld [vmem:[#allocation99_spill] sm:$0xff] }
 0x628   :  { %v4202_v30 = vsel %vm1611_vm5, %v4201_v36, %v4200_v44  ;;  %v14676_v0 = vld [vmem:[#allocation102_spill] sm:$0xff]  ;;  %v14679_v21 = vld [vmem:[#allocation105_spill] sm:$0xff]  ;;  %v14681_v5 = vld [vmem:[#allocation107_spill] sm:$0xff] }
 0x629   :  { %v4204_v17 = vsel %vm1684_vm6, %v4203_v14, %v4202_v30  ;;  %v14680_v29 = vld [vmem:[#allocation106_spill] sm:$0xff]  ;;  %v14682_v20 = vld [vmem:[#allocation108_spill] sm:$0xff]  ;;  %v14683_v46 = vld [vmem:[#allocation109_spill] sm:$0xff] }
 0x62a   :  { %v4206_v40 = vsel %vm1687_vm8, %v4205_v18, %v4204_v17  ;;  %v14684_v11 = vld [vmem:[#allocation110_spill] sm:$0xff]  ;;  %v14685_v23 = vld [vmem:[#allocation111_spill] sm:$0xff]  ;;  %v14686_v2 = vld [vmem:[#allocation112_spill] sm:$0xff] }
 0x62b   :  { %v4208_v61 = vsel %vm1690_vm11, %v4207_v13, %v4206_v40  ;;  %v14687_v28 = vld [vmem:[#allocation113_spill] sm:$0xff]  ;;  %v14688_v42 = vld [vmem:[#allocation114_spill] sm:$0xff]  ;;  %v14689_v3 = vld [vmem:[#allocation115_spill] sm:$0xff] }
 0x62c   :  { %v11983_v19 = vpack.c.b16 %v4208_v61, %v4208_v61  ;;  %v14690_v47 = vld [vmem:[#allocation116_spill] sm:$0xff]  ;;  %v14691_v16 = vld [vmem:[#allocation117_spill] sm:$0xff]  ;;  %v14692_v1 = vld [vmem:[#allocation118_spill] sm:$0xff] }
 0x62d   :  { %v14693_v22 = vld [vmem:[#allocation119_spill] sm:$0xff]  ;;  %v14694_v9 = vld [vmem:[#allocation120_spill] sm:$0xff]  ;;  %v14695_v26 = vld [vmem:[#allocation121_spill] sm:$0xff] }
 0x62e   :  { %4260 = vmatmul.mubr.bf16.vlgmr.msra.gmra.mxu0 %v11983_v19  ;;  %4301 = vmatmul.mubr.bf16.vlgmr.msra.gmra.mxu1 %v11983_v19  ;;  %v14696_v36 = vld [vmem:[#allocation122_spill] sm:$0xff]  ;;  %v14697_v44 = vld [vmem:[#allocation123_spill] sm:$0xff]  ;;  %v14698_v14 = vld [vmem:[#allocation124_spill] sm:$0xff] }
 0x62f   :  { %4310 = vmatpush1.bf16.msra.mxu0 %v14292_v31  ;;  %4351 = vmatpush1.bf16.msra.mxu1 %v14293_v39  ;;  %v14699_v30 = vld [vmem:[#allocation125_spill] sm:$0xff]  ;;  %v14700_v18 = vld [vmem:[#allocation126_spill] sm:$0xff]  ;;  %v14701_v17 = vld [vmem:[#allocation127_spill] sm:$0xff] }
 0x630   :  { %4341 = vmatprep.mubr.bf16.mxu0 %v11878_v48  ;;  %4382 = vmatprep.mubr.bf16.mxu1 %v11878_v48  ;;  %v14674_v48 = vld [vmem:[#allocation100_spill] sm:$0xff]  ;;  %v14703_v40 = vld [vmem:[#allocation129_spill] sm:$0xff]  ;;  %v14704_v61 = vld [vmem:[#allocation130_spill] sm:$0xff] }
 0x631   :  { %4311 = vmatprep.subr.bf16.mxu0 %v14294_v35  ;;  %4352 = vmatprep.subr.bf16.mxu1 %v14295_v12  ;;  %v14702_v13 = vld [vmem:[#allocation128_spill] sm:$0xff]  ;;  %vm12880_vm7 = vmand %vm1687_vm8, %vm5812_vm4 }
 0x632   :  { %vm12902_vm9 = vmor %vm12880_vm7, %vm12868_vm3 }
 0x633   :  { %4312 = vmatpush1.bf16.msra.mxu0 %v14296_v43  ;;  %4353 = vmatpush1.bf16.msra.mxu1 %v14297_v41 }
 0x634   :  { %4313 = vmatprep.subr.bf16.mxu0 %v14298_v55  ;;  %4354 = vmatprep.subr.bf16.mxu1 %v14299_v34 }
 0x637   :  { %4314 = vmatpush1.bf16.msra.mxu0 %v14300_v56  ;;  %4355 = vmatpush1.bf16.msra.mxu1 %v14301_v32 }
 0x638   :  { %4315 = vmatprep.subr.bf16.mxu0 %v14302_v54  ;;  %4356 = vmatprep.subr.bf16.mxu1 %v14303_v60 }
 0x63b   :  { %4316 = vmatpush1.bf16.msra.mxu0 %v14304_v50  ;;  %4357 = vmatpush1.bf16.msra.mxu1 %v14305_v59 }
 0x63c   :  { %4317 = vmatprep.subr.bf16.mxu0 %v14306_v45  ;;  %4358 = vmatprep.subr.bf16.mxu1 %v14307_v33 }
 0x63f   :  { %4318 = vmatpush1.bf16.msra.mxu0 %v14308_v8  ;;  %4359 = vmatpush1.bf16.msra.mxu1 %v14309_v38 }
 0x640   :  { %4319 = vmatprep.subr.bf16.mxu0 %v14310_v7  ;;  %4360 = vmatprep.subr.bf16.mxu1 %v14311_v24 }
 0x643   :  { %4320 = vmatpush1.bf16.msra.mxu0 %v14312_v37  ;;  %4361 = vmatpush1.bf16.msra.mxu1 %v14313_v25 }
 0x644   :  { %4321 = vmatprep.subr.bf16.mxu0 %v14314_v62  ;;  %4362 = vmatprep.subr.bf16.mxu1 %v14315_v49 }
 0x647   :  { %4322 = vmatpush1.bf16.msra.mxu0 %v14316_v51  ;;  %4363 = vmatpush1.bf16.msra.mxu1 %v14416_v57 }
 0x648   :  { %4323 = vmatprep.subr.bf16.mxu0 %v14544_v6  ;;  %4364 = vmatprep.subr.bf16.mxu1 %v14671_v4 }
 0x64b   :  { %4324 = vmatpush1.bf16.msra.mxu0 %v14672_v52  ;;  %4365 = vmatpush1.bf16.msra.mxu1 %v14673_v53 }
 0x64c   :  { %4325 = vmatprep.subr.bf16.mxu0 %v14674_v48  ;;  %4366 = vmatprep.subr.bf16.mxu1 %v14675_v63 }
 0x64f   :  { %4326 = vmatpush2.bf16.msra.mxu0 %v14676_v0  ;;  %4367 = vmatpush2.bf16.msra.mxu1 %v14677_v15 }
 0x650   :  { %4327 = vmatprep.subr.bf16.mxu0 %v14678_v58  ;;  %4368 = vmatprep.subr.bf16.mxu1 %v14679_v21 }
 0x653   :  { %4328 = vmatpush2.bf16.msra.mxu0 %v14680_v29  ;;  %4369 = vmatpush2.bf16.msra.mxu1 %v14681_v5  ;;  %v7995_v29 = vld [vmem:[%s13795_s0 + $0x144] ss:$8 sm:$0xf] }
 0x654   :  { %4329 = vmatprep.subr.bf16.mxu0 %v14682_v20  ;;  %4370 = vmatprep.subr.bf16.mxu1 %v14683_v46  ;;  %v7994_v46 = vld [vmem:[%s13795_s0 + $0x104] ss:$8 sm:$0xf0] }
 0x657   :  { %4330 = vmatpush2.bf16.msra.mxu0 %v14684_v11  ;;  %4371 = vmatpush2.bf16.msra.mxu1 %v14685_v23 }
 0x658   :  { %4331 = vmatprep.subr.bf16.mxu0 %v14686_v2  ;;  %4372 = vmatprep.subr.bf16.mxu1 %v14687_v28 }
 0x65b   :  { %4332 = vmatpush2.bf16.msra.mxu0 %v14688_v42  ;;  %4373 = vmatpush2.bf16.msra.mxu1 %v14689_v3 }
 0x65c   :  { %4333 = vmatprep.subr.bf16.mxu0 %v14690_v47  ;;  %4374 = vmatprep.subr.bf16.mxu1 %v14691_v16  ;;  %v14772_v47 = vld [vmem:[#allocation132_spill] sm:$0xff] }
 0x65f   :  { %4334 = vmatpush2.bf16.msra.mxu0 %v14692_v1  ;;  %4375 = vmatpush2.bf16.msra.mxu1 %v14693_v22 }
 0x660   :  { %4335 = vmatprep.subr.bf16.mxu0 %v14694_v9  ;;  %4376 = vmatprep.subr.bf16.mxu1 %v14695_v26  ;;  %v14705_v9 = vld [vmem:[#allocation131_spill] sm:$0xff]  ;;  %v14706_v26 = vld [vmem:[#allocation4_spill] sm:$0xff] }
 0x663   :  { %4336 = vmatpush2.bf16.msra.mxu0 %v14696_v36  ;;  %4377 = vmatpush2.bf16.msra.mxu1 %v14697_v44  ;;  %v14707_v36 = vld [vmem:[#allocation6_spill] sm:$0xff] }
 0x664   :  { %4337 = vmatprep.subr.bf16.mxu0 %v14698_v14  ;;  %4378 = vmatprep.subr.bf16.mxu1 %v14699_v30  ;;  %v14708_v30 = vld [vmem:[#allocation5_spill] sm:$0xff]  ;;  %v14717_v14 = vld [vmem:[#allocation15_spill] sm:$0xff] }
 0x667   :  { %4338 = vmatpush2.bf16.msra.mxu0 %v14700_v18  ;;  %4379 = vmatpush2.bf16.msra.mxu1 %v14701_v17  ;;  %v14709_v18 = vld [vmem:[#allocation7_spill] sm:$0xff]  ;;  %v14710_v17 = vld [vmem:[#allocation8_spill] sm:$0xff] }
 0x668   :  { %4339 = vmatprep.subr.bf16.mxu0 %v14702_v13  ;;  %4380 = vmatprep.subr.bf16.mxu1 %v14703_v40  ;;  %v14711_v13 = vld [vmem:[#allocation9_spill] sm:$0xff]  ;;  %v14712_v40 = vld [vmem:[#allocation10_spill] sm:$0xff] }
 0x66b   :  { %4340 = vmatpush2.bf16.msra.mxu0 %v14704_v61  ;;  %4381 = vmatpush2.bf16.msra.mxu1 %v14705_v9  ;;  %v14713_v61 = vld [vmem:[#allocation11_spill] sm:$0xff]  ;;  %v14714_v9 = vld [vmem:[#allocation12_spill] sm:$0xff] }
 0x66c   :  { %5054 = vmatprep.subr.bf16.mxu0 %v14706_v26  ;;  %5095 = vmatprep.subr.bf16.mxu1 %v14707_v36  ;;  %v14715_v26 = vld [vmem:[#allocation13_spill] sm:$0xff]  ;;  %v14716_v36 = vld [vmem:[#allocation14_spill] sm:$0xff] }
 0x66e   :  { %4342 = vmatmul.mubr.bf16.vlgmr.msra.gmra.mxu0 %v11983_v19  ;;  %4383 = vmatmul.mubr.bf16.vlgmr.msra.gmra.mxu1 %v11983_v19  ;;  %v14718_v19 = vld [vmem:[#allocation16_spill] sm:$0xff] }
 0x66f   :  { %5055 = vmatpush1.bf16.msra.mxu0 %v14708_v30  ;;  %5096 = vmatpush1.bf16.msra.mxu1 %v14709_v18  ;;  %v14719_v30 = vld [vmem:[#allocation17_spill] sm:$0xff]  ;;  %v14720_v18 = vld [vmem:[#allocation18_spill] sm:$0xff] }
 0x670   :  { %5056 = vmatprep.subr.bf16.mxu0 %v14710_v17  ;;  %5097 = vmatprep.subr.bf16.mxu1 %v14711_v13  ;;  %v14721_v17 = vld [vmem:[#allocation19_spill] sm:$0xff]  ;;  %v14722_v13 = vld [vmem:[#allocation20_spill] sm:$0xff] }
 0x673   :  { %5057 = vmatpush1.bf16.msra.mxu0 %v14712_v40  ;;  %5098 = vmatpush1.bf16.msra.mxu1 %v14713_v61  ;;  %v14723_v40 = vld [vmem:[#allocation21_spill] sm:$0xff]  ;;  %v14724_v61 = vld [vmem:[#allocation22_spill] sm:$0xff] }
 0x674   :  { %5058 = vmatprep.subr.bf16.mxu0 %v14714_v9  ;;  %5099 = vmatprep.subr.bf16.mxu1 %v14715_v26  ;;  %v14725_v9 = vld [vmem:[#allocation23_spill] sm:$0xff]  ;;  %v14726_v26 = vld [vmem:[#allocation24_spill] sm:$0xff] }
 0x677   :  { %5059 = vmatpush1.bf16.msra.mxu0 %v14716_v36  ;;  %5100 = vmatpush1.bf16.msra.mxu1 %v14717_v14  ;;  %v14727_v36 = vld [vmem:[#allocation25_spill] sm:$0xff]  ;;  %v14728_v14 = vld [vmem:[#allocation26_spill] sm:$0xff] }
 0x678   :  { %5060 = vmatprep.subr.bf16.mxu0 %v14718_v19  ;;  %5101 = vmatprep.subr.bf16.mxu1 %v14719_v30  ;;  %v14729_v19 = vld [vmem:[#allocation27_spill] sm:$0xff]  ;;  %v14730_v30 = vld [vmem:[#allocation28_spill] sm:$0xff] }
 0x67b   :  { %5061 = vmatpush1.bf16.msra.mxu0 %v14720_v18  ;;  %5102 = vmatpush1.bf16.msra.mxu1 %v14721_v17  ;;  %v14731_v18 = vld [vmem:[#allocation29_spill] sm:$0xff]  ;;  %v14732_v17 = vld [vmem:[#allocation30_spill] sm:$0xff] }
 0x67c   :  { %5062 = vmatprep.subr.bf16.mxu0 %v14722_v13  ;;  %5103 = vmatprep.subr.bf16.mxu1 %v14723_v40  ;;  %v14733_v13 = vld [vmem:[#allocation31_spill] sm:$0xff]  ;;  %v14734_v40 = vld [vmem:[#allocation32_spill] sm:$0xff] }
 0x67f   :  { %5063 = vmatpush1.bf16.msra.mxu0 %v14724_v61  ;;  %5104 = vmatpush1.bf16.msra.mxu1 %v14725_v9  ;;  %v14735_v61 = vld [vmem:[#allocation33_spill] sm:$0xff]  ;;  %v14736_v9 = vld [vmem:[#allocation34_spill] sm:$0xff] }
 0x680   :  { %5064 = vmatprep.subr.bf16.mxu0 %v14726_v26  ;;  %5105 = vmatprep.subr.bf16.mxu1 %v14727_v36  ;;  %v14737_v26 = vld [vmem:[#allocation35_spill] sm:$0xff]  ;;  %v14738_v36 = vld [vmem:[#allocation36_spill] sm:$0xff] }
 0x683   :  { %5065 = vmatpush1.bf16.msra.mxu0 %v14728_v14  ;;  %5106 = vmatpush1.bf16.msra.mxu1 %v14729_v19  ;;  %v14739_v14 = vld [vmem:[#allocation37_spill] sm:$0xff]  ;;  %v14740_v19 = vld [vmem:[#allocation38_spill] sm:$0xff] }
 0x684   :  { %5066 = vmatprep.subr.bf16.mxu0 %v14730_v30  ;;  %5107 = vmatprep.subr.bf16.mxu1 %v14731_v18  ;;  %v14741_v30 = vld [vmem:[#allocation39_spill] sm:$0xff]  ;;  %v14742_v18 = vld [vmem:[#allocation40_spill] sm:$0xff] }
 0x687   :  { %5067 = vmatpush1.bf16.msra.mxu0 %v14732_v17  ;;  %5108 = vmatpush1.bf16.msra.mxu1 %v14733_v13  ;;  %v14743_v17 = vld [vmem:[#allocation41_spill] sm:$0xff]  ;;  %v14744_v13 = vld [vmem:[#allocation42_spill] sm:$0xff] }
 0x688   :  { %5068 = vmatprep.subr.bf16.mxu0 %v14734_v40  ;;  %5109 = vmatprep.subr.bf16.mxu1 %v14735_v61  ;;  %v14745_v40 = vld [vmem:[#allocation43_spill] sm:$0xff]  ;;  %v14746_v61 = vld [vmem:[#allocation44_spill] sm:$0xff] }
 0x68b   :  { %5069 = vmatpush1.bf16.msra.mxu0 %v14736_v9  ;;  %5110 = vmatpush1.bf16.msra.mxu1 %v14737_v26  ;;  %v14747_v9 = vld [vmem:[#allocation45_spill] sm:$0xff]  ;;  %v14748_v26 = vld [vmem:[#allocation46_spill] sm:$0xff] }
 0x68c   :  { %5070 = vmatprep.subr.bf16.mxu0 %v14738_v36  ;;  %5111 = vmatprep.subr.bf16.mxu1 %v14739_v14  ;;  %v14749_v36 = vld [vmem:[#allocation47_spill] sm:$0xff]  ;;  %v14750_v14 = vld [vmem:[#allocation48_spill] sm:$0xff] }
 0x68f   :  { %5071 = vmatpush2.bf16.msra.mxu0 %v14740_v19  ;;  %5112 = vmatpush2.bf16.msra.mxu1 %v14741_v30  ;;  %v14751_v19 = vld [vmem:[#allocation49_spill] sm:$0xff]  ;;  %v14752_v30 = vld [vmem:[#allocation50_spill] sm:$0xff] }
 0x690   :  { %5072 = vmatprep.subr.bf16.mxu0 %v14742_v18  ;;  %5113 = vmatprep.subr.bf16.mxu1 %v14743_v17  ;;  %v14753_v18 = vld [vmem:[#allocation51_spill] sm:$0xff]  ;;  %v14754_v17 = vld [vmem:[#allocation52_spill] sm:$0xff] }
 0x693   :  { %5073 = vmatpush2.bf16.msra.mxu0 %v14744_v13  ;;  %5114 = vmatpush2.bf16.msra.mxu1 %v14745_v40  ;;  %v14755_v13 = vld [vmem:[#allocation53_spill] sm:$0xff]  ;;  %v14756_v40 = vld [vmem:[#allocation54_spill] sm:$0xff] }
 0x694   :  { %5074 = vmatprep.subr.bf16.mxu0 %v14746_v61  ;;  %5115 = vmatprep.subr.bf16.mxu1 %v14747_v9  ;;  %v14757_v61 = vld [vmem:[#allocation55_spill] sm:$0xff]  ;;  %v14758_v9 = vld [vmem:[#allocation56_spill] sm:$0xff] }
 0x697   :  { %5075 = vmatpush2.bf16.msra.mxu0 %v14748_v26  ;;  %5116 = vmatpush2.bf16.msra.mxu1 %v14749_v36  ;;  %v14759_v26 = vld [vmem:[#allocation57_spill] sm:$0xff]  ;;  %v14760_v36 = vld [vmem:[#allocation58_spill] sm:$0xff] }
 0x698   :  { %5076 = vmatprep.subr.bf16.mxu0 %v14750_v14  ;;  %5117 = vmatprep.subr.bf16.mxu1 %v14751_v19  ;;  %v14761_v14 = vld [vmem:[#allocation59_spill] sm:$0xff]  ;;  %v14762_v19 = vld [vmem:[#allocation60_spill] sm:$0xff] }
 0x69b   :  { %5077 = vmatpush2.bf16.msra.mxu0 %v14752_v30  ;;  %5118 = vmatpush2.bf16.msra.mxu1 %v14753_v18  ;;  %v14763_v30 = vld [vmem:[#allocation61_spill] sm:$0xff]  ;;  %v14764_v18 = vld [vmem:[#allocation62_spill] sm:$0xff] }
 0x69c   :  { %5078 = vmatprep.subr.bf16.mxu0 %v14754_v17  ;;  %5119 = vmatprep.subr.bf16.mxu1 %v14755_v13  ;;  %v14765_v17 = vld [vmem:[#allocation63_spill] sm:$0xff]  ;;  %v14766_v13 = vld [vmem:[#allocation64_spill] sm:$0xff] }
 0x69f   :  { %5079 = vmatpush2.bf16.msra.mxu0 %v14756_v40  ;;  %5120 = vmatpush2.bf16.msra.mxu1 %v14757_v61  ;;  %v14767_v40 = vld [vmem:[#allocation65_spill] sm:$0xff]  ;;  %v14768_v61 = vld [vmem:[#allocation66_spill] sm:$0xff] }
 0x6a0   :  { %5080 = vmatprep.subr.bf16.mxu0 %v14758_v9  ;;  %5121 = vmatprep.subr.bf16.mxu1 %v14759_v26  ;;  %v14769_v9 = vld [vmem:[#allocation67_spill] sm:$0xff]  ;;  %v14770_v26 = vld [vmem:[#allocation68_spill] sm:$0xff] }
 0x6a3   :  { %5081 = vmatpush2.bf16.msra.mxu0 %v14760_v36  ;;  %5122 = vmatpush2.bf16.msra.mxu1 %v14761_v14  ;;  %v14771_v36 = vld [vmem:[#allocation69_spill] sm:$0xff] }
 0x6a4   :  { %5082 = vmatprep.subr.bf16.mxu0 %v14762_v19  ;;  %5123 = vmatprep.subr.bf16.mxu1 %v14763_v30 }
 0x6a7   :  { %5083 = vmatpush2.bf16.msra.mxu0 %v14764_v18  ;;  %5124 = vmatpush2.bf16.msra.mxu1 %v14765_v17 }
 0x6a8   :  { %5084 = vmatprep.subr.bf16.mxu0 %v14766_v13  ;;  %5125 = vmatprep.subr.bf16.mxu1 %v14767_v40 }
 0x6ab   :  { %5085 = vmatpush2.bf16.msra.mxu0 %v14768_v61  ;;  %5126 = vmatpush2.bf16.msra.mxu1 %v14769_v9 }
 0x6ac   :  { %5136 = vmatprep.subr.bf16.mxu0 %v14770_v26  ;;  %5177 = vmatprep.subr.bf16.mxu1 %v14771_v36 }
 0x6ee   :  { %v4261_v14 = vpop.f32.mrf.mxu0  ;;  %v4302_v19 = vpop.f32.mrf.mxu1 }
 0x6f0   :  { %v4263_v44 = vpop.f32.mrf.mxu0  ;;  %v4304_v30 = vpop.f32.mrf.mxu1 }
 0x6f1   :  { %v4399_v22 = vcombine.low %v4261_v14, %v4263_v44  ;;  %v4400_v18 = vcombine.high %v4261_v14, %v4263_v44  ;;  %v4401_v1 = vcombine.low %v4302_v19, %v4304_v30  ;;  %v4402_v17 = vcombine.high %v4302_v19, %v4304_v30  ;;  %v7993_v19 = vld [vmem:[%s13795_s0 + $0x104] ss:$8 sm:$0xf] }
 0x6f2   :  { %v4265_v16 = vpop.f32.mrf.mxu0  ;;  %v4306_v13 = vpop.f32.mrf.mxu1 }
 0x6f3   :  { %v4413_v40 = vrot.slane %v4399_v22, %v14772_v47  ;;  %v4420_v61 = vrot.slane %v4400_v18, %v14772_v47  ;;  %v4427_v9 = vrot.slane %v4401_v1, %v14772_v47  ;;  %v4434_v26 = vrot.slane %v4402_v17, %v14772_v47  ;;  %v7985_v16 = vld [vmem:[%s13795_s0 + $0x4] ss:$8 sm:$0xf] }
 0x6f4   :  { %v4266_v3 = vpop.f32.mrf.mxu0  ;;  %v4307_v36 = vpop.f32.mrf.mxu1  ;;  %v7986_v22 = vld [vmem:[%s13795_s0 + $0x4] ss:$8 sm:$0xf0] }
 0x6f5   :  { %v4463_v42 = vcombine.low %v4413_v40, %v4427_v9  ;;  %v4464_v28 = vcombine.high %v4413_v40, %v4427_v9  ;;  %v4465_v2 = vcombine.low %v4420_v61, %v4434_v26  ;;  %v4466_v23 = vcombine.high %v4420_v61, %v4434_v26  ;;  %v7987_v1 = vld [vmem:[%s13795_s0 + $0x44] ss:$8 sm:$0xf] }
 0x6f6   :  { %v7988_v3 = vld [vmem:[%s13795_s0 + $0x44] ss:$8 sm:$0xf0]  ;;  %v4166_v58 = vor.u32 %v7986_v22, %v7985_v16 }
 0x6f7   :  { %v7989_v26 = vld [vmem:[%s13795_s0 + $0x84] ss:$8 sm:$0xf]  ;;  %v4170_v15 = vor.u32 %v7988_v3, %v7987_v1  ;;  %v4491_v52 = vrot.slane %v4464_v28, %v14772_v47 }
 0x6f8   :  { %v7990_v36 = vld [vmem:[%s13795_s0 + $0x84] ss:$8 sm:$0xf0] }
 0x6f9   :  { %v7991_v17 = vld [vmem:[%s13795_s0 + $0xc4] ss:$8 sm:$0xf] }
 0x6fa   :  { %v7992_v13 = vld [vmem:[%s13795_s0 + $0xc4] ss:$8 sm:$0xf0] }
 0x6fb   :  { %v8000_v16 = vld [vmem:[%s13795_s0 + $0x1c4] ss:$8 sm:$0xf0] }
 0x72e   :  { %v4343_v11 = vpop.f32.mrf.mxu0  ;;  %v4384_v44 = vpop.f32.mrf.mxu1 }
 0x730   :  { %v4345_v9 = vpop.f32.mrf.mxu0  ;;  %v4386_v14 = vpop.f32.mrf.mxu1 }
 0x731   :  { %v4403_v30 = vcombine.low %v4343_v11, %v4345_v9  ;;  %v4404_v18 = vcombine.high %v4343_v11, %v4345_v9  ;;  %v4405_v40 = vcombine.low %v4384_v44, %v4386_v14  ;;  %v4406_v61 = vcombine.high %v4384_v44, %v4386_v14  ;;  %v7996_v44 = vld [vmem:[%s13795_s0 + $0x144] ss:$8 sm:$0xf0] }
 0x732   :  { %v4347_v20 = vpop.f32.mrf.mxu0  ;;  %v4388_v11 = vpop.f32.mrf.mxu1 }
 0x733   :  { %v4441_v9 = vrot.slane %v4403_v30, %v14772_v47  ;;  %v4448_v5 = vrot.slane %v4404_v18, %v14772_v47  ;;  %v4455_v14 = vrot.slane %v4405_v40, %v14772_v47  ;;  %v4462_v21 = vrot.slane %v4406_v61, %v14772_v47  ;;  %v7997_v30 = vld [vmem:[%s13795_s0 + $0x184] ss:$8 sm:$0xf] }
 0x734   :  { %v4174_v20 = vor.u32 %v7990_v36, %v7989_v26  ;;  %v4178_v11 = vor.u32 %v7992_v13, %v7991_v17  ;;  %v7998_v18 = vld [vmem:[%s13795_s0 + $0x184] ss:$8 sm:$0xf0]  ;;  %v4348_v0 = vpop.f32.mrf.mxu0  ;;  %v4389_v63 = vpop.f32.mrf.mxu1  ;;  %v4477_v36 = vrot.slane %v4463_v42, %v14772_v47  ;;  %v4484_v17 = vrot.slane %v4465_v2, %v14772_v47 }
 0x735   :  { %v7999_v40 = vld [vmem:[%s13795_s0 + $0x1c4] ss:$8 sm:$0xf]  ;;  %v4467_v22 = vcombine.low %v4441_v9, %v4455_v14  ;;  %v4468_v1 = vcombine.high %v4441_v9, %v4455_v14  ;;  %v4469_v3 = vcombine.low %v4448_v5, %v4462_v21  ;;  %v4470_v26 = vcombine.high %v4448_v5, %v4462_v21 }
 0x736   :  { %v4182_v13 = vor.u32 %v7994_v46, %v7993_v19  ;;  %v4186_v61 = vor.u32 %v7996_v44, %v7995_v29  ;;  %v4498_v9 = vrot.slane %v4466_v23, %v14772_v47  ;;  %v4190_v14 = vor.u32 %v7998_v18, %v7997_v30 }
 0x737   :  { %v4505_v63 = vrot.slane %v4467_v22, %v14772_v47  ;;  %v4512_v0 = vrot.slane %v4469_v3, %v14772_v47  ;;  %v4519_v48 = vrot.slane %v4468_v1, %v14772_v47  ;;  %v4526_v53 = vrot.slane %v4470_v26, %v14772_v47 }
 0x738   :  { %v4194_v21 = vor.u32 %v8000_v16, %v7999_v40 }
 0x739   :  { %v4527_v5 = vcombine.low %v4477_v36, %v4505_v63  ;;  %v4528_v42 = vcombine.high %v4477_v36, %v4505_v63  ;;  %v4529_v4 = vcombine.low %v4484_v17, %v4512_v0  ;;  %v4530_v2 = vcombine.high %v4484_v17, %v4512_v0 }
 0x73a   :  { %v4531_v46 = vcombine.low %v4491_v52, %v4519_v48  ;;  %v4532_v29 = vcombine.high %v4491_v52, %v4519_v48  ;;  %v4533_v19 = vcombine.low %v4498_v9, %v4526_v53  ;;  %v4534_v44 = vcombine.high %v4498_v9, %v4526_v53 }
 0x73b   :  { %v12183_v22 = vadd.f32 %v4527_v5, %v4166_v58  ;;  %v12185_v3 = vadd.f32 %v4528_v42, %v4174_v20  ;;  %v12187_v1 = vadd.f32 %v4529_v4, %v4182_v13  ;;  %v12195_v30 = vadd.f32 %v4530_v2, %v4190_v14 }
 0x73c   :  { %v12189_v26 = vadd.f32 %v4531_v46, %v4170_v15  ;;  %v12191_v28 = vadd.f32 %v4532_v29, %v4178_v11  ;;  %v12193_v23 = vadd.f32 %v4533_v19, %v4186_v61  ;;  %v12199_v48 = vadd.f32 %v4534_v44, %v4194_v21 }
 0x73d   :  { %v8001_v18 = vmul.f32 -1.442695, %v12183_v22  ;;  %v8003_v52 = vmul.f32 -1.442695, %v12185_v3  ;;  %v8005_v4 = vmul.f32 -1.442695, %v12187_v1 }
 0x73e   :  { %v8002_v53 = vmul.f32 -1.442695, %v12189_v26  ;;  %v8004_v58 = vmul.f32 -1.442695, %v12191_v28  ;;  %v4607_v15 = vrot.slane %v12183_v22, 2  ;;  %v4608_v11 = vrot.slane %v12189_v26, 2 }
 0x73f   :  { %8756 = vpow2.f32 %v8001_v18  ;;  %v8006_v20 = vmul.f32 -1.442695, %v12193_v23  ;;  %v8007_v40 = vmul.f32 -1.442695, %v12195_v30  ;;  %v4609_v16 = vrot.slane %v12185_v3, 2 }
 0x740   :  { %8758 = vpow2.f32 %v8002_v53  ;;  %v8008_v36 = vmul.f32 -1.442695, %v12199_v48  ;;  %v4610_v17 = vrot.slane %v12191_v28, 2  ;;  %v4611_v13 = vrot.slane %v12187_v1, 2 }
 0x741   :  { %8760 = vpow2.f32 %v8003_v52  ;;  %v8009_v61 = vmul.f32 -1.442695, %v4607_v15  ;;  %v4612_v63 = vrot.slane %v12193_v23, 2  ;;  %v8010_v0 = vmul.f32 -1.442695, %v4608_v11 }
 0x742   :  { %8762 = vpow2.f32 %v8004_v58  ;;  %v4613_v9 = vrot.slane %v12195_v30, 2  ;;  %v8011_v14 = vmul.f32 -1.442695, %v4609_v16  ;;  %v4614_v21 = vrot.slane %v12199_v48, 2 }
 0x743   :  { %8764 = vpow2.f32 %v8005_v4  ;;  %v8012_v5 = vmul.f32 -1.442695, %v4610_v17  ;;  %v8013_v42 = vmul.f32 -1.442695, %v4611_v13  ;;  %v8014_v2 = vmul.f32 -1.442695, %v4612_v63 }
 0x744   :  { %8766 = vpow2.f32 %v8006_v20  ;;  %v8015_v46 = vmul.f32 -1.442695, %v4613_v9  ;;  %v8016_v29 = vmul.f32 -1.442695, %v4614_v21 }
 0x745   :  { %8768 = vpow2.f32 %v8007_v40 }
 0x746   :  { %8770 = vpow2.f32 %v8008_v36 }
 0x747   :  { %8772 = vpow2.f32 %v8009_v61 }
 0x748   :  { %8774 = vpow2.f32 %v8010_v0 }
 0x749   :  { %8776 = vpow2.f32 %v8011_v14 }
 0x74a   :  { %8778 = vpow2.f32 %v8012_v5 }
 0x74b   :  { %8780 = vpow2.f32 %v8013_v42 }
 0x74c   :  { %v8757_v19 = vpop.eup %8756  ;;  %8782 = vpow2.f32 %v8014_v2 }
 0x74d   :  { %v8759_v44 = vpop.eup %8758  ;;  %v4575_v18 = vadd.f32 1.0, %v8757_v19  ;;  %8784 = vpow2.f32 %v8015_v46 }
 0x74e   :  { %v8761_v52 = vpop.eup %8760  ;;  %v4576_v53 = vadd.f32 1.0, %v8759_v44  ;;  %8786 = vpow2.f32 %v8016_v29 }
 0x74f   :  { %v8763_v58 = vpop.eup %8762  ;;  %v4577_v4 = vadd.f32 1.0, %v8761_v52  ;;  %8788 = vrcp.f32 %v4575_v18 }
 0x750   :  { %v8765_v15 = vpop.eup %8764  ;;  %v4578_v20 = vadd.f32 1.0, %v8763_v58  ;;  %8790 = vrcp.f32 %v4576_v53  ;;  %v4671_v58 = vrot.slane %v12183_v22, 4 }
 0x751   :  { %v8767_v11 = vpop.eup %8766  ;;  %v4579_v40 = vadd.f32 1.0, %v8765_v15  ;;  %8792 = vrcp.f32 %v4577_v4 }
 0x752   :  { %v8769_v16 = vpop.eup %8768  ;;  %v4580_v36 = vadd.f32 1.0, %v8767_v11  ;;  %8794 = vrcp.f32 %v4578_v20  ;;  %v4672_v20 = vrot.slane %v12189_v26, 4 }
 0x753   :  { %v8771_v17 = vpop.eup %8770  ;;  %v4581_v13 = vadd.f32 1.0, %v8769_v16  ;;  %8796 = vrcp.f32 %v4579_v40  ;;  %v4673_v40 = vrot.slane %v12185_v3, 4 }
 0x754   :  { %v8773_v61 = vpop.eup %8772  ;;  %v4582_v63 = vadd.f32 1.0, %v8771_v17  ;;  %8798 = vrcp.f32 %v4580_v36  ;;  %v4674_v36 = vrot.slane %v12191_v28, 4 }
 0x755   :  { %v8775_v0 = vpop.eup %8774  ;;  %8800 = vrcp.f32 %v4581_v13  ;;  %v4647_v9 = vadd.f32 1.0, %v8773_v61  ;;  %v4675_v13 = vrot.slane %v12187_v1, 4  ;;  %v4695_v61 = vrot.slane %v12183_v22, 6 }
 0x756   :  { %v8777_v14 = vpop.eup %8776  ;;  %8802 = vrcp.f32 %v4582_v63  ;;  %v4648_v21 = vadd.f32 1.0, %v8775_v0  ;;  %v4676_v0 = vrot.slane %v12193_v23, 4  ;;  %v4698_v22 = vrot.slane %v12191_v28, 6 }
 0x757   :  { %v8779_v5 = vpop.eup %8778  ;;  %v4649_v42 = vadd.f32 1.0, %v8777_v14  ;;  %8804 = vrcp.f32 %v4647_v9  ;;  %v4696_v9 = vrot.slane %v12189_v26, 6  ;;  %v8017_v26 = vmul.f32 -1.442695, %v4695_v61 }
 0x758   :  { %v8781_v2 = vpop.eup %8780  ;;  %v4650_v46 = vadd.f32 1.0, %v8779_v5  ;;  %8806 = vrcp.f32 %v4648_v21  ;;  %v4677_v21 = vrot.slane %v12195_v30, 4  ;;  %v4697_v5 = vrot.slane %v12185_v3, 6 }
 0x759   :  { %v8783_v29 = vpop.eup %8782  ;;  %v4651_v19 = vadd.f32 1.0, %v8781_v2  ;;  %8808 = vrcp.f32 %v4649_v42  ;;  %v4678_v2 = vrot.slane %v12199_v48, 4  ;;  %v4701_v3 = vrot.slane %v12195_v30, 6  ;;  %v14773_v30 = vld [vmem:[#allocation86_spill] sm:$0xff] }
 0x75a   :  { %v8785_v44 = vpop.eup %8784  ;;  %v4652_v18 = vadd.f32 1.0, %v8783_v29  ;;  %8810 = vrcp.f32 %v4650_v46  ;;  %v4699_v29 = vrot.slane %v12187_v1, 6  ;;  %v4702_v28 = vrot.slane %v12199_v48, 6  ;;  %v14774_v48 = vld [vmem:[#allocation87_spill] sm:$0xff] }
 0x75b   :  { %v8787_v52 = vpop.eup %8786  ;;  %v4653_v53 = vadd.f32 1.0, %v8785_v44  ;;  %8812 = vrcp.f32 %v4651_v19  ;;  %v4700_v44 = vrot.slane %v12193_v23, 6  ;;  %v8023_v23 = vmul.f32 -1.442695, %v4701_v3  ;;  %v14776_v3 = vld [vmem:[#allocation89_spill] sm:$0xff] }
 0x75c   :  { %v12216_v4 = vpop.eup %8788  ;;  %v4654_v15 = vadd.f32 1.0, %v8787_v52  ;;  %8814 = vrcp.f32 %v4652_v18  ;;  %v8018_v18 = vmul.f32 -1.442695, %v4696_v9 }
 0x75d   :  { %v12219_v11 = vpop.eup %8790  ;;  %8816 = vrcp.f32 %v4653_v53  ;;  %v8019_v53 = vmul.f32 -1.442695, %v4697_v5 }
 0x75e   :  { %v12222_v16 = vpop.eup %8792  ;;  %8818 = vrcp.f32 %v4654_v15  ;;  %v8020_v15 = vmul.f32 -1.442695, %v4698_v22 }
 0x75f   :  { %v12225_v17 = vpop.eup %8794  ;;  %8820 = vtanh.f32 %v4671_v58 }
 0x760   :  { %v12229_v63 = vpop.eup %8796  ;;  %8822 = vtanh.f32 %v4672_v20 }
 0x761   :  { %v12233_v14 = vpop.eup %8798  ;;  %8824 = vtanh.f32 %v4673_v40  ;;  %v8021_v40 = vmul.f32 -1.442695, %v4699_v29  ;;  %v14775_v29 = vld [vmem:[#allocation88_spill] sm:$0xff] }
 0x762   :  { %v12237_v42 = vpop.eup %8800  ;;  %8826 = vtanh.f32 %v4674_v36  ;;  %v8022_v36 = vmul.f32 -1.442695, %v4700_v44 }
 0x763   :  { %v12241_v46 = vpop.eup %8802  ;;  %8828 = vtanh.f32 %v4675_v13 }
 0x764   :  { %v8805_v19 = vpop.eup %8804  ;;  %8830 = vtanh.f32 %v4676_v0  ;;  %v8024_v0 = vmul.f32 -1.442695, %v4702_v28 }
 0x765   :  { %v8807_v52 = vpop.eup %8806  ;;  %8832 = vtanh.f32 %v4677_v21  ;;  %v4759_v21 = vmul.f32 %v8805_v19, %v14773_v30  ;;  %v14779_v30 = vld [vmem:[#allocation91_spill] sm:$0xff] }
 0x766   :  { %v8809_v58 = vpop.eup %8808  ;;  %8834 = vtanh.f32 %v4678_v2  ;;  %v4760_v2 = vmul.f32 %v8807_v52, %v14774_v48 }
 0x767   :  { %v8811_v20 = vpop.eup %8810  ;;  %8836 = vpow2.f32 %v8017_v26  ;;  %v4761_v26 = vmul.f32 %v8809_v58, %v14775_v29 }
 0x768   :  { %v8813_v1 = vpop.eup %8812  ;;  %8838 = vpow2.f32 %v8018_v18 }
 0x769   :  { %v8815_v13 = vpop.eup %8814  ;;  %8840 = vpow2.f32 %v8019_v53  ;;  %v4762_v53 = vmul.f32 %v8811_v20, %v14776_v3 }
 0x76a   :  { %v8817_v61 = vpop.eup %8816  ;;  %8842 = vpow2.f32 %v8020_v15 }
 0x76b   :  { %v8819_v9 = vpop.eup %8818  ;;  %8844 = vpow2.f32 %v8021_v40  ;;  %v14777_v40 = vld [vmem:[#allocation90_spill] sm:$0xff] }
 0x76c   :  { %v8821_v5 = vpop.eup %8820  ;;  %8846 = vpow2.f32 %v8022_v36  ;;  %v4763_v47 = vmul.f32 %v8813_v1, %v14777_v40 }
 0x76d   :  { %v8823_v22 = vpop.eup %8822  ;;  %8848 = vpow2.f32 %v8023_v23  ;;  %v4767_v44 = vmul.f32 %v8821_v5, %v12216_v4  ;;  %v4764_v23 = vmul.f32 %v8815_v13, %v14779_v30 }
 0x76e   :  { %v8825_v18 = vpop.eup %8824  ;;  %8850 = vpow2.f32 %v8024_v0  ;;  %v4768_v28 = vmul.f32 %v8823_v22, %v12219_v11 }
 0x76f   :  { %v8827_v15 = vpop.eup %8826  ;;  %v4769_v19 = vmul.f32 %v8825_v18, %v12222_v16  ;;  %v12255_v36 = vadd.f32 %v4767_v44, %v4759_v21 }
 0x770   :  { %v8829_v52 = vpop.eup %8828  ;;  %v4770_v58 = vmul.f32 %v8827_v15, %v12225_v17  ;;  %v12259_v48 = vadd.f32 %v4768_v28, %v4760_v2 }
 0x771   :  { %14778 = vst [vmem:[#allocation94_spill] sm:$0xff] %v12255_v36  ;;  %v8831_v4 = vpop.eup %8830  ;;  %v4771_v0 = vmul.f32 %v8829_v52, %v12229_v63  ;;  %v12262_v20 = vadd.f32 %v4769_v19, %v4761_v26  ;;  %8852 = vtanh.f32 %v12255_v36 }
 0x772   :  { %14780 = vst [vmem:[#allocation133_spill] sm:$0xff] %v12259_v48  ;;  %v8833_v11 = vpop.eup %8832  ;;  %v4772_v1 = vmul.f32 %v8831_v4, %v12233_v14  ;;  %v12266_v16 = vadd.f32 %v4770_v58, %v4762_v53  ;;  %8854 = vtanh.f32 %v12259_v48  ;;  %v14786_v53 = vld [vmem:[#allocation93_spill] sm:$0xff] }
 0x773   :  { %14781 = vst [vmem:[#allocation134_spill] sm:$0xff] %v12262_v20  ;;  %v8835_v21 = vpop.eup %8834  ;;  %v12269_v13 = vadd.f32 %v4771_v0, %v4763_v47  ;;  %8856 = vtanh.f32 %v12262_v20  ;;  %v14785_v47 = vld [vmem:[#allocation92_spill] sm:$0xff]  ;;  %v4766_v28 = vmul.f32 %v8819_v9, %v14786_v53  ;;  %v4773_v19 = vmul.f32 %v8833_v11, %v12237_v42 }
 0x774   :  { %14782 = vst [vmem:[#allocation135_spill] sm:$0xff] %v12266_v16  ;;  %v8837_v17 = vpop.eup %8836  ;;  %v12272_v5 = vadd.f32 %v4772_v1, %v4764_v23  ;;  %8858 = vtanh.f32 %v12266_v16  ;;  %v4765_v44 = vmul.f32 %v8817_v61, %v14785_v47  ;;  %v4774_v23 = vmul.f32 %v8835_v21, %v12241_v46 }
 0x775   :  { %14783 = vst [vmem:[#allocation136_spill] sm:$0xff] %v12269_v13  ;;  %v8839_v63 = vpop.eup %8838  ;;  %v4735_v2 = vadd.f32 1.0, %v8837_v17  ;;  %8860 = vtanh.f32 %v12269_v13 }
 0x776   :  { %14784 = vst [vmem:[#allocation137_spill] sm:$0xff] %v12272_v5  ;;  %v8841_v22 = vpop.eup %8840  ;;  %v4736_v14 = vadd.f32 1.0, %v8839_v63  ;;  %8862 = vtanh.f32 %v12272_v5  ;;  %v12281_v0 = vadd.f32 %v4773_v19, %v4765_v44  ;;  %v12283_v1 = vadd.f32 %v4774_v23, %v4766_v28 }
 0x777   :  { %v8843_v29 = vpop.eup %8842  ;;  %v4737_v26 = vadd.f32 1.0, %v8841_v22  ;;  %8864 = vrcp.f32 %v4735_v2 }
 0x778   :  { %v8845_v18 = vpop.eup %8844  ;;  %v4738_v3 = vadd.f32 1.0, %v8843_v29  ;;  %8866 = vrcp.f32 %v4736_v14  ;;  %14787 = vst [vmem:[#allocation138_spill] sm:$0xff] %v12281_v0  ;;  %14788 = vst [vmem:[#allocation95_spill] sm:$0xff] %v12283_v1 }
 0x779   :  { %v8847_v15 = vpop.eup %8846  ;;  %v4739_v40 = vadd.f32 1.0, %v8845_v18  ;;  %8868 = vrcp.f32 %v4737_v26 }
 0x77a   :  { %v8849_v52 = vpop.eup %8848  ;;  %v4740_v30 = vadd.f32 1.0, %v8847_v15  ;;  %8870 = vrcp.f32 %v4738_v3 }
 0x77b   :  { %v8851_v58 = vpop.eup %8850  ;;  %v4741_v4 = vadd.f32 1.0, %v8849_v52  ;;  %8872 = vrcp.f32 %v4739_v40 }
 0x77c   :  { %v4742_v61 = vadd.f32 1.0, %v8851_v58  ;;  %8874 = vrcp.f32 %v4740_v30 }
 0x77d   :  { %8876 = vrcp.f32 %v4741_v4 }
 0x77e   :  { %v8853_v9 = vpop.eup %8852  ;;  %8878 = vrcp.f32 %v4742_v61 }
 0x77f   :  { %v8855_v17 = vpop.eup %8854  ;;  %8880 = vtanh.f32 %v12281_v0 }
 0x780   :  { %v8857_v42 = vpop.eup %8856  ;;  %8882 = vtanh.f32 %v12283_v1 }
 0x781   :  { %v8859_v11 = vpop.eup %8858 }
 0x782   :  { %v8861_v46 = vpop.eup %8860 }
 0x783   :  { %v8863_v21 = vpop.eup %8862 }
 0x784   :  { %v8865_v63 = vpop.eup %8864 }
 0x785   :  { %v8867_v2 = vpop.eup %8866  ;;  %v4791_v22 = vmul.f32 %v8865_v63, %v8853_v9 }
 0x786   :  { %v8869_v14 = vpop.eup %8868  ;;  %v4792_v29 = vmul.f32 %v8867_v2, %v8855_v17 }
 0x787   :  { %v8871_v26 = vpop.eup %8870  ;;  %v4793_v47 = vmul.f32 %v8869_v14, %v8857_v42  ;;  %v12288_v44 = vrot.slane %v4791_v22, %v14663_v27  ;;  %v12294_v28 = vrot.slane %v4791_v22, %v14664_v10 }
 0x788   :  { %v8873_v18 = vpop.eup %8872  ;;  %v4794_v3 = vmul.f32 %v8871_v26, %v8859_v11  ;;  %v12291_v53 = vrot.slane %v4792_v29, %v14663_v27  ;;  %v12297_v15 = vrot.slane %v4792_v29, %v14664_v10 }
 0x789   :  { %v8875_v40 = vpop.eup %8874  ;;  %v4795_v19 = vmul.f32 %v8873_v18, %v8861_v46  ;;  %v12300_v52 = vrot.slane %v4793_v47, %v14663_v27  ;;  %v4888_v30 = vpack.c.bf16 %v12288_v44, %v12288_v44  ;;  %v12305_v23 = vrot.slane %v4793_v47, %v14664_v10 }
 0x78a   :  { %v8877_v58 = vpop.eup %8876  ;;  %v4796_v4 = vmul.f32 %v8875_v40, %v8863_v21  ;;  %v12308_v61 = vrot.slane %v4794_v3, %v14663_v27  ;;  %v4890_v9 = vpack.c.bf16 %v12291_v53, %v12291_v53  ;;  %v12313_v17 = vrot.slane %v4794_v3, %v14664_v10 }
 0x78b   :  { %v8879_v42 = vpop.eup %8878  ;;  %v12316_v11 = vrot.slane %v4795_v19, %v14663_v27  ;;  %v4892_v46 = vpack.c.bf16 %v12300_v52, %v12300_v52  ;;  %v4920_v63 = vunpack.c.l.b16 %v4888_v30  ;;  %v12321_v21 = vrot.slane %v4795_v19, %v14664_v10 }
 0x78c   :  { %v8881_v2 = vpop.eup %8880  ;;  %v12324_v22 = vrot.slane %v4796_v4, %v14663_v27  ;;  %v4894_v14 = vpack.c.bf16 %v12308_v61, %v12308_v61  ;;  %v4922_v29 = vunpack.c.l.b16 %v4890_v9  ;;  %v12329_v26 = vrot.slane %v4796_v4, %v14664_v10 }
 0x78d   :  { %v8883_v47 = vpop.eup %8882  ;;  %v4797_v18 = vmul.f32 %v8881_v2, %v8877_v58  ;;  %v4896_v3 = vpack.c.bf16 %v12316_v11, %v12316_v11  ;;  %v4924_v40 = vunpack.c.l.b16 %v4892_v46  ;;  %v4887_v19 = vpack.c.bf16 %v12294_v28, %v12294_v28 }
 0x78e   :  { %v4798_v30 = vmul.f32 %v8883_v47, %v8879_v42  ;;  %v4898_v1 = vpack.c.bf16 %v12324_v22, %v12324_v22  ;;  %v4926_v0 = vunpack.c.l.b16 %v4894_v14  ;;  %v5036_v5 = vrot.slane %v4922_v29, 7 }
 0x78f   :  { %v12338_v9 = vrot.slane %v4797_v18, %v14663_v27  ;;  %v4928_v4 = vunpack.c.l.b16 %v4896_v3  ;;  %v5038_v13 = vrot.slane %v4924_v40, 6  ;;  %v12341_v58 = vrot.slane %v4797_v18, %v14664_v10 }
 0x790   :  { %v4870_v2 = vrot.slane %v4798_v30, %v14663_v27  ;;  %v4930_v46 = vunpack.c.l.b16 %v4898_v1  ;;  %v5037_v16 = vsel %vm1672_vm0, %v5036_v5, %v4920_v63  ;;  %v5040_v20 = vrot.slane %v4926_v0, 5 }
 0x791   :  { %v4900_v42 = vpack.c.bf16 %v12338_v9, %v12338_v9  ;;  %v5039_v14 = vsel %vm1675_vm1, %v5038_v13, %v5037_v16  ;;  %v5042_v29 = vrot.slane %v4928_v4, 4  ;;  %v12349_v47 = vrot.slane %v4798_v30, %v14664_v10 }
 0x792   :  { %v4902_v3 = vpack.c.bf16 %v4870_v2, %v4870_v2  ;;  %v5041_v40 = vsel %vm1678_vm2, %v5040_v20, %v5039_v14  ;;  %v5044_v18 = vrot.slane %v4930_v46, 3  ;;  %v4889_v27 = vpack.c.bf16 %v12297_v15, %v12297_v15 }
 0x793   :  { %v4932_v1 = vunpack.c.l.b16 %v4900_v42  ;;  %v5043_v5 = vsel %vm1611_vm5, %v5042_v29, %v5041_v40  ;;  %v4891_v0 = vpack.c.bf16 %v12305_v23, %v12305_v23  ;;  %v4893_v16 = vpack.c.bf16 %v12313_v17, %v12313_v17 }
 0x794   :  { %v4934_v13 = vunpack.c.l.b16 %v4902_v3  ;;  %v5045_v63 = vsel %vm1684_vm6, %v5044_v18, %v5043_v5  ;;  %v4895_v30 = vpack.c.bf16 %v12321_v21, %v12321_v21  ;;  %v4897_v20 = vpack.c.bf16 %v12329_v26, %v12329_v26 }
 0x795   :  { %v5046_v4 = vrot.slane %v4932_v1, 2  ;;  %v4899_v46 = vpack.c.bf16 %v12341_v58, %v12341_v58  ;;  %v4901_v29 = vpack.c.bf16 %v12349_v47, %v12349_v47  ;;  %v4919_v3 = vunpack.c.l.b16 %v4887_v19  ;;  %v4966_v19 = vld [vmem:[%s13796_s2] sm:$0x44] }
 0x796   :  { %v5048_v14 = vrot.slane %v4934_v13, 1  ;;  %v4921_v40 = vunpack.c.l.b16 %v4889_v27  ;;  %v4923_v5 = vunpack.c.l.b16 %v4891_v0  ;;  %v4925_v10 = vunpack.c.l.b16 %v4893_v16  ;;  %v4972_v0 = vld [vmem:[%s13796_s2 + $0x10] sm:$0x44] }
 0x797   :  { %v5047_v1 = vsel %vm1687_vm8, %v5046_v4, %v5045_v63  ;;  %v4927_v48 = vunpack.c.l.b16 %v4895_v30  ;;  %v4929_v6 = vunpack.c.l.b16 %v4897_v20  ;;  %v8209_v13 = vpack.c.bf16 %v12288_v44, %v12294_v28  ;;  %v4969_v63 = vld [vmem:[%s13796_s2 + $0x8] sm:$0x44] }
 0x798   :  { %v5049_v36 = vsel %vm1690_vm11, %v5048_v14, %v5047_v1  ;;  %v8210_v27 = vpack.c.bf16 %v12291_v53, %v12297_v15  ;;  %v8211_v30 = vpack.c.bf16 %v12300_v52, %v12305_v23  ;;  %v8212_v44 = vpack.c.bf16 %v12308_v61, %v12313_v17  ;;  %v4978_v15 = vld [vmem:[%s13796_s2 + $0x20] sm:$0x44] }
 0x799   :  { %v5051_v16 = vpack.c.b16 %v5049_v36, %v5049_v36  ;;  %v8213_v53 = vpack.c.bf16 %v12316_v11, %v12321_v21  ;;  %v4975_v36 = vld [vmem:[%s13796_s2 + $0x18] sm:$0x44]  ;;  %v8214_v52 = vpack.c.bf16 %v12324_v22, %v12329_v26  ;;  %v8215_v23 = vpack.c.bf16 %v12338_v9, %v12341_v58  ;;  %v4981_v11 = vld [vmem:[%s13796_s2 + $0x28] sm:$0x44]  ;;  %v4984_v21 = vld [vmem:[%s13796_s2 + $0x30] sm:$0x44] }
 0x79a   :  { %v8216_v61 = vpack.c.bf16 %v4870_v2, %v12349_v47  ;;  %v4943_v17 = vrot.slane %v8209_v13, 6  ;;  %v4944_v20 = vrot.slane %v8210_v27, 6  ;;  %v4945_v4 = vrot.slane %v8211_v30, 6  ;;  %v4987_v26 = vld [vmem:[%s13796_s2 + $0x38] sm:$0x44] }
 0x79b   :  { %5086 = vmatprep.mubr.bf16.mxu0 %v5051_v16  ;;  %5127 = vmatprep.mubr.bf16.mxu1 %v5051_v16  ;;  %v4946_v42 = vrot.slane %v8212_v44, 6  ;;  %v4947_v22 = vrot.slane %v8213_v53, 6  ;;  %v4948_v9 = vrot.slane %v8214_v52, 6  ;;  %v4949_v58 = vrot.slane %v8215_v23, 6 }
 0x79c   :  { %v4950_v2 = vrot.slane %v8216_v61, 6  ;;  %v4967_v47 = vsel %vm12405_vm14, %v4943_v17, %v4966_v19  ;;  %v4970_v14 = vsel %vm12405_vm14, %v4944_v20, %v4969_v63  ;;  %v4973_v18 = vsel %vm12405_vm14, %v4945_v4, %v4972_v0  ;;  %v14800_v20 = vld [vmem:[#allocation101_spill] sm:$0xff]  ;;  %v14801_v4 = vld [vmem:[#allocation102_spill] sm:$0xff] }
 0x79d   :  { %4968 = vst [vmem:[%s13796_s2] sm:$0x44] %v4967_v47  ;;  %v4976_v1 = vsel %vm12405_vm14, %v4946_v42, %v4975_v36  ;;  %v4979_v13 = vsel %vm12405_vm14, %v4947_v22, %v4978_v15  ;;  %4971 = vst [vmem:[%s13796_s2 + $0x8] sm:$0x44] %v4970_v14  ;;  %v4982_v27 = vsel %vm12405_vm14, %v4948_v9, %v4981_v11  ;;  %v5022_v0 = vrot.slane %v4921_v40, 7  ;;  %v14802_v42 = vld [vmem:[#allocation103_spill] sm:$0xff]  ;;  %v14803_v22 = vld [vmem:[#allocation104_spill] sm:$0xff] }
 0x79e   :  { %4974 = vst [vmem:[%s13796_s2 + $0x10] sm:$0x44] %v4973_v18  ;;  %4977 = vst [vmem:[%s13796_s2 + $0x18] sm:$0x44] %v4976_v1  ;;  %v4985_v19 = vsel %vm12405_vm14, %v4949_v58, %v4984_v21  ;;  %v4988_v63 = vsel %vm12405_vm14, %v4950_v2, %v4987_v26  ;;  %v4931_v30 = vunpack.c.l.b16 %v4899_v46  ;;  %v5024_v44 = vrot.slane %v4923_v5, 6  ;;  %v14804_v26 = vld [vmem:[#allocation105_spill] sm:$0xff] }
 0x79f   :  { %4980 = vst [vmem:[%s13796_s2 + $0x20] sm:$0x44] %v4979_v13  ;;  %4983 = vst [vmem:[%s13796_s2 + $0x28] sm:$0x44] %v4982_v27  ;;  %v4933_v53 = vunpack.c.l.b16 %v4901_v29  ;;  %v5023_v36 = vsel %vm1672_vm0, %v5022_v0, %v4919_v3  ;;  %v5026_v28 = vrot.slane %v4925_v10, 5  ;;  %v5028_v46 = vrot.slane %v4927_v48, 4 }
 0x7a0   :  { %4986 = vst [vmem:[%s13796_s2 + $0x30] sm:$0x44] %v4985_v19  ;;  %4989 = vst [vmem:[%s13796_s2 + $0x38] sm:$0x44] %v4988_v63  ;;  %v5025_v40 = vsel %vm1675_vm1, %v5024_v44, %v5023_v36  ;;  %v5030_v52 = vrot.slane %v4929_v6, 3  ;;  %v5032_v61 = vrot.slane %v4931_v30, 2 }
 0x7a1   :  { %v5027_v15 = vsel %vm1678_vm2, %v5026_v28, %v5025_v40  ;;  %v5034_v11 = vrot.slane %v4933_v53, 1  ;;  %v14795_v6 = vld [vmem:[#allocation96_spill] sm:$0xff]  ;;  %v14796_v10 = vld [vmem:[#allocation97_spill] sm:$0xff]  ;;  %v14797_v48 = vld [vmem:[#allocation98_spill] sm:$0xff] }
 0x7a2   :  { %v5029_v23 = vsel %vm1611_vm5, %v5028_v46, %v5027_v15  ;;  %v14798_v3 = vld [vmem:[#allocation99_spill] sm:$0xff]  ;;  %v14805_v9 = vld [vmem:[#allocation106_spill] sm:$0xff]  ;;  %v14807_v2 = vld [vmem:[#allocation108_spill] sm:$0xff] }
 0x7a3   :  { %v5031_v17 = vsel %vm1684_vm6, %v5030_v52, %v5029_v23  ;;  %v14806_v58 = vld [vmem:[#allocation107_spill] sm:$0xff]  ;;  %v14808_v47 = vld [vmem:[#allocation109_spill] sm:$0xff]  ;;  %v14809_v14 = vld [vmem:[#allocation110_spill] sm:$0xff] }
 0x7a4   :  { %v5033_v21 = vsel %vm1687_vm8, %v5032_v61, %v5031_v17  ;;  %v14810_v18 = vld [vmem:[#allocation111_spill] sm:$0xff]  ;;  %v14811_v1 = vld [vmem:[#allocation112_spill] sm:$0xff]  ;;  %v14812_v13 = vld [vmem:[#allocation113_spill] sm:$0xff] }
 0x7a5   :  { %v5035_v5 = vsel %vm1690_vm11, %v5034_v11, %v5033_v21  ;;  %v14813_v27 = vld [vmem:[#allocation114_spill] sm:$0xff]  ;;  %v14814_v19 = vld [vmem:[#allocation115_spill] sm:$0xff]  ;;  %v14815_v63 = vld [vmem:[#allocation116_spill] sm:$0xff] }
 0x7a6   :  { %v12476_v29 = vpack.c.b16 %v5035_v5, %v5035_v5  ;;  %v14816_v0 = vld [vmem:[#allocation117_spill] sm:$0xff]  ;;  %v14817_v30 = vld [vmem:[#allocation118_spill] sm:$0xff]  ;;  %v14818_v44 = vld [vmem:[#allocation119_spill] sm:$0xff] }
 0x7a7   :  { %v14819_v53 = vld [vmem:[#allocation120_spill] sm:$0xff]  ;;  %v14820_v36 = vld [vmem:[#allocation121_spill] sm:$0xff]  ;;  %v14821_v28 = vld [vmem:[#allocation122_spill] sm:$0xff] }
 0x7a8   :  { %5087 = vmatmul.mubr.bf16.vlgmr.msra.gmra.mxu0 %v12476_v29  ;;  %5128 = vmatmul.mubr.bf16.vlgmr.msra.gmra.mxu1 %v12476_v29  ;;  %v14822_v40 = vld [vmem:[#allocation123_spill] sm:$0xff]  ;;  %v14823_v46 = vld [vmem:[#allocation124_spill] sm:$0xff]  ;;  %v14824_v15 = vld [vmem:[#allocation125_spill] sm:$0xff] }
 0x7a9   :  { %5137 = vmatpush1.bf16.msra.mxu0 %v14292_v31  ;;  %5178 = vmatpush1.bf16.msra.mxu1 %v14293_v39  ;;  %v14825_v52 = vld [vmem:[#allocation126_spill] sm:$0xff]  ;;  %v14826_v23 = vld [vmem:[#allocation127_spill] sm:$0xff]  ;;  %v14827_v61 = vld [vmem:[#allocation128_spill] sm:$0xff] }
 0x7aa   :  { %5168 = vmatprep.mubr.bf16.mxu0 %v5051_v16  ;;  %5209 = vmatprep.mubr.bf16.mxu1 %v5051_v16  ;;  %v14799_v16 = vld [vmem:[#allocation100_spill] sm:$0xff]  ;;  %v14828_v17 = vld [vmem:[#allocation129_spill] sm:$0xff]  ;;  %v14829_v11 = vld [vmem:[#allocation130_spill] sm:$0xff] }
 0x7ab   :  { %5138 = vmatprep.subr.bf16.mxu0 %v14294_v35  ;;  %5179 = vmatprep.subr.bf16.mxu1 %v14295_v12  ;;  %v14830_v21 = vld [vmem:[#allocation131_spill] sm:$0xff]  ;;  %v14831_v5 = vld [vmem:[#allocation4_spill] sm:$0xff]  ;;  %vm13382_vm14 = vmand %vm1690_vm11, %vm6639_vm12 }
 0x7ac   :  { %vm13411_vm15 = vmor %vm13382_vm14, %vm13374_vm13 }
 0x7ad   :  { %5139 = vmatpush1.bf16.msra.mxu0 %v14296_v43  ;;  %5180 = vmatpush1.bf16.msra.mxu1 %v14297_v41 }
 0x7ae   :  { %5140 = vmatprep.subr.bf16.mxu0 %v14298_v55  ;;  %5181 = vmatprep.subr.bf16.mxu1 %v14299_v34 }
 0x7b1   :  { %5141 = vmatpush1.bf16.msra.mxu0 %v14300_v56  ;;  %5182 = vmatpush1.bf16.msra.mxu1 %v14301_v32 }
 0x7b2   :  { %5142 = vmatprep.subr.bf16.mxu0 %v14302_v54  ;;  %5183 = vmatprep.subr.bf16.mxu1 %v14303_v60 }
 0x7b5   :  { %5143 = vmatpush1.bf16.msra.mxu0 %v14304_v50  ;;  %5184 = vmatpush1.bf16.msra.mxu1 %v14305_v59 }
 0x7b6   :  { %5144 = vmatprep.subr.bf16.mxu0 %v14306_v45  ;;  %5185 = vmatprep.subr.bf16.mxu1 %v14307_v33 }
 0x7b9   :  { %5145 = vmatpush1.bf16.msra.mxu0 %v14308_v8  ;;  %5186 = vmatpush1.bf16.msra.mxu1 %v14309_v38 }
 0x7ba   :  { %5146 = vmatprep.subr.bf16.mxu0 %v14310_v7  ;;  %5187 = vmatprep.subr.bf16.mxu1 %v14311_v24 }
 0x7bd   :  { %5147 = vmatpush1.bf16.msra.mxu0 %v14312_v37  ;;  %5188 = vmatpush1.bf16.msra.mxu1 %v14313_v25 }
 0x7be   :  { %5148 = vmatprep.subr.bf16.mxu0 %v14314_v62  ;;  %5189 = vmatprep.subr.bf16.mxu1 %v14315_v49 }
 0x7c1   :  { %5149 = vmatpush1.bf16.msra.mxu0 %v14316_v51  ;;  %5190 = vmatpush1.bf16.msra.mxu1 %v14416_v57 }
 0x7c2   :  { %5150 = vmatprep.subr.bf16.mxu0 %v14795_v6  ;;  %5191 = vmatprep.subr.bf16.mxu1 %v14796_v10 }
 0x7c5   :  { %5151 = vmatpush1.bf16.msra.mxu0 %v14797_v48  ;;  %5192 = vmatpush1.bf16.msra.mxu1 %v14798_v3 }
 0x7c6   :  { %5152 = vmatprep.subr.bf16.mxu0 %v14799_v16  ;;  %5193 = vmatprep.subr.bf16.mxu1 %v14800_v20 }
 0x7c9   :  { %5153 = vmatpush2.bf16.msra.mxu0 %v14801_v4  ;;  %5194 = vmatpush2.bf16.msra.mxu1 %v14802_v42 }
 0x7ca   :  { %5154 = vmatprep.subr.bf16.mxu0 %v14803_v22  ;;  %5195 = vmatprep.subr.bf16.mxu1 %v14804_v26 }
 0x7cd   :  { %5155 = vmatpush2.bf16.msra.mxu0 %v14805_v9  ;;  %5196 = vmatpush2.bf16.msra.mxu1 %v14806_v58 }
 0x7ce   :  { %5156 = vmatprep.subr.bf16.mxu0 %v14807_v2  ;;  %5197 = vmatprep.subr.bf16.mxu1 %v14808_v47  ;;  %v8043_v2 = vld [vmem:[%s13795_s0 + $0x145] ss:$8 sm:$0xf] }
 0x7d1   :  { %5157 = vmatpush2.bf16.msra.mxu0 %v14809_v14  ;;  %5198 = vmatpush2.bf16.msra.mxu1 %v14810_v18  ;;  %v8042_v18 = vld [vmem:[%s13795_s0 + $0x105] ss:$8 sm:$0xf0] }
 0x7d2   :  { %5158 = vmatprep.subr.bf16.mxu0 %v14811_v1  ;;  %5199 = vmatprep.subr.bf16.mxu1 %v14812_v13 }
 0x7d5   :  { %5159 = vmatpush2.bf16.msra.mxu0 %v14813_v27  ;;  %5200 = vmatpush2.bf16.msra.mxu1 %v14814_v19 }
 0x7d6   :  { %5160 = vmatprep.subr.bf16.mxu0 %v14815_v63  ;;  %5201 = vmatprep.subr.bf16.mxu1 %v14816_v0 }
 0x7d9   :  { %5161 = vmatpush2.bf16.msra.mxu0 %v14817_v30  ;;  %5202 = vmatpush2.bf16.msra.mxu1 %v14818_v44  ;;  %v14897_v30 = vld [vmem:[#allocation132_spill] sm:$0xff] }
 0x7da   :  { %5162 = vmatprep.subr.bf16.mxu0 %v14819_v53  ;;  %5203 = vmatprep.subr.bf16.mxu1 %v14820_v36 }
 0x7dd   :  { %5163 = vmatpush2.bf16.msra.mxu0 %v14821_v28  ;;  %5204 = vmatpush2.bf16.msra.mxu1 %v14822_v40  ;;  %v14832_v28 = vld [vmem:[#allocation6_spill] sm:$0xff] }
 0x7de   :  { %5164 = vmatprep.subr.bf16.mxu0 %v14823_v46  ;;  %5205 = vmatprep.subr.bf16.mxu1 %v14824_v15  ;;  %v14833_v15 = vld [vmem:[#allocation5_spill] sm:$0xff]  ;;  %v14842_v46 = vld [vmem:[#allocation15_spill] sm:$0xff] }
 0x7e1   :  { %5165 = vmatpush2.bf16.msra.mxu0 %v14825_v52  ;;  %5206 = vmatpush2.bf16.msra.mxu1 %v14826_v23  ;;  %v14834_v52 = vld [vmem:[#allocation7_spill] sm:$0xff]  ;;  %v14835_v23 = vld [vmem:[#allocation8_spill] sm:$0xff] }
 0x7e2   :  { %5166 = vmatprep.subr.bf16.mxu0 %v14827_v61  ;;  %5207 = vmatprep.subr.bf16.mxu1 %v14828_v17  ;;  %v14836_v61 = vld [vmem:[#allocation9_spill] sm:$0xff]  ;;  %v14837_v17 = vld [vmem:[#allocation10_spill] sm:$0xff] }
 0x7e5   :  { %5167 = vmatpush2.bf16.msra.mxu0 %v14829_v11  ;;  %5208 = vmatpush2.bf16.msra.mxu1 %v14830_v21  ;;  %v14838_v11 = vld [vmem:[#allocation11_spill] sm:$0xff]  ;;  %v14839_v21 = vld [vmem:[#allocation12_spill] sm:$0xff] }
 0x7e6   :  { %5903 = vmatprep.subr.bf16.mxu0 %v14831_v5  ;;  %5944 = vmatprep.subr.bf16.mxu1 %v14832_v28  ;;  %v14840_v5 = vld [vmem:[#allocation13_spill] sm:$0xff]  ;;  %v14841_v28 = vld [vmem:[#allocation14_spill] sm:$0xff] }
 0x7e8   :  { %5169 = vmatmul.mubr.bf16.vlgmr.msra.gmra.mxu0 %v12476_v29  ;;  %5210 = vmatmul.mubr.bf16.vlgmr.msra.gmra.mxu1 %v12476_v29  ;;  %v14843_v29 = vld [vmem:[#allocation16_spill] sm:$0xff] }
 0x7e9   :  { %5904 = vmatpush1.bf16.msra.mxu0 %v14833_v15  ;;  %5945 = vmatpush1.bf16.msra.mxu1 %v14834_v52  ;;  %v14844_v15 = vld [vmem:[#allocation17_spill] sm:$0xff]  ;;  %v14845_v52 = vld [vmem:[#allocation18_spill] sm:$0xff] }
 0x7ea   :  { %5905 = vmatprep.subr.bf16.mxu0 %v14835_v23  ;;  %5946 = vmatprep.subr.bf16.mxu1 %v14836_v61  ;;  %v14846_v23 = vld [vmem:[#allocation19_spill] sm:$0xff]  ;;  %v14847_v61 = vld [vmem:[#allocation20_spill] sm:$0xff] }
 0x7ed   :  { %5906 = vmatpush1.bf16.msra.mxu0 %v14837_v17  ;;  %5947 = vmatpush1.bf16.msra.mxu1 %v14838_v11  ;;  %v14848_v17 = vld [vmem:[#allocation21_spill] sm:$0xff]  ;;  %v14849_v11 = vld [vmem:[#allocation22_spill] sm:$0xff] }
 0x7ee   :  { %5907 = vmatprep.subr.bf16.mxu0 %v14839_v21  ;;  %5948 = vmatprep.subr.bf16.mxu1 %v14840_v5  ;;  %v14850_v21 = vld [vmem:[#allocation23_spill] sm:$0xff]  ;;  %v14851_v5 = vld [vmem:[#allocation24_spill] sm:$0xff] }
 0x7f1   :  { %5908 = vmatpush1.bf16.msra.mxu0 %v14841_v28  ;;  %5949 = vmatpush1.bf16.msra.mxu1 %v14842_v46  ;;  %v14852_v28 = vld [vmem:[#allocation25_spill] sm:$0xff]  ;;  %v14853_v46 = vld [vmem:[#allocation26_spill] sm:$0xff] }
 0x7f2   :  { %5909 = vmatprep.subr.bf16.mxu0 %v14843_v29  ;;  %5950 = vmatprep.subr.bf16.mxu1 %v14844_v15  ;;  %v14854_v29 = vld [vmem:[#allocation27_spill] sm:$0xff]  ;;  %v14855_v15 = vld [vmem:[#allocation28_spill] sm:$0xff] }
 0x7f5   :  { %5910 = vmatpush1.bf16.msra.mxu0 %v14845_v52  ;;  %5951 = vmatpush1.bf16.msra.mxu1 %v14846_v23  ;;  %v14856_v52 = vld [vmem:[#allocation29_spill] sm:$0xff]  ;;  %v14857_v23 = vld [vmem:[#allocation30_spill] sm:$0xff] }
 0x7f6   :  { %5911 = vmatprep.subr.bf16.mxu0 %v14847_v61  ;;  %5952 = vmatprep.subr.bf16.mxu1 %v14848_v17  ;;  %v14858_v61 = vld [vmem:[#allocation31_spill] sm:$0xff]  ;;  %v14859_v17 = vld [vmem:[#allocation32_spill] sm:$0xff] }
 0x7f9   :  { %5912 = vmatpush1.bf16.msra.mxu0 %v14849_v11  ;;  %5953 = vmatpush1.bf16.msra.mxu1 %v14850_v21  ;;  %v14860_v11 = vld [vmem:[#allocation33_spill] sm:$0xff]  ;;  %v14861_v21 = vld [vmem:[#allocation34_spill] sm:$0xff] }
 0x7fa   :  { %5913 = vmatprep.subr.bf16.mxu0 %v14851_v5  ;;  %5954 = vmatprep.subr.bf16.mxu1 %v14852_v28  ;;  %v14862_v5 = vld [vmem:[#allocation35_spill] sm:$0xff]  ;;  %v14863_v28 = vld [vmem:[#allocation36_spill] sm:$0xff] }
 0x7fd   :  { %5914 = vmatpush1.bf16.msra.mxu0 %v14853_v46  ;;  %5955 = vmatpush1.bf16.msra.mxu1 %v14854_v29  ;;  %v14864_v46 = vld [vmem:[#allocation37_spill] sm:$0xff]  ;;  %v14865_v29 = vld [vmem:[#allocation38_spill] sm:$0xff] }
 0x7fe   :  { %5915 = vmatprep.subr.bf16.mxu0 %v14855_v15  ;;  %5956 = vmatprep.subr.bf16.mxu1 %v14856_v52  ;;  %v14866_v15 = vld [vmem:[#allocation39_spill] sm:$0xff]  ;;  %v14867_v52 = vld [vmem:[#allocation40_spill] sm:$0xff] }
 0x801   :  { %5916 = vmatpush1.bf16.msra.mxu0 %v14857_v23  ;;  %5957 = vmatpush1.bf16.msra.mxu1 %v14858_v61  ;;  %v14868_v23 = vld [vmem:[#allocation41_spill] sm:$0xff]  ;;  %v14869_v61 = vld [vmem:[#allocation42_spill] sm:$0xff] }
 0x802   :  { %5917 = vmatprep.subr.bf16.mxu0 %v14859_v17  ;;  %5958 = vmatprep.subr.bf16.mxu1 %v14860_v11  ;;  %v14870_v17 = vld [vmem:[#allocation43_spill] sm:$0xff]  ;;  %v14871_v11 = vld [vmem:[#allocation44_spill] sm:$0xff] }
 0x805   :  { %5918 = vmatpush1.bf16.msra.mxu0 %v14861_v21  ;;  %5959 = vmatpush1.bf16.msra.mxu1 %v14862_v5  ;;  %v14872_v21 = vld [vmem:[#allocation45_spill] sm:$0xff]  ;;  %v14873_v5 = vld [vmem:[#allocation46_spill] sm:$0xff] }
 0x806   :  { %5919 = vmatprep.subr.bf16.mxu0 %v14863_v28  ;;  %5960 = vmatprep.subr.bf16.mxu1 %v14864_v46  ;;  %v14874_v28 = vld [vmem:[#allocation47_spill] sm:$0xff]  ;;  %v14875_v46 = vld [vmem:[#allocation48_spill] sm:$0xff] }
 0x809   :  { %5920 = vmatpush2.bf16.msra.mxu0 %v14865_v29  ;;  %5961 = vmatpush2.bf16.msra.mxu1 %v14866_v15  ;;  %v14876_v29 = vld [vmem:[#allocation49_spill] sm:$0xff]  ;;  %v14877_v15 = vld [vmem:[#allocation50_spill] sm:$0xff] }
 0x80a   :  { %5921 = vmatprep.subr.bf16.mxu0 %v14867_v52  ;;  %5962 = vmatprep.subr.bf16.mxu1 %v14868_v23  ;;  %v14878_v52 = vld [vmem:[#allocation51_spill] sm:$0xff]  ;;  %v14879_v23 = vld [vmem:[#allocation52_spill] sm:$0xff] }
 0x80d   :  { %5922 = vmatpush2.bf16.msra.mxu0 %v14869_v61  ;;  %5963 = vmatpush2.bf16.msra.mxu1 %v14870_v17  ;;  %v14880_v61 = vld [vmem:[#allocation53_spill] sm:$0xff]  ;;  %v14881_v17 = vld [vmem:[#allocation54_spill] sm:$0xff] }
 0x80e   :  { %5923 = vmatprep.subr.bf16.mxu0 %v14871_v11  ;;  %5964 = vmatprep.subr.bf16.mxu1 %v14872_v21  ;;  %v14882_v11 = vld [vmem:[#allocation55_spill] sm:$0xff]  ;;  %v14883_v21 = vld [vmem:[#allocation56_spill] sm:$0xff] }
 0x811   :  { %5924 = vmatpush2.bf16.msra.mxu0 %v14873_v5  ;;  %5965 = vmatpush2.bf16.msra.mxu1 %v14874_v28  ;;  %v14884_v5 = vld [vmem:[#allocation57_spill] sm:$0xff]  ;;  %v14885_v28 = vld [vmem:[#allocation58_spill] sm:$0xff] }
 0x812   :  { %5925 = vmatprep.subr.bf16.mxu0 %v14875_v46  ;;  %5966 = vmatprep.subr.bf16.mxu1 %v14876_v29  ;;  %v14886_v46 = vld [vmem:[#allocation59_spill] sm:$0xff]  ;;  %v14887_v29 = vld [vmem:[#allocation60_spill] sm:$0xff] }
 0x815   :  { %5926 = vmatpush2.bf16.msra.mxu0 %v14877_v15  ;;  %5967 = vmatpush2.bf16.msra.mxu1 %v14878_v52  ;;  %v14888_v15 = vld [vmem:[#allocation61_spill] sm:$0xff]  ;;  %v14889_v52 = vld [vmem:[#allocation62_spill] sm:$0xff] }
 0x816   :  { %5927 = vmatprep.subr.bf16.mxu0 %v14879_v23  ;;  %5968 = vmatprep.subr.bf16.mxu1 %v14880_v61  ;;  %v14890_v23 = vld [vmem:[#allocation63_spill] sm:$0xff]  ;;  %v14891_v61 = vld [vmem:[#allocation64_spill] sm:$0xff] }
 0x819   :  { %5928 = vmatpush2.bf16.msra.mxu0 %v14881_v17  ;;  %5969 = vmatpush2.bf16.msra.mxu1 %v14882_v11  ;;  %v14892_v17 = vld [vmem:[#allocation65_spill] sm:$0xff]  ;;  %v14893_v11 = vld [vmem:[#allocation66_spill] sm:$0xff] }
 0x81a   :  { %5929 = vmatprep.subr.bf16.mxu0 %v14883_v21  ;;  %5970 = vmatprep.subr.bf16.mxu1 %v14884_v5  ;;  %v14894_v21 = vld [vmem:[#allocation67_spill] sm:$0xff]  ;;  %v14895_v5 = vld [vmem:[#allocation68_spill] sm:$0xff] }
 0x81d   :  { %5930 = vmatpush2.bf16.msra.mxu0 %v14885_v28  ;;  %5971 = vmatpush2.bf16.msra.mxu1 %v14886_v46  ;;  %v14896_v28 = vld [vmem:[#allocation69_spill] sm:$0xff] }
 0x81e   :  { %5931 = vmatprep.subr.bf16.mxu0 %v14887_v29  ;;  %5972 = vmatprep.subr.bf16.mxu1 %v14888_v15 }
 0x821   :  { %5932 = vmatpush2.bf16.msra.mxu0 %v14889_v52  ;;  %5973 = vmatpush2.bf16.msra.mxu1 %v14890_v23 }
 0x822   :  { %5933 = vmatprep.subr.bf16.mxu0 %v14891_v61  ;;  %5974 = vmatprep.subr.bf16.mxu1 %v14892_v17 }
 0x825   :  { %5934 = vmatpush2.bf16.msra.mxu0 %v14893_v11  ;;  %5975 = vmatpush2.bf16.msra.mxu1 %v14894_v21 }
 0x826   :  { %5985 = vmatprep.subr.bf16.mxu0 %v14895_v5  ;;  %6026 = vmatprep.subr.bf16.mxu1 %v14896_v28 }
 0x868   :  { %v5088_v46 = vpop.f32.mrf.mxu0  ;;  %v5129_v29 = vpop.f32.mrf.mxu1 }
 0x86a   :  { %v5090_v40 = vpop.f32.mrf.mxu0  ;;  %v5131_v15 = vpop.f32.mrf.mxu1 }
 0x86b   :  { %v5226_v36 = vcombine.low %v5088_v46, %v5090_v40  ;;  %v5227_v52 = vcombine.high %v5088_v46, %v5090_v40  ;;  %v5228_v53 = vcombine.low %v5129_v29, %v5131_v15  ;;  %v5229_v23 = vcombine.high %v5129_v29, %v5131_v15  ;;  %v8037_v46 = vld [vmem:[%s13795_s0 + $0x85] ss:$8 sm:$0xf] }
 0x86c   :  { %v5092_v44 = vpop.f32.mrf.mxu0  ;;  %v5133_v61 = vpop.f32.mrf.mxu1  ;;  %v8038_v15 = vld [vmem:[%s13795_s0 + $0x85] ss:$8 sm:$0xf0] }
 0x86d   :  { %v5240_v17 = vrot.slane %v5226_v36, %v14897_v30  ;;  %v5247_v11 = vrot.slane %v5227_v52, %v14897_v30  ;;  %v5254_v21 = vrot.slane %v5228_v53, %v14897_v30  ;;  %v5261_v5 = vrot.slane %v5229_v23, %v14897_v30  ;;  %v8033_v44 = vld [vmem:[%s13795_s0 + $0x5] ss:$8 sm:$0xf] }
 0x86e   :  { %v5093_v0 = vpop.f32.mrf.mxu0  ;;  %v5134_v28 = vpop.f32.mrf.mxu1  ;;  %v8034_v36 = vld [vmem:[%s13795_s0 + $0x5] ss:$8 sm:$0xf0] }
 0x86f   :  { %v5290_v63 = vcombine.low %v5240_v17, %v5254_v21  ;;  %v5291_v19 = vcombine.high %v5240_v17, %v5254_v21  ;;  %v5292_v27 = vcombine.low %v5247_v11, %v5261_v5  ;;  %v5293_v13 = vcombine.high %v5247_v11, %v5261_v5  ;;  %v8035_v53 = vld [vmem:[%s13795_s0 + $0x45] ss:$8 sm:$0xf] }
 0x870   :  { %v8036_v0 = vld [vmem:[%s13795_s0 + $0x45] ss:$8 sm:$0xf0]  ;;  %v4993_v9 = vor.u32 %v8034_v36, %v8033_v44 }
 0x871   :  { %v8039_v17 = vld [vmem:[%s13795_s0 + $0xc5] ss:$8 sm:$0xf]  ;;  %v4997_v26 = vor.u32 %v8036_v0, %v8035_v53  ;;  %v5318_v16 = vrot.slane %v5291_v19, %v14897_v30 }
 0x872   :  { %v8040_v11 = vld [vmem:[%s13795_s0 + $0xc5] ss:$8 sm:$0xf0] }
 0x873   :  { %v8041_v29 = vld [vmem:[%s13795_s0 + $0x105] ss:$8 sm:$0xf] }
 0x874   :  { %v8048_v44 = vld [vmem:[%s13795_s0 + $0x1c5] ss:$8 sm:$0xf0] }
 0x8a8   :  { %v5170_v1 = vpop.f32.mrf.mxu0  ;;  %v5211_v40 = vpop.f32.mrf.mxu1 }
 0x8aa   :  { %v5172_v28 = vpop.f32.mrf.mxu0  ;;  %v5213_v52 = vpop.f32.mrf.mxu1 }
 0x8ab   :  { %v5230_v23 = vcombine.low %v5170_v1, %v5172_v28  ;;  %v5231_v61 = vcombine.high %v5170_v1, %v5172_v28  ;;  %v5232_v21 = vcombine.low %v5211_v40, %v5213_v52  ;;  %v5233_v5 = vcombine.high %v5211_v40, %v5213_v52  ;;  %v8044_v40 = vld [vmem:[%s13795_s0 + $0x145] ss:$8 sm:$0xf0] }
 0x8ac   :  { %v5174_v14 = vpop.f32.mrf.mxu0  ;;  %v5215_v1 = vpop.f32.mrf.mxu1 }
 0x8ad   :  { %v5268_v28 = vrot.slane %v5230_v23, %v14897_v30  ;;  %v5275_v47 = vrot.slane %v5231_v61, %v14897_v30  ;;  %v5282_v52 = vrot.slane %v5232_v21, %v14897_v30  ;;  %v5289_v58 = vrot.slane %v5233_v5, %v14897_v30  ;;  %v8045_v23 = vld [vmem:[%s13795_s0 + $0x185] ss:$8 sm:$0xf] }
 0x8ae   :  { %v5001_v14 = vor.u32 %v8038_v15, %v8037_v46  ;;  %v5005_v1 = vor.u32 %v8040_v11, %v8039_v17  ;;  %v8046_v61 = vld [vmem:[%s13795_s0 + $0x185] ss:$8 sm:$0xf0]  ;;  %v5175_v22 = vpop.f32.mrf.mxu0  ;;  %v5216_v42 = vpop.f32.mrf.mxu1  ;;  %v5304_v15 = vrot.slane %v5290_v63, %v14897_v30  ;;  %v5311_v17 = vrot.slane %v5292_v27, %v14897_v30 }
 0x8af   :  { %v8047_v21 = vld [vmem:[%s13795_s0 + $0x1c5] ss:$8 sm:$0xf]  ;;  %v5294_v36 = vcombine.low %v5268_v28, %v5282_v52  ;;  %v5295_v53 = vcombine.high %v5268_v28, %v5282_v52  ;;  %v5296_v0 = vcombine.low %v5275_v47, %v5289_v58  ;;  %v5297_v46 = vcombine.high %v5275_v47, %v5289_v58 }
 0x8b0   :  { %v5009_v11 = vor.u32 %v8042_v18, %v8041_v29  ;;  %v5013_v5 = vor.u32 %v8044_v40, %v8043_v2  ;;  %v5325_v28 = vrot.slane %v5293_v13, %v14897_v30  ;;  %v5017_v52 = vor.u32 %v8046_v61, %v8045_v23 }
 0x8b1   :  { %v5332_v42 = vrot.slane %v5294_v36, %v14897_v30  ;;  %v5339_v22 = vrot.slane %v5296_v0, %v14897_v30  ;;  %v5346_v4 = vrot.slane %v5295_v53, %v14897_v30  ;;  %v5353_v20 = vrot.slane %v5297_v46, %v14897_v30 }
 0x8b2   :  { %v5021_v58 = vor.u32 %v8048_v44, %v8047_v21 }
 0x8b3   :  { %v5354_v47 = vcombine.low %v5304_v15, %v5332_v42  ;;  %v5355_v63 = vcombine.high %v5304_v15, %v5332_v42  ;;  %v5356_v3 = vcombine.low %v5311_v17, %v5339_v22  ;;  %v5357_v27 = vcombine.high %v5311_v17, %v5339_v22 }
 0x8b4   :  { %v5358_v18 = vcombine.low %v5318_v16, %v5346_v4  ;;  %v5359_v2 = vcombine.high %v5318_v16, %v5346_v4  ;;  %v5360_v29 = vcombine.low %v5325_v28, %v5353_v20  ;;  %v5361_v40 = vcombine.high %v5325_v28, %v5353_v20 }
 0x8b5   :  { %v12674_v36 = vadd.f32 %v5354_v47, %v4993_v9  ;;  %v12676_v0 = vadd.f32 %v5355_v63, %v5001_v14  ;;  %v12678_v53 = vadd.f32 %v5356_v3, %v5009_v11  ;;  %v12686_v23 = vadd.f32 %v5357_v27, %v5017_v52 }
 0x8b6   :  { %v12680_v46 = vadd.f32 %v5358_v18, %v4997_v26  ;;  %v12682_v19 = vadd.f32 %v5359_v2, %v5005_v1  ;;  %v12684_v13 = vadd.f32 %v5360_v29, %v5013_v5  ;;  %v12690_v4 = vadd.f32 %v5361_v40, %v5021_v58 }
 0x8b7   :  { %v8049_v61 = vmul.f32 -1.442695, %v12674_v36  ;;  %v8051_v16 = vmul.f32 -1.442695, %v12676_v0  ;;  %v8053_v3 = vmul.f32 -1.442695, %v12678_v53 }
 0x8b8   :  { %v8050_v20 = vmul.f32 -1.442695, %v12680_v46  ;;  %v8052_v9 = vmul.f32 -1.442695, %v12682_v19  ;;  %v5434_v26 = vrot.slane %v12674_v36, 2  ;;  %v5435_v1 = vrot.slane %v12680_v46, 2 }
 0x8b9   :  { %8884 = vpow2.f32 %v8049_v61  ;;  %v8054_v14 = vmul.f32 -1.442695, %v12684_v13  ;;  %v8055_v21 = vmul.f32 -1.442695, %v12686_v23  ;;  %v5436_v44 = vrot.slane %v12676_v0, 2 }
 0x8ba   :  { %8886 = vpow2.f32 %v8050_v20  ;;  %v8056_v15 = vmul.f32 -1.442695, %v12690_v4  ;;  %v5437_v17 = vrot.slane %v12682_v19, 2  ;;  %v5438_v11 = vrot.slane %v12678_v53, 2 }
 0x8bb   :  { %8888 = vpow2.f32 %v8051_v16  ;;  %v8057_v5 = vmul.f32 -1.442695, %v5434_v26  ;;  %v5439_v42 = vrot.slane %v12684_v13, 2  ;;  %v8058_v22 = vmul.f32 -1.442695, %v5435_v1 }
 0x8bc   :  { %8890 = vpow2.f32 %v8052_v9  ;;  %v5440_v28 = vrot.slane %v12686_v23, 2  ;;  %v8059_v52 = vmul.f32 -1.442695, %v5436_v44  ;;  %v5441_v58 = vrot.slane %v12690_v4, 2 }
 0x8bd   :  { %8892 = vpow2.f32 %v8053_v3  ;;  %v8060_v47 = vmul.f32 -1.442695, %v5437_v17  ;;  %v8061_v63 = vmul.f32 -1.442695, %v5438_v11  ;;  %v8062_v27 = vmul.f32 -1.442695, %v5439_v42 }
 0x8be   :  { %8894 = vpow2.f32 %v8054_v14  ;;  %v8063_v18 = vmul.f32 -1.442695, %v5440_v28  ;;  %v8064_v2 = vmul.f32 -1.442695, %v5441_v58 }
 0x8bf   :  { %8896 = vpow2.f32 %v8055_v21 }
 0x8c0   :  { %8898 = vpow2.f32 %v8056_v15 }
 0x8c1   :  { %8900 = vpow2.f32 %v8057_v5 }
 0x8c2   :  { %8902 = vpow2.f32 %v8058_v22 }
 0x8c3   :  { %8904 = vpow2.f32 %v8059_v52 }
 0x8c4   :  { %8906 = vpow2.f32 %v8060_v47 }
 0x8c5   :  { %8908 = vpow2.f32 %v8061_v63 }
 0x8c6   :  { %v8885_v29 = vpop.eup %8884  ;;  %8910 = vpow2.f32 %v8062_v27 }
 0x8c7   :  { %v8887_v40 = vpop.eup %8886  ;;  %v5402_v61 = vadd.f32 1.0, %v8885_v29  ;;  %8912 = vpow2.f32 %v8063_v18 }
 0x8c8   :  { %v8889_v16 = vpop.eup %8888  ;;  %v5403_v20 = vadd.f32 1.0, %v8887_v40  ;;  %8914 = vpow2.f32 %v8064_v2 }
 0x8c9   :  { %v8891_v9 = vpop.eup %8890  ;;  %v5404_v3 = vadd.f32 1.0, %v8889_v16  ;;  %8916 = vrcp.f32 %v5402_v61 }
 0x8ca   :  { %v8893_v26 = vpop.eup %8892  ;;  %v5405_v14 = vadd.f32 1.0, %v8891_v9  ;;  %8918 = vrcp.f32 %v5403_v20  ;;  %v5498_v9 = vrot.slane %v12674_v36, 4 }
 0x8cb   :  { %v8895_v1 = vpop.eup %8894  ;;  %v5406_v21 = vadd.f32 1.0, %v8893_v26  ;;  %8920 = vrcp.f32 %v5404_v3 }
 0x8cc   :  { %v8897_v44 = vpop.eup %8896  ;;  %v5407_v15 = vadd.f32 1.0, %v8895_v1  ;;  %8922 = vrcp.f32 %v5405_v14  ;;  %v5499_v14 = vrot.slane %v12680_v46, 4 }
 0x8cd   :  { %v8899_v17 = vpop.eup %8898  ;;  %v5408_v11 = vadd.f32 1.0, %v8897_v44  ;;  %8924 = vrcp.f32 %v5406_v21  ;;  %v5500_v21 = vrot.slane %v12676_v0, 4 }
 0x8ce   :  { %v8901_v5 = vpop.eup %8900  ;;  %v5409_v42 = vadd.f32 1.0, %v8899_v17  ;;  %8926 = vrcp.f32 %v5407_v15  ;;  %v5501_v15 = vrot.slane %v12682_v19, 4 }
 0x8cf   :  { %v8903_v22 = vpop.eup %8902  ;;  %8928 = vrcp.f32 %v5408_v11  ;;  %v5474_v28 = vadd.f32 1.0, %v8901_v5  ;;  %v5502_v11 = vrot.slane %v12678_v53, 4  ;;  %v5522_v5 = vrot.slane %v12674_v36, 6 }
 0x8d0   :  { %v8905_v52 = vpop.eup %8904  ;;  %8930 = vrcp.f32 %v5409_v42  ;;  %v5475_v58 = vadd.f32 1.0, %v8903_v22  ;;  %v5503_v22 = vrot.slane %v12684_v13, 4  ;;  %v5525_v36 = vrot.slane %v12682_v19, 6 }
 0x8d1   :  { %v8907_v47 = vpop.eup %8906  ;;  %v5476_v63 = vadd.f32 1.0, %v8905_v52  ;;  %8932 = vrcp.f32 %v5474_v28  ;;  %v5523_v28 = vrot.slane %v12680_v46, 6  ;;  %v8065_v46 = vmul.f32 -1.442695, %v5522_v5 }
 0x8d2   :  { %v8909_v27 = vpop.eup %8908  ;;  %v5477_v18 = vadd.f32 1.0, %v8907_v47  ;;  %8934 = vrcp.f32 %v5475_v58  ;;  %v5504_v58 = vrot.slane %v12686_v23, 4  ;;  %v5524_v47 = vrot.slane %v12676_v0, 6 }
 0x8d3   :  { %v8911_v2 = vpop.eup %8910  ;;  %v5478_v29 = vadd.f32 1.0, %v8909_v27  ;;  %8936 = vrcp.f32 %v5476_v63  ;;  %v5505_v27 = vrot.slane %v12690_v4, 4  ;;  %v5528_v0 = vrot.slane %v12686_v23, 6  ;;  %v14898_v23 = vld [vmem:[#allocation94_spill] sm:$0xff] }
 0x8d4   :  { %v8913_v40 = vpop.eup %8912  ;;  %v5479_v61 = vadd.f32 1.0, %v8911_v2  ;;  %8938 = vrcp.f32 %v5477_v18  ;;  %v5526_v2 = vrot.slane %v12678_v53, 6  ;;  %v5529_v19 = vrot.slane %v12690_v4, 6  ;;  %v14899_v4 = vld [vmem:[#allocation133_spill] sm:$0xff] }
 0x8d5   :  { %v8915_v16 = vpop.eup %8914  ;;  %v5480_v20 = vadd.f32 1.0, %v8913_v40  ;;  %8940 = vrcp.f32 %v5478_v29  ;;  %v5527_v40 = vrot.slane %v12684_v13, 6  ;;  %v8071_v13 = vmul.f32 -1.442695, %v5528_v0  ;;  %v14901_v0 = vld [vmem:[#allocation135_spill] sm:$0xff] }
 0x8d6   :  { %v12707_v3 = vpop.eup %8916  ;;  %v5481_v26 = vadd.f32 1.0, %v8915_v16  ;;  %8942 = vrcp.f32 %v5479_v61  ;;  %v8066_v61 = vmul.f32 -1.442695, %v5523_v28 }
 0x8d7   :  { %v12710_v1 = vpop.eup %8918  ;;  %8944 = vrcp.f32 %v5480_v20  ;;  %v8067_v20 = vmul.f32 -1.442695, %v5524_v47 }
 0x8d8   :  { %v12713_v44 = vpop.eup %8920  ;;  %8946 = vrcp.f32 %v5481_v26  ;;  %v8068_v26 = vmul.f32 -1.442695, %v5525_v36 }
 0x8d9   :  { %v12716_v17 = vpop.eup %8922  ;;  %8948 = vtanh.f32 %v5498_v9 }
 0x8da   :  { %v12720_v42 = vpop.eup %8924  ;;  %8950 = vtanh.f32 %v5499_v14 }
 0x8db   :  { %v12724_v52 = vpop.eup %8926  ;;  %8952 = vtanh.f32 %v5500_v21  ;;  %v8069_v21 = vmul.f32 -1.442695, %v5526_v2  ;;  %v14900_v2 = vld [vmem:[#allocation134_spill] sm:$0xff] }
 0x8dc   :  { %v12728_v63 = vpop.eup %8928  ;;  %8954 = vtanh.f32 %v5501_v15  ;;  %v8070_v15 = vmul.f32 -1.442695, %v5527_v40 }
 0x8dd   :  { %v12732_v18 = vpop.eup %8930  ;;  %8956 = vtanh.f32 %v5502_v11 }
 0x8de   :  { %v8933_v29 = vpop.eup %8932  ;;  %8958 = vtanh.f32 %v5503_v22  ;;  %v8072_v22 = vmul.f32 -1.442695, %v5529_v19 }
 0x8df   :  { %v8935_v16 = vpop.eup %8934  ;;  %8960 = vtanh.f32 %v5504_v58  ;;  %v5586_v58 = vmul.f32 %v8933_v29, %v14898_v23  ;;  %v14904_v23 = vld [vmem:[#allocation137_spill] sm:$0xff] }
 0x8e0   :  { %v8937_v9 = vpop.eup %8936  ;;  %8962 = vtanh.f32 %v5505_v27  ;;  %v5587_v27 = vmul.f32 %v8935_v16, %v14899_v4 }
 0x8e1   :  { %v8939_v14 = vpop.eup %8938  ;;  %8964 = vpow2.f32 %v8065_v46  ;;  %v5588_v46 = vmul.f32 %v8937_v9, %v14900_v2 }
 0x8e2   :  { %v8941_v53 = vpop.eup %8940  ;;  %8966 = vpow2.f32 %v8066_v61 }
 0x8e3   :  { %v8943_v11 = vpop.eup %8942  ;;  %8968 = vpow2.f32 %v8067_v20  ;;  %v5589_v20 = vmul.f32 %v8939_v14, %v14901_v0 }
 0x8e4   :  { %v8945_v5 = vpop.eup %8944  ;;  %8970 = vpow2.f32 %v8068_v26 }
 0x8e5   :  { %v8947_v28 = vpop.eup %8946  ;;  %8972 = vpow2.f32 %v8069_v21  ;;  %v14902_v21 = vld [vmem:[#allocation136_spill] sm:$0xff] }
 0x8e6   :  { %v8949_v47 = vpop.eup %8948  ;;  %8974 = vpow2.f32 %v8070_v15  ;;  %v5590_v30 = vmul.f32 %v8941_v53, %v14902_v21 }
 0x8e7   :  { %v8951_v36 = vpop.eup %8950  ;;  %8976 = vpow2.f32 %v8071_v13  ;;  %v5594_v40 = vmul.f32 %v8949_v47, %v12707_v3  ;;  %v5591_v13 = vmul.f32 %v8943_v11, %v14904_v23 }
 0x8e8   :  { %v8953_v61 = vpop.eup %8952  ;;  %8978 = vpow2.f32 %v8072_v22  ;;  %v5595_v19 = vmul.f32 %v8951_v36, %v12710_v1 }
 0x8e9   :  { %v8955_v26 = vpop.eup %8954  ;;  %v5596_v29 = vmul.f32 %v8953_v61, %v12713_v44  ;;  %v12746_v15 = vadd.f32 %v5594_v40, %v5586_v58 }
 0x8ea   :  { %v8957_v16 = vpop.eup %8956  ;;  %v5597_v9 = vmul.f32 %v8955_v26, %v12716_v17  ;;  %v12750_v4 = vadd.f32 %v5595_v19, %v5587_v27 }
 0x8eb   :  { %14903 = vst [vmem:[#allocation70_spill] sm:$0xff] %v12746_v15  ;;  %v8959_v3 = vpop.eup %8958  ;;  %v5598_v22 = vmul.f32 %v8957_v16, %v12720_v42  ;;  %v12753_v14 = vadd.f32 %v5596_v29, %v5588_v46  ;;  %8980 = vtanh.f32 %v12746_v15 }
 0x8ec   :  { %14905 = vst [vmem:[#allocation71_spill] sm:$0xff] %v12750_v4  ;;  %v8961_v1 = vpop.eup %8960  ;;  %v5599_v53 = vmul.f32 %v8959_v3, %v12724_v52  ;;  %v12757_v44 = vadd.f32 %v5597_v9, %v5589_v20  ;;  %8982 = vtanh.f32 %v12750_v4  ;;  %v14911_v20 = vld [vmem:[#allocation95_spill] sm:$0xff] }
 0x8ed   :  { %14906 = vst [vmem:[#allocation72_spill] sm:$0xff] %v12753_v14  ;;  %v8963_v58 = vpop.eup %8962  ;;  %v12760_v11 = vadd.f32 %v5598_v22, %v5590_v30  ;;  %8984 = vtanh.f32 %v12753_v14  ;;  %v14910_v30 = vld [vmem:[#allocation138_spill] sm:$0xff]  ;;  %v5593_v19 = vmul.f32 %v8947_v28, %v14911_v20  ;;  %v5600_v29 = vmul.f32 %v8961_v1, %v12728_v63 }
 0x8ee   :  { %14907 = vst [vmem:[#allocation73_spill] sm:$0xff] %v12757_v44  ;;  %v8965_v17 = vpop.eup %8964  ;;  %v12763_v47 = vadd.f32 %v5599_v53, %v5591_v13  ;;  %8986 = vtanh.f32 %v12757_v44  ;;  %v5592_v40 = vmul.f32 %v8945_v5, %v14910_v30  ;;  %v5601_v13 = vmul.f32 %v8963_v58, %v12732_v18 }
 0x8ef   :  { %14908 = vst [vmem:[#allocation74_spill] sm:$0xff] %v12760_v11  ;;  %v8967_v42 = vpop.eup %8966  ;;  %v5562_v27 = vadd.f32 1.0, %v8965_v17  ;;  %8988 = vtanh.f32 %v12760_v11 }
 0x8f0   :  { %14909 = vst [vmem:[#allocation75_spill] sm:$0xff] %v12763_v47  ;;  %v8969_v36 = vpop.eup %8968  ;;  %v5563_v52 = vadd.f32 1.0, %v8967_v42  ;;  %8990 = vtanh.f32 %v12763_v47  ;;  %v12772_v22 = vadd.f32 %v5600_v29, %v5592_v40  ;;  %v12774_v53 = vadd.f32 %v5601_v13, %v5593_v19  ;;  %v14914_v40 = vld [vmem:[#allocation139_spill] sm:$0xff] }
 0x8f1   :  { %v8971_v2 = vpop.eup %8970  ;;  %v5564_v46 = vadd.f32 1.0, %v8969_v36  ;;  %8992 = vrcp.f32 %v5562_v27 }
 0x8f2   :  { %v8973_v61 = vpop.eup %8972  ;;  %v5565_v0 = vadd.f32 1.0, %v8971_v2  ;;  %8994 = vrcp.f32 %v5563_v52  ;;  %14912 = vst [vmem:[#allocation76_spill] sm:$0xff] %v12772_v22  ;;  %14913 = vst [vmem:[#allocation77_spill] sm:$0xff] %v12774_v53 }
 0x8f3   :  { %v8975_v26 = vpop.eup %8974  ;;  %v5566_v21 = vadd.f32 1.0, %v8973_v61  ;;  %8996 = vrcp.f32 %v5564_v46 }
 0x8f4   :  { %v8977_v16 = vpop.eup %8976  ;;  %v5567_v23 = vadd.f32 1.0, %v8975_v26  ;;  %8998 = vrcp.f32 %v5565_v0  ;;  %v14915_v26 = vld [vmem:[#allocation140_spill] sm:$0xff] }
 0x8f5   :  { %v8979_v9 = vpop.eup %8978  ;;  %v5568_v3 = vadd.f32 1.0, %v8977_v16  ;;  %9000 = vrcp.f32 %v5566_v21 }
 0x8f6   :  { %v5569_v5 = vadd.f32 1.0, %v8979_v9  ;;  %9002 = vrcp.f32 %v5567_v23 }
 0x8f7   :  { %9004 = vrcp.f32 %v5568_v3 }
 0x8f8   :  { %v8981_v28 = vpop.eup %8980  ;;  %9006 = vrcp.f32 %v5569_v5 }
 0x8f9   :  { %v8983_v17 = vpop.eup %8982  ;;  %9008 = vtanh.f32 %v12772_v22 }
 0x8fa   :  { %v8985_v63 = vpop.eup %8984  ;;  %9010 = vtanh.f32 %v12774_v53 }
 0x8fb   :  { %v8987_v1 = vpop.eup %8986 }
 0x8fc   :  { %v8989_v18 = vpop.eup %8988 }
 0x8fd   :  { %v8991_v58 = vpop.eup %8990 }
 0x8fe   :  { %v8993_v42 = vpop.eup %8992 }
 0x8ff   :  { %v8995_v27 = vpop.eup %8994  ;;  %v5618_v36 = vmul.f32 %v8993_v42, %v8981_v28 }
 0x900   :  { %v8997_v52 = vpop.eup %8996  ;;  %v5619_v2 = vmul.f32 %v8995_v27, %v8983_v17 }
 0x901   :  { %v8999_v46 = vpop.eup %8998  ;;  %v5620_v30 = vmul.f32 %v8997_v52, %v8985_v63  ;;  %v12779_v61 = vrot.slane %v5618_v36, %v14914_v40  ;;  %v12785_v21 = vrot.slane %v5618_v36, %v14915_v26 }
 0x902   :  { %v9001_v0 = vpop.eup %9000  ;;  %v5621_v20 = vmul.f32 %v8999_v46, %v8987_v1  ;;  %v12782_v19 = vrot.slane %v5619_v2, %v14914_v40  ;;  %v12788_v29 = vrot.slane %v5619_v2, %v14915_v26 }
 0x903   :  { %v9003_v16 = vpop.eup %9002  ;;  %v5622_v23 = vmul.f32 %v9001_v0, %v8989_v18  ;;  %v12791_v13 = vrot.slane %v5620_v30, %v14914_v40  ;;  %v5715_v9 = vpack.c.bf16 %v12779_v61, %v12779_v61  ;;  %v12796_v3 = vrot.slane %v5620_v30, %v14915_v26 }
 0x904   :  { %v9005_v5 = vpop.eup %9004  ;;  %v5623_v28 = vmul.f32 %v9003_v16, %v8991_v58  ;;  %v12799_v17 = vrot.slane %v5621_v20, %v14914_v40  ;;  %v5717_v63 = vpack.c.bf16 %v12782_v19, %v12782_v19  ;;  %v12804_v1 = vrot.slane %v5621_v20, %v14915_v26 }
 0x905   :  { %v9007_v18 = vpop.eup %9006  ;;  %v12807_v42 = vrot.slane %v5622_v23, %v14914_v40  ;;  %v5719_v27 = vpack.c.bf16 %v12791_v13, %v12791_v13  ;;  %v5747_v36 = vunpack.c.l.b16 %v5715_v9  ;;  %v12812_v52 = vrot.slane %v5622_v23, %v14915_v26 }
 0x906   :  { %v9009_v58 = vpop.eup %9008  ;;  %v12815_v2 = vrot.slane %v5623_v28, %v14914_v40  ;;  %v5721_v46 = vpack.c.bf16 %v12799_v17, %v12799_v17  ;;  %v5749_v30 = vunpack.c.l.b16 %v5717_v63  ;;  %v12820_v0 = vrot.slane %v5623_v28, %v14915_v26 }
 0x907   :  { %v9011_v20 = vpop.eup %9010  ;;  %v5624_v16 = vmul.f32 %v9009_v58, %v9005_v5  ;;  %v5723_v9 = vpack.c.bf16 %v12807_v42, %v12807_v42  ;;  %v5751_v53 = vunpack.c.l.b16 %v5719_v27  ;;  %v5714_v23 = vpack.c.bf16 %v12785_v21, %v12785_v21 }
 0x908   :  { %v5625_v22 = vmul.f32 %v9011_v20, %v9007_v18  ;;  %v5725_v47 = vpack.c.bf16 %v12815_v2, %v12815_v2  ;;  %v5753_v11 = vunpack.c.l.b16 %v5721_v46  ;;  %v5885_v44 = vrot.slane %v5749_v30, 7 }
 0x909   :  { %v5689_v63 = vrot.slane %v5624_v16, %v14914_v40  ;;  %v5755_v28 = vunpack.c.l.b16 %v5723_v9  ;;  %v5887_v14 = vrot.slane %v5751_v53, 6  ;;  %v12830_v4 = vrot.slane %v5624_v16, %v14915_v26 }
 0x90a   :  { %v5697_v5 = vrot.slane %v5625_v22, %v14914_v40  ;;  %v5757_v58 = vunpack.c.l.b16 %v5725_v47  ;;  %v5886_v27 = vsel %vm1672_vm0, %v5885_v44, %v5747_v36  ;;  %v5889_v15 = vrot.slane %v5753_v11, 5 }
 0x90b   :  { %v5727_v48 = vpack.c.bf16 %v5689_v63, %v5689_v63  ;;  %v5888_v18 = vsel %vm1675_vm1, %v5887_v14, %v5886_v27  ;;  %v5891_v20 = vrot.slane %v5755_v28, 4  ;;  %v12836_v46 = vrot.slane %v5625_v22, %v14915_v26 }
 0x90c   :  { %v5729_v30 = vpack.c.bf16 %v5697_v5, %v5697_v5  ;;  %v5890_v9 = vsel %vm1678_vm2, %v5889_v15, %v5888_v18  ;;  %v5893_v53 = vrot.slane %v5757_v58, 3  ;;  %v5716_v16 = vpack.c.bf16 %v12788_v29, %v12788_v29 }
 0x90d   :  { %v5759_v10 = vunpack.c.l.b16 %v5727_v48  ;;  %v5892_v47 = vsel %vm1611_vm5, %v5891_v20, %v5890_v9  ;;  %v5718_v44 = vpack.c.bf16 %v12796_v3, %v12796_v3  ;;  %v5720_v14 = vpack.c.bf16 %v12804_v1, %v12804_v1 }
 0x90e   :  { %v5761_v11 = vunpack.c.l.b16 %v5729_v30  ;;  %v5894_v22 = vsel %vm1684_vm6, %v5893_v53, %v5892_v47  ;;  %v5722_v36 = vpack.c.bf16 %v12812_v52, %v12812_v52  ;;  %v5724_v15 = vpack.c.bf16 %v12820_v0, %v12820_v0 }
 0x90f   :  { %v5895_v28 = vrot.slane %v5759_v10, 2  ;;  %v5726_v48 = vpack.c.bf16 %v12830_v4, %v12830_v4  ;;  %v5728_v27 = vpack.c.bf16 %v12836_v46, %v12836_v46  ;;  %v12855_v18 = vunpack.c.l.b16 %v5714_v23 }
 0x910   :  { %v5897_v58 = vrot.slane %v5761_v11, 1  ;;  %v12857_v20 = vunpack.c.l.b16 %v5716_v16  ;;  %v12860_v9 = vunpack.c.l.b16 %v5718_v44  ;;  %v12862_v53 = vunpack.c.l.b16 %v5720_v14  ;;  %v5824_v14 = vld [vmem:[%s13796_s2 + $0x18] sm:$0x44] }
 0x911   :  { %v5896_v30 = vsel %vm1687_vm8, %v5895_v28, %v5894_v22  ;;  %v12864_v47 = vunpack.c.l.b16 %v5722_v36  ;;  %v12873_v23 = vunpack.c.l.b16 %v5724_v15  ;;  %v8217_v16 = vpack.c.bf16 %v12779_v61, %v12785_v21 }
 0x912   :  { %v5898_v11 = vsel %vm1690_vm11, %v5897_v58, %v5896_v30  ;;  %v8218_v44 = vpack.c.bf16 %v12782_v19, %v12788_v29  ;;  %v8219_v36 = vpack.c.bf16 %v12791_v13, %v12796_v3  ;;  %v8220_v15 = vpack.c.bf16 %v12799_v17, %v12804_v1  ;;  %v5815_v1 = vld [vmem:[%s13796_s2] sm:$0x44] }
 0x913   :  { %v12884_v22 = vpack.c.b16 %v5898_v11, %v5898_v11  ;;  %v8221_v28 = vpack.c.bf16 %v12807_v42, %v12812_v52  ;;  %v8222_v61 = vpack.c.bf16 %v12815_v2, %v12820_v0  ;;  %v8223_v19 = vpack.c.bf16 %v5689_v63, %v12830_v4  ;;  %v5818_v63 = vld [vmem:[%s13796_s2 + $0x8] sm:$0x44] }
 0x914   :  { %v8224_v21 = vpack.c.bf16 %v5697_v5, %v12836_v46  ;;  %v5771_v29 = vshll.u32 %v8217_v16, 16  ;;  %v5775_v58 = vshll.u32 %v8218_v44, 16  ;;  %v5779_v13 = vshll.u32 %v8219_v36, 16  ;;  %v5821_v5 = vld [vmem:[%s13796_s2 + $0x10] sm:$0x44] }
 0x915   :  { %5935 = vmatprep.mubr.bf16.mxu0 %v12884_v22  ;;  %5976 = vmatprep.mubr.bf16.mxu1 %v12884_v22  ;;  %v5783_v3 = vshll.u32 %v8220_v15, 16  ;;  %v5787_v30 = vshll.u32 %v8221_v28, 16  ;;  %v5791_v52 = vshll.u32 %v8222_v61, 16  ;;  %v5795_v2 = vshll.u32 %v8223_v19, 16  ;;  %v5827_v19 = vld [vmem:[%s13796_s2 + $0x20] sm:$0x44] }
 0x916   :  { %v5773_v42 = vrot.slane %v5771_v29, 6  ;;  %v5799_v0 = vshll.u32 %v8224_v21, 16  ;;  %v5777_v10 = vrot.slane %v5775_v58, 6  ;;  %v5781_v11 = vrot.slane %v5779_v13, 6 }
 0x917   :  { %v5785_v16 = vrot.slane %v5783_v3, 6  ;;  %v5789_v44 = vrot.slane %v5787_v30, 6  ;;  %v5793_v36 = vrot.slane %v5791_v52, 6  ;;  %v5797_v15 = vrot.slane %v5795_v2, 6  ;;  %v5830_v3 = vld [vmem:[%s13796_s2 + $0x28] sm:$0x44] }
 0x918   :  { %v5801_v28 = vrot.slane %v5799_v0, 6  ;;  %v5816_v61 = vsel %vm12902_vm9, %v5773_v42, %v5815_v1  ;;  %v5819_v21 = vsel %vm12902_vm9, %v5777_v10, %v5818_v63  ;;  %v5822_v29 = vsel %vm12902_vm9, %v5781_v11, %v5821_v5  ;;  %v5833_v30 = vld [vmem:[%s13796_s2 + $0x30] sm:$0x44]  ;;  %v5836_v1 = vld [vmem:[%s13796_s2 + $0x38] sm:$0x44] }
 0x919   :  { %5817 = vst [vmem:[%s13796_s2] sm:$0x44] %v5816_v61  ;;  %v5825_v58 = vsel %vm12902_vm9, %v5785_v16, %v5824_v14  ;;  %v5828_v13 = vsel %vm12902_vm9, %v5789_v44, %v5827_v19  ;;  %5820 = vst [vmem:[%s13796_s2 + $0x8] sm:$0x44] %v5819_v21  ;;  %v5831_v42 = vsel %vm12902_vm9, %v5793_v36, %v5830_v3  ;;  %v5871_v0 = vrot.slane %v12857_v20, 7  ;;  %v14928_v61 = vld [vmem:[#allocation103_spill] sm:$0xff]  ;;  %v14929_v19 = vld [vmem:[#allocation104_spill] sm:$0xff] }
 0x91a   :  { %5823 = vst [vmem:[%s13796_s2 + $0x10] sm:$0x44] %v5822_v29  ;;  %5826 = vst [vmem:[%s13796_s2 + $0x18] sm:$0x44] %v5825_v58  ;;  %v5834_v52 = vsel %vm12902_vm9, %v5797_v15, %v5833_v30  ;;  %v5837_v2 = vsel %vm12902_vm9, %v5801_v28, %v5836_v1  ;;  %v5758_v63 = vunpack.c.l.b16 %v5726_v48  ;;  %v5873_v17 = vrot.slane %v12860_v9, 6  ;;  %v14926_v15 = vld [vmem:[#allocation101_spill] sm:$0xff] }
 0x91b   :  { %5829 = vst [vmem:[%s13796_s2 + $0x20] sm:$0x44] %v5828_v13  ;;  %5832 = vst [vmem:[%s13796_s2 + $0x28] sm:$0x44] %v5831_v42  ;;  %v5760_v20 = vunpack.c.l.b16 %v5728_v27  ;;  %v5872_v4 = vsel %vm1672_vm0, %v5871_v0, %v12855_v18  ;;  %v5875_v48 = vrot.slane %v12862_v53, 5  ;;  %v5877_v10 = vrot.slane %v12864_v47, 4 }
 0x91c   :  { %5835 = vst [vmem:[%s13796_s2 + $0x30] sm:$0x44] %v5834_v52  ;;  %5838 = vst [vmem:[%s13796_s2 + $0x38] sm:$0x44] %v5837_v2  ;;  %v5874_v5 = vsel %vm1675_vm1, %v5873_v17, %v5872_v4  ;;  %v5879_v16 = vrot.slane %v12873_v23, 3  ;;  %v5881_v9 = vrot.slane %v5758_v63, 2 }
 0x91d   :  { %v5876_v11 = vsel %vm1678_vm2, %v5875_v48, %v5874_v5  ;;  %v5883_v46 = vrot.slane %v5760_v20, 1  ;;  %v14922_v53 = vld [vmem:[#allocation97_spill] sm:$0xff]  ;;  %v14923_v47 = vld [vmem:[#allocation98_spill] sm:$0xff]  ;;  %v14924_v23 = vld [vmem:[#allocation99_spill] sm:$0xff] }
 0x91e   :  { %v5878_v44 = vsel %vm1611_vm5, %v5877_v10, %v5876_v11  ;;  %v14927_v28 = vld [vmem:[#allocation102_spill] sm:$0xff]  ;;  %v14930_v21 = vld [vmem:[#allocation105_spill] sm:$0xff]  ;;  %v14932_v58 = vld [vmem:[#allocation107_spill] sm:$0xff] }
 0x91f   :  { %v5880_v14 = vsel %vm1684_vm6, %v5879_v16, %v5878_v44  ;;  %v14931_v29 = vld [vmem:[#allocation106_spill] sm:$0xff]  ;;  %v14933_v13 = vld [vmem:[#allocation108_spill] sm:$0xff]  ;;  %v14934_v3 = vld [vmem:[#allocation109_spill] sm:$0xff] }
 0x920   :  { %v5882_v27 = vsel %vm1687_vm8, %v5881_v9, %v5880_v14  ;;  %v14935_v30 = vld [vmem:[#allocation110_spill] sm:$0xff]  ;;  %v14936_v1 = vld [vmem:[#allocation111_spill] sm:$0xff]  ;;  %v14937_v42 = vld [vmem:[#allocation112_spill] sm:$0xff] }
 0x921   :  { %v5884_v18 = vsel %vm1690_vm11, %v5883_v46, %v5882_v27  ;;  %v14938_v52 = vld [vmem:[#allocation113_spill] sm:$0xff]  ;;  %v14939_v2 = vld [vmem:[#allocation114_spill] sm:$0xff]  ;;  %v14940_v0 = vld [vmem:[#allocation115_spill] sm:$0xff] }
 0x922   :  { %v12989_v36 = vpack.c.b16 %v5884_v18, %v5884_v18  ;;  %v14941_v63 = vld [vmem:[#allocation116_spill] sm:$0xff]  ;;  %v14942_v17 = vld [vmem:[#allocation117_spill] sm:$0xff]  ;;  %v14943_v20 = vld [vmem:[#allocation118_spill] sm:$0xff] }
 0x923   :  { %v14944_v4 = vld [vmem:[#allocation119_spill] sm:$0xff]  ;;  %v14945_v48 = vld [vmem:[#allocation120_spill] sm:$0xff]  ;;  %v14946_v5 = vld [vmem:[#allocation121_spill] sm:$0xff] }
 0x924   :  { %5936 = vmatmul.mubr.bf16.vlgmr.msra.gmra.mxu0 %v12989_v36  ;;  %5977 = vmatmul.mubr.bf16.vlgmr.msra.gmra.mxu1 %v12989_v36  ;;  %v14947_v10 = vld [vmem:[#allocation122_spill] sm:$0xff]  ;;  %v14948_v11 = vld [vmem:[#allocation123_spill] sm:$0xff]  ;;  %v14949_v16 = vld [vmem:[#allocation124_spill] sm:$0xff] }
 0x925   :  { %5986 = vmatpush1.bf16.msra.mxu0 %v14292_v31  ;;  %6027 = vmatpush1.bf16.msra.mxu1 %v14293_v39  ;;  %v14950_v44 = vld [vmem:[#allocation125_spill] sm:$0xff]  ;;  %v14951_v9 = vld [vmem:[#allocation126_spill] sm:$0xff]  ;;  %v14952_v14 = vld [vmem:[#allocation127_spill] sm:$0xff] }
 0x926   :  { %6017 = vmatprep.mubr.bf16.mxu0 %v12884_v22  ;;  %6058 = vmatprep.mubr.bf16.mxu1 %v12884_v22  ;;  %v14925_v22 = vld [vmem:[#allocation100_spill] sm:$0xff]  ;;  %v14954_v27 = vld [vmem:[#allocation129_spill] sm:$0xff]  ;;  %v14955_v18 = vld [vmem:[#allocation130_spill] sm:$0xff] }
 0x927   :  { %5987 = vmatprep.subr.bf16.mxu0 %v14294_v35  ;;  %6028 = vmatprep.subr.bf16.mxu1 %v14295_v12  ;;  %v14953_v46 = vld [vmem:[#allocation128_spill] sm:$0xff] }
 0x929   :  { %5988 = vmatpush1.bf16.msra.mxu0 %v14296_v43  ;;  %6029 = vmatpush1.bf16.msra.mxu1 %v14297_v41 }
 0x92a   :  { %5989 = vmatprep.subr.bf16.mxu0 %v14298_v55  ;;  %6030 = vmatprep.subr.bf16.mxu1 %v14299_v34 }
 0x92d   :  { %5990 = vmatpush1.bf16.msra.mxu0 %v14300_v56  ;;  %6031 = vmatpush1.bf16.msra.mxu1 %v14301_v32 }
 0x92e   :  { %5991 = vmatprep.subr.bf16.mxu0 %v14302_v54  ;;  %6032 = vmatprep.subr.bf16.mxu1 %v14303_v60 }
 0x931   :  { %5992 = vmatpush1.bf16.msra.mxu0 %v14304_v50  ;;  %6033 = vmatpush1.bf16.msra.mxu1 %v14305_v59 }
 0x932   :  { %5993 = vmatprep.subr.bf16.mxu0 %v14306_v45  ;;  %6034 = vmatprep.subr.bf16.mxu1 %v14307_v33 }
 0x935   :  { %5994 = vmatpush1.bf16.msra.mxu0 %v14308_v8  ;;  %6035 = vmatpush1.bf16.msra.mxu1 %v14309_v38 }
 0x936   :  { %5995 = vmatprep.subr.bf16.mxu0 %v14310_v7  ;;  %6036 = vmatprep.subr.bf16.mxu1 %v14311_v24 }
 0x939   :  { %5996 = vmatpush1.bf16.msra.mxu0 %v14312_v37  ;;  %6037 = vmatpush1.bf16.msra.mxu1 %v14313_v25 }
 0x93a   :  { %5997 = vmatprep.subr.bf16.mxu0 %v14314_v62  ;;  %6038 = vmatprep.subr.bf16.mxu1 %v14315_v49 }
 0x93d   :  { %5998 = vmatpush1.bf16.msra.mxu0 %v14316_v51  ;;  %6039 = vmatpush1.bf16.msra.mxu1 %v14416_v57 }
 0x93e   :  { %5999 = vmatprep.subr.bf16.mxu0 %v14795_v6  ;;  %6040 = vmatprep.subr.bf16.mxu1 %v14922_v53 }
 0x941   :  { %6000 = vmatpush1.bf16.msra.mxu0 %v14923_v47  ;;  %6041 = vmatpush1.bf16.msra.mxu1 %v14924_v23 }
 0x942   :  { %6001 = vmatprep.subr.bf16.mxu0 %v14925_v22  ;;  %6042 = vmatprep.subr.bf16.mxu1 %v14926_v15 }
 0x945   :  { %6002 = vmatpush2.bf16.msra.mxu0 %v14927_v28  ;;  %6043 = vmatpush2.bf16.msra.mxu1 %v14928_v61 }
 0x946   :  { %6003 = vmatprep.subr.bf16.mxu0 %v14929_v19  ;;  %6044 = vmatprep.subr.bf16.mxu1 %v14930_v21 }
 0x949   :  { %6004 = vmatpush2.bf16.msra.mxu0 %v14931_v29  ;;  %6045 = vmatpush2.bf16.msra.mxu1 %v14932_v58  ;;  %v8091_v29 = vld [vmem:[%s13795_s0 + $0x146] ss:$8 sm:$0xf] }
 0x94a   :  { %6005 = vmatprep.subr.bf16.mxu0 %v14933_v13  ;;  %6046 = vmatprep.subr.bf16.mxu1 %v14934_v3  ;;  %v8090_v3 = vld [vmem:[%s13795_s0 + $0x106] ss:$8 sm:$0xf0] }
 0x94d   :  { %6006 = vmatpush2.bf16.msra.mxu0 %v14935_v30  ;;  %6047 = vmatpush2.bf16.msra.mxu1 %v14936_v1 }
 0x94e   :  { %6007 = vmatprep.subr.bf16.mxu0 %v14937_v42  ;;  %6048 = vmatprep.subr.bf16.mxu1 %v14938_v52 }
 0x951   :  { %6008 = vmatpush2.bf16.msra.mxu0 %v14939_v2  ;;  %6049 = vmatpush2.bf16.msra.mxu1 %v14940_v0 }
 0x952   :  { %6009 = vmatprep.subr.bf16.mxu0 %v14941_v63  ;;  %6050 = vmatprep.subr.bf16.mxu1 %v14942_v17  ;;  %v15023_v63 = vld [vmem:[#allocation132_spill] sm:$0xff] }
 0x955   :  { %6010 = vmatpush2.bf16.msra.mxu0 %v14943_v20  ;;  %6051 = vmatpush2.bf16.msra.mxu1 %v14944_v4 }
 0x956   :  { %6011 = vmatprep.subr.bf16.mxu0 %v14945_v48  ;;  %6052 = vmatprep.subr.bf16.mxu1 %v14946_v5  ;;  %v14956_v48 = vld [vmem:[#allocation131_spill] sm:$0xff]  ;;  %v14957_v5 = vld [vmem:[#allocation4_spill] sm:$0xff] }
 0x959   :  { %6012 = vmatpush2.bf16.msra.mxu0 %v14947_v10  ;;  %6053 = vmatpush2.bf16.msra.mxu1 %v14948_v11  ;;  %v14958_v10 = vld [vmem:[#allocation6_spill] sm:$0xff] }
 0x95a   :  { %6013 = vmatprep.subr.bf16.mxu0 %v14949_v16  ;;  %6054 = vmatprep.subr.bf16.mxu1 %v14950_v44  ;;  %v14959_v44 = vld [vmem:[#allocation5_spill] sm:$0xff]  ;;  %v14968_v16 = vld [vmem:[#allocation15_spill] sm:$0xff] }
 0x95d   :  { %6014 = vmatpush2.bf16.msra.mxu0 %v14951_v9  ;;  %6055 = vmatpush2.bf16.msra.mxu1 %v14952_v14  ;;  %v14960_v9 = vld [vmem:[#allocation7_spill] sm:$0xff]  ;;  %v14961_v14 = vld [vmem:[#allocation8_spill] sm:$0xff] }
 0x95e   :  { %6015 = vmatprep.subr.bf16.mxu0 %v14953_v46  ;;  %6056 = vmatprep.subr.bf16.mxu1 %v14954_v27  ;;  %v14962_v46 = vld [vmem:[#allocation9_spill] sm:$0xff]  ;;  %v14963_v27 = vld [vmem:[#allocation10_spill] sm:$0xff] }
 0x961   :  { %6016 = vmatpush2.bf16.msra.mxu0 %v14955_v18  ;;  %6057 = vmatpush2.bf16.msra.mxu1 %v14956_v48  ;;  %v14964_v18 = vld [vmem:[#allocation11_spill] sm:$0xff]  ;;  %v14965_v48 = vld [vmem:[#allocation12_spill] sm:$0xff] }
 0x962   :  { %6730 = vmatprep.subr.bf16.mxu0 %v14957_v5  ;;  %6771 = vmatprep.subr.bf16.mxu1 %v14958_v10  ;;  %v14966_v5 = vld [vmem:[#allocation13_spill] sm:$0xff]  ;;  %v14967_v10 = vld [vmem:[#allocation14_spill] sm:$0xff] }
 0x964   :  { %6018 = vmatmul.mubr.bf16.vlgmr.msra.gmra.mxu0 %v12989_v36  ;;  %6059 = vmatmul.mubr.bf16.vlgmr.msra.gmra.mxu1 %v12989_v36  ;;  %v14969_v36 = vld [vmem:[#allocation16_spill] sm:$0xff] }
 0x965   :  { %6731 = vmatpush1.bf16.msra.mxu0 %v14959_v44  ;;  %6772 = vmatpush1.bf16.msra.mxu1 %v14960_v9  ;;  %v14970_v44 = vld [vmem:[#allocation17_spill] sm:$0xff]  ;;  %v14971_v9 = vld [vmem:[#allocation18_spill] sm:$0xff] }
 0x966   :  { %6732 = vmatprep.subr.bf16.mxu0 %v14961_v14  ;;  %6773 = vmatprep.subr.bf16.mxu1 %v14962_v46  ;;  %v14972_v14 = vld [vmem:[#allocation19_spill] sm:$0xff]  ;;  %v14973_v46 = vld [vmem:[#allocation20_spill] sm:$0xff] }
 0x969   :  { %6733 = vmatpush1.bf16.msra.mxu0 %v14963_v27  ;;  %6774 = vmatpush1.bf16.msra.mxu1 %v14964_v18  ;;  %v14974_v27 = vld [vmem:[#allocation21_spill] sm:$0xff]  ;;  %v14975_v18 = vld [vmem:[#allocation22_spill] sm:$0xff] }
 0x96a   :  { %6734 = vmatprep.subr.bf16.mxu0 %v14965_v48  ;;  %6775 = vmatprep.subr.bf16.mxu1 %v14966_v5  ;;  %v14976_v48 = vld [vmem:[#allocation23_spill] sm:$0xff]  ;;  %v14977_v5 = vld [vmem:[#allocation24_spill] sm:$0xff] }
 0x96d   :  { %6735 = vmatpush1.bf16.msra.mxu0 %v14967_v10  ;;  %6776 = vmatpush1.bf16.msra.mxu1 %v14968_v16  ;;  %v14978_v10 = vld [vmem:[#allocation25_spill] sm:$0xff]  ;;  %v14979_v16 = vld [vmem:[#allocation26_spill] sm:$0xff] }
 0x96e   :  { %6736 = vmatprep.subr.bf16.mxu0 %v14969_v36  ;;  %6777 = vmatprep.subr.bf16.mxu1 %v14970_v44  ;;  %v14980_v36 = vld [vmem:[#allocation27_spill] sm:$0xff]  ;;  %v14981_v44 = vld [vmem:[#allocation28_spill] sm:$0xff] }
 0x971   :  { %6737 = vmatpush1.bf16.msra.mxu0 %v14971_v9  ;;  %6778 = vmatpush1.bf16.msra.mxu1 %v14972_v14  ;;  %v14982_v9 = vld [vmem:[#allocation29_spill] sm:$0xff]  ;;  %v14983_v14 = vld [vmem:[#allocation30_spill] sm:$0xff] }
 0x972   :  { %6738 = vmatprep.subr.bf16.mxu0 %v14973_v46  ;;  %6779 = vmatprep.subr.bf16.mxu1 %v14974_v27  ;;  %v14984_v46 = vld [vmem:[#allocation31_spill] sm:$0xff]  ;;  %v14985_v27 = vld [vmem:[#allocation32_spill] sm:$0xff] }
 0x975   :  { %6739 = vmatpush1.bf16.msra.mxu0 %v14975_v18  ;;  %6780 = vmatpush1.bf16.msra.mxu1 %v14976_v48  ;;  %v14986_v18 = vld [vmem:[#allocation33_spill] sm:$0xff]  ;;  %v14987_v48 = vld [vmem:[#allocation34_spill] sm:$0xff] }
 0x976   :  { %6740 = vmatprep.subr.bf16.mxu0 %v14977_v5  ;;  %6781 = vmatprep.subr.bf16.mxu1 %v14978_v10  ;;  %v14988_v5 = vld [vmem:[#allocation35_spill] sm:$0xff]  ;;  %v14989_v10 = vld [vmem:[#allocation36_spill] sm:$0xff] }
 0x979   :  { %6741 = vmatpush1.bf16.msra.mxu0 %v14979_v16  ;;  %6782 = vmatpush1.bf16.msra.mxu1 %v14980_v36  ;;  %v14990_v16 = vld [vmem:[#allocation37_spill] sm:$0xff]  ;;  %v14991_v36 = vld [vmem:[#allocation38_spill] sm:$0xff] }
 0x97a   :  { %6742 = vmatprep.subr.bf16.mxu0 %v14981_v44  ;;  %6783 = vmatprep.subr.bf16.mxu1 %v14982_v9  ;;  %v14992_v44 = vld [vmem:[#allocation39_spill] sm:$0xff]  ;;  %v14993_v9 = vld [vmem:[#allocation40_spill] sm:$0xff] }
 0x97d   :  { %6743 = vmatpush1.bf16.msra.mxu0 %v14983_v14  ;;  %6784 = vmatpush1.bf16.msra.mxu1 %v14984_v46  ;;  %v14994_v14 = vld [vmem:[#allocation41_spill] sm:$0xff]  ;;  %v14995_v46 = vld [vmem:[#allocation42_spill] sm:$0xff] }
 0x97e   :  { %6744 = vmatprep.subr.bf16.mxu0 %v14985_v27  ;;  %6785 = vmatprep.subr.bf16.mxu1 %v14986_v18  ;;  %v14996_v27 = vld [vmem:[#allocation43_spill] sm:$0xff]  ;;  %v14997_v18 = vld [vmem:[#allocation44_spill] sm:$0xff] }
 0x981   :  { %6745 = vmatpush1.bf16.msra.mxu0 %v14987_v48  ;;  %6786 = vmatpush1.bf16.msra.mxu1 %v14988_v5  ;;  %v14998_v48 = vld [vmem:[#allocation45_spill] sm:$0xff]  ;;  %v14999_v5 = vld [vmem:[#allocation46_spill] sm:$0xff] }
 0x982   :  { %6746 = vmatprep.subr.bf16.mxu0 %v14989_v10  ;;  %6787 = vmatprep.subr.bf16.mxu1 %v14990_v16  ;;  %v15000_v10 = vld [vmem:[#allocation47_spill] sm:$0xff]  ;;  %v15001_v16 = vld [vmem:[#allocation48_spill] sm:$0xff] }
 0x985   :  { %6747 = vmatpush2.bf16.msra.mxu0 %v14991_v36  ;;  %6788 = vmatpush2.bf16.msra.mxu1 %v14992_v44  ;;  %v15002_v36 = vld [vmem:[#allocation49_spill] sm:$0xff]  ;;  %v15003_v44 = vld [vmem:[#allocation50_spill] sm:$0xff] }
 0x986   :  { %6748 = vmatprep.subr.bf16.mxu0 %v14993_v9  ;;  %6789 = vmatprep.subr.bf16.mxu1 %v14994_v14  ;;  %v15004_v9 = vld [vmem:[#allocation51_spill] sm:$0xff]  ;;  %v15005_v14 = vld [vmem:[#allocation52_spill] sm:$0xff] }
 0x989   :  { %6749 = vmatpush2.bf16.msra.mxu0 %v14995_v46  ;;  %6790 = vmatpush2.bf16.msra.mxu1 %v14996_v27  ;;  %v15006_v46 = vld [vmem:[#allocation53_spill] sm:$0xff]  ;;  %v15007_v27 = vld [vmem:[#allocation54_spill] sm:$0xff] }
 0x98a   :  { %6750 = vmatprep.subr.bf16.mxu0 %v14997_v18  ;;  %6791 = vmatprep.subr.bf16.mxu1 %v14998_v48  ;;  %v15008_v18 = vld [vmem:[#allocation55_spill] sm:$0xff]  ;;  %v15009_v48 = vld [vmem:[#allocation56_spill] sm:$0xff] }
 0x98d   :  { %6751 = vmatpush2.bf16.msra.mxu0 %v14999_v5  ;;  %6792 = vmatpush2.bf16.msra.mxu1 %v15000_v10  ;;  %v15010_v5 = vld [vmem:[#allocation57_spill] sm:$0xff]  ;;  %v15011_v10 = vld [vmem:[#allocation58_spill] sm:$0xff] }
 0x98e   :  { %6752 = vmatprep.subr.bf16.mxu0 %v15001_v16  ;;  %6793 = vmatprep.subr.bf16.mxu1 %v15002_v36  ;;  %v15012_v16 = vld [vmem:[#allocation59_spill] sm:$0xff]  ;;  %v15013_v36 = vld [vmem:[#allocation60_spill] sm:$0xff] }
 0x991   :  { %6753 = vmatpush2.bf16.msra.mxu0 %v15003_v44  ;;  %6794 = vmatpush2.bf16.msra.mxu1 %v15004_v9  ;;  %v15014_v44 = vld [vmem:[#allocation61_spill] sm:$0xff]  ;;  %v15015_v9 = vld [vmem:[#allocation62_spill] sm:$0xff] }
 0x992   :  { %6754 = vmatprep.subr.bf16.mxu0 %v15005_v14  ;;  %6795 = vmatprep.subr.bf16.mxu1 %v15006_v46  ;;  %v15016_v14 = vld [vmem:[#allocation63_spill] sm:$0xff]  ;;  %v15017_v46 = vld [vmem:[#allocation64_spill] sm:$0xff] }
 0x995   :  { %6755 = vmatpush2.bf16.msra.mxu0 %v15007_v27  ;;  %6796 = vmatpush2.bf16.msra.mxu1 %v15008_v18  ;;  %v15018_v27 = vld [vmem:[#allocation65_spill] sm:$0xff]  ;;  %v15019_v18 = vld [vmem:[#allocation66_spill] sm:$0xff] }
 0x996   :  { %6756 = vmatprep.subr.bf16.mxu0 %v15009_v48  ;;  %6797 = vmatprep.subr.bf16.mxu1 %v15010_v5  ;;  %v15020_v48 = vld [vmem:[#allocation67_spill] sm:$0xff]  ;;  %v15021_v5 = vld [vmem:[#allocation68_spill] sm:$0xff] }
 0x999   :  { %6757 = vmatpush2.bf16.msra.mxu0 %v15011_v10  ;;  %6798 = vmatpush2.bf16.msra.mxu1 %v15012_v16  ;;  %v15022_v10 = vld [vmem:[#allocation69_spill] sm:$0xff] }
 0x99a   :  { %6758 = vmatprep.subr.bf16.mxu0 %v15013_v36  ;;  %6799 = vmatprep.subr.bf16.mxu1 %v15014_v44 }
 0x99d   :  { %6759 = vmatpush2.bf16.msra.mxu0 %v15015_v9  ;;  %6800 = vmatpush2.bf16.msra.mxu1 %v15016_v14 }
 0x99e   :  { %6760 = vmatprep.subr.bf16.mxu0 %v15017_v46  ;;  %6801 = vmatprep.subr.bf16.mxu1 %v15018_v27 }
 0x9a1   :  { %6761 = vmatpush2.bf16.msra.mxu0 %v15019_v18  ;;  %6802 = vmatpush2.bf16.msra.mxu1 %v15020_v48 }
 0x9a2   :  { %6812 = vmatprep.subr.bf16.mxu0 %v15021_v5  ;;  %6853 = vmatprep.subr.bf16.mxu1 %v15022_v10 }
 0x9e4   :  { %v5937_v16 = vpop.f32.mrf.mxu0  ;;  %v5978_v36 = vpop.f32.mrf.mxu1 }
 0x9e6   :  { %v5939_v11 = vpop.f32.mrf.mxu0  ;;  %v5980_v44 = vpop.f32.mrf.mxu1 }
 0x9e7   :  { %v6075_v4 = vcombine.low %v5937_v16, %v5939_v11  ;;  %v6076_v9 = vcombine.high %v5937_v16, %v5939_v11  ;;  %v6077_v20 = vcombine.low %v5978_v36, %v5980_v44  ;;  %v6078_v14 = vcombine.high %v5978_v36, %v5980_v44  ;;  %v8085_v36 = vld [vmem:[%s13795_s0 + $0x86] ss:$8 sm:$0xf] }
 0x9e8   :  { %v5941_v17 = vpop.f32.mrf.mxu0  ;;  %v5982_v46 = vpop.f32.mrf.mxu1  ;;  %v8086_v44 = vld [vmem:[%s13795_s0 + $0x86] ss:$8 sm:$0xf0] }
 0x9e9   :  { %v6089_v27 = vrot.slane %v6075_v4, %v15023_v63  ;;  %v6096_v18 = vrot.slane %v6076_v9, %v15023_v63  ;;  %v6103_v48 = vrot.slane %v6077_v20, %v15023_v63  ;;  %v6110_v5 = vrot.slane %v6078_v14, %v15023_v63  ;;  %v8081_v17 = vld [vmem:[%s13795_s0 + $0x6] ss:$8 sm:$0xf] }
 0x9ea   :  { %v5942_v0 = vpop.f32.mrf.mxu0  ;;  %v5983_v10 = vpop.f32.mrf.mxu1  ;;  %v8082_v4 = vld [vmem:[%s13795_s0 + $0x6] ss:$8 sm:$0xf0] }
 0x9eb   :  { %v6139_v2 = vcombine.low %v6089_v27, %v6103_v48  ;;  %v6140_v52 = vcombine.high %v6089_v27, %v6103_v48  ;;  %v6141_v42 = vcombine.low %v6096_v18, %v6110_v5  ;;  %v6142_v1 = vcombine.high %v6096_v18, %v6110_v5  ;;  %v8083_v20 = vld [vmem:[%s13795_s0 + $0x46] ss:$8 sm:$0xf] }
 0x9ec   :  { %v8084_v0 = vld [vmem:[%s13795_s0 + $0x46] ss:$8 sm:$0xf0]  ;;  %v5842_v19 = vor.u32 %v8082_v4, %v8081_v17 }
 0x9ed   :  { %v8087_v27 = vld [vmem:[%s13795_s0 + $0xc6] ss:$8 sm:$0xf]  ;;  %v5846_v61 = vor.u32 %v8084_v0, %v8083_v20  ;;  %v6167_v47 = vrot.slane %v6140_v52, %v15023_v63 }
 0x9ee   :  { %v8088_v18 = vld [vmem:[%s13795_s0 + $0xc6] ss:$8 sm:$0xf0] }
 0x9ef   :  { %v8089_v10 = vld [vmem:[%s13795_s0 + $0x106] ss:$8 sm:$0xf] }
 0x9f0   :  { %v8096_v17 = vld [vmem:[%s13795_s0 + $0x1c6] ss:$8 sm:$0xf0] }
 0xa24   :  { %v6019_v30 = vpop.f32.mrf.mxu0  ;;  %v6060_v11 = vpop.f32.mrf.mxu1 }
 0xa26   :  { %v6021_v16 = vpop.f32.mrf.mxu0  ;;  %v6062_v9 = vpop.f32.mrf.mxu1 }
 0xa27   :  { %v6079_v14 = vcombine.low %v6019_v30, %v6021_v16  ;;  %v6080_v46 = vcombine.high %v6019_v30, %v6021_v16  ;;  %v6081_v48 = vcombine.low %v6060_v11, %v6062_v9  ;;  %v6082_v5 = vcombine.high %v6060_v11, %v6062_v9  ;;  %v8092_v11 = vld [vmem:[%s13795_s0 + $0x146] ss:$8 sm:$0xf0] }
 0xa28   :  { %v6023_v13 = vpop.f32.mrf.mxu0  ;;  %v6064_v30 = vpop.f32.mrf.mxu1 }
 0xa29   :  { %v6117_v16 = vrot.slane %v6079_v14, %v15023_v63  ;;  %v6124_v58 = vrot.slane %v6080_v46, %v15023_v63  ;;  %v6131_v9 = vrot.slane %v6081_v48, %v15023_v63  ;;  %v6138_v21 = vrot.slane %v6082_v5, %v15023_v63  ;;  %v8093_v14 = vld [vmem:[%s13795_s0 + $0x186] ss:$8 sm:$0xf] }
 0xa2a   :  { %v5850_v13 = vor.u32 %v8086_v44, %v8085_v36  ;;  %v5854_v30 = vor.u32 %v8088_v18, %v8087_v27  ;;  %v8094_v46 = vld [vmem:[%s13795_s0 + $0x186] ss:$8 sm:$0xf0]  ;;  %v6024_v28 = vpop.f32.mrf.mxu0  ;;  %v6065_v15 = vpop.f32.mrf.mxu1  ;;  %v6153_v44 = vrot.slane %v6139_v2, %v15023_v63  ;;  %v6160_v27 = vrot.slane %v6141_v42, %v15023_v63 }
 0xa2b   :  { %v8095_v48 = vld [vmem:[%s13795_s0 + $0x1c6] ss:$8 sm:$0xf]  ;;  %v6143_v4 = vcombine.low %v6117_v16, %v6131_v9  ;;  %v6144_v20 = vcombine.high %v6117_v16, %v6131_v9  ;;  %v6145_v0 = vcombine.low %v6124_v58, %v6138_v21  ;;  %v6146_v36 = vcombine.high %v6124_v58, %v6138_v21 }
 0xa2c   :  { %v5858_v18 = vor.u32 %v8090_v3, %v8089_v10  ;;  %v5862_v5 = vor.u32 %v8092_v11, %v8091_v29  ;;  %v6174_v16 = vrot.slane %v6142_v1, %v15023_v63  ;;  %v5866_v9 = vor.u32 %v8094_v46, %v8093_v14 }
 0xa2d   :  { %v6181_v15 = vrot.slane %v6143_v4, %v15023_v63  ;;  %v6188_v28 = vrot.slane %v6145_v0, %v15023_v63  ;;  %v6195_v22 = vrot.slane %v6144_v20, %v15023_v63  ;;  %v6202_v23 = vrot.slane %v6146_v36, %v15023_v63 }
 0xa2e   :  { %v5870_v21 = vor.u32 %v8096_v17, %v8095_v48 }
 0xa2f   :  { %v6203_v58 = vcombine.low %v6153_v44, %v6181_v15  ;;  %v6204_v2 = vcombine.high %v6153_v44, %v6181_v15  ;;  %v6205_v53 = vcombine.low %v6160_v27, %v6188_v28  ;;  %v6206_v42 = vcombine.high %v6160_v27, %v6188_v28 }
 0xa30   :  { %v6207_v3 = vcombine.low %v6167_v47, %v6195_v22  ;;  %v6208_v29 = vcombine.high %v6167_v47, %v6195_v22  ;;  %v6209_v10 = vcombine.low %v6174_v16, %v6202_v23  ;;  %v6210_v11 = vcombine.high %v6174_v16, %v6202_v23 }
 0xa31   :  { %v13189_v4 = vadd.f32 %v6203_v58, %v5842_v19  ;;  %v13191_v0 = vadd.f32 %v6204_v2, %v5850_v13  ;;  %v13193_v20 = vadd.f32 %v6205_v53, %v5858_v18  ;;  %v13201_v14 = vadd.f32 %v6206_v42, %v5866_v9 }
 0xa32   :  { %v13195_v36 = vadd.f32 %v6207_v3, %v5846_v61  ;;  %v13197_v52 = vadd.f32 %v6208_v29, %v5854_v30  ;;  %v13199_v1 = vadd.f32 %v6209_v10, %v5862_v5  ;;  %v13205_v22 = vadd.f32 %v6210_v11, %v5870_v21 }
 0xa33   :  { %v8097_v46 = vmul.f32 -1.442695, %v13189_v4  ;;  %v8099_v47 = vmul.f32 -1.442695, %v13191_v0  ;;  %v8101_v53 = vmul.f32 -1.442695, %v13193_v20 }
 0xa34   :  { %v8098_v23 = vmul.f32 -1.442695, %v13195_v36  ;;  %v8100_v19 = vmul.f32 -1.442695, %v13197_v52  ;;  %v6283_v61 = vrot.slane %v13189_v4, 2  ;;  %v6284_v30 = vrot.slane %v13195_v36, 2 }
 0xa35   :  { %9012 = vpow2.f32 %v8097_v46  ;;  %v8102_v13 = vmul.f32 -1.442695, %v13199_v1  ;;  %v8103_v48 = vmul.f32 -1.442695, %v13201_v14  ;;  %v6285_v17 = vrot.slane %v13191_v0, 2 }
 0xa36   :  { %9014 = vpow2.f32 %v8098_v23  ;;  %v8104_v44 = vmul.f32 -1.442695, %v13205_v22  ;;  %v6286_v27 = vrot.slane %v13197_v52, 2  ;;  %v6287_v18 = vrot.slane %v13193_v20, 2 }
 0xa37   :  { %9016 = vpow2.f32 %v8099_v47  ;;  %v8105_v5 = vmul.f32 -1.442695, %v6283_v61  ;;  %v6288_v15 = vrot.slane %v13199_v1, 2  ;;  %v8106_v28 = vmul.f32 -1.442695, %v6284_v30 }
 0xa38   :  { %9018 = vpow2.f32 %v8100_v19  ;;  %v6289_v16 = vrot.slane %v13201_v14, 2  ;;  %v8107_v9 = vmul.f32 -1.442695, %v6285_v17  ;;  %v6290_v21 = vrot.slane %v13205_v22, 2 }
 0xa39   :  { %9020 = vpow2.f32 %v8101_v53  ;;  %v8108_v58 = vmul.f32 -1.442695, %v6286_v27  ;;  %v8109_v2 = vmul.f32 -1.442695, %v6287_v18  ;;  %v8110_v42 = vmul.f32 -1.442695, %v6288_v15 }
 0xa3a   :  { %9022 = vpow2.f32 %v8102_v13  ;;  %v8111_v3 = vmul.f32 -1.442695, %v6289_v16  ;;  %v8112_v29 = vmul.f32 -1.442695, %v6290_v21 }
 0xa3b   :  { %9024 = vpow2.f32 %v8103_v48 }
 0xa3c   :  { %9026 = vpow2.f32 %v8104_v44 }
 0xa3d   :  { %9028 = vpow2.f32 %v8105_v5 }
 0xa3e   :  { %9030 = vpow2.f32 %v8106_v28 }
 0xa3f   :  { %9032 = vpow2.f32 %v8107_v9 }
 0xa40   :  { %9034 = vpow2.f32 %v8108_v58 }
 0xa41   :  { %9036 = vpow2.f32 %v8109_v2 }
 0xa42   :  { %v9013_v10 = vpop.eup %9012  ;;  %9038 = vpow2.f32 %v8110_v42 }
 0xa43   :  { %v9015_v11 = vpop.eup %9014  ;;  %v6251_v46 = vadd.f32 1.0, %v9013_v10  ;;  %9040 = vpow2.f32 %v8111_v3 }
 0xa44   :  { %v9017_v47 = vpop.eup %9016  ;;  %v6252_v23 = vadd.f32 1.0, %v9015_v11  ;;  %9042 = vpow2.f32 %v8112_v29 }
 0xa45   :  { %v9019_v19 = vpop.eup %9018  ;;  %v6253_v53 = vadd.f32 1.0, %v9017_v47  ;;  %9044 = vrcp.f32 %v6251_v46 }
 0xa46   :  { %v9021_v61 = vpop.eup %9020  ;;  %v6254_v13 = vadd.f32 1.0, %v9019_v19  ;;  %9046 = vrcp.f32 %v6252_v23  ;;  %v6347_v19 = vrot.slane %v13189_v4, 4 }
 0xa47   :  { %v9023_v30 = vpop.eup %9022  ;;  %v6255_v48 = vadd.f32 1.0, %v9021_v61  ;;  %9048 = vrcp.f32 %v6253_v53 }
 0xa48   :  { %v9025_v17 = vpop.eup %9024  ;;  %v6256_v44 = vadd.f32 1.0, %v9023_v30  ;;  %9050 = vrcp.f32 %v6254_v13  ;;  %v6348_v13 = vrot.slane %v13195_v36, 4 }
 0xa49   :  { %v9027_v27 = vpop.eup %9026  ;;  %v6257_v18 = vadd.f32 1.0, %v9025_v17  ;;  %9052 = vrcp.f32 %v6255_v48  ;;  %v6349_v48 = vrot.slane %v13191_v0, 4 }
 0xa4a   :  { %v9029_v5 = vpop.eup %9028  ;;  %v6258_v15 = vadd.f32 1.0, %v9027_v27  ;;  %9054 = vrcp.f32 %v6256_v44  ;;  %v6350_v44 = vrot.slane %v13197_v52, 4 }
 0xa4b   :  { %v9031_v28 = vpop.eup %9030  ;;  %9056 = vrcp.f32 %v6257_v18  ;;  %v6323_v16 = vadd.f32 1.0, %v9029_v5  ;;  %v6351_v18 = vrot.slane %v13193_v20, 4  ;;  %v6371_v5 = vrot.slane %v13189_v4, 6 }
 0xa4c   :  { %v9033_v9 = vpop.eup %9032  ;;  %9058 = vrcp.f32 %v6258_v15  ;;  %v6324_v21 = vadd.f32 1.0, %v9031_v28  ;;  %v6352_v28 = vrot.slane %v13199_v1, 4  ;;  %v6374_v4 = vrot.slane %v13197_v52, 6 }
 0xa4d   :  { %v9035_v58 = vpop.eup %9034  ;;  %v6325_v2 = vadd.f32 1.0, %v9033_v9  ;;  %9060 = vrcp.f32 %v6323_v16  ;;  %v6372_v16 = vrot.slane %v13195_v36, 6  ;;  %v8113_v36 = vmul.f32 -1.442695, %v6371_v5 }
 0xa4e   :  { %v9037_v42 = vpop.eup %9036  ;;  %v6326_v3 = vadd.f32 1.0, %v9035_v58  ;;  %9062 = vrcp.f32 %v6324_v21  ;;  %v6353_v21 = vrot.slane %v13201_v14, 4  ;;  %v6373_v58 = vrot.slane %v13191_v0, 6 }
 0xa4f   :  { %v9039_v29 = vpop.eup %9038  ;;  %v6327_v10 = vadd.f32 1.0, %v9037_v42  ;;  %9064 = vrcp.f32 %v6325_v2  ;;  %v6354_v42 = vrot.slane %v13205_v22, 4  ;;  %v6377_v0 = vrot.slane %v13201_v14, 6  ;;  %v15024_v14 = vld [vmem:[#allocation70_spill] sm:$0xff] }
 0xa50   :  { %v9041_v11 = vpop.eup %9040  ;;  %v6328_v46 = vadd.f32 1.0, %v9039_v29  ;;  %9066 = vrcp.f32 %v6326_v3  ;;  %v6375_v29 = vrot.slane %v13193_v20, 6  ;;  %v6378_v52 = vrot.slane %v13205_v22, 6  ;;  %v15025_v22 = vld [vmem:[#allocation71_spill] sm:$0xff] }
 0xa51   :  { %v9043_v47 = vpop.eup %9042  ;;  %v6329_v23 = vadd.f32 1.0, %v9041_v11  ;;  %9068 = vrcp.f32 %v6327_v10  ;;  %v6376_v11 = vrot.slane %v13199_v1, 6  ;;  %v8119_v1 = vmul.f32 -1.442695, %v6377_v0  ;;  %v15027_v0 = vld [vmem:[#allocation73_spill] sm:$0xff] }
 0xa52   :  { %v13222_v53 = vpop.eup %9044  ;;  %v6330_v61 = vadd.f32 1.0, %v9043_v47  ;;  %9070 = vrcp.f32 %v6328_v46  ;;  %v8114_v46 = vmul.f32 -1.442695, %v6372_v16 }
 0xa53   :  { %v13225_v30 = vpop.eup %9046  ;;  %9072 = vrcp.f32 %v6329_v23  ;;  %v8115_v23 = vmul.f32 -1.442695, %v6373_v58 }
 0xa54   :  { %v13228_v17 = vpop.eup %9048  ;;  %9074 = vrcp.f32 %v6330_v61  ;;  %v8116_v61 = vmul.f32 -1.442695, %v6374_v4 }
 0xa55   :  { %v13231_v27 = vpop.eup %9050  ;;  %9076 = vtanh.f32 %v6347_v19 }
 0xa56   :  { %v13235_v15 = vpop.eup %9052  ;;  %9078 = vtanh.f32 %v6348_v13 }
 0xa57   :  { %v13239_v9 = vpop.eup %9054  ;;  %9080 = vtanh.f32 %v6349_v48  ;;  %v8117_v48 = vmul.f32 -1.442695, %v6375_v29  ;;  %v15026_v29 = vld [vmem:[#allocation72_spill] sm:$0xff] }
 0xa58   :  { %v13243_v2 = vpop.eup %9056  ;;  %9082 = vtanh.f32 %v6350_v44  ;;  %v8118_v44 = vmul.f32 -1.442695, %v6376_v11 }
 0xa59   :  { %v13247_v3 = vpop.eup %9058  ;;  %9084 = vtanh.f32 %v6351_v18 }
 0xa5a   :  { %v9061_v10 = vpop.eup %9060  ;;  %9086 = vtanh.f32 %v6352_v28  ;;  %v8120_v28 = vmul.f32 -1.442695, %v6378_v52 }
 0xa5b   :  { %v9063_v47 = vpop.eup %9062  ;;  %9088 = vtanh.f32 %v6353_v21  ;;  %v6435_v21 = vmul.f32 %v9061_v10, %v15024_v14  ;;  %v15030_v14 = vld [vmem:[#allocation75_spill] sm:$0xff] }
 0xa5c   :  { %v9065_v19 = vpop.eup %9064  ;;  %9090 = vtanh.f32 %v6354_v42  ;;  %v6436_v42 = vmul.f32 %v9063_v47, %v15025_v22 }
 0xa5d   :  { %v9067_v13 = vpop.eup %9066  ;;  %9092 = vpow2.f32 %v8113_v36  ;;  %v6437_v36 = vmul.f32 %v9065_v19, %v15026_v29 }
 0xa5e   :  { %v9069_v20 = vpop.eup %9068  ;;  %9094 = vpow2.f32 %v8114_v46 }
 0xa5f   :  { %v9071_v18 = vpop.eup %9070  ;;  %9096 = vpow2.f32 %v8115_v23  ;;  %v6438_v23 = vmul.f32 %v9067_v13, %v15027_v0 }
 0xa60   :  { %v9073_v5 = vpop.eup %9072  ;;  %9098 = vpow2.f32 %v8116_v61 }
 0xa61   :  { %v9075_v16 = vpop.eup %9074  ;;  %9100 = vpow2.f32 %v8117_v48  ;;  %v15028_v48 = vld [vmem:[#allocation74_spill] sm:$0xff] }
 0xa62   :  { %v9077_v58 = vpop.eup %9076  ;;  %9102 = vpow2.f32 %v8118_v44  ;;  %v6439_v63 = vmul.f32 %v9069_v20, %v15028_v48 }
 0xa63   :  { %v9079_v4 = vpop.eup %9078  ;;  %9104 = vpow2.f32 %v8119_v1  ;;  %v6443_v11 = vmul.f32 %v9077_v58, %v13222_v53  ;;  %v6440_v1 = vmul.f32 %v9071_v18, %v15030_v14 }
 0xa64   :  { %v9081_v46 = vpop.eup %9080  ;;  %9106 = vpow2.f32 %v8120_v28  ;;  %v6444_v52 = vmul.f32 %v9079_v4, %v13225_v30 }
 0xa65   :  { %v9083_v61 = vpop.eup %9082  ;;  %v6445_v10 = vmul.f32 %v9081_v46, %v13228_v17  ;;  %v13261_v44 = vadd.f32 %v6443_v11, %v6435_v21 }
 0xa66   :  { %v9085_v47 = vpop.eup %9084  ;;  %v6446_v19 = vmul.f32 %v9083_v61, %v13231_v27  ;;  %v13265_v22 = vadd.f32 %v6444_v52, %v6436_v42 }
 0xa67   :  { %15029 = vst [vmem:[#allocation78_spill] sm:$0xff] %v13261_v44  ;;  %v9087_v53 = vpop.eup %9086  ;;  %v6447_v28 = vmul.f32 %v9085_v47, %v13235_v15  ;;  %v13268_v13 = vadd.f32 %v6445_v10, %v6437_v36  ;;  %9108 = vtanh.f32 %v13261_v44 }
 0xa68   :  { %15031 = vst [vmem:[#allocation79_spill] sm:$0xff] %v13265_v22  ;;  %v9089_v30 = vpop.eup %9088  ;;  %v6448_v20 = vmul.f32 %v9087_v53, %v13239_v9  ;;  %v13272_v17 = vadd.f32 %v6446_v19, %v6438_v23  ;;  %9110 = vtanh.f32 %v13265_v22  ;;  %v15037_v23 = vld [vmem:[#allocation77_spill] sm:$0xff] }
 0xa69   :  { %15032 = vst [vmem:[#allocation80_spill] sm:$0xff] %v13268_v13  ;;  %v9091_v21 = vpop.eup %9090  ;;  %v13275_v18 = vadd.f32 %v6447_v28, %v6439_v63  ;;  %9112 = vtanh.f32 %v13268_v13  ;;  %v15036_v63 = vld [vmem:[#allocation76_spill] sm:$0xff]  ;;  %v6442_v52 = vmul.f32 %v9075_v16, %v15037_v23  ;;  %v6449_v10 = vmul.f32 %v9089_v30, %v13243_v2 }
 0xa6a   :  { %15033 = vst [vmem:[#allocation81_spill] sm:$0xff] %v13272_v17  ;;  %v9093_v27 = vpop.eup %9092  ;;  %v13278_v58 = vadd.f32 %v6448_v20, %v6440_v1  ;;  %9114 = vtanh.f32 %v13272_v17  ;;  %v6441_v11 = vmul.f32 %v9073_v5, %v15036_v63  ;;  %v6450_v1 = vmul.f32 %v9091_v21, %v13247_v3 }
 0xa6b   :  { %15034 = vst [vmem:[#allocation82_spill] sm:$0xff] %v13275_v18  ;;  %v9095_v15 = vpop.eup %9094  ;;  %v6411_v42 = vadd.f32 1.0, %v9093_v27  ;;  %9116 = vtanh.f32 %v13275_v18 }
 0xa6c   :  { %15035 = vst [vmem:[#allocation83_spill] sm:$0xff] %v13278_v58  ;;  %v9097_v4 = vpop.eup %9096  ;;  %v6412_v9 = vadd.f32 1.0, %v9095_v15  ;;  %9118 = vtanh.f32 %v13278_v58  ;;  %v13287_v28 = vadd.f32 %v6449_v10, %v6441_v11  ;;  %v13289_v20 = vadd.f32 %v6450_v1, %v6442_v52 }
 0xa6d   :  { %v9099_v29 = vpop.eup %9098  ;;  %v6413_v36 = vadd.f32 1.0, %v9097_v4  ;;  %9120 = vrcp.f32 %v6411_v42 }
 0xa6e   :  { %v9101_v46 = vpop.eup %9100  ;;  %v6414_v0 = vadd.f32 1.0, %v9099_v29  ;;  %9122 = vrcp.f32 %v6412_v9  ;;  %15038 = vst [vmem:[#allocation84_spill] sm:$0xff] %v13287_v28  ;;  %15039 = vst [vmem:[#allocation85_spill] sm:$0xff] %v13289_v20 }
 0xa6f   :  { %v9103_v61 = vpop.eup %9102  ;;  %v6415_v48 = vadd.f32 1.0, %v9101_v46  ;;  %9124 = vrcp.f32 %v6413_v36 }
 0xa70   :  { %v9105_v47 = vpop.eup %9104  ;;  %v6416_v14 = vadd.f32 1.0, %v9103_v61  ;;  %9126 = vrcp.f32 %v6414_v0 }
 0xa71   :  { %v9107_v19 = vpop.eup %9106  ;;  %v6417_v53 = vadd.f32 1.0, %v9105_v47  ;;  %9128 = vrcp.f32 %v6415_v48 }
 0xa72   :  { %v6418_v5 = vadd.f32 1.0, %v9107_v19  ;;  %9130 = vrcp.f32 %v6416_v14 }
 0xa73   :  { %9132 = vrcp.f32 %v6417_v53 }
 0xa74   :  { %v9109_v16 = vpop.eup %9108  ;;  %9134 = vrcp.f32 %v6418_v5 }
 0xa75   :  { %v9111_v27 = vpop.eup %9110  ;;  %9136 = vtanh.f32 %v13287_v28 }
 0xa76   :  { %v9113_v2 = vpop.eup %9112  ;;  %9138 = vtanh.f32 %v13289_v20 }
 0xa77   :  { %v9115_v30 = vpop.eup %9114 }
 0xa78   :  { %v9117_v3 = vpop.eup %9116 }
 0xa79   :  { %v9119_v21 = vpop.eup %9118 }
 0xa7a   :  { %v9121_v15 = vpop.eup %9120 }
 0xa7b   :  { %v9123_v42 = vpop.eup %9122  ;;  %v6467_v4 = vmul.f32 %v9121_v15, %v9109_v16 }
 0xa7c   :  { %v9125_v9 = vpop.eup %9124  ;;  %v6468_v29 = vmul.f32 %v9123_v42, %v9111_v27 }
 0xa7d   :  { %v9127_v36 = vpop.eup %9126  ;;  %v6469_v63 = vmul.f32 %v9125_v9, %v9113_v2  ;;  %v13294_v11 = vrot.slane %v6467_v4, %v14914_v40  ;;  %v13300_v52 = vrot.slane %v6467_v4, %v14915_v26 }
 0xa7e   :  { %v9129_v46 = vpop.eup %9128  ;;  %v6470_v0 = vmul.f32 %v9127_v36, %v9115_v30  ;;  %v13297_v23 = vrot.slane %v6468_v29, %v14914_v40  ;;  %v13303_v61 = vrot.slane %v6468_v29, %v14915_v26 }
 0xa7f   :  { %v9131_v48 = vpop.eup %9130  ;;  %v6471_v10 = vmul.f32 %v9129_v46, %v9117_v3  ;;  %v13306_v47 = vrot.slane %v6469_v63, %v14914_v40  ;;  %v6564_v14 = vpack.c.bf16 %v13294_v11, %v13294_v11  ;;  %v13311_v1 = vrot.slane %v6469_v63, %v14915_v26 }
 0xa80   :  { %v9133_v19 = vpop.eup %9132  ;;  %v6472_v53 = vmul.f32 %v9131_v48, %v9119_v21  ;;  %v13314_v5 = vrot.slane %v6470_v0, %v14914_v40  ;;  %v6566_v16 = vpack.c.bf16 %v13297_v23, %v13297_v23  ;;  %v13319_v27 = vrot.slane %v6470_v0, %v14915_v26 }
 0xa81   :  { %v9135_v2 = vpop.eup %9134  ;;  %v13322_v30 = vrot.slane %v6471_v10, %v14914_v40  ;;  %v6568_v3 = vpack.c.bf16 %v13306_v47, %v13306_v47  ;;  %v6596_v15 = vunpack.c.l.b16 %v6564_v14  ;;  %v13327_v21 = vrot.slane %v6471_v10, %v14915_v26 }
 0xa82   :  { %v9137_v42 = vpop.eup %9136  ;;  %v13330_v4 = vrot.slane %v6472_v53, %v14914_v40  ;;  %v6570_v9 = vpack.c.bf16 %v13314_v5, %v13314_v5  ;;  %v6598_v29 = vunpack.c.l.b16 %v6566_v16  ;;  %v13335_v36 = vrot.slane %v6472_v53, %v14915_v26 }
 0xa83   :  { %v9139_v63 = vpop.eup %9138  ;;  %v6473_v46 = vmul.f32 %v9137_v42, %v9133_v19  ;;  %v6572_v0 = vpack.c.bf16 %v13322_v30, %v13322_v30  ;;  %v6600_v48 = vunpack.c.l.b16 %v6568_v3  ;;  %v6563_v10 = vpack.c.bf16 %v13300_v52, %v13300_v52 }
 0xa84   :  { %v6474_v14 = vmul.f32 %v9139_v63, %v9135_v2  ;;  %v6574_v20 = vpack.c.bf16 %v13330_v4, %v13330_v4  ;;  %v6602_v28 = vunpack.c.l.b16 %v6570_v9  ;;  %v6712_v58 = vrot.slane %v6598_v29, 7 }
 0xa85   :  { %v13344_v16 = vrot.slane %v6473_v46, %v14914_v40  ;;  %v6604_v53 = vunpack.c.l.b16 %v6572_v0  ;;  %v6714_v18 = vrot.slane %v6600_v48, 6  ;;  %v13347_v19 = vrot.slane %v6473_v46, %v14915_v26 }
 0xa86   :  { %v6546_v42 = vrot.slane %v6474_v14, %v14914_v40  ;;  %v6606_v3 = vunpack.c.l.b16 %v6574_v20  ;;  %v6713_v17 = vsel %vm1672_vm0, %v6712_v58, %v6596_v15  ;;  %v6716_v13 = vrot.slane %v6602_v28, 5 }
 0xa87   :  { %v6576_v2 = vpack.c.bf16 %v13344_v16, %v13344_v16  ;;  %v6715_v9 = vsel %vm1675_vm1, %v6714_v18, %v6713_v17  ;;  %v6718_v29 = vrot.slane %v6604_v53, 4  ;;  %v13355_v63 = vrot.slane %v6474_v14, %v14915_v26 }
 0xa88   :  { %v6578_v0 = vpack.c.bf16 %v6546_v42, %v6546_v42  ;;  %v6717_v48 = vsel %vm1678_vm2, %v6716_v13, %v6715_v9  ;;  %v6720_v46 = vrot.slane %v6606_v3, 3  ;;  %v6565_v40 = vpack.c.bf16 %v13303_v61, %v13303_v61 }
 0xa89   :  { %v6608_v20 = vunpack.c.l.b16 %v6576_v2  ;;  %v6719_v58 = vsel %vm1611_vm5, %v6718_v29, %v6717_v48  ;;  %v6567_v28 = vpack.c.bf16 %v13311_v1, %v13311_v1  ;;  %v6569_v17 = vpack.c.bf16 %v13319_v27, %v13319_v27 }
 0xa8a   :  { %v6610_v18 = vunpack.c.l.b16 %v6578_v0  ;;  %v6721_v15 = vsel %vm1684_vm6, %v6720_v46, %v6719_v58  ;;  %v6571_v14 = vpack.c.bf16 %v13327_v21, %v13327_v21  ;;  %v6573_v13 = vpack.c.bf16 %v13335_v36, %v13335_v36 }
 0xa8b   :  { %v6722_v53 = vrot.slane %v6608_v20, 2  ;;  %v6575_v3 = vpack.c.bf16 %v13347_v19, %v13347_v19  ;;  %v6577_v29 = vpack.c.bf16 %v13355_v63, %v13355_v63  ;;  %v6595_v0 = vunpack.c.l.b16 %v6563_v10  ;;  %v6642_v10 = vld [vmem:[%s13796_s2] sm:$0x88] }
 0xa8c   :  { %v6724_v9 = vrot.slane %v6610_v18, 1  ;;  %v6597_v48 = vunpack.c.l.b16 %v6565_v40  ;;  %v6599_v58 = vunpack.c.l.b16 %v6567_v28  ;;  %v6601_v26 = vunpack.c.l.b16 %v6569_v17  ;;  %v6648_v28 = vld [vmem:[%s13796_s2 + $0x10] sm:$0x88] }
 0xa8d   :  { %v6723_v20 = vsel %vm1687_vm8, %v6722_v53, %v6721_v15  ;;  %v6603_v22 = vunpack.c.l.b16 %v6571_v14  ;;  %v6605_v6 = vunpack.c.l.b16 %v6573_v13  ;;  %v8225_v18 = vpack.c.bf16 %v13294_v11, %v13300_v52  ;;  %v6645_v15 = vld [vmem:[%s13796_s2 + $0x8] sm:$0x88] }
 0xa8e   :  { %v6725_v44 = vsel %vm1690_vm11, %v6724_v9, %v6723_v20  ;;  %v8226_v40 = vpack.c.bf16 %v13297_v23, %v13303_v61  ;;  %v8227_v14 = vpack.c.bf16 %v13306_v47, %v13311_v1  ;;  %v8228_v11 = vpack.c.bf16 %v13314_v5, %v13319_v27  ;;  %v6654_v61 = vld [vmem:[%s13796_s2 + $0x20] sm:$0x88] }
 0xa8f   :  { %v6727_v17 = vpack.c.b16 %v6725_v44, %v6725_v44  ;;  %v8229_v23 = vpack.c.bf16 %v13322_v30, %v13327_v21  ;;  %v6651_v44 = vld [vmem:[%s13796_s2 + $0x18] sm:$0x88]  ;;  %v8230_v47 = vpack.c.bf16 %v13330_v4, %v13335_v36  ;;  %v8231_v1 = vpack.c.bf16 %v13344_v16, %v13347_v19  ;;  %v6657_v30 = vld [vmem:[%s13796_s2 + $0x28] sm:$0x88]  ;;  %v6660_v21 = vld [vmem:[%s13796_s2 + $0x30] sm:$0x88] }
 0xa90   :  { %v8232_v5 = vpack.c.bf16 %v6546_v42, %v13355_v63  ;;  %v6619_v27 = vrot.slane %v8225_v18, 5  ;;  %v6620_v13 = vrot.slane %v8226_v40, 5  ;;  %v6621_v53 = vrot.slane %v8227_v14, 5  ;;  %v6663_v36 = vld [vmem:[%s13796_s2 + $0x38] sm:$0x88] }
 0xa91   :  { %6762 = vmatprep.mubr.bf16.mxu0 %v6727_v17  ;;  %6803 = vmatprep.mubr.bf16.mxu1 %v6727_v17  ;;  %v6622_v2 = vrot.slane %v8228_v11, 5  ;;  %v6623_v4 = vrot.slane %v8229_v23, 5  ;;  %v6624_v16 = vrot.slane %v8230_v47, 5  ;;  %v6625_v19 = vrot.slane %v8231_v1, 5 }
 0xa92   :  { %v6626_v42 = vrot.slane %v8232_v5, 5  ;;  %v6643_v63 = vsel %vm13411_vm15, %v6619_v27, %v6642_v10  ;;  %v6646_v9 = vsel %vm13411_vm15, %v6620_v13, %v6645_v15  ;;  %v6649_v46 = vsel %vm13411_vm15, %v6621_v53, %v6648_v28  ;;  %v15077_v13 = vld [vmem:[#allocation127_spill] sm:$0xff]  ;;  %v15078_v53 = vld [vmem:[#allocation128_spill] sm:$0xff] }
 0xa93   :  { %6644 = vst [vmem:[%s13796_s2] sm:$0x88] %v6643_v63  ;;  %v6652_v20 = vsel %vm13411_vm15, %v6622_v2, %v6651_v44  ;;  %v6655_v18 = vsel %vm13411_vm15, %v6623_v4, %v6654_v61  ;;  %6647 = vst [vmem:[%s13796_s2 + $0x8] sm:$0x88] %v6646_v9  ;;  %v6658_v40 = vsel %vm13411_vm15, %v6624_v16, %v6657_v30  ;;  %v6698_v28 = vrot.slane %v6597_v48, 7  ;;  %v15079_v2 = vld [vmem:[#allocation129_spill] sm:$0xff]  ;;  %v15080_v4 = vld [vmem:[#allocation130_spill] sm:$0xff] }
 0xa94   :  { %6650 = vst [vmem:[%s13796_s2 + $0x10] sm:$0x88] %v6649_v46  ;;  %6653 = vst [vmem:[%s13796_s2 + $0x18] sm:$0x88] %v6652_v20  ;;  %v6661_v10 = vsel %vm13411_vm15, %v6625_v19, %v6660_v21  ;;  %v6664_v15 = vsel %vm13411_vm15, %v6626_v42, %v6663_v36  ;;  %v6607_v14 = vunpack.c.l.b16 %v6575_v3  ;;  %v6700_v11 = vrot.slane %v6599_v58, 6  ;;  %v15081_v36 = vld [vmem:[#allocation131_spill] sm:$0xff] }
 0xa95   :  { %6656 = vst [vmem:[%s13796_s2 + $0x20] sm:$0x88] %v6655_v18  ;;  %6659 = vst [vmem:[%s13796_s2 + $0x28] sm:$0x88] %v6658_v40  ;;  %v6609_v23 = vunpack.c.l.b16 %v6577_v29  ;;  %v6699_v44 = vsel %vm1672_vm0, %v6698_v28, %v6595_v0  ;;  %v6702_v52 = vrot.slane %v6601_v26, 5  ;;  %v6704_v3 = vrot.slane %v6603_v22, 4 }
 0xa96   :  { %6662 = vst [vmem:[%s13796_s2 + $0x30] sm:$0x88] %v6661_v10  ;;  %6665 = vst [vmem:[%s13796_s2 + $0x38] sm:$0x88] %v6664_v15  ;;  %v6701_v48 = vsel %vm1675_vm1, %v6700_v11, %v6699_v44  ;;  %v6706_v47 = vrot.slane %v6605_v6, 3  ;;  %v6708_v5 = vrot.slane %v6607_v14, 2 }
 0xa97   :  { %v6703_v61 = vsel %vm1678_vm2, %v6702_v52, %v6701_v48  ;;  %v6710_v30 = vrot.slane %v6609_v23, 1  ;;  %v15072_v6 = vld [vmem:[#allocation122_spill] sm:$0xff]  ;;  %v15073_v26 = vld [vmem:[#allocation123_spill] sm:$0xff]  ;;  %v15074_v22 = vld [vmem:[#allocation124_spill] sm:$0xff]  ;;  %vm7486_vm0 = vsmask.f32 7950 }
 0xa98   :  { %v6705_v1 = vsel %vm1611_vm5, %v6704_v3, %v6703_v61  ;;  %v15075_v0 = vld [vmem:[#allocation125_spill] sm:$0xff]  ;;  %v15082_v15 = vld [vmem:[#allocation132_spill] sm:$0xff]  ;;  %vm7488_vm1 = vsmask.f32 7966  ;;  %vm13704_vm5 = vmand %vm1678_vm2, %vm7486_vm0 }
 0xa99   :  { %v6707_v27 = vsel %vm1684_vm6, %v6706_v47, %v6705_v1  ;;  %vm13712_vm6 = vmand %vm1690_vm11, %vm7488_vm1 }
 0xa9a   :  { %v6709_v21 = vsel %vm1687_vm8, %v6708_v5, %v6707_v27  ;;  %v8129_v27 = vld [vmem:[%s13795_s0 + $0x7] ss:$8 sm:$0xf]  ;;  %vm13722_vm2 = vmor %vm13712_vm6, %vm13704_vm5 }
 0xa9b   :  { %v6711_v58 = vsel %vm1690_vm11, %v6710_v30, %v6709_v21  ;;  %v8130_v30 = vld [vmem:[%s13795_s0 + $0x7] ss:$8 sm:$0xf0] }
 0xa9c   :  { %v13482_v29 = vpack.c.b16 %v6711_v58, %v6711_v58  ;;  %v8131_v21 = vld [vmem:[%s13795_s0 + $0x47] ss:$8 sm:$0xf] }
 0xa9d   :  { %v8132_v58 = vld [vmem:[%s13795_s0 + $0x47] ss:$8 sm:$0xf0] }
 0xa9e   :  { %6763 = vmatmul.mubr.bf16.vlgmr.msra.gmra.mxu0 %v13482_v29  ;;  %6804 = vmatmul.mubr.bf16.vlgmr.msra.gmra.mxu1 %v13482_v29 }
 0xa9f   :  { %6813 = vmatpush1.bf16.msra.mxu0 %v14292_v31  ;;  %6854 = vmatpush1.bf16.msra.mxu1 %v14293_v39  ;;  %v15046_v31 = vld [vmem:[#allocation96_spill] sm:$0xff]  ;;  %v15047_v39 = vld [vmem:[#allocation97_spill] sm:$0xff] }
 0xaa0   :  { %6844 = vmatprep.mubr.bf16.mxu0 %v6727_v17  ;;  %6885 = vmatprep.mubr.bf16.mxu1 %v6727_v17  ;;  %v15076_v17 = vld [vmem:[#allocation126_spill] sm:$0xff] }
 0xaa1   :  { %6814 = vmatprep.subr.bf16.mxu0 %v14294_v35  ;;  %6855 = vmatprep.subr.bf16.mxu1 %v14295_v12  ;;  %v15048_v35 = vld [vmem:[#allocation98_spill] sm:$0xff]  ;;  %v15049_v12 = vld [vmem:[#allocation99_spill] sm:$0xff] }
 0xaa3   :  { %6815 = vmatpush1.bf16.msra.mxu0 %v14296_v43  ;;  %6856 = vmatpush1.bf16.msra.mxu1 %v14297_v41  ;;  %v15050_v43 = vld [vmem:[#allocation100_spill] sm:$0xff]  ;;  %v15051_v41 = vld [vmem:[#allocation101_spill] sm:$0xff] }
 0xaa4   :  { %6816 = vmatprep.subr.bf16.mxu0 %v14298_v55  ;;  %6857 = vmatprep.subr.bf16.mxu1 %v14299_v34  ;;  %v15052_v55 = vld [vmem:[#allocation102_spill] sm:$0xff]  ;;  %v15053_v34 = vld [vmem:[#allocation103_spill] sm:$0xff] }
 0xaa7   :  { %6817 = vmatpush1.bf16.msra.mxu0 %v14300_v56  ;;  %6858 = vmatpush1.bf16.msra.mxu1 %v14301_v32  ;;  %v15054_v56 = vld [vmem:[#allocation104_spill] sm:$0xff]  ;;  %v15055_v32 = vld [vmem:[#allocation105_spill] sm:$0xff] }
 0xaa8   :  { %6818 = vmatprep.subr.bf16.mxu0 %v14302_v54  ;;  %6859 = vmatprep.subr.bf16.mxu1 %v14303_v60  ;;  %v15056_v54 = vld [vmem:[#allocation106_spill] sm:$0xff]  ;;  %v15057_v60 = vld [vmem:[#allocation107_spill] sm:$0xff] }
 0xaab   :  { %6819 = vmatpush1.bf16.msra.mxu0 %v14304_v50  ;;  %6860 = vmatpush1.bf16.msra.mxu1 %v14305_v59  ;;  %v15058_v50 = vld [vmem:[#allocation108_spill] sm:$0xff]  ;;  %v15059_v59 = vld [vmem:[#allocation109_spill] sm:$0xff] }
 0xaac   :  { %6820 = vmatprep.subr.bf16.mxu0 %v14306_v45  ;;  %6861 = vmatprep.subr.bf16.mxu1 %v14307_v33  ;;  %v15060_v45 = vld [vmem:[#allocation110_spill] sm:$0xff]  ;;  %v15061_v33 = vld [vmem:[#allocation111_spill] sm:$0xff] }
 0xaaf   :  { %6821 = vmatpush1.bf16.msra.mxu0 %v14308_v8  ;;  %6862 = vmatpush1.bf16.msra.mxu1 %v14309_v38  ;;  %v15062_v8 = vld [vmem:[#allocation112_spill] sm:$0xff]  ;;  %v15063_v38 = vld [vmem:[#allocation113_spill] sm:$0xff] }
 0xab0   :  { %6822 = vmatprep.subr.bf16.mxu0 %v14310_v7  ;;  %6863 = vmatprep.subr.bf16.mxu1 %v14311_v24  ;;  %v15064_v7 = vld [vmem:[#allocation114_spill] sm:$0xff]  ;;  %v15065_v24 = vld [vmem:[#allocation115_spill] sm:$0xff] }
 0xab3   :  { %6823 = vmatpush1.bf16.msra.mxu0 %v14312_v37  ;;  %6864 = vmatpush1.bf16.msra.mxu1 %v14313_v25  ;;  %v15066_v37 = vld [vmem:[#allocation116_spill] sm:$0xff]  ;;  %v15067_v25 = vld [vmem:[#allocation117_spill] sm:$0xff] }
 0xab4   :  { %6824 = vmatprep.subr.bf16.mxu0 %v14314_v62  ;;  %6865 = vmatprep.subr.bf16.mxu1 %v14315_v49  ;;  %v15068_v62 = vld [vmem:[#allocation118_spill] sm:$0xff]  ;;  %v15069_v49 = vld [vmem:[#allocation119_spill] sm:$0xff] }
 0xab7   :  { %6825 = vmatpush1.bf16.msra.mxu0 %v14316_v51  ;;  %6866 = vmatpush1.bf16.msra.mxu1 %v14416_v57  ;;  %v15070_v51 = vld [vmem:[#allocation120_spill] sm:$0xff]  ;;  %v15071_v57 = vld [vmem:[#allocation121_spill] sm:$0xff] }
 0xab8   :  { %6826 = vmatprep.subr.bf16.mxu0 %v15046_v31  ;;  %6867 = vmatprep.subr.bf16.mxu1 %v15047_v39  ;;  %v8133_v31 = vld [vmem:[%s13795_s0 + $0x87] ss:$8 sm:$0xf] }
 0xab9   :  { %v8134_v39 = vld [vmem:[%s13795_s0 + $0x87] ss:$8 sm:$0xf0] }
 0xabb   :  { %6827 = vmatpush1.bf16.msra.mxu0 %v15048_v35  ;;  %6868 = vmatpush1.bf16.msra.mxu1 %v15049_v12 }
 0xabc   :  { %6828 = vmatprep.subr.bf16.mxu0 %v15050_v43  ;;  %6869 = vmatprep.subr.bf16.mxu1 %v15051_v41  ;;  %v8135_v41 = vld [vmem:[%s13795_s0 + $0xc7] ss:$8 sm:$0xf] }
 0xabf   :  { %6829 = vmatpush2.bf16.msra.mxu0 %v15052_v55  ;;  %6870 = vmatpush2.bf16.msra.mxu1 %v15053_v34  ;;  %v8136_v55 = vld [vmem:[%s13795_s0 + $0xc7] ss:$8 sm:$0xf0] }
 0xac0   :  { %6830 = vmatprep.subr.bf16.mxu0 %v15054_v56  ;;  %6871 = vmatprep.subr.bf16.mxu1 %v15055_v32  ;;  %v8137_v32 = vld [vmem:[%s13795_s0 + $0x107] ss:$8 sm:$0xf] }
 0xac3   :  { %6831 = vmatpush2.bf16.msra.mxu0 %v15056_v54  ;;  %6872 = vmatpush2.bf16.msra.mxu1 %v15057_v60  ;;  %v8138_v54 = vld [vmem:[%s13795_s0 + $0x107] ss:$8 sm:$0xf0] }
 0xac4   :  { %6832 = vmatprep.subr.bf16.mxu0 %v15058_v50  ;;  %6873 = vmatprep.subr.bf16.mxu1 %v15059_v59 }
 0xac7   :  { %6833 = vmatpush2.bf16.msra.mxu0 %v15060_v45  ;;  %6874 = vmatpush2.bf16.msra.mxu1 %v15061_v33  ;;  %v8139_v33 = vld [vmem:[%s13795_s0 + $0x147] ss:$8 sm:$0xf] }
 0xac8   :  { %6834 = vmatprep.subr.bf16.mxu0 %v15062_v8  ;;  %6875 = vmatprep.subr.bf16.mxu1 %v15063_v38  ;;  %v8140_v8 = vld [vmem:[%s13795_s0 + $0x147] ss:$8 sm:$0xf0] }
 0xacb   :  { %6835 = vmatpush2.bf16.msra.mxu0 %v15064_v7  ;;  %6876 = vmatpush2.bf16.msra.mxu1 %v15065_v24  ;;  %v6669_v24 = vor.u32 %v8130_v30, %v8129_v27 }
 0xacc   :  { %6836 = vmatprep.subr.bf16.mxu0 %v15066_v37  ;;  %6877 = vmatprep.subr.bf16.mxu1 %v15067_v25  ;;  %v6673_v37 = vor.u32 %v8132_v58, %v8131_v21  ;;  %v6677_v25 = vor.u32 %v8134_v39, %v8133_v31 }
 0xacf   :  { %6837 = vmatpush2.bf16.msra.mxu0 %v15068_v62  ;;  %6878 = vmatpush2.bf16.msra.mxu1 %v15069_v49  ;;  %v6681_v62 = vor.u32 %v8136_v55, %v8135_v41  ;;  %v8141_v49 = vld [vmem:[%s13795_s0 + $0x187] ss:$8 sm:$0xf] }
 0xad0   :  { %6838 = vmatprep.subr.bf16.mxu0 %v15070_v51  ;;  %6879 = vmatprep.subr.bf16.mxu1 %v15071_v57  ;;  %v8142_v51 = vld [vmem:[%s13795_s0 + $0x187] ss:$8 sm:$0xf0] }
 0xad3   :  { %6839 = vmatpush2.bf16.msra.mxu0 %v15072_v6  ;;  %6880 = vmatpush2.bf16.msra.mxu1 %v15073_v26  ;;  %v8143_v26 = vld [vmem:[%s13795_s0 + $0x1c7] ss:$8 sm:$0xf] }
 0xad4   :  { %6840 = vmatprep.subr.bf16.mxu0 %v15074_v22  ;;  %6881 = vmatprep.subr.bf16.mxu1 %v15075_v0  ;;  %v8144_v22 = vld [vmem:[%s13795_s0 + $0x1c7] ss:$8 sm:$0xf0] }
 0xad7   :  { %6841 = vmatpush2.bf16.msra.mxu0 %v15076_v17  ;;  %6882 = vmatpush2.bf16.msra.mxu1 %v15077_v13 }
 0xad8   :  { %6842 = vmatprep.subr.bf16.mxu0 %v15078_v53  ;;  %6883 = vmatprep.subr.bf16.mxu1 %v15079_v2 }
 0xadb   :  { %6843 = vmatpush2.bf16.msra.mxu0 %v15080_v4  ;;  %6884 = vmatpush2.bf16.msra.mxu1 %v15081_v36  ;;  %v6685_v36 = vor.u32 %v8138_v54, %v8137_v32 }
 0xade   :  { %6845 = vmatmul.mubr.bf16.vlgmr.msra.gmra.mxu0 %v13482_v29  ;;  %6886 = vmatmul.mubr.bf16.vlgmr.msra.gmra.mxu1 %v13482_v29 }
 0xb5e   :  { %v6764_v16 = vpop.f32.mrf.mxu0  ;;  %v6805_v19 = vpop.f32.mrf.mxu1 }
 0xb60   :  { %v6766_v42 = vpop.f32.mrf.mxu0  ;;  %v6807_v63 = vpop.f32.mrf.mxu1 }
 0xb61   :  { %v6902_v9 = vcombine.low %v6764_v16, %v6766_v42  ;;  %v6903_v46 = vcombine.high %v6764_v16, %v6766_v42  ;;  %v6904_v20 = vcombine.low %v6805_v19, %v6807_v63  ;;  %v6905_v18 = vcombine.high %v6805_v19, %v6807_v63 }
 0xb62   :  { %v6768_v40 = vpop.f32.mrf.mxu0  ;;  %v6809_v10 = vpop.f32.mrf.mxu1  ;;  %v6689_v16 = vor.u32 %v8140_v8, %v8139_v33 }
 0xb63   :  { %v6916_v28 = vrot.slane %v6902_v9, %v15082_v15  ;;  %v6923_v14 = vrot.slane %v6903_v46, %v15082_v15  ;;  %v6930_v11 = vrot.slane %v6904_v20, %v15082_v15  ;;  %v6937_v23 = vrot.slane %v6905_v18, %v15082_v15 }
 0xb64   :  { %v6769_v44 = vpop.f32.mrf.mxu0  ;;  %v6810_v52 = vpop.f32.mrf.mxu1  ;;  %v6693_v18 = vor.u32 %v8142_v51, %v8141_v49  ;;  %v6697_v40 = vor.u32 %v8144_v22, %v8143_v26 }
 0xb65   :  { %v6966_v48 = vcombine.low %v6916_v28, %v6930_v11  ;;  %v6967_v3 = vcombine.high %v6916_v28, %v6930_v11  ;;  %v6968_v61 = vcombine.low %v6923_v14, %v6937_v23  ;;  %v6969_v47 = vcombine.high %v6923_v14, %v6937_v23 }
 0xb67   :  { %v6980_v2 = vrot.slane %v6966_v48, %v15082_v15  ;;  %v6987_v4 = vrot.slane %v6968_v61, %v15082_v15  ;;  %v6994_v46 = vrot.slane %v6967_v3, %v15082_v15  ;;  %v7001_v20 = vrot.slane %v6969_v47, %v15082_v15 }
 0xb9e   :  { %v6846_v1 = vpop.f32.mrf.mxu0  ;;  %v6887_v5 = vpop.f32.mrf.mxu1 }
 0xba0   :  { %v6848_v29 = vpop.f32.mrf.mxu0  ;;  %v6889_v35 = vpop.f32.mrf.mxu1 }
 0xba1   :  { %v6906_v12 = vcombine.low %v6846_v1, %v6848_v29  ;;  %v6907_v43 = vcombine.high %v6846_v1, %v6848_v29  ;;  %v6908_v34 = vcombine.low %v6887_v5, %v6889_v35  ;;  %v6909_v56 = vcombine.high %v6887_v5, %v6889_v35 }
 0xba2   :  { %v6850_v60 = vpop.f32.mrf.mxu0  ;;  %v6891_v50 = vpop.f32.mrf.mxu1 }
 0xba3   :  { %v6944_v59 = vrot.slane %v6906_v12, %v15082_v15  ;;  %v6951_v45 = vrot.slane %v6907_v43, %v15082_v15  ;;  %v6958_v38 = vrot.slane %v6908_v34, %v15082_v15  ;;  %v6965_v7 = vrot.slane %v6909_v56, %v15082_v15 }
 0xba4   :  { %v6851_v57 = vpop.f32.mrf.mxu0  ;;  %v6892_v6 = vpop.f32.mrf.mxu1 }
 0xba5   :  { %v6970_v0 = vcombine.low %v6944_v59, %v6958_v38  ;;  %v6971_v17 = vcombine.high %v6944_v59, %v6958_v38  ;;  %v6972_v13 = vcombine.low %v6951_v45, %v6965_v7  ;;  %v6973_v53 = vcombine.high %v6951_v45, %v6965_v7 }
 0xba7   :  { %v7008_v19 = vrot.slane %v6970_v0, %v15082_v15  ;;  %v7015_v42 = vrot.slane %v6972_v13, %v15082_v15  ;;  %v7022_v63 = vrot.slane %v6971_v17, %v15082_v15  ;;  %v7029_v9 = vrot.slane %v6973_v53, %v15082_v15 }
 0xba9   :  { %v7030_v10 = vcombine.low %v6980_v2, %v7008_v19  ;;  %v7031_v28 = vcombine.high %v6980_v2, %v7008_v19  ;;  %v7032_v14 = vcombine.low %v6987_v4, %v7015_v42  ;;  %v7033_v11 = vcombine.high %v6987_v4, %v7015_v42 }
 0xbaa   :  { %v7034_v23 = vcombine.low %v6994_v46, %v7022_v63  ;;  %v7035_v44 = vcombine.high %v6994_v46, %v7022_v63  ;;  %v7036_v52 = vcombine.low %v7001_v20, %v7029_v9  ;;  %v7037_v48 = vcombine.high %v7001_v20, %v7029_v9 }
 0xbab   :  { %v13614_v61 = vadd.f32 %v7030_v10, %v6669_v24  ;;  %v13616_v1 = vadd.f32 %v7031_v28, %v6677_v25  ;;  %v13618_v5 = vadd.f32 %v7032_v14, %v6685_v36  ;;  %v13626_v47 = vadd.f32 %v7033_v11, %v6693_v18 }
 0xbac   :  { %v13620_v27 = vadd.f32 %v7034_v23, %v6673_v37  ;;  %v13622_v3 = vadd.f32 %v7035_v44, %v6681_v62  ;;  %v13624_v15 = vadd.f32 %v7036_v52, %v6689_v16  ;;  %v13630_v58 = vadd.f32 %v7037_v48, %v6697_v40 }
 0xbad   :  { %v8145_v30 = vmul.f32 -1.442695, %v13614_v61  ;;  %v8147_v21 = vmul.f32 -1.442695, %v13616_v1  ;;  %v8149_v39 = vmul.f32 -1.442695, %v13618_v5 }
 0xbae   :  { %v8146_v29 = vmul.f32 -1.442695, %v13620_v27  ;;  %v8148_v31 = vmul.f32 -1.442695, %v13622_v3  ;;  %v7110_v35 = vrot.slane %v13614_v61, 2  ;;  %v7111_v43 = vrot.slane %v13620_v27, 2 }
 0xbaf   :  { %9140 = vpow2.f32 %v8145_v30  ;;  %v8150_v12 = vmul.f32 -1.442695, %v13624_v15  ;;  %v8151_v41 = vmul.f32 -1.442695, %v13626_v47  ;;  %v7112_v55 = vrot.slane %v13616_v1, 2 }
 0xbb0   :  { %9142 = vpow2.f32 %v8146_v29  ;;  %v8152_v34 = vmul.f32 -1.442695, %v13630_v58  ;;  %v7113_v56 = vrot.slane %v13622_v3, 2  ;;  %v7114_v32 = vrot.slane %v13618_v5, 2 }
 0xbb1   :  { %9144 = vpow2.f32 %v8147_v21  ;;  %v8153_v54 = vmul.f32 -1.442695, %v7110_v35  ;;  %v7115_v60 = vrot.slane %v13624_v15, 2  ;;  %v8154_v50 = vmul.f32 -1.442695, %v7111_v43 }
 0xbb2   :  { %9146 = vpow2.f32 %v8148_v31  ;;  %v7116_v59 = vrot.slane %v13626_v47, 2  ;;  %v8155_v45 = vmul.f32 -1.442695, %v7112_v55  ;;  %v7117_v33 = vrot.slane %v13630_v58, 2 }
 0xbb3   :  { %9148 = vpow2.f32 %v8149_v39  ;;  %v8156_v8 = vmul.f32 -1.442695, %v7113_v56  ;;  %v8157_v38 = vmul.f32 -1.442695, %v7114_v32  ;;  %v8158_v7 = vmul.f32 -1.442695, %v7115_v60 }
 0xbb4   :  { %9150 = vpow2.f32 %v8150_v12  ;;  %v8159_v24 = vmul.f32 -1.442695, %v7116_v59  ;;  %v8160_v37 = vmul.f32 -1.442695, %v7117_v33  ;;  %v7174_v48 = vrot.slane %v13614_v61, 4 }
 0xbb5   :  { %9152 = vpow2.f32 %v8151_v41  ;;  %v7175_v29 = vrot.slane %v13620_v27, 4  ;;  %v7176_v39 = vrot.slane %v13616_v1, 4  ;;  %v7177_v12 = vrot.slane %v13622_v3, 4 }
 0xbb6   :  { %9154 = vpow2.f32 %v8152_v34  ;;  %v7178_v41 = vrot.slane %v13618_v5, 4  ;;  %v7198_v55 = vrot.slane %v13614_v61, 6  ;;  %v7179_v56 = vrot.slane %v13624_v15, 4 }
 0xbb7   :  { %9156 = vpow2.f32 %v8153_v54  ;;  %v7199_v32 = vrot.slane %v13620_v27, 6  ;;  %v7180_v60 = vrot.slane %v13626_v47, 4  ;;  %v7201_v61 = vrot.slane %v13622_v3, 6 }
 0xbb8   :  { %9158 = vpow2.f32 %v8154_v50  ;;  %v7200_v50 = vrot.slane %v13616_v1, 6  ;;  %v8161_v27 = vmul.f32 -1.442695, %v7198_v55  ;;  %v7204_v1 = vrot.slane %v13626_v47, 6  ;;  %v15083_v47 = vld [vmem:[#allocation78_spill] sm:$0xff] }
 0xbb9   :  { %9160 = vpow2.f32 %v8155_v45  ;;  %v7181_v45 = vrot.slane %v13630_v58, 4  ;;  %v7205_v3 = vrot.slane %v13630_v58, 6  ;;  %v15084_v58 = vld [vmem:[#allocation79_spill] sm:$0xff] }
 0xbba   :  { %9162 = vpow2.f32 %v8156_v8  ;;  %v7202_v8 = vrot.slane %v13618_v5, 6 }
 0xbbb   :  { %9164 = vpow2.f32 %v8157_v38 }
 0xbbc   :  { %v9141_v25 = vpop.eup %9140  ;;  %9166 = vpow2.f32 %v8158_v7  ;;  %v7203_v7 = vrot.slane %v13624_v15, 6  ;;  %v8167_v15 = vmul.f32 -1.442695, %v7204_v1 }
 0xbbd   :  { %v9143_v62 = vpop.eup %9142  ;;  %v7078_v49 = vadd.f32 1.0, %v9141_v25  ;;  %9168 = vpow2.f32 %v8159_v24  ;;  %v8162_v24 = vmul.f32 -1.442695, %v7199_v32  ;;  %v8163_v25 = vmul.f32 -1.442695, %v7200_v50 }
 0xbbe   :  { %v9145_v51 = vpop.eup %9144  ;;  %v7079_v57 = vadd.f32 1.0, %v9143_v62  ;;  %9170 = vpow2.f32 %v8160_v37 }
 0xbbf   :  { %v9147_v6 = vpop.eup %9146  ;;  %v7080_v26 = vadd.f32 1.0, %v9145_v51  ;;  %9172 = vrcp.f32 %v7078_v49  ;;  %v8164_v49 = vmul.f32 -1.442695, %v7201_v61 }
 0xbc0   :  { %v9149_v22 = vpop.eup %9148  ;;  %v7081_v0 = vadd.f32 1.0, %v9147_v6  ;;  %9174 = vrcp.f32 %v7079_v57  ;;  %v8165_v57 = vmul.f32 -1.442695, %v7202_v8  ;;  %v8166_v6 = vmul.f32 -1.442695, %v7203_v7 }
 0xbc1   :  { %v9151_v17 = vpop.eup %9150  ;;  %v7082_v13 = vadd.f32 1.0, %v9149_v22  ;;  %9176 = vrcp.f32 %v7080_v26 }
 0xbc2   :  { %v9153_v53 = vpop.eup %9152  ;;  %v7083_v2 = vadd.f32 1.0, %v9151_v17  ;;  %9178 = vrcp.f32 %v7081_v0  ;;  %v8168_v0 = vmul.f32 -1.442695, %v7205_v3 }
 0xbc3   :  { %v9155_v4 = vpop.eup %9154  ;;  %v7084_v36 = vadd.f32 1.0, %v9153_v53  ;;  %9180 = vrcp.f32 %v7082_v13 }
 0xbc4   :  { %v9157_v16 = vpop.eup %9156  ;;  %v7085_v19 = vadd.f32 1.0, %v9155_v4  ;;  %9182 = vrcp.f32 %v7083_v2 }
 0xbc5   :  { %v9159_v42 = vpop.eup %9158  ;;  %9184 = vrcp.f32 %v7084_v36  ;;  %v7150_v63 = vadd.f32 1.0, %v9157_v16  ;;  %v15085_v36 = vld [vmem:[#allocation80_spill] sm:$0xff] }
 0xbc6   :  { %v9161_v9 = vpop.eup %9160  ;;  %9186 = vrcp.f32 %v7085_v19  ;;  %v7151_v46 = vadd.f32 1.0, %v9159_v42 }
 0xbc7   :  { %v9163_v20 = vpop.eup %9162  ;;  %v7152_v18 = vadd.f32 1.0, %v9161_v9  ;;  %9188 = vrcp.f32 %v7150_v63  ;;  %v15086_v63 = vld [vmem:[#allocation81_spill] sm:$0xff] }
 0xbc8   :  { %v9165_v40 = vpop.eup %9164  ;;  %v7153_v10 = vadd.f32 1.0, %v9163_v20  ;;  %9190 = vrcp.f32 %v7151_v46 }
 0xbc9   :  { %v9167_v28 = vpop.eup %9166  ;;  %v7154_v14 = vadd.f32 1.0, %v9165_v40  ;;  %9192 = vrcp.f32 %v7152_v18  ;;  %v15087_v18 = vld [vmem:[#allocation82_spill] sm:$0xff] }
 0xbca   :  { %v9169_v11 = vpop.eup %9168  ;;  %v7155_v23 = vadd.f32 1.0, %v9167_v28  ;;  %9194 = vrcp.f32 %v7153_v10 }
 0xbcb   :  { %v9171_v44 = vpop.eup %9170  ;;  %v7156_v52 = vadd.f32 1.0, %v9169_v11  ;;  %9196 = vrcp.f32 %v7154_v14  ;;  %v15088_v11 = vld [vmem:[#allocation83_spill] sm:$0xff] }
 0xbcc   :  { %v13647_v30 = vpop.eup %9172  ;;  %v7157_v21 = vadd.f32 1.0, %v9171_v44  ;;  %9198 = vrcp.f32 %v7155_v23 }
 0xbcd   :  { %v13650_v31 = vpop.eup %9174  ;;  %9200 = vrcp.f32 %v7156_v52 }
 0xbce   :  { %v13653_v35 = vpop.eup %9176  ;;  %9202 = vrcp.f32 %v7157_v21 }
 0xbcf   :  { %v13656_v43 = vpop.eup %9178  ;;  %9204 = vtanh.f32 %v7174_v48 }
 0xbd0   :  { %v13660_v34 = vpop.eup %9180  ;;  %9206 = vtanh.f32 %v7175_v29 }
 0xbd1   :  { %v13664_v54 = vpop.eup %9182  ;;  %9208 = vtanh.f32 %v7176_v39 }
 0xbd2   :  { %v13668_v59 = vpop.eup %9184  ;;  %9210 = vtanh.f32 %v7177_v12 }
 0xbd3   :  { %v13672_v33 = vpop.eup %9186  ;;  %9212 = vtanh.f32 %v7178_v41 }
 0xbd4   :  { %v9189_v38 = vpop.eup %9188  ;;  %9214 = vtanh.f32 %v7179_v56 }
 0xbd5   :  { %v9191_v37 = vpop.eup %9190  ;;  %9216 = vtanh.f32 %v7180_v60  ;;  %v7262_v13 = vmul.f32 %v9189_v38, %v15083_v47 }
 0xbd6   :  { %v9193_v62 = vpop.eup %9192  ;;  %9218 = vtanh.f32 %v7181_v45  ;;  %v7263_v2 = vmul.f32 %v9191_v37, %v15084_v58  ;;  %v15089_v45 = vld [vmem:[#allocation84_spill] sm:$0xff] }
 0xbd7   :  { %v9195_v51 = vpop.eup %9194  ;;  %9220 = vpow2.f32 %v8161_v27  ;;  %v7264_v16 = vmul.f32 %v9193_v62, %v15085_v36  ;;  %v15090_v27 = vld [vmem:[#allocation85_spill] sm:$0xff] }
 0xbd8   :  { %v9197_v5 = vpop.eup %9196  ;;  %9222 = vpow2.f32 %v8162_v24  ;;  %v7265_v9 = vmul.f32 %v9195_v51, %v15086_v63 }
 0xbd9   :  { %v9199_v26 = vpop.eup %9198  ;;  %9224 = vpow2.f32 %v8163_v25  ;;  %v7266_v40 = vmul.f32 %v9197_v5, %v15087_v18 }
 0xbda   :  { %v9201_v22 = vpop.eup %9200  ;;  %9226 = vpow2.f32 %v8164_v49  ;;  %v7267_v23 = vmul.f32 %v9199_v26, %v15088_v11 }
 0xbdb   :  { %v9203_v17 = vpop.eup %9202  ;;  %9228 = vpow2.f32 %v8165_v57  ;;  %v7268_v61 = vmul.f32 %v9201_v22, %v15089_v45 }
 0xbdc   :  { %v9205_v53 = vpop.eup %9204  ;;  %9230 = vpow2.f32 %v8166_v6  ;;  %v7269_v38 = vmul.f32 %v9203_v17, %v15090_v27 }
 0xbdd   :  { %v9207_v4 = vpop.eup %9206  ;;  %9232 = vpow2.f32 %v8167_v15  ;;  %v7270_v19 = vmul.f32 %v9205_v53, %v13647_v30 }
 0xbde   :  { %v9209_v42 = vpop.eup %9208  ;;  %9234 = vpow2.f32 %v8168_v0  ;;  %v7271_v46 = vmul.f32 %v9207_v4, %v13650_v31  ;;  %v15091_v4 = vld [vmem:[#allocation140_spill] sm:$0xff] }
 0xbdf   :  { %v9211_v20 = vpop.eup %9210  ;;  %v7272_v10 = vmul.f32 %v9209_v42, %v13653_v35  ;;  %v7278_v28 = vadd.f32 %v7270_v19, %v7262_v13 }
 0xbe0   :  { %v9213_v14 = vpop.eup %9212  ;;  %v7273_v44 = vmul.f32 %v9211_v20, %v13656_v43  ;;  %v7279_v52 = vadd.f32 %v7271_v46, %v7263_v2 }
 0xbe1   :  { %v9215_v48 = vpop.eup %9214  ;;  %v7274_v30 = vmul.f32 %v9213_v14, %v13660_v34  ;;  %v7280_v21 = vadd.f32 %v7272_v10, %v7264_v16  ;;  %9236 = vtanh.f32 %v7278_v28  ;;  %v15092_v16 = vld [vmem:[#allocation139_spill] sm:$0xff] }
 0xbe2   :  { %v9217_v29 = vpop.eup %9216  ;;  %v7275_v31 = vmul.f32 %v9215_v48, %v13664_v54  ;;  %v7281_v39 = vadd.f32 %v7273_v44, %v7265_v9  ;;  %9238 = vtanh.f32 %v7279_v52 }
 0xbe3   :  { %v9219_v12 = vpop.eup %9218  ;;  %v7282_v41 = vadd.f32 %v7274_v30, %v7266_v40  ;;  %9240 = vtanh.f32 %v7280_v21  ;;  %v7276_v37 = vmul.f32 %v9217_v29, %v13668_v59 }
 0xbe4   :  { %v9221_v35 = vpop.eup %9220  ;;  %v7283_v55 = vadd.f32 %v7275_v31, %v7267_v23  ;;  %9242 = vtanh.f32 %v7281_v39  ;;  %v7277_v62 = vmul.f32 %v9219_v12, %v13672_v33 }
 0xbe5   :  { %v9223_v56 = vpop.eup %9222  ;;  %v7238_v32 = vadd.f32 1.0, %v9221_v35  ;;  %9244 = vtanh.f32 %v7282_v41  ;;  %v7284_v51 = vadd.f32 %v7276_v37, %v7268_v61 }
 0xbe6   :  { %v9225_v43 = vpop.eup %9224  ;;  %v7239_v60 = vadd.f32 1.0, %v9223_v56  ;;  %9246 = vtanh.f32 %v7283_v55  ;;  %v7285_v5 = vadd.f32 %v7277_v62, %v7269_v38 }
 0xbe7   :  { %v9227_v34 = vpop.eup %9226  ;;  %v7240_v50 = vadd.f32 1.0, %v9225_v43  ;;  %9248 = vrcp.f32 %v7238_v32 }
 0xbe8   :  { %v9229_v54 = vpop.eup %9228  ;;  %v7241_v8 = vadd.f32 1.0, %v9227_v34  ;;  %9250 = vrcp.f32 %v7239_v60 }
 0xbe9   :  { %v9231_v7 = vpop.eup %9230  ;;  %v7242_v24 = vadd.f32 1.0, %v9229_v54  ;;  %9252 = vrcp.f32 %v7240_v50 }
 0xbea   :  { %v9233_v1 = vpop.eup %9232  ;;  %v7243_v25 = vadd.f32 1.0, %v9231_v7  ;;  %9254 = vrcp.f32 %v7241_v8 }
 0xbeb   :  { %v9235_v3 = vpop.eup %9234  ;;  %v7244_v49 = vadd.f32 1.0, %v9233_v1  ;;  %9256 = vrcp.f32 %v7242_v24 }
 0xbec   :  { %v7245_v57 = vadd.f32 1.0, %v9235_v3  ;;  %9258 = vrcp.f32 %v7243_v25 }
 0xbed   :  { %9260 = vrcp.f32 %v7244_v49 }
 0xbee   :  { %v9237_v6 = vpop.eup %9236  ;;  %9262 = vrcp.f32 %v7245_v57  ;;  %v7494_v57 = vld [vmem:[%s13796_s2 + $0x8] sm:$0x88] }
 0xbef   :  { %v9239_v26 = vpop.eup %9238  ;;  %9264 = vtanh.f32 %v7284_v51  ;;  %v7491_v51 = vld [vmem:[%s13796_s2] sm:$0x88] }
 0xbf0   :  { %v9241_v15 = vpop.eup %9240  ;;  %9266 = vtanh.f32 %v7285_v5 }
 0xbf1   :  { %v9243_v59 = vpop.eup %9242 }
 0xbf2   :  { %v9245_v22 = vpop.eup %9244 }
 0xbf3   :  { %v9247_v0 = vpop.eup %9246 }
 0xbf4   :  { %v9249_v17 = vpop.eup %9248 }
 0xbf5   :  { %v9251_v47 = vpop.eup %9250  ;;  %v7294_v33 = vmul.f32 %v9249_v17, %v9237_v6 }
 0xbf6   :  { %v9253_v13 = vpop.eup %9252  ;;  %v7295_v53 = vmul.f32 %v9251_v47, %v9239_v26 }
 0xbf7   :  { %v9255_v58 = vpop.eup %9254  ;;  %v7296_v2 = vmul.f32 %v9253_v13, %v9241_v15  ;;  %v7313_v36 = vrot.slane %v7294_v33, %v15091_v4  ;;  %v7317_v19 = vrot.slane %v7294_v33, %v15092_v16  ;;  %v7503_v13 = vld [vmem:[%s13796_s2 + $0x20] sm:$0x88] }
 0xbf8   :  { %v9257_v42 = vpop.eup %9256  ;;  %v7297_v63 = vmul.f32 %v9255_v58, %v9243_v59  ;;  %v7321_v9 = vrot.slane %v7295_v53, %v15091_v4  ;;  %v7325_v46 = vrot.slane %v7295_v53, %v15092_v16  ;;  %v7497_v59 = vld [vmem:[%s13796_s2 + $0x10] sm:$0x88] }
 0xbf9   :  { %v9259_v20 = vpop.eup %9258  ;;  %v7298_v18 = vmul.f32 %v9257_v42, %v9245_v22  ;;  %v7329_v40 = vrot.slane %v7296_v2, %v15091_v4  ;;  %v7333_v10 = vrot.slane %v7296_v2, %v15092_v16  ;;  %v8233_v28 = vpack.c.bf16 %v7317_v19, %v7313_v36  ;;  %v7500_v22 = vld [vmem:[%s13796_s2 + $0x18] sm:$0x88]  ;;  %v7506_v2 = vld [vmem:[%s13796_s2 + $0x28] sm:$0x88]  ;;  %v7509_v42 = vld [vmem:[%s13796_s2 + $0x30] sm:$0x88] }
 0xbfa   :  { %v9261_v14 = vpop.eup %9260  ;;  %v7299_v11 = vmul.f32 %v9259_v20, %v9247_v0  ;;  %v7337_v23 = vrot.slane %v7297_v63, %v15091_v4  ;;  %v7341_v44 = vrot.slane %v7297_v63, %v15092_v16  ;;  %v8234_v52 = vpack.c.bf16 %v7325_v46, %v7321_v9  ;;  %v7512_v9 = vld [vmem:[%s13796_s2 + $0x38] sm:$0x88] }
 0xbfb   :  { %v9263_v30 = vpop.eup %9262  ;;  %v7345_v21 = vrot.slane %v7298_v18, %v15091_v4  ;;  %v7349_v29 = vrot.slane %v7298_v18, %v15092_v16  ;;  %v8235_v31 = vpack.c.bf16 %v7333_v10, %v7329_v40  ;;  %v7447_v39 = vshll.u32 %v8233_v28, 16 }
 0xbfc   :  { %v9265_v41 = vpop.eup %9264  ;;  %v7353_v35 = vrot.slane %v7299_v11, %v15091_v4  ;;  %v7357_v55 = vrot.slane %v7299_v11, %v15092_v16  ;;  %v8236_v56 = vpack.c.bf16 %v7341_v44, %v7337_v23  ;;  %v7451_v32 = vshll.u32 %v8234_v52, 16 }
 0xbfd   :  { %v9267_v43 = vpop.eup %9266  ;;  %v7300_v60 = vmul.f32 %v9265_v41, %v9261_v14  ;;  %v8237_v34 = vpack.c.bf16 %v7349_v29, %v7345_v21  ;;  %v7449_v50 = vrot.slane %v7447_v39, 5  ;;  %v7455_v45 = vshll.u32 %v8235_v31, 16 }
 0xbfe   :  { %v7301_v61 = vmul.f32 %v9267_v43, %v9263_v30  ;;  %v8238_v54 = vpack.c.bf16 %v7357_v55, %v7353_v35  ;;  %v7453_v8 = vrot.slane %v7451_v32, 5  ;;  %v7459_v27 = vshll.u32 %v8236_v56, 16 }
 0xbff   :  { %v7361_v7 = vrot.slane %v7300_v60, %v15091_v4  ;;  %v7365_v24 = vrot.slane %v7300_v60, %v15092_v16  ;;  %v7457_v37 = vrot.slane %v7455_v45, 5  ;;  %v7463_v1 = vshll.u32 %v8237_v34, 16 }
 0xc00   :  { %v7369_v25 = vrot.slane %v7301_v61, %v15091_v4  ;;  %v7373_v62 = vrot.slane %v7301_v61, %v15092_v16  ;;  %v7461_v3 = vrot.slane %v7459_v27, 5  ;;  %v7467_v49 = vshll.u32 %v8238_v54, 16 }
 0xc01   :  { %v8239_v5 = vpack.c.bf16 %v7365_v24, %v7361_v7  ;;  %v7465_v6 = vrot.slane %v7463_v1, 5  ;;  %v7492_v26 = vsel %vm13722_vm2, %v7449_v50, %v7491_v51  ;;  %v7495_v15 = vsel %vm13722_vm2, %v7453_v8, %v7494_v57 }
 0xc02   :  { %v8240_v0 = vpack.c.bf16 %v7373_v62, %v7369_v25  ;;  %v7469_v17 = vrot.slane %v7467_v49, 5  ;;  %7493 = vst [vmem:[%s13796_s2] sm:$0x88] %v7492_v26  ;;  %7496 = vst [vmem:[%s13796_s2 + $0x8] sm:$0x88] %v7495_v15  ;;  %v7498_v47 = vsel %vm13722_vm2, %v7457_v37, %v7497_v59  ;;  %v7501_v33 = vsel %vm13722_vm2, %v7461_v3, %v7500_v22 }
 0xc03   :  { %v7471_v53 = vshll.u32 %v8239_v5, 16  ;;  %7499 = vst [vmem:[%s13796_s2 + $0x10] sm:$0x88] %v7498_v47  ;;  %7502 = vst [vmem:[%s13796_s2 + $0x18] sm:$0x88] %v7501_v33  ;;  %v7504_v58 = vsel %vm13722_vm2, %v7465_v6, %v7503_v13 }
 0xc04   :  { %v7475_v4 = vshll.u32 %v8240_v0, 16  ;;  %7505 = vst [vmem:[%s13796_s2 + $0x20] sm:$0x88] %v7504_v58  ;;  %v7507_v36 = vsel %vm13722_vm2, %v7469_v17, %v7506_v2 }
 0xc05   :  { %v7473_v16 = vrot.slane %v7471_v53, 5  ;;  %7508 = vst [vmem:[%s13796_s2 + $0x28] sm:$0x88] %v7507_v36 }
 0xc06   :  { %v7477_v19 = vrot.slane %v7475_v4, 5 }
 0xc07   :  { %v7510_v63 = vsel %vm13722_vm2, %v7473_v16, %v7509_v42 }
 0xc08   :  { %7511 = vst [vmem:[%s13796_s2 + $0x30] sm:$0x88] %v7510_v63  ;;  %v7513_v46 = vsel %vm13722_vm2, %v7477_v19, %v7512_v9 }
 0xc09   :  { %7514 = vst [vmem:[%s13796_s2 + $0x38] sm:$0x88] %v7513_v46 }

</bundles_post_ra>
